<compile_context>
chip_gen: v6e
topology: v6e:2x2x1
jax: 0.10.0
libtpu: 0.0.40
codegen_flags: <defaults>
</compile_context>

<pallas_src>
import functools

import jax
import jax.numpy as jnp
from jax.experimental import pallas as pl
from jax.experimental.pallas import tpu as pltpu

LEAKY_ALPHA = 0.2      # LeakyReLU negative slope (the module's `alpha` arg)
_MASKED = -1.0e30      # additive sentinel for non-edges (keep softmax logits in f32!)
_EMPTY_COL = -1.0e29   # col_max below this => dst node has no in-edges


def _round_up(v, m):
    return (v + m - 1) // m * m


def _tpu_generation():
    try:
        kind = jax.devices()[0].device_kind.lower()
    except Exception:
        return 6
    for gen in (7, 6, 5, 4, 3, 2):
        if ("v%d" % gen) in kind or ("tpu%d" % gen) in kind:
            return gen
    return 6


def _vmem_capacity_bytes(gen):
    try:
        cap = int(getattr(pltpu.get_tpu_info(), "vmem_capacity_bytes", 0))
        if cap > 0:
            return cap
    except Exception:
        pass
    return (64 if gen >= 7 else 128) * 1024 * 1024


def _vmem_estimate(n_pad, tn, f_in, f_out_pad):
    """Rough per-core VMEM need (bytes) for one kernel instance."""
    return (2 * n_pad * tn                  # adjacency int8 tile, double-buffered
            + 2 * n_pad * f_out_pad * 4     # resident output block (buffers)
            + n_pad * f_out_pad * 4         # h = fc(x) scratch
            + n_pad * 128 * 4               # a_src.h scratch (lane-padded)
            + 2 * n_pad * f_in * 4          # x (resident input, buffered)
            + 2 * f_in * f_out_pad * 4      # W^T
            + 4 * n_pad * tn * 4)           # e / p / select temporaries


def spgat_kernel(x_ref, wt_ref, b_ref, asrc_ref, adst_ref, adj_ref, out_ref,
                 h_ref, ssrc_ref, *, alpha, tn, mm_dtype, exp_dtype):
    j = pl.program_id(1)         # column tile within this split (reduction axis)
    c_per = pl.num_programs(1)

    # ---- hoisted once per split: h = x @ W^T + b and per-src attention score ----
    @pl.when(j == 0)
    def _init():
        h = jnp.dot(x_ref[...], wt_ref[...],
                    preferred_element_type=jnp.float32) + b_ref[...]          # (N, Fout)
        h_ref[...] = h
        # VPU multiply + lane reduce instead of a width-1 MXU matvec.
        ssrc_ref[...] = jnp.sum(h * asrc_ref[...], axis=-1, keepdims=True)    # (N, 1)

    # ---- this tile's dst columns ----
    col0 = pl.multiple_of((pl.program_id(0) * c_per + j) * tn, tn)
    h_dst = h_ref[pl.ds(col0, tn), :]                                          # (TN, Fout) f32
    sdst = jnp.sum(h_dst * adst_ref[...], axis=-1, keepdims=True).T            # (1, TN)

    # ---- edge logits e[src, dst] = LeakyReLU(a_src.h[src] + a_dst.h[dst]) ----
    e = ssrc_ref[...] + sdst                                                   # (N, TN) f32
    if alpha <= 1.0:
        e = jnp.maximum(e, alpha * e)            # LeakyReLU for slope in [0, 1]
    else:
        e = jnp.where(e > 0, e, alpha * e)
    # fold the adjacency with an integer compare (no int8 -> f32 convert pass)
    e = jnp.where(adj_ref[...] != 0, e, _MASKED)

    # ---- edge softmax, normalized per dst node (per column) ----
    col_max = jnp.max(e, axis=0, keepdims=True)                                # (1, TN) f32
    # exp in bf16 on v6e/v7x (EUP bf16), f32 on v5e; non-edges underflow to 0.
    p = jnp.exp((e - col_max).astype(exp_dtype))
    denom = jnp.sum(p.astype(jnp.float32), axis=0, keepdims=True)              # f32 accumulation
    # dst nodes with no in-edges (incl. padding) keep col_max at the sentinel;
    # zero their scale so they contribute nothing (matches edge-wise reference).
    scale = jnp.where(col_max > _EMPTY_COL,
                      pl.reciprocal(denom, approx=True), 0.0)                  # (1, TN), EUP
    att = p.astype(mm_dtype)                                                   # free when exp is bf16
    # Fold the per-dst softmax scale into the (TN, Fout) RHS instead of scaling
    # the full (N, TN) probability matrix (review: ~64x less VALU work).
    rhs = (h_dst * scale.T).astype(mm_dtype)
    # TODO(synk): attention dropout omitted (identity at inference / eval mode).

    # ---- h_prime[src] += sum_dst att[src, dst] * (scale[dst] * h[dst])  (MXU) ----
    contrib = jnp.dot(att, rhs, preferred_element_type=jnp.float32)

    @pl.when(j == 0)
    def _first():                       # direct write: no zero-fill, no RMW pass
        out_ref[...] = contrib

    @pl.when(j != 0)
    def _acc():
        out_ref[...] += contrib


def sp_graph_attention_layer(adj, x, fc_w, fc_b, a, *,
                             alpha=LEAKY_ALPHA, concat=True,
                             tn=None, num_partials=None,
                             matmul_dtype=jnp.bfloat16, exp_dtype=None):
    """adj: (2, E) int32 [src; dst]; x: (N, Fin); fc_w: (Fout, Fin);
    fc_b: (Fout,); a: (1, 2*Fout)."""
    N, f_in = x.shape
    f_out = fc_w.shape[0]

    # --- generation-aware defaults (review) ---
    gen = _tpu_generation()
    vmem_cap = _vmem_capacity_bytes(gen)
    if num_partials is None:
        # Only v7x has 2 TensorCores/chip; on 1-TC chips a 'parallel' split only
        # recomputes fc(x)/ssrc and doubles the partial-output writeback.
        num_partials = 2 if gen >= 7 else 1
    if tn is None:
        # v5e/v6e (128 MiB VMEM): bigger tiles, fewer grid steps, longer bursts.
        # v7x (64 MiB/TC): smaller tiles keep e/p temporaries under budget.
        tn = 128 if gen >= 7 else 512
    if exp_dtype is None:
        # bf16 EUP/VPU exists on v6e/v7x only; masking/denominator stay f32.
        exp_dtype = jnp.bfloat16 if gen >= 6 else jnp.float32

    # --- layout / padding (plain-JAX glue) ---
    f_out_pad = _round_up(f_out, 128)                 # lane-dense h / output layout
    n_pad = _round_up(N, num_partials * tn)
    # Gate tn (>=128) so temporaries + resident blocks stay well under VMEM.
    while tn > 128 and _vmem_estimate(n_pad, tn, f_in, f_out_pad) > 0.35 * vmem_cap:
        tn //= 2
        n_pad = _round_up(N, num_partials * tn)
    c_per = n_pad // (num_partials * tn)              # column tiles per 'parallel' split
    n_tiles = n_pad // tn

    src, dst = adj[0], adj[1]
    # adjacency as int8 -> 4x less HBM/DMA traffic than an f32 mask
    # TODO(synk): for a graph that is static across calls, build & cache this
    # dense/tiled mask once outside the hot path (the O(N^2) scatter dominates
    # end-to-end latency for repeated layers).
    mask = jnp.zeros((n_pad, n_pad), jnp.int8).at[src, dst].set(1)
    # Pre-tile so each (n_pad, tn) dst-column tile is a contiguous HBM slab.
    mask_tiled = mask.reshape(n_pad, n_tiles, tn).transpose(1, 0, 2)   # (T, n_pad, tn)

    x_p = jnp.zeros((n_pad, f_in), jnp.float32).at[:N].set(x.astype(jnp.float32))
    w_t = jnp.zeros((f_in, f_out_pad), jnp.float32).at[:, :f_out].set(
        fc_w.T.astype(jnp.float32))
    b_p = jnp.zeros((1, f_out_pad), jnp.float32).at[0, :f_out].set(
        fc_b.astype(jnp.float32))
    a_src = jnp.zeros((1, f_out_pad), jnp.float32).at[0, :f_out].set(
        a[0, :f_out].astype(jnp.float32))             # src half of `a`
    a_dst = jnp.zeros((1, f_out_pad), jnp.float32).at[0, :f_out].set(
        a[0, f_out:].astype(jnp.float32))             # dst half of `a`

    kernel = functools.partial(spgat_kernel, alpha=float(alpha), tn=tn,
                               mm_dtype=matmul_dtype, exp_dtype=exp_dtype)
    const = lambda c, j: (0, 0)

    est_vmem = _vmem_estimate(n_pad, tn, f_in, f_out_pad)
    # Cap at ~75% of this chip's physical VMEM (>=96 MiB on v5e/v6e, ~48 MiB v7x).
    vmem_limit = int(min(max(2 * est_vmem, 16 * 1024 * 1024), int(0.75 * vmem_cap)))

    cost = pl.CostEstimate(
        flops=int(2 * num_partials * n_pad * f_in * f_out_pad
                  + 2 * n_pad * n_pad * f_out_pad + 8 * n_pad * n_pad),
        transcendentals=int(n_pad * n_pad),
        bytes_accessed=int(n_pad * n_pad
                           + 4 * (n_pad * f_in + f_in * f_out_pad
                                  + num_partials * n_pad * f_out_pad)))

    partials = pl.pallas_call(
        kernel,
        out_shape=jax.ShapeDtypeStruct((num_partials * n_pad, f_out_pad), jnp.float32),
        grid_spec=pltpu.PrefetchScalarGridSpec(
            num_scalar_prefetch=0,
            grid=(num_partials, c_per),
            in_specs=[
                pl.BlockSpec((n_pad, f_in), const),        # x          (resident)
                pl.BlockSpec((f_in, f_out_pad), const),    # W^T        (resident)
                pl.BlockSpec((1, f_out_pad), const),       # bias
                pl.BlockSpec((1, f_out_pad), const),       # a_src
                pl.BlockSpec((1, f_out_pad), const),       # a_dst
                pl.BlockSpec((None, n_pad, tn),            # contiguous column tile
                             lambda c, j, c_per=c_per: (c * c_per + j, 0, 0)),
            ],
            out_specs=pl.BlockSpec((n_pad, f_out_pad), lambda c, j: (c, 0)),
            scratch_shapes=[
                pltpu.VMEM((n_pad, f_out_pad), jnp.float32),   # h = fc(x)
                pltpu.VMEM((n_pad, 1), jnp.float32),           # a_src . h (per-src score)
            ],
        ),
        compiler_params=pltpu.CompilerParams(
            dimension_semantics=("parallel", "arbitrary"),
            vmem_limit_bytes=vmem_limit,
        ),
        cost_estimate=cost,
    )(x_p, w_t, b_p, a_src, a_dst, mask_tiled)

    # Single-TC chips use one partial: no reshape/sum epilogue needed.
    if num_partials == 1:
        h_prime = partials[:N, :f_out]
    else:
        h_prime = partials.reshape(num_partials, n_pad, f_out_pad).sum(axis=0)[:N, :f_out]
    if concat:
        h_prime = jax.nn.elu(h_prime)        # ELU must follow the cross-partial sum
    return h_prime


def reference(adj, x, fc_w, fc_b, a, alpha=LEAKY_ALPHA, concat=True):
    """Pure-JAX edge-wise reference mirroring the PyTorch forward."""
    N = x.shape[0]
    f_out = fc_w.shape[0]
    h = x @ fc_w.T + fc_b
    src, dst = adj[0], adj[1]
    edge_h = jnp.concatenate([h[src], h[dst]], axis=1)          # (E, 2*Fout)
    e = edge_h @ a[0]                                           # (E,)
    e = jnp.where(e > 0, e, alpha * e)                          # LeakyReLU
    m = jax.ops.segment_max(e, dst, num_segments=N)             # softmax grouped by dst
    p = jnp.exp(e - m[dst])
    s = jax.ops.segment_sum(p, dst, num_segments=N)
    att = p / s[dst]
    hp = jnp.zeros((N, f_out), jnp.float32).at[src].add(att[:, None] * h[dst])
    if concat:
        hp = jax.nn.elu(hp)
    return hp


if __name__ == "__main__":
    key = jax.random.PRNGKey(0)
    N, F_IN, F_OUT = 300, 16, 32
    k_x, k_w, k_b, k_a, k_e = jax.random.split(key, 5)

    # Deterministic parameter init (xavier_normal_, gain=1.414; small-normal bias).
    gain = 1.414
    x = jax.random.normal(k_x, (N, F_IN), jnp.float32)
    fc_w = gain * (2.0 / (F_IN + F_OUT)) ** 0.5 * jax.random.normal(
        k_w, (F_OUT, F_IN), jnp.float32)
    fc_b = 0.1 * jax.random.normal(k_b, (F_OUT,), jnp.float32)
    a = gain * (2.0 / (1 + 2 * F_OUT)) ** 0.5 * jax.random.normal(
        k_a, (1, 2 * F_OUT), jnp.float32)

    # Random sparse graph (~15% density) plus self-loops; edge list (2, E).
    adj_dense = (jax.random.uniform(k_e, (N, N)) < 0.15) | jnp.eye(N, dtype=bool)
    src_idx, dst_idx = jnp.nonzero(adj_dense)
    adj = jnp.stack([src_idx, dst_idx]).astype(jnp.int32)

    ref = reference(adj, x, fc_w, fc_b, a)

    # 1) Device-tuned defaults (tn / num_partials / exp dtype picked per generation).
    out = sp_graph_attention_layer(adj, x, fc_w, fc_b, a)
    out = jax.block_until_ready(out)
    assert out.shape == (N, F_OUT), out.shape
    # bf16 exp (v6e/v7x) + bf16 att@h matmul + approximate EUP reciprocal -> 5e-2 tol.
    max_err = float(jnp.max(jnp.abs(out - ref)))
    assert jnp.allclose(out, ref, atol=5e-2, rtol=5e-2), f"max_err={max_err}"

    # 2) Explicit small tiling that exercises both grid axes and the partial-sum epilogue.
    out2 = sp_graph_attention_layer(adj, x, fc_w, fc_b, a, tn=128, num_partials=2)
    out2 = jax.block_until_ready(out2)
    max_err2 = float(jnp.max(jnp.abs(out2 - ref)))
    assert jnp.allclose(out2, ref, atol=5e-2, rtol=5e-2), f"max_err={max_err2}"

    print("KERNEL_OK")
</pallas_src>

<mosaic_0001>
module attributes {stable_mosaic.version = 11 : i64} {
  func.func @spgat_kernel(%arg0: i32, %arg1: i32, %arg2: memref<512x16xf32, #tpu.memory_space<vmem>>, %arg3: memref<16x128xf32, #tpu.memory_space<vmem>>, %arg4: memref<1x128xf32, #tpu.memory_space<vmem>>, %arg5: memref<1x128xf32, #tpu.memory_space<vmem>>, %arg6: memref<1x128xf32, #tpu.memory_space<vmem>>, %arg7: memref<1x512x512xi8, #tpu.memory_space<vmem>>, %arg8: memref<512x128xf32, #tpu.memory_space<vmem>>, %arg9: memref<512x128xf32, #tpu.memory_space<vmem>>, %arg10: memref<512x1xf32, #tpu.memory_space<vmem>>) attributes {dimension_semantics = [#tpu.dimension_semantics<parallel>, #tpu.dimension_semantics<arbitrary>], iteration_bounds = array<i64: 1, 1>, scalar_prefetch = 0 : i64, scratch_operands = 2 : i64, tpu.core_type = #tpu.core_type<tc>, window_params = [{pipeline_mode = #tpu.pipeline_mode<synchronous>, transform_indices = @transform_0, window_bounds = array<i64: 512, 16>}, {pipeline_mode = #tpu.pipeline_mode<synchronous>, transform_indices = @transform_1, window_bounds = array<i64: 16, 128>}, {pipeline_mode = #tpu.pipeline_mode<synchronous>, transform_indices = @transform_2, window_bounds = array<i64: 1, 128>}, {pipeline_mode = #tpu.pipeline_mode<synchronous>, transform_indices = @transform_3, window_bounds = array<i64: 1, 128>}, {pipeline_mode = #tpu.pipeline_mode<synchronous>, transform_indices = @transform_4, window_bounds = array<i64: 1, 128>}, {transform_indices = @transform_5, window_bounds = array<i64: 1, 512, 512>}, {transform_indices = @transform_6, window_bounds = array<i64: 512, 128>}]} {
    %c0_i32 = arith.constant 0 : i32
    %0 = arith.cmpi eq, %arg1, %c0_i32 : i32
    %1 = arith.extui %0 : i1 to i32
    %c0_i32_0 = arith.constant 0 : i32
    %2 = arith.cmpi ne, %1, %c0_i32_0 : i32
    scf.if %2 {
      %c0_19 = arith.constant 0 : index
      %c0_20 = arith.constant 0 : index
      %53 = vector.load %arg2[%c0_19, %c0_20] : memref<512x16xf32, #tpu.memory_space<vmem>>, vector<512x16xf32>
      %c0_21 = arith.constant 0 : index
      %c0_22 = arith.constant 0 : index
      %54 = vector.load %arg3[%c0_21, %c0_22] : memref<16x128xf32, #tpu.memory_space<vmem>>, vector<16x128xf32>
      %cst_23 = arith.constant dense<0.000000e+00> : vector<512x128xf32>
      %55 = tpu.matmul %53, %54, %cst_23 {dimension_numbers = #tpu.dot_dimension_numbers<[1], [0], [0], [1], [0, 0, 1, 1], [], []>} : vector<512x16xf32>, vector<16x128xf32>, vector<512x128xf32> -> vector<512x128xf32>
      %c0_24 = arith.constant 0 : index
      %c0_25 = arith.constant 0 : index
      %56 = vector.load %arg4[%c0_24, %c0_25] : memref<1x128xf32, #tpu.memory_space<vmem>>, vector<1x128xf32>
      %57 = vector.broadcast %56 : vector<1x128xf32> to vector<512x128xf32>
      %58 = arith.addf %55, %57 : vector<512x128xf32>
      %c0_26 = arith.constant 0 : index
      %c0_27 = arith.constant 0 : index
      %59 = vector.load %arg9[%c0_26, %c0_27] : memref<512x128xf32, #tpu.memory_space<vmem>>, vector<512x128xf32>
      tpu.vector_store %arg9[%c0_26, %c0_27], %58 {strides = array<i32>} : memref<512x128xf32, #tpu.memory_space<vmem>>, vector<512x128xf32>,
      %c0_28 = arith.constant 0 : index
      %c0_29 = arith.constant 0 : index
      %60 = vector.load %arg5[%c0_28, %c0_29] : memref<1x128xf32, #tpu.memory_space<vmem>>, vector<1x128xf32>
      %61 = vector.broadcast %60 : vector<1x128xf32> to vector<512x128xf32>
      %62 = arith.mulf %58, %61 : vector<512x128xf32>
      %cst_30 = arith.constant dense<0.000000e+00> : vector<512xf32>
      %63 = vector.multi_reduction <add>, %62, %cst_30 [1] : vector<512x128xf32> to vector<512xf32>
      %64 = vector.shape_cast %63 : vector<512xf32> to vector<512x1xf32>
      %c0_31 = arith.constant 0 : index
      %c0_32 = arith.constant 0 : index
      %65 = vector.load %arg10[%c0_31, %c0_32] : memref<512x1xf32, #tpu.memory_space<vmem>>, vector<512x1xf32>
      tpu.vector_store %arg10[%c0_31, %c0_32], %64 {strides = array<i32>} : memref<512x1xf32, #tpu.memory_space<vmem>>, vector<512x1xf32>,
    } else {
    }
    %c1_i32 = arith.constant 1 : i32
    %3 = arith.muli %arg0, %c1_i32 : i32
    %4 = arith.addi %3, %arg1 : i32
    %c512_i32 = arith.constant 512 : i32
    %5 = arith.muli %4, %c512_i32 : i32
    %6 = tpu.assume_multiple %5, 512 : i32
    %7 = arith.index_cast %6 : i32 to index
    %c0 = arith.constant 0 : index
    %8 = vector.load %arg9[%7, %c0] : memref<512x128xf32, #tpu.memory_space<vmem>>, vector<512x128xf32>
    %c0_1 = arith.constant 0 : index
    %c0_2 = arith.constant 0 : index
    %9 = vector.load %arg6[%c0_1, %c0_2] : memref<1x128xf32, #tpu.memory_space<vmem>>, vector<1x128xf32>
    %10 = vector.broadcast %9 : vector<1x128xf32> to vector<512x128xf32>
    %11 = arith.mulf %8, %10 : vector<512x128xf32>
    %cst = arith.constant dense<0.000000e+00> : vector<512xf32>
    %12 = vector.multi_reduction <add>, %11, %cst [1] : vector<512x128xf32> to vector<512xf32>
    %13 = vector.shape_cast %12 : vector<512xf32> to vector<512x1xf32>
    %14 = tpu.transpose %13, [1, 0] : vector<512x1xf32> -> vector<1x512xf32>
    %c0_3 = arith.constant 0 : index
    %c0_4 = arith.constant 0 : index
    %15 = vector.load %arg10[%c0_3, %c0_4] : memref<512x1xf32, #tpu.memory_space<vmem>>, vector<512x1xf32>
    %16 = vector.broadcast %15 : vector<512x1xf32> to vector<512x512xf32>
    %17 = vector.broadcast %14 : vector<1x512xf32> to vector<512x512xf32>
    %18 = arith.addf %16, %17 : vector<512x512xf32>
    %cst_5 = arith.constant 2.000000e-01 : f32
    %19 = vector.broadcast %cst_5 : f32 to vector<512x512xf32>
    %20 = arith.mulf %19, %18 : vector<512x512xf32>
    %21 = arith.maximumf %18, %20 : vector<512x512xf32>
    %c0_6 = arith.constant 0 : index
    %c0_7 = arith.constant 0 : index
    %c0_8 = arith.constant 0 : index
    %22 = vector.load %arg7[%c0_6, %c0_7, %c0_8] : memref<1x512x512xi8, #tpu.memory_space<vmem>>, vector<1x512x512xi8>
    %23 = vector.shape_cast %22 : vector<1x512x512xi8> to vector<512x512xi8>
    %c0_i8 = arith.constant 0 : i8
    %24 = vector.broadcast %c0_i8 : i8 to vector<512x512xi8>
    %25 = arith.cmpi ne, %23, %24 : vector<512x512xi8>
    %cst_9 = arith.constant -1.000000e+30 : f32
    %26 = vector.broadcast %cst_9 : f32 to vector<512x512xf32>
    %27 = arith.select %25, %21, %26 : vector<512x512xi1>, vector<512x512xf32>
    %cst_10 = arith.constant dense<0xFF800000> : vector<512xf32>
    %28 = vector.multi_reduction <maximumf>, %27, %cst_10 [0] : vector<512x512xf32> to vector<512xf32>
    %29 = vector.shape_cast %28 : vector<512xf32> to vector<1x512xf32>
    %30 = vector.broadcast %29 : vector<1x512xf32> to vector<512x512xf32>
    %31 = arith.subf %27, %30 : vector<512x512xf32>
    %32 = arith.truncf %31 : vector<512x512xf32> to vector<512x512xbf16>
    %33 = math.exp %32 : vector<512x512xbf16>
    %34 = arith.extf %33 : vector<512x512xbf16> to vector<512x512xf32>
    %cst_11 = arith.constant dense<0.000000e+00> : vector<512xf32>
    %35 = vector.multi_reduction <add>, %34, %cst_11 [0] : vector<512x512xf32> to vector<512xf32>
    %36 = vector.shape_cast %35 : vector<512xf32> to vector<1x512xf32>
    %cst_12 = arith.constant -1.000000e+29 : f32
    %37 = vector.broadcast %cst_12 : f32 to vector<1x512xf32>
    %38 = arith.cmpf ogt, %29, %37 : vector<1x512xf32>
    %39 = tpu.reciprocal %36 {approx = true} : vector<1x512xf32> -> vector<1x512xf32>
    %cst_13 = arith.constant 0.000000e+00 : f32
    %40 = vector.broadcast %cst_13 : f32 to vector<1x512xf32>
    %41 = arith.select %38, %39, %40 : vector<1x512xi1>, vector<1x512xf32>
    %42 = tpu.transpose %41, [1, 0] : vector<1x512xf32> -> vector<512x1xf32>
    %43 = vector.broadcast %42 : vector<512x1xf32> to vector<512x128xf32>
    %44 = arith.mulf %8, %43 : vector<512x128xf32>
    %45 = arith.truncf %44 : vector<512x128xf32> to vector<512x128xbf16>
    %cst_14 = arith.constant dense<0.000000e+00> : vector<512x128xf32>
    %46 = tpu.matmul %33, %45, %cst_14 {dimension_numbers = #tpu.dot_dimension_numbers<[1], [0], [0], [1], [0, 0, 1, 1], [], []>} : vector<512x512xbf16>, vector<512x128xbf16>, vector<512x128xf32> -> vector<512x128xf32>
    %c0_i32_15 = arith.constant 0 : i32
    %47 = arith.cmpi eq, %arg1, %c0_i32_15 : i32
    %48 = arith.extui %47 : i1 to i32
    %c0_i32_16 = arith.constant 0 : i32
    %49 = arith.cmpi ne, %48, %c0_i32_16 : i32
    scf.if %49 {
      %c0_19 = arith.constant 0 : index
      %c0_20 = arith.constant 0 : index
      %53 = vector.load %arg8[%c0_19, %c0_20] : memref<512x128xf32, #tpu.memory_space<vmem>>, vector<512x128xf32>
      tpu.vector_store %arg8[%c0_19, %c0_20], %46 {strides = array<i32>} : memref<512x128xf32, #tpu.memory_space<vmem>>, vector<512x128xf32>,
    } else {
    }
    %c0_i32_17 = arith.constant 0 : i32
    %50 = arith.cmpi ne, %arg1, %c0_i32_17 : i32
    %51 = arith.extui %50 : i1 to i32
    %c0_i32_18 = arith.constant 0 : i32
    %52 = arith.cmpi ne, %51, %c0_i32_18 : i32
    scf.if %52 {
      %c0_19 = arith.constant 0 : index
      %c0_20 = arith.constant 0 : index
      %53 = vector.load %arg8[%c0_19, %c0_20] : memref<512x128xf32, #tpu.memory_space<vmem>>, vector<512x128xf32>
      %54 = arith.addf %53, %46 : vector<512x128xf32>
      %c0_21 = arith.constant 0 : index
      %c0_22 = arith.constant 0 : index
      %55 = vector.load %arg8[%c0_21, %c0_22] : memref<512x128xf32, #tpu.memory_space<vmem>>, vector<512x128xf32>
      tpu.vector_store %arg8[%c0_21, %c0_22], %54 {strides = array<i32>} : memref<512x128xf32, #tpu.memory_space<vmem>>, vector<512x128xf32>,
    } else {
    }
    return
  }
  func.func @transform_0(%arg0: i32, %arg1: i32) -> (i32, i32) {
    %c0_i32 = arith.constant 0 : i32
    %c0_i32_0 = arith.constant 0 : i32
    %c0_i32_1 = arith.constant 0 : i32
    return %c0_i32, %c0_i32_0 : i32, i32
  }
  func.func @transform_1(%arg0: i32, %arg1: i32) -> (i32, i32) {
    %c0_i32 = arith.constant 0 : i32
    %c0_i32_0 = arith.constant 0 : i32
    %c0_i32_1 = arith.constant 0 : i32
    return %c0_i32, %c0_i32_0 : i32, i32
  }
  func.func @transform_2(%arg0: i32, %arg1: i32) -> (i32, i32) {
    %c0_i32 = arith.constant 0 : i32
    %c0_i32_0 = arith.constant 0 : i32
    %c0_i32_1 = arith.constant 0 : i32
    return %c0_i32, %c0_i32_0 : i32, i32
  }
  func.func @transform_3(%arg0: i32, %arg1: i32) -> (i32, i32) {
    %c0_i32 = arith.constant 0 : i32
    %c0_i32_0 = arith.constant 0 : i32
    %c0_i32_1 = arith.constant 0 : i32
    return %c0_i32, %c0_i32_0 : i32, i32
  }
  func.func @transform_4(%arg0: i32, %arg1: i32) -> (i32, i32) {
    %c0_i32 = arith.constant 0 : i32
    %c0_i32_0 = arith.constant 0 : i32
    %c0_i32_1 = arith.constant 0 : i32
    return %c0_i32, %c0_i32_0 : i32, i32
  }
  func.func @transform_5(%arg0: i32, %arg1: i32) -> (i32, i32, i32) {
    %c1_i32 = arith.constant 1 : i32
    %0 = arith.muli %arg0, %c1_i32 : i32
    %1 = arith.addi %0, %arg1 : i32
    %c0_i32 = arith.constant 0 : i32
    %c0_i32_0 = arith.constant 0 : i32
    %c0_i32_1 = arith.constant 0 : i32
    return %1, %c0_i32, %c0_i32_0 : i32, i32, i32
  }
  func.func @transform_6(%arg0: i32, %arg1: i32) -> (i32, i32) {
    %c0_i32 = arith.constant 0 : i32
    %c0_i32_0 = arith.constant 0 : i32
    return %arg0, %c0_i32 : i32, i32
  }
}

</mosaic_0001>

<bundles_post_ra>
// kernel: tpu_custom_call.1
= control target key start
LH: loop header
LB: loop body
LE: loop exit
PB: predicated region body
PF: predicated region fallthrough
CT: control target
= control target key end

     0   :  { %vm124_vm0 = vcmask 130048   ;;  %s15067_s0 = inlined_call_operand.vmem [shape: f32[512,16], index: 0, kind: input, shape index: {}]   ;;  %s15068_s1 = inlined_call_operand.vmem [shape: f32[16,128], index: 1, kind: input, shape index: {}]   ;;  %s15069_s2 = inlined_call_operand.vmem [shape: f32[1,128], index: 2, kind: input, shape index: {}]   ;;  %s15070_s3 = inlined_call_operand.vmem [shape: f32[1,128], index: 3, kind: input, shape index: {}]   ;;  %s15071_s4 = inlined_call_operand.vmem [shape: f32[1,128], index: 4, kind: input, shape index: {}]   ;;  %s15072_s5 = inlined_call_operand.vmem [shape: s8[1,512,512], index: 5, kind: input, shape index: {}]   ;;  %s15073_s6 = inlined_call_operand.hbm [shape: f32[512,128], index: 6, kind: output, shape index: {}]  }
   0x1   :  { %v116_v0 = vld [vmem:[%s15068_s1 + $0x8] sm:$0xff]  ;;  %v115_v1 = vld [vmem:[%s15068_s1] sm:$0xff]  ;;  %v53_v6 = vld [vmem:[%s15067_s0 + $0x10] sm:$0xff] }
   0x2   :  { %7256 = vmatprep.subr.mxu0 %v116_v0  ;;  %7356 = vmatprep.subr.mxu1 %v116_v0  ;;  %v51_v2 = vld [vmem:[%s15067_s0] sm:$0xff]  ;;  %v52_v4 = vld [vmem:[%s15067_s0 + $0x8] sm:$0xff]  ;;  %v85_v7 = vld [vmem:[%s15067_s0 + $0x110] sm:$0xff] }
   0x3   :  { %7257 = vmatpush3.msra.mxu0 %v116_v0  ;;  %7358 = vmatpush3.msra.mxu1 %v116_v0  ;;  %v83_v3 = vld [vmem:[%s15067_s0 + $0x100] sm:$0xff]  ;;  %v84_v5 = vld [vmem:[%s15067_s0 + $0x108] sm:$0xff]  ;;  %v54_v8 = vld [vmem:[%s15067_s0 + $0x18] sm:$0xff] }
   0x4   :  { %7258 = vmatprep.subr.mxu0 %v115_v1  ;;  %7357 = vmatprep.subr.mxu1 %v115_v1  ;;  %v86_v9 = vld [vmem:[%s15067_s0 + $0x118] sm:$0xff]  ;;  %v55_v10 = vld [vmem:[%s15067_s0 + $0x20] sm:$0xff]  ;;  %v56_v12 = vld [vmem:[%s15067_s0 + $0x28] sm:$0xff] }
   0x5   :  { %7259 = vmatpush3.msra.mxu0 %v115_v1  ;;  %7359 = vmatpush3.msra.mxu1 %v115_v1  ;;  %v87_v11 = vld [vmem:[%s15067_s0 + $0x120] sm:$0xff]  ;;  %v88_v13 = vld [vmem:[%s15067_s0 + $0x128] sm:$0xff]  ;;  %v57_v14 = vld [vmem:[%s15067_s0 + $0x30] sm:$0xff] }
   0x6   :  { %7260 = vmatprep.mubr.msk.f32.mxu0 %vm124_vm0, %v51_v2  ;;  %7308 = vmatprep.mubr.msk.f32.mxu1 %vm124_vm0, %v83_v3  ;;  %v89_v15 = vld [vmem:[%s15067_s0 + $0x130] sm:$0xff]  ;;  %v58_v16 = vld [vmem:[%s15067_s0 + $0x38] sm:$0xff]  ;;  %v59_v18 = vld [vmem:[%s15067_s0 + $0x40] sm:$0xff] }
   0x7   :  { %7261 = vmatmul.mubr.msk.f32.vlgmr.msra.gmra.mxu0 %vm124_vm0, %v52_v4  ;;  %7309 = vmatmul.mubr.msk.f32.vlgmr.msra.gmra.mxu1 %vm124_vm0, %v84_v5  ;;  %v90_v17 = vld [vmem:[%s15067_s0 + $0x138] sm:$0xff]  ;;  %v91_v19 = vld [vmem:[%s15067_s0 + $0x140] sm:$0xff]  ;;  %v60_v20 = vld [vmem:[%s15067_s0 + $0x48] sm:$0xff] }
   0x8   :  { %7263 = vmatprep.mubr.msk.f32.mxu0 %vm124_vm0, %v53_v6  ;;  %7311 = vmatprep.mubr.msk.f32.mxu1 %vm124_vm0, %v85_v7  ;;  %v92_v21 = vld [vmem:[%s15067_s0 + $0x148] sm:$0xff]  ;;  %v61_v22 = vld [vmem:[%s15067_s0 + $0x50] sm:$0xff] }
   0x9   :  { %v93_v23 = vld [vmem:[%s15067_s0 + $0x150] sm:$0xff] }
   0xb   :  { %7264 = vmatmul.mubr.msk.f32.gmra.mxu0 %vm124_vm0, %v54_v8  ;;  %7312 = vmatmul.mubr.msk.f32.gmra.mxu1 %vm124_vm0, %v86_v9 }
   0xc   :  { %7266 = vmatprep.mubr.msk.f32.mxu0 %vm124_vm0, %v55_v10  ;;  %7314 = vmatprep.mubr.msk.f32.mxu1 %vm124_vm0, %v87_v11 }
   0xf   :  { %7267 = vmatmul.mubr.msk.f32.gmra.mxu0 %vm124_vm0, %v56_v12  ;;  %7315 = vmatmul.mubr.msk.f32.gmra.mxu1 %vm124_vm0, %v88_v13 }
  0x10   :  { %7269 = vmatprep.mubr.msk.f32.mxu0 %vm124_vm0, %v57_v14  ;;  %7317 = vmatprep.mubr.msk.f32.mxu1 %vm124_vm0, %v89_v15 }
  0x13   :  { %7270 = vmatmul.mubr.msk.f32.gmra.mxu0 %vm124_vm0, %v58_v16  ;;  %7318 = vmatmul.mubr.msk.f32.gmra.mxu1 %vm124_vm0, %v90_v17 }
  0x14   :  { %7272 = vmatprep.mubr.msk.f32.mxu0 %vm124_vm0, %v59_v18  ;;  %7320 = vmatprep.mubr.msk.f32.mxu1 %vm124_vm0, %v91_v19 }
  0x15   :  { %11 = vsyncpa [#allocation5], 0  ;;  %v62_v24 = vld [vmem:[%s15067_s0 + $0x58] sm:$0xff]  ;;  %v63_v26 = vld [vmem:[%s15067_s0 + $0x60] sm:$0xff]  ;;  %vm965_vm1 = vcmask 7168  }
  0x16   :  { %v94_v25 = vld [vmem:[%s15067_s0 + $0x158] sm:$0xff]  ;;  %v95_v27 = vld [vmem:[%s15067_s0 + $0x160] sm:$0xff]  ;;  %v64_v28 = vld [vmem:[%s15067_s0 + $0x68] sm:$0xff] }
  0x17   :  { %7273 = vmatmul.mubr.msk.f32.gmra.mxu0 %vm124_vm0, %v60_v20  ;;  %7321 = vmatmul.mubr.msk.f32.gmra.mxu1 %vm124_vm0, %v92_v21  ;;  %v96_v29 = vld [vmem:[%s15067_s0 + $0x168] sm:$0xff]  ;;  %v65_v30 = vld [vmem:[%s15067_s0 + $0x70] sm:$0xff]  ;;  %v66_v32 = vld [vmem:[%s15067_s0 + $0x78] sm:$0xff] }
  0x18   :  { %7275 = vmatprep.mubr.msk.f32.mxu0 %vm124_vm0, %v61_v22  ;;  %7323 = vmatprep.mubr.msk.f32.mxu1 %vm124_vm0, %v93_v23  ;;  %v97_v31 = vld [vmem:[%s15067_s0 + $0x170] sm:$0xff]  ;;  %v98_v33 = vld [vmem:[%s15067_s0 + $0x178] sm:$0xff]  ;;  %v67_v34 = vld [vmem:[%s15067_s0 + $0x80] sm:$0xff] }
  0x19   :  { %v99_v35 = vld [vmem:[%s15067_s0 + $0x180] sm:$0xff]  ;;  %v68_v36 = vld [vmem:[%s15067_s0 + $0x88] sm:$0xff]  ;;  %v69_v38 = vld [vmem:[%s15067_s0 + $0x90] sm:$0xff] }
  0x1a   :  { %v100_v37 = vld [vmem:[%s15067_s0 + $0x188] sm:$0xff]  ;;  %v101_v39 = vld [vmem:[%s15067_s0 + $0x190] sm:$0xff]  ;;  %v70_v40 = vld [vmem:[%s15067_s0 + $0x98] sm:$0xff] }
  0x1b   :  { %7276 = vmatmul.mubr.msk.f32.gmra.mxu0 %vm124_vm0, %v62_v24  ;;  %7324 = vmatmul.mubr.msk.f32.gmra.mxu1 %vm124_vm0, %v94_v25  ;;  %v102_v41 = vld [vmem:[%s15067_s0 + $0x198] sm:$0xff]  ;;  %v71_v42 = vld [vmem:[%s15067_s0 + $0xa0] sm:$0xff]  ;;  %v72_v44 = vld [vmem:[%s15067_s0 + $0xa8] sm:$0xff] }
  0x1c   :  { %7278 = vmatprep.mubr.msk.f32.mxu0 %vm124_vm0, %v63_v26  ;;  %7326 = vmatprep.mubr.msk.f32.mxu1 %vm124_vm0, %v95_v27  ;;  %v103_v43 = vld [vmem:[%s15067_s0 + $0x1a0] sm:$0xff]  ;;  %v104_v45 = vld [vmem:[%s15067_s0 + $0x1a8] sm:$0xff]  ;;  %v73_v46 = vld [vmem:[%s15067_s0 + $0xb0] sm:$0xff] }
  0x1d   :  { %v105_v47 = vld [vmem:[%s15067_s0 + $0x1b0] sm:$0xff]  ;;  %v74_v48 = vld [vmem:[%s15067_s0 + $0xb8] sm:$0xff]  ;;  %v75_v50 = vld [vmem:[%s15067_s0 + $0xc0] sm:$0xff] }
  0x1e   :  { %v106_v49 = vld [vmem:[%s15067_s0 + $0x1b8] sm:$0xff]  ;;  %v107_v51 = vld [vmem:[%s15067_s0 + $0x1c0] sm:$0xff]  ;;  %v76_v52 = vld [vmem:[%s15067_s0 + $0xc8] sm:$0xff] }
  0x1f   :  { %7279 = vmatmul.mubr.msk.f32.gmra.mxu0 %vm124_vm0, %v64_v28  ;;  %7327 = vmatmul.mubr.msk.f32.gmra.mxu1 %vm124_vm0, %v96_v29  ;;  %v108_v53 = vld [vmem:[%s15067_s0 + $0x1c8] sm:$0xff]  ;;  %v77_v54 = vld [vmem:[%s15067_s0 + $0xd0] sm:$0xff]  ;;  %v78_v56 = vld [vmem:[%s15067_s0 + $0xd8] sm:$0xff] }
  0x20   :  { %7281 = vmatprep.mubr.msk.f32.mxu0 %vm124_vm0, %v65_v30  ;;  %7329 = vmatprep.mubr.msk.f32.mxu1 %vm124_vm0, %v97_v31  ;;  %v109_v55 = vld [vmem:[%s15067_s0 + $0x1d0] sm:$0xff]  ;;  %v110_v57 = vld [vmem:[%s15067_s0 + $0x1d8] sm:$0xff]  ;;  %v79_v58 = vld [vmem:[%s15067_s0 + $0xe0] sm:$0xff] }
  0x21   :  { %v111_v59 = vld [vmem:[%s15067_s0 + $0x1e0] sm:$0xff]  ;;  %v80_v60 = vld [vmem:[%s15067_s0 + $0xe8] sm:$0xff]  ;;  %v81_v62 = vld [vmem:[%s15067_s0 + $0xf0] sm:$0xff] }
  0x22   :  { %v112_v61 = vld [vmem:[%s15067_s0 + $0x1e8] sm:$0xff]  ;;  %v82_v63 = vld [vmem:[%s15067_s0 + $0xf8] sm:$0xff]  ;;  %v113_v0 = vld [vmem:[%s15067_s0 + $0x1f0] sm:$0xff] }
  0x23   :  { %7282 = vmatmul.mubr.msk.f32.gmra.mxu0 %vm124_vm0, %v66_v32  ;;  %7330 = vmatmul.mubr.msk.f32.gmra.mxu1 %vm124_vm0, %v98_v33  ;;  %v114_v1 = vld [vmem:[%s15067_s0 + $0x1f8] sm:$0xff]  ;;  %v7958_v2 = vld [vmem:[%s15069_s2] ss:$0 sm:$0xff] }
  0x24   :  { %7284 = vmatprep.mubr.msk.f32.mxu0 %vm124_vm0, %v67_v34  ;;  %7332 = vmatprep.mubr.msk.f32.mxu1 %vm124_vm0, %v99_v35  ;;  %v7963_v5 = vld [vmem:[%s15071_s4] ss:$0 sm:$0xff] }
  0x25   :  { %v7968_v6 = vld [vmem:[%s15070_s3] ss:$0 sm:$0xff] }
  0x27   :  { %7285 = vmatmul.mubr.msk.f32.gmra.mxu0 %vm124_vm0, %v68_v36  ;;  %7333 = vmatmul.mubr.msk.f32.gmra.mxu1 %vm124_vm0, %v100_v37 }
  0x28   :  { %7287 = vmatprep.mubr.msk.f32.mxu0 %vm124_vm0, %v69_v38  ;;  %7335 = vmatprep.mubr.msk.f32.mxu1 %vm124_vm0, %v101_v39 }
  0x2b   :  { %7288 = vmatmul.mubr.msk.f32.gmra.mxu0 %vm124_vm0, %v70_v40  ;;  %7336 = vmatmul.mubr.msk.f32.gmra.mxu1 %vm124_vm0, %v102_v41 }
  0x2c   :  { %7290 = vmatprep.mubr.msk.f32.mxu0 %vm124_vm0, %v71_v42  ;;  %7338 = vmatprep.mubr.msk.f32.mxu1 %vm124_vm0, %v103_v43 }
  0x2f   :  { %7291 = vmatmul.mubr.msk.f32.gmra.mxu0 %vm124_vm0, %v72_v44  ;;  %7339 = vmatmul.mubr.msk.f32.gmra.mxu1 %vm124_vm0, %v104_v45 }
  0x30   :  { %7293 = vmatprep.mubr.msk.f32.mxu0 %vm124_vm0, %v73_v46  ;;  %7341 = vmatprep.mubr.msk.f32.mxu1 %vm124_vm0, %v105_v47 }
  0x33   :  { %7294 = vmatmul.mubr.msk.f32.gmra.mxu0 %vm124_vm0, %v74_v48  ;;  %7342 = vmatmul.mubr.msk.f32.gmra.mxu1 %vm124_vm0, %v106_v49 }
  0x34   :  { %7296 = vmatprep.mubr.msk.f32.mxu0 %vm124_vm0, %v75_v50  ;;  %7344 = vmatprep.mubr.msk.f32.mxu1 %vm124_vm0, %v107_v51 }
  0x37   :  { %7297 = vmatmul.mubr.msk.f32.gmra.mxu0 %vm124_vm0, %v76_v52  ;;  %7345 = vmatmul.mubr.msk.f32.gmra.mxu1 %vm124_vm0, %v108_v53 }
  0x38   :  { %7299 = vmatprep.mubr.msk.f32.mxu0 %vm124_vm0, %v77_v54  ;;  %7347 = vmatprep.mubr.msk.f32.mxu1 %vm124_vm0, %v109_v55 }
  0x3b   :  { %7300 = vmatmul.mubr.msk.f32.gmra.mxu0 %vm124_vm0, %v78_v56  ;;  %7348 = vmatmul.mubr.msk.f32.gmra.mxu1 %vm124_vm0, %v110_v57 }
  0x3c   :  { %7302 = vmatprep.mubr.msk.f32.mxu0 %vm124_vm0, %v79_v58  ;;  %7350 = vmatprep.mubr.msk.f32.mxu1 %vm124_vm0, %v111_v59 }
  0x3f   :  { %7303 = vmatmul.mubr.msk.f32.gmra.mxu0 %vm124_vm0, %v80_v60  ;;  %7351 = vmatmul.mubr.msk.f32.gmra.mxu1 %vm124_vm0, %v112_v61 }
  0x40   :  { %7305 = vmatprep.mubr.msk.f32.mxu0 %vm124_vm0, %v81_v62  ;;  %7353 = vmatprep.mubr.msk.f32.mxu1 %vm124_vm0, %v113_v0 }
  0x43   :  { %7306 = vmatmul.mubr.msk.f32.gmra.mxu0 %vm124_vm0, %v82_v63  ;;  %7354 = vmatmul.mubr.msk.f32.gmra.mxu1 %vm124_vm0, %v114_v1 }
  0xc7   :  { %v7262_v3 = vpop.f32.mrf.mxu0  ;;  %v7310_v4 = vpop.f32.mrf.mxu1 }
  0xc8   :  { %v7971_v7 = vadd.f32 %v7262_v3, %v7958_v2  ;;  %v7974_v8 = vadd.f32 %v7310_v4, %v7958_v2 }
  0xc9   :  { %v383_v11 = vpop.f32.mrf.mxu0  ;;  %v543_v16 = vpop.f32.mrf.mxu1 }
  0xca   :  { %15872 = vst [vmem:[#allocation7_spill] sm:$0xff] %v7971_v7  ;;  %15873 = vst [vmem:[#allocation8_spill] sm:$0xff] %v7974_v8  ;;  %v1137_v9 = vmul.f32 %v7963_v5, %v7974_v8  ;;  %v774_v10 = vmul.f32 %v7968_v6, %v7971_v7  ;;  %v806_v12 = vmul.f32 %v7968_v6, %v7974_v8 }
  0xcb   :  { %v7265_v13 = vpop.f32.mrf.mxu0  ;;  %v7983_v14 = vadd.f32 %v7958_v2, %v383_v11  ;;  %v1105_v15 = vmul.f32 %v7963_v5, %v7971_v7  ;;  %v7313_v18 = vpop.f32.mrf.mxu1  ;;  %v7991_v19 = vadd.f32 %v7958_v2, %v543_v16 }
  0xcc   :  { %1234 = vadd.xlane.f32.xlu1 %v1137_v9  ;;  %839 = vadd.xlane.f32.xlu0 %v774_v10  ;;  %v7988_v17 = vadd.f32 %v7265_v13, %v7958_v2  ;;  %v7998_v22 = vadd.f32 %v7313_v18, %v7958_v2 }
  0xcd   :  { %15874 = vst [vmem:[#allocation9_spill] sm:$0xff] %v7983_v14  ;;  %15876 = vst [vmem:[#allocation11_spill] sm:$0xff] %v7991_v19  ;;  %v1104_v20 = vmul.f32 %v7963_v5, %v7983_v14  ;;  %v773_v21 = vmul.f32 %v7968_v6, %v7983_v14  ;;  %v1136_v24 = vmul.f32 %v7963_v5, %v7991_v19  ;;  %v393_v27 = vpop.f32.mrf.mxu0  ;;  %v553_v28 = vpop.f32.mrf.mxu1 }
  0xce   :  { %15875 = vst [vmem:[#allocation10_spill] sm:$0xff] %v7988_v17  ;;  %15877 = vst [vmem:[#allocation12_spill] sm:$0xff] %v7998_v22  ;;  %v776_v23 = vmul.f32 %v7968_v6, %v7988_v17  ;;  %v1139_v25 = vmul.f32 %v7963_v5, %v7998_v22  ;;  %v805_v26 = vmul.f32 %v7968_v6, %v7991_v19 }
  0xcf   :  { %v808_v29 = vmul.f32 %v7968_v6, %v7998_v22  ;;  %v1107_v30 = vmul.f32 %v7963_v5, %v7988_v17  ;;  %v8013_v31 = vadd.f32 %v7958_v2, %v393_v27  ;;  %v8016_v32 = vadd.f32 %v7958_v2, %v553_v28  ;;  %v7268_v35 = vpop.f32.mrf.mxu0  ;;  %v7316_v37 = vpop.f32.mrf.mxu1 }
  0xd0   :  { %903 = vadd.xlane.f32.xlu1 %v806_v12  ;;  %1170 = vadd.xlane.f32.xlu0 %v1105_v15  ;;  %v8023_v36 = vadd.f32 %v7268_v35, %v7958_v2  ;;  %v8030_v41 = vadd.f32 %v7316_v37, %v7958_v2 }
  0xd1   :  { %15878 = vst [vmem:[#allocation13_spill] sm:$0xff] %v8013_v31  ;;  %15879 = vst [vmem:[#allocation14_spill] sm:$0xff] %v8016_v32  ;;  %v775_v33 = vmul.f32 %v7968_v6, %v8013_v31  ;;  %v1138_v34 = vmul.f32 %v7963_v5, %v8016_v32  ;;  %v1106_v38 = vmul.f32 %v7963_v5, %v8013_v31  ;;  %v403_v40 = vpop.f32.mrf.mxu0  ;;  %v563_v45 = vpop.f32.mrf.mxu1 }
  0xd2   :  { %15880 = vst [vmem:[#allocation15_spill] sm:$0xff] %v8023_v36  ;;  %v807_v39 = vmul.f32 %v7968_v6, %v8016_v32  ;;  %15881 = vst [vmem:[#allocation16_spill] sm:$0xff] %v8030_v41  ;;  %v778_v42 = vmul.f32 %v7968_v6, %v8023_v36  ;;  %v1109_v43 = vmul.f32 %v7963_v5, %v8023_v36 }
  0xd3   :  { %v8037_v44 = vadd.f32 %v7958_v2, %v403_v40  ;;  %v1141_v46 = vmul.f32 %v7963_v5, %v8030_v41  ;;  %v8042_v47 = vadd.f32 %v7958_v2, %v563_v45  ;;  %v810_v49 = vmul.f32 %v7968_v6, %v8030_v41  ;;  %v7271_v51 = vpop.f32.mrf.mxu0  ;;  %v7319_v53 = vpop.f32.mrf.mxu1 }
  0xd4   :  { %1168 = vadd.xlane.f32.xlu1 %v1104_v20  ;;  %837 = vadd.xlane.f32.xlu0 %v773_v21  ;;  %v8051_v52 = vadd.f32 %v7271_v51, %v7958_v2  ;;  %v8058_v57 = vadd.f32 %v7319_v53, %v7958_v2 }
  0xd5   :  { %15882 = vst [vmem:[#allocation17_spill] sm:$0xff] %v8037_v44  ;;  %15883 = vst [vmem:[#allocation18_spill] sm:$0xff] %v8042_v47  ;;  %v777_v48 = vmul.f32 %v7968_v6, %v8037_v44  ;;  %v1140_v50 = vmul.f32 %v7963_v5, %v8042_v47  ;;  %v1108_v54 = vmul.f32 %v7963_v5, %v8037_v44  ;;  %v413_v56 = vpop.f32.mrf.mxu0  ;;  %v573_v61 = vpop.f32.mrf.mxu1 }
  0xd6   :  { %15884 = vst [vmem:[#allocation19_spill] sm:$0xff] %v8051_v52  ;;  %v809_v55 = vmul.f32 %v7968_v6, %v8042_v47  ;;  %15885 = vst [vmem:[#allocation20_spill] sm:$0xff] %v8058_v57  ;;  %v780_v58 = vmul.f32 %v7968_v6, %v8051_v52  ;;  %v1111_v59 = vmul.f32 %v7963_v5, %v8051_v52 }
  0xd7   :  { %v8065_v60 = vadd.f32 %v7958_v2, %v413_v56  ;;  %v1143_v62 = vmul.f32 %v7963_v5, %v8058_v57  ;;  %v8070_v63 = vadd.f32 %v7958_v2, %v573_v61  ;;  %v812_v1 = vmul.f32 %v7968_v6, %v8058_v57  ;;  %v7274_v4 = vpop.f32.mrf.mxu0  ;;  %v7322_v10 = vpop.f32.mrf.mxu1 }
  0xd8   :  { %843 = vadd.xlane.f32.xlu1 %v776_v23  ;;  %1232 = vadd.xlane.f32.xlu0 %v1136_v24  ;;  %v8079_v9 = vadd.f32 %v7274_v4, %v7958_v2  ;;  %v8086_v15 = vadd.f32 %v7322_v10, %v7958_v2 }
  0xd9   :  { %15886 = vst [vmem:[#allocation21_spill] sm:$0xff] %v8065_v60  ;;  %15887 = vst [vmem:[#allocation22_spill] sm:$0xff] %v8070_v63  ;;  %v779_v0 = vmul.f32 %v7968_v6, %v8065_v60  ;;  %v1142_v3 = vmul.f32 %v7963_v5, %v8070_v63  ;;  %v1110_v11 = vmul.f32 %v7963_v5, %v8065_v60  ;;  %v423_v13 = vpop.f32.mrf.mxu0  ;;  %v583_v21 = vpop.f32.mrf.mxu1 }
  0xda   :  { %15888 = vst [vmem:[#allocation23_spill] sm:$0xff] %v8079_v9  ;;  %v811_v12 = vmul.f32 %v7968_v6, %v8070_v63  ;;  %15889 = vst [vmem:[#allocation24_spill] sm:$0xff] %v8086_v15  ;;  %v782_v16 = vmul.f32 %v7968_v6, %v8079_v9  ;;  %v1113_v18 = vmul.f32 %v7963_v5, %v8079_v9 }
  0xdb   :  { %v8093_v20 = vadd.f32 %v7958_v2, %v423_v13  ;;  %v1145_v23 = vmul.f32 %v7963_v5, %v8086_v15  ;;  %v8098_v24 = vadd.f32 %v7958_v2, %v583_v21  ;;  %v7277_v28 = vpop.f32.mrf.mxu0 }
  0xdc   :  { %1238 = vadd.xlane.f32.xlu1 %v1139_v25  ;;  %901 = vadd.xlane.f32.xlu0 %v805_v26  ;;  %v814_v26 = vmul.f32 %v7968_v6, %v8086_v15 }
  0xdd   :  { %15890 = vst [vmem:[#allocation25_spill] sm:$0xff] %v8093_v20  ;;  %15891 = vst [vmem:[#allocation26_spill] sm:$0xff] %v8098_v24  ;;  %v781_v25 = vmul.f32 %v7968_v6, %v8093_v20  ;;  %v1144_v27 = vmul.f32 %v7963_v5, %v8098_v24  ;;  %v433_v35 = vpop.f32.mrf.mxu0 }
  0xde   :  { %v8121_v40 = vadd.f32 %v7958_v2, %v433_v35 }
  0xdf   :  { %v7280_v45 = vpop.f32.mrf.mxu0 }
  0xe0   :  { %907 = vadd.xlane.f32.xlu1 %v808_v29  ;;  %1174 = vadd.xlane.f32.xlu0 %v1107_v30  ;;  %v8107_v29 = vadd.f32 %v7277_v28, %v7958_v2  ;;  %v7325_v30 = vpop.f32.mrf.mxu1  ;;  %15894 = vst [vmem:[#allocation29_spill] sm:$0xff] %v8121_v40  ;;  %v1114_v51 = vmul.f32 %v7963_v5, %v8121_v40 }
  0xe1   :  { %v8114_v37 = vadd.f32 %v7325_v30, %v7958_v2 }
  0xe2   :  { %15892 = vst [vmem:[#allocation27_spill] sm:$0xff] %v8107_v29 }
  0xe3   :  { %15893 = vst [vmem:[#allocation28_spill] sm:$0xff] %v8114_v37 }
  0xe4   :  { %841 = vadd.xlane.f32.xlu1 %v775_v33  ;;  %1236 = vadd.xlane.f32.xlu0 %v1138_v34  ;;  %v1112_v33 = vmul.f32 %v7963_v5, %v8093_v20  ;;  %v813_v34 = vmul.f32 %v7968_v6, %v8098_v24 }
  0xe8   :  { %1172 = vadd.xlane.f32.xlu1 %v1106_v38  ;;  %905 = vadd.xlane.f32.xlu0 %v807_v39  ;;  %v784_v38 = vmul.f32 %v7968_v6, %v8107_v29  ;;  %v1115_v39 = vmul.f32 %v7963_v5, %v8107_v29 }
  0xec   :  { %847 = vadd.xlane.f32.xlu1 %v778_v42  ;;  %1178 = vadd.xlane.f32.xlu0 %v1109_v43  ;;  %v593_v42 = vpop.f32.mrf.mxu1  ;;  %v1147_v43 = vmul.f32 %v7963_v5, %v8114_v37 }
  0xf0   :  { %1242 = vadd.xlane.f32.xlu1 %v1141_v46  ;;  %845 = vadd.xlane.f32.xlu0 %v777_v48  ;;  %v8126_v46 = vadd.f32 %v7958_v2, %v593_v42  ;;  %v783_v48 = vmul.f32 %v7968_v6, %v8121_v40 }
  0xf2   :  { %15895 = vst [vmem:[#allocation30_spill] sm:$0xff] %v8126_v46  ;;  %v1146_v53 = vmul.f32 %v7963_v5, %v8126_v46  ;;  %v815_v56 = vmul.f32 %v7968_v6, %v8126_v46 }
  0xf4   :  { %911 = vadd.xlane.f32.xlu1 %v810_v49  ;;  %1240 = vadd.xlane.f32.xlu0 %v1140_v50  ;;  %v8131_v49 = vadd.f32 %v7280_v45, %v7958_v2  ;;  %v7328_v50 = vpop.f32.mrf.mxu1 }
  0xf6   :  { %15896 = vst [vmem:[#allocation31_spill] sm:$0xff] %v8131_v49  ;;  %v1117_v61 = vmul.f32 %v7963_v5, %v8131_v49 }
  0xf8   :  { %1176 = vadd.xlane.f32.xlu1 %v1108_v54  ;;  %909 = vadd.xlane.f32.xlu0 %v809_v55  ;;  %v8138_v54 = vadd.f32 %v7328_v50, %v7958_v2  ;;  %v786_v55 = vmul.f32 %v7968_v6, %v8131_v49 }
  0xfa   :  { %15897 = vst [vmem:[#allocation32_spill] sm:$0xff] %v8138_v54 }
  0xfc   :  { %851 = vadd.xlane.f32.xlu1 %v780_v58  ;;  %1182 = vadd.xlane.f32.xlu0 %v1111_v59  ;;  %v443_v58 = vpop.f32.mrf.mxu0  ;;  %v1149_v59 = vmul.f32 %v7963_v5, %v8138_v54 }
 0x100   :  { %1246 = vadd.xlane.f32.xlu1 %v1143_v62  ;;  %849 = vadd.xlane.f32.xlu0 %v779_v0  ;;  %v7283_v62 = vpop.f32.mrf.mxu0  ;;  %v8149_v0 = vadd.f32 %v7958_v2, %v443_v58 }
 0x102   :  { %15898 = vst [vmem:[#allocation33_spill] sm:$0xff] %v8149_v0  ;;  %v453_v21 = vpop.f32.mrf.mxu0 }
 0x104   :  { %915 = vadd.xlane.f32.xlu1 %v812_v1  ;;  %1244 = vadd.xlane.f32.xlu0 %v1142_v3  ;;  %v603_v1 = vpop.f32.mrf.mxu1  ;;  %v8152_v3 = vadd.f32 %v7283_v62, %v7958_v2 }
 0x105   :  { %v8155_v10 = vadd.f32 %v7958_v2, %v603_v1 }
 0x106   :  { %15899 = vst [vmem:[#allocation34_spill] sm:$0xff] %v8152_v3  ;;  %v7331_v4 = vpop.f32.mrf.mxu1 }
 0x107   :  { %15900 = vst [vmem:[#allocation35_spill] sm:$0xff] %v8155_v10  ;;  %v8162_v13 = vadd.f32 %v7331_v4, %v7958_v2 }
 0x108   :  { %1180 = vadd.xlane.f32.xlu1 %v1110_v11  ;;  %913 = vadd.xlane.f32.xlu0 %v811_v12  ;;  %v1116_v11 = vmul.f32 %v7963_v5, %v8149_v0  ;;  %v785_v12 = vmul.f32 %v7968_v6, %v8149_v0  ;;  %v613_v28 = vpop.f32.mrf.mxu1 }
 0x109   :  { %15901 = vst [vmem:[#allocation36_spill] sm:$0xff] %v8162_v13 }
 0x10c   :  { %855 = vadd.xlane.f32.xlu1 %v782_v16  ;;  %1186 = vadd.xlane.f32.xlu0 %v1113_v18  ;;  %v788_v16 = vmul.f32 %v7968_v6, %v8152_v3  ;;  %v1148_v18 = vmul.f32 %v7963_v5, %v8155_v10 }
 0x110   :  { %1250 = vadd.xlane.f32.xlu1 %v1145_v23  ;;  %853 = vadd.xlane.f32.xlu0 %v781_v25  ;;  %v1151_v23 = vmul.f32 %v7963_v5, %v8162_v13  ;;  %v1119_v25 = vmul.f32 %v7963_v5, %v8152_v3 }
 0x114   :  { %919 = vadd.xlane.f32.xlu1 %v814_v26  ;;  %1248 = vadd.xlane.f32.xlu0 %v1144_v27  ;;  %v7286_v26 = vpop.f32.mrf.mxu0  ;;  %v8173_v27 = vadd.f32 %v7958_v2, %v453_v21 }
 0x115   :  { %v8176_v30 = vadd.f32 %v7286_v26, %v7958_v2 }
 0x116   :  { %15902 = vst [vmem:[#allocation37_spill] sm:$0xff] %v8173_v27  ;;  %v1118_v35 = vmul.f32 %v7963_v5, %v8173_v27  ;;  %v463_v45 = vpop.f32.mrf.mxu0 }
 0x117   :  { %15903 = vst [vmem:[#allocation38_spill] sm:$0xff] %v8176_v30  ;;  %v790_v42 = vmul.f32 %v7968_v6, %v8176_v30  ;;  %v1121_v50 = vmul.f32 %v7963_v5, %v8176_v30 }
 0x118   :  { %1184 = vadd.xlane.f32.xlu1 %v1112_v33  ;;  %917 = vadd.xlane.f32.xlu0 %v813_v34  ;;  %v7334_v33 = vpop.f32.mrf.mxu1  ;;  %v8179_v34 = vadd.f32 %v7958_v2, %v613_v28 }
 0x11a   :  { %15904 = vst [vmem:[#allocation39_spill] sm:$0xff] %v8179_v34 }
 0x11c   :  { %859 = vadd.xlane.f32.xlu1 %v784_v38  ;;  %1190 = vadd.xlane.f32.xlu0 %v1115_v39  ;;  %v787_v38 = vmul.f32 %v7968_v6, %v8173_v27  ;;  %v8186_v39 = vadd.f32 %v7334_v33, %v7958_v2 }
 0x11e   :  { %15905 = vst [vmem:[#allocation40_spill] sm:$0xff] %v8186_v39 }
 0x120   :  { %1254 = vadd.xlane.f32.xlu1 %v1147_v43  ;;  %857 = vadd.xlane.f32.xlu0 %v783_v48  ;;  %v1150_v43 = vmul.f32 %v7963_v5, %v8179_v34  ;;  %v1153_v48 = vmul.f32 %v7963_v5, %v8186_v39 }
 0x124   :  { %1188 = vadd.xlane.f32.xlu1 %v1114_v51  ;;  %1252 = vadd.xlane.f32.xlu0 %v1146_v53  ;;  %v7289_v51 = vpop.f32.mrf.mxu0  ;;  %v8197_v53 = vadd.f32 %v7958_v2, %v463_v45 }
 0x126   :  { %15906 = vst [vmem:[#allocation41_spill] sm:$0xff] %v8197_v53  ;;  %v789_v62 = vmul.f32 %v7968_v6, %v8197_v53 }
 0x128   :  { %863 = vadd.xlane.f32.xlu1 %v786_v55  ;;  %921 = vadd.xlane.f32.xlu0 %v815_v56  ;;  %v623_v55 = vpop.f32.mrf.mxu1  ;;  %v8200_v56 = vadd.f32 %v7289_v51, %v7958_v2 }
 0x12a   :  { %15907 = vst [vmem:[#allocation42_spill] sm:$0xff] %v8200_v56  ;;  %v7337_v58 = vpop.f32.mrf.mxu1  ;;  %v792_v4 = vmul.f32 %v7968_v6, %v8200_v56 }
 0x12b   :  { %v8210_v1 = vadd.f32 %v7337_v58, %v7958_v2 }
 0x12c   :  { %1258 = vadd.xlane.f32.xlu1 %v1149_v59  ;;  %1194 = vadd.xlane.f32.xlu0 %v1117_v61  ;;  %v8203_v59 = vadd.f32 %v7958_v2, %v623_v55  ;;  %v1120_v61 = vmul.f32 %v7963_v5, %v8197_v53 }
 0x12d   :  { %15909 = vst [vmem:[#allocation44_spill] sm:$0xff] %v8210_v1 }
 0x12e   :  { %15908 = vst [vmem:[#allocation43_spill] sm:$0xff] %v8203_v59 }
 0x130   :  { %1192 = vadd.xlane.f32.xlu1 %v1116_v11  ;;  %861 = vadd.xlane.f32.xlu0 %v785_v12  ;;  %v1152_v11 = vmul.f32 %v7963_v5, %v8203_v59  ;;  %v473_v12 = vpop.f32.mrf.mxu0 }
 0x132   :  { %v7292_v21 = vpop.f32.mrf.mxu0 }
 0x133   :  { %v8224_v26 = vadd.f32 %v7292_v21, %v7958_v2 }
 0x134   :  { %867 = vadd.xlane.f32.xlu1 %v788_v16  ;;  %1256 = vadd.xlane.f32.xlu0 %v1148_v18  ;;  %v1155_v16 = vmul.f32 %v7963_v5, %v8210_v1  ;;  %v1123_v18 = vmul.f32 %v7963_v5, %v8200_v56 }
 0x135   :  { %15911 = vst [vmem:[#allocation46_spill] sm:$0xff] %v8224_v26  ;;  %v1125_v58 = vmul.f32 %v7963_v5, %v8224_v26 }
 0x138   :  { %1262 = vadd.xlane.f32.xlu1 %v1151_v23  ;;  %1198 = vadd.xlane.f32.xlu0 %v1119_v25  ;;  %v8221_v23 = vadd.f32 %v7958_v2, %v473_v12  ;;  %v633_v25 = vpop.f32.mrf.mxu1 }
 0x139   :  { %v8227_v33 = vadd.f32 %v7958_v2, %v633_v25 }
 0x13a   :  { %15910 = vst [vmem:[#allocation45_spill] sm:$0xff] %v8221_v23  ;;  %v7340_v28 = vpop.f32.mrf.mxu1 }
 0x13b   :  { %15912 = vst [vmem:[#allocation47_spill] sm:$0xff] %v8227_v33  ;;  %v1154_v51 = vmul.f32 %v7963_v5, %v8227_v33 }
 0x13c   :  { %1196 = vadd.xlane.f32.xlu1 %v1118_v35  ;;  %865 = vadd.xlane.f32.xlu0 %v787_v38  ;;  %v1122_v35 = vmul.f32 %v7963_v5, %v8221_v23  ;;  %v791_v38 = vmul.f32 %v7968_v6, %v8221_v23  ;;  %v643_v12 = vpop.f32.mrf.mxu1 }
 0x13e   :  { %v7343_v21 = vpop.f32.mrf.mxu1 }
 0x140   :  { %871 = vadd.xlane.f32.xlu1 %v790_v42  ;;  %1260 = vadd.xlane.f32.xlu0 %v1150_v43  ;;  %v8234_v42 = vadd.f32 %v7340_v28, %v7958_v2  ;;  %v794_v43 = vmul.f32 %v7968_v6, %v8224_v26 }
 0x142   :  { %15913 = vst [vmem:[#allocation48_spill] sm:$0xff] %v8234_v42  ;;  %v1157_v55 = vmul.f32 %v7963_v5, %v8234_v42 }
 0x144   :  { %1266 = vadd.xlane.f32.xlu1 %v1153_v48  ;;  %1202 = vadd.xlane.f32.xlu0 %v1121_v50  ;;  %v483_v50 = vpop.f32.mrf.mxu0 }
 0x148   :  { %1200 = vadd.xlane.f32.xlu1 %v1120_v61  ;;  %869 = vadd.xlane.f32.xlu0 %v789_v62  ;;  %v7295_v61 = vpop.f32.mrf.mxu0 }
 0x14c   :  { %875 = vadd.xlane.f32.xlu1 %v792_v4  ;;  %1264 = vadd.xlane.f32.xlu0 %v1152_v11  ;;  %v8250_v11 = vadd.f32 %v7958_v2, %v483_v50 }
 0x14e   :  { %15914 = vst [vmem:[#allocation49_spill] sm:$0xff] %v8250_v11 }
 0x150   :  { %1270 = vadd.xlane.f32.xlu1 %v1155_v16  ;;  %1206 = vadd.xlane.f32.xlu0 %v1123_v18  ;;  %v15074_v16 = vmov 0   ;;  %v8257_v18 = vadd.f32 %v7295_v61, %v7958_v2 }
 0x151   :  { %7365 = vset.pattern.permute.xlu1 %v15074_v16  ;;  %6260 = vmatprep.subr.bf16.mxu1 %v15074_v16 }
 0x152   :  { %6549 = vmatprep.subr.bf16.mxu0 %v15074_v16  ;;  %15915 = vst [vmem:[#allocation50_spill] sm:$0xff] %v8257_v18  ;;  %v796_v50 = vmul.f32 %v7968_v6, %v8257_v18 }
 0x154   :  { %1204 = vadd.xlane.f32.xlu1 %v1122_v35  ;;  %873 = vadd.xlane.f32.xlu0 %v791_v38  ;;  %v8262_v35 = vadd.f32 %v7958_v2, %v643_v12  ;;  %v1124_v38 = vmul.f32 %v7963_v5, %v8250_v11  ;;  %v1127_v12 = vmul.f32 %v7963_v5, %v8257_v18 }
 0x155   :  { %v8238_v45 = vpop.xlane.xlu1 %1234  ;;  %v840_v48 = vpop.xlane.xlu0 %839 }
 0x156   :  { %967 = vst.msk [vmem:[#allocation3 + $0x8] sm:$0xff] %vm965_vm1, %v840_v48  ;;  %15916 = vst [vmem:[#allocation51_spill] sm:$0xff] %v8262_v35  ;;  %v8270_v48 = vadd.f32 %v7343_v21, %v7958_v2  ;;  %v1156_v61 = vmul.f32 %v7963_v5, %v8262_v35 }
 0x158   :  { %879 = vadd.xlane.f32.xlu1 %v794_v43  ;;  %1268 = vadd.xlane.f32.xlu0 %v1154_v51  ;;  %v793_v43 = vmul.f32 %v7968_v6, %v8250_v11  ;;  %15917 = vst [vmem:[#allocation52_spill] sm:$0xff] %v8270_v48 }
 0x159   :  { %v904_v62 = vpop.xlane.xlu1 %903  ;;  %v8247_v4 = vpop.xlane.xlu0 %1170 }
 0x15a   :  { %999 = vst.msk [vmem:[#allocation3 + $0x108] sm:$0xff] %vm965_vm1, %v904_v62  ;;  %v1159_v62 = vmul.f32 %v7963_v5, %v8270_v48 }
 0x15c   :  { %1274 = vadd.xlane.f32.xlu1 %v1157_v55  ;;  %1210 = vadd.xlane.f32.xlu0 %v1125_v58  ;;  %v493_v58 = vpop.f32.mrf.mxu0 }
 0x15d   :  { %v8259_v25 = vpop.xlane.xlu1 %1168  ;;  %v838_v28 = vpop.xlane.xlu0 %837 }
 0x15e   :  { %966 = vst.msk [vmem:[#allocation3] sm:$0xff] %vm965_vm1, %v838_v28  ;;  %v7298_v21 = vpop.f32.mrf.mxu0 }
 0x160   :  { %1208 = vadd.xlane.f32.xlu1 %v1124_v38  ;;  %877 = vadd.xlane.f32.xlu0 %v793_v43  ;;  %v8286_v43 = vadd.f32 %v7958_v2, %v493_v58 }
 0x161   :  { %v844_v51 = vpop.xlane.xlu1 %843  ;;  %v8274_v55 = vpop.xlane.xlu0 %1232 }
 0x162   :  { %969 = vst.msk [vmem:[#allocation3 + $0x18] sm:$0xff] %vm965_vm1, %v844_v51  ;;  %15918 = vst [vmem:[#allocation53_spill] sm:$0xff] %v8286_v43  ;;  %v653_v51 = vpop.f32.mrf.mxu1  ;;  %v1126_v58 = vmul.f32 %v7963_v5, %v8286_v43 }
 0x163   :  { %v8295_v53 = vadd.f32 %v7958_v2, %v653_v51 }
 0x164   :  { %883 = vadd.xlane.f32.xlu1 %v796_v50  ;;  %1272 = vadd.xlane.f32.xlu0 %v1156_v61  ;;  %v8290_v50 = vadd.f32 %v7298_v21, %v7958_v2  ;;  %v7346_v61 = vpop.f32.mrf.mxu1 }
 0x165   :  { %v8283_v28 = vpop.xlane.xlu1 %1238  ;;  %v902_v38 = vpop.xlane.xlu0 %901  ;;  %15920 = vst [vmem:[#allocation55_spill] sm:$0xff] %v8295_v53  ;;  %v1158_v51 = vmul.f32 %v7963_v5, %v8295_v53 }
 0x166   :  { %998 = vst.msk [vmem:[#allocation3 + $0x100] sm:$0xff] %vm965_vm1, %v902_v38  ;;  %15919 = vst [vmem:[#allocation54_spill] sm:$0xff] %v8290_v50  ;;  %v795_v38 = vmul.f32 %v7968_v6, %v8286_v43 }
 0x168   :  { %1278 = vadd.xlane.f32.xlu1 %v1159_v62  ;;  %1214 = vadd.xlane.f32.xlu0 %v1127_v12  ;;  %v8303_v62 = vadd.f32 %v7346_v61, %v7958_v2  ;;  %v798_v12 = vmul.f32 %v7968_v6, %v8290_v50  ;;  %v1129_v61 = vmul.f32 %v7963_v5, %v8290_v50 }
 0x169   :  { %v908_v16 = vpop.xlane.xlu1 %907  ;;  %v8292_v30 = vpop.xlane.xlu0 %1174 }
 0x16a   :  { %1001 = vst.msk [vmem:[#allocation3 + $0x118] sm:$0xff] %vm965_vm1, %v908_v16  ;;  %15921 = vst [vmem:[#allocation56_spill] sm:$0xff] %v8303_v62  ;;  %v503_v16 = vpop.f32.mrf.mxu0 }
 0x16b   :  { %v8319_v11 = vadd.f32 %v7958_v2, %v503_v16 }
 0x16c   :  { %1212 = vadd.xlane.f32.xlu1 %v1126_v58  ;;  %881 = vadd.xlane.f32.xlu0 %v795_v38  ;;  %v1161_v58 = vmul.f32 %v7963_v5, %v8303_v62  ;;  %v7301_v38 = vpop.f32.mrf.mxu0 }
 0x16d   :  { %v842_v21 = vpop.xlane.xlu1 %841  ;;  %v8307_v56 = vpop.xlane.xlu0 %1236  ;;  %15922 = vst [vmem:[#allocation57_spill] sm:$0xff] %v8319_v11  ;;  %v1128_v16 = vmul.f32 %v7963_v5, %v8319_v11 }
 0x16e   :  { %968 = vst.msk [vmem:[#allocation3 + $0x10] sm:$0xff] %vm965_vm1, %v842_v21  ;;  %v663_v21 = vpop.f32.mrf.mxu1 }
 0x16f   :  { %v8328_v50 = vadd.f32 %v7958_v2, %v663_v21 }
 0x170   :  { %887 = vadd.xlane.f32.xlu1 %v798_v12  ;;  %1276 = vadd.xlane.f32.xlu0 %v1158_v51  ;;  %v8323_v12 = vadd.f32 %v7301_v38, %v7958_v2  ;;  %v7349_v51 = vpop.f32.mrf.mxu1 }
 0x171   :  { %v8316_v23 = vpop.xlane.xlu1 %1172  ;;  %v906_v26 = vpop.xlane.xlu0 %905  ;;  %15924 = vst [vmem:[#allocation59_spill] sm:$0xff] %v8328_v50  ;;  %v1160_v19 = vmul.f32 %v7963_v5, %v8328_v50 }
 0x172   :  { %1000 = vst.msk [vmem:[#allocation3 + $0x110] sm:$0xff] %vm965_vm1, %v906_v26  ;;  %15923 = vst [vmem:[#allocation58_spill] sm:$0xff] %v8323_v12  ;;  %v797_v26 = vmul.f32 %v7968_v6, %v8319_v11 }
 0x174   :  { %1282 = vadd.xlane.f32.xlu1 %v1161_v58  ;;  %1218 = vadd.xlane.f32.xlu0 %v1129_v61  ;;  %v8336_v58 = vadd.f32 %v7349_v51, %v7958_v2  ;;  %v800_v61 = vmul.f32 %v7968_v6, %v8323_v12  ;;  %v1131_v51 = vmul.f32 %v7963_v5, %v8323_v12 }
 0x175   :  { %v848_v18 = vpop.xlane.xlu1 %847  ;;  %v8325_v43 = vpop.xlane.xlu0 %1178 }
 0x176   :  { %971 = vst.msk [vmem:[#allocation3 + $0x28] sm:$0xff] %vm965_vm1, %v848_v18  ;;  %15925 = vst [vmem:[#allocation60_spill] sm:$0xff] %v8336_v58  ;;  %v513_v18 = vpop.f32.mrf.mxu0 }
 0x177   :  { %v8352_v14 = vadd.f32 %v7958_v2, %v513_v18 }
 0x178   :  { %1216 = vadd.xlane.f32.xlu1 %v1128_v16  ;;  %885 = vadd.xlane.f32.xlu0 %v797_v26  ;;  %v1163_v16 = vmul.f32 %v7963_v5, %v8336_v58  ;;  %v7304_v26 = vpop.f32.mrf.mxu0 }
 0x179   :  { %v8340_v38 = vpop.xlane.xlu1 %1242  ;;  %v846_v21 = vpop.xlane.xlu0 %845  ;;  %15926 = vst [vmem:[#allocation61_spill] sm:$0xff] %v8352_v14  ;;  %v1130_v18 = vmul.f32 %v7963_v5, %v8352_v14 }
 0x17a   :  { %970 = vst.msk [vmem:[#allocation3 + $0x20] sm:$0xff] %vm965_vm1, %v846_v21  ;;  %v673_v21 = vpop.f32.mrf.mxu1 }
 0x17b   :  { %v8361_v12 = vadd.f32 %v7958_v2, %v673_v21 }
 0x17c   :  { %891 = vadd.xlane.f32.xlu1 %v800_v61  ;;  %1280 = vadd.xlane.f32.xlu0 %v1160_v19  ;;  %v8356_v19 = vadd.f32 %v7304_v26, %v7958_v2  ;;  %v7352_v61 = vpop.f32.mrf.mxu1 }
 0x17d   :  { %v912_v11 = vpop.xlane.xlu1 %911  ;;  %v8349_v8 = vpop.xlane.xlu0 %1240  ;;  %15928 = vst [vmem:[#allocation63_spill] sm:$0xff] %v8361_v12  ;;  %v1162_v21 = vmul.f32 %v7963_v5, %v8361_v12 }
 0x17e   :  { %1003 = vst.msk [vmem:[#allocation3 + $0x128] sm:$0xff] %vm965_vm1, %v912_v11  ;;  %15927 = vst [vmem:[#allocation62_spill] sm:$0xff] %v8356_v19  ;;  %v799_v11 = vmul.f32 %v7968_v6, %v8352_v14 }
 0x180   :  { %1286 = vadd.xlane.f32.xlu1 %v1163_v16  ;;  %1222 = vadd.xlane.f32.xlu0 %v1131_v51  ;;  %v8369_v16 = vadd.f32 %v7352_v61, %v7958_v2  ;;  %v802_v51 = vmul.f32 %v7968_v6, %v8356_v19  ;;  %v1133_v61 = vmul.f32 %v7963_v5, %v8356_v19 }
 0x181   :  { %v8358_v7 = vpop.xlane.xlu1 %1176  ;;  %v910_v32 = vpop.xlane.xlu0 %909 }
 0x182   :  { %1002 = vst.msk [vmem:[#allocation3 + $0x120] sm:$0xff] %vm965_vm1, %v910_v32  ;;  %15929 = vst [vmem:[#allocation64_spill] sm:$0xff] %v8369_v16  ;;  %v523_v32 = vpop.f32.mrf.mxu0 }
 0x183   :  { %v8385_v17 = vadd.f32 %v7958_v2, %v523_v32 }
 0x184   :  { %1220 = vadd.xlane.f32.xlu1 %v1130_v18  ;;  %889 = vadd.xlane.f32.xlu0 %v799_v11  ;;  %v1165_v18 = vmul.f32 %v7963_v5, %v8369_v16  ;;  %v7307_v11 = vpop.f32.mrf.mxu0 }
 0x185   :  { %v852_v26 = vpop.xlane.xlu1 %851  ;;  %v8373_v22 = vpop.xlane.xlu0 %1182  ;;  %15930 = vst [vmem:[#allocation65_spill] sm:$0xff] %v8385_v17  ;;  %v1132_v32 = vmul.f32 %v7963_v5, %v8385_v17 }
 0x186   :  { %973 = vst.msk [vmem:[#allocation3 + $0x38] sm:$0xff] %vm965_vm1, %v852_v26  ;;  %v683_v26 = vpop.f32.mrf.mxu1  ;;  %v533_v44 = vpop.f32.mrf.mxu0 }
 0x187   :  { %v8394_v19 = vadd.f32 %v7958_v2, %v683_v26  ;;  %v8418_v36 = vadd.f32 %v7958_v2, %v533_v44 }
 0x188   :  { %895 = vadd.xlane.f32.xlu1 %v802_v51  ;;  %1284 = vadd.xlane.f32.xlu0 %v1162_v21  ;;  %v8389_v51 = vadd.f32 %v7307_v11, %v7958_v2  ;;  %v7355_v21 = vpop.f32.mrf.mxu1 }
 0x189   :  { %v8382_v14 = vpop.xlane.xlu1 %1246  ;;  %v850_v31 = vpop.xlane.xlu0 %849  ;;  %15932 = vst [vmem:[#allocation67_spill] sm:$0xff] %v8394_v19  ;;  %15934 = vst [vmem:[#allocation69_spill] sm:$0xff] %v8418_v36  ;;  %v803_v44 = vmul.f32 %v7968_v6, %v8418_v36 }
 0x18a   :  { %972 = vst.msk [vmem:[#allocation3 + $0x30] sm:$0xff] %vm965_vm1, %v850_v31  ;;  %15931 = vst [vmem:[#allocation66_spill] sm:$0xff] %v8389_v51  ;;  %v801_v31 = vmul.f32 %v7968_v6, %v8385_v17 }
 0x18c   :  { %1290 = vadd.xlane.f32.xlu1 %v1165_v18  ;;  %1226 = vadd.xlane.f32.xlu0 %v1133_v61  ;;  %v8402_v18 = vadd.f32 %v7355_v21, %v7958_v2  ;;  %v804_v61 = vmul.f32 %v7968_v6, %v8389_v51  ;;  %v1135_v21 = vmul.f32 %v7963_v5, %v8389_v51 }
 0x18d   :  { %v916_v47 = vpop.xlane.xlu1 %915  ;;  %v8391_v41 = vpop.xlane.xlu0 %1244  ;;  %v1134_v51 = vmul.f32 %v7963_v5, %v8418_v36 }
 0x18e   :  { %1005 = vst.msk [vmem:[#allocation3 + $0x138] sm:$0xff] %vm965_vm1, %v916_v47  ;;  %15933 = vst [vmem:[#allocation68_spill] sm:$0xff] %v8402_v18  ;;  %v1164_v47 = vmul.f32 %v7963_v5, %v8394_v19 }
 0x190   :  { %1224 = vadd.xlane.f32.xlu1 %v1132_v32  ;;  %893 = vadd.xlane.f32.xlu0 %v801_v31  ;;  %v1167_v32 = vmul.f32 %v7963_v5, %v8402_v18 }
 0x191   :  { %v8406_v11 = vpop.xlane.xlu1 %1180  ;;  %v914_v26 = vpop.xlane.xlu0 %913 }
 0x192   :  { %1004 = vst.msk [vmem:[#allocation3 + $0x130] sm:$0xff] %vm965_vm1, %v914_v26  ;;  %v693_v26 = vpop.f32.mrf.mxu1 }
 0x194   :  { %899 = vadd.xlane.f32.xlu1 %v804_v61  ;;  %1288 = vadd.xlane.f32.xlu0 %v1164_v47  ;;  %v8424_v47 = vadd.f32 %v7958_v2, %v693_v26 }
 0x195   :  { %v856_v31 = vpop.xlane.xlu1 %855  ;;  %v8415_v17 = vpop.xlane.xlu0 %1186 }
 0x196   :  { %975 = vst.msk [vmem:[#allocation3 + $0x48] sm:$0xff] %vm965_vm1, %v856_v31  ;;  %15935 = vst [vmem:[#allocation70_spill] sm:$0xff] %v8424_v47  ;;  %v1166_v2 = vmul.f32 %v7963_v5, %v8424_v47 }
 0x198   :  { %1294 = vadd.xlane.f32.xlu1 %v1167_v32  ;;  %1230 = vadd.xlane.f32.xlu0 %v1135_v21  ;;  %v816_v32 = vmul.f32 %v7968_v6, %v8114_v37 }
 0x199   :  { %v8421_v63 = vpop.xlane.xlu1 %1250  ;;  %v854_v61 = vpop.xlane.xlu0 %853 }
 0x19a   :  { %974 = vst.msk [vmem:[#allocation3 + $0x40] sm:$0xff] %vm965_vm1, %v854_v61 }
 0x19c   :  { %1228 = vadd.xlane.f32.xlu1 %v1134_v51  ;;  %897 = vadd.xlane.f32.xlu0 %v803_v44  ;;  %v818_v51 = vmul.f32 %v7968_v6, %v8138_v54 }
 0x19d   :  { %v920_v31 = vpop.xlane.xlu1 %919  ;;  %v8431_v57 = vpop.xlane.xlu0 %1248 }
 0x19e   :  { %1007 = vst.msk [vmem:[#allocation3 + $0x148] sm:$0xff] %vm965_vm1, %v920_v31  ;;  %v820_v31 = vmul.f32 %v7968_v6, %v8162_v13 }
 0x1a0   :  { %923 = vadd.xlane.f32.xlu1 %v816_v32  ;;  %1292 = vadd.xlane.f32.xlu0 %v1166_v2  ;;  %v822_v2 = vmul.f32 %v7968_v6, %v8186_v39  ;;  %v829_v39 = vmul.f32 %v7968_v6, %v8328_v50 }
 0x1a1   :  { %v8438_v21 = vpop.xlane.xlu1 %1184  ;;  %v918_v26 = vpop.xlane.xlu0 %917 }
 0x1a2   :  { %1006 = vst.msk [vmem:[#allocation3 + $0x140] sm:$0xff] %vm965_vm1, %v918_v26 }
 0x1a4   :  { %927 = vadd.xlane.f32.xlu1 %v818_v51 }
 0x1a5   :  { %v860_v61 = vpop.xlane.xlu1 %859  ;;  %v8443_v44 = vpop.xlane.xlu0 %1190 }
 0x1a6   :  { %977 = vst.msk [vmem:[#allocation3 + $0x58] sm:$0xff] %vm965_vm1, %v860_v61  ;;  %v824_v61 = vmul.f32 %v7968_v6, %v8210_v1 }
 0x1a8   :  { %931 = vadd.xlane.f32.xlu1 %v820_v31  ;;  %v826_v31 = vmul.f32 %v7968_v6, %v8234_v42 }
 0x1a9   :  { %v8448_v5 = vpop.xlane.xlu1 %1254  ;;  %v858_v32 = vpop.xlane.xlu0 %857 }
 0x1aa   :  { %976 = vst.msk [vmem:[#allocation3 + $0x50] sm:$0xff] %vm965_vm1, %v858_v32 }
 0x1ac   :  { %935 = vadd.xlane.f32.xlu1 %v822_v2 }
 0x1ad   :  { %v8453_v26 = vpop.xlane.xlu1 %1188  ;;  %v8455_v51 = vpop.xlane.xlu0 %1252 }
 0x1b0   :  { %939 = vadd.xlane.f32.xlu1 %v824_v61 }
 0x1b1   :  { %v864_v36 = vpop.xlane.xlu1 %863  ;;  %v922_v60 = vpop.xlane.xlu0 %921 }
 0x1b2   :  { %979 = vst.msk [vmem:[#allocation3 + $0x68] sm:$0xff] %vm965_vm1, %v864_v36  ;;  %1008 = vst.msk [vmem:[#allocation3 + $0x150] sm:$0xff] %vm965_vm1, %v922_v60  ;;  %v830_v36 = vmul.f32 %v7968_v6, %v8303_v62 }
 0x1b4   :  { %943 = vadd.xlane.f32.xlu1 %v826_v31  ;;  %v832_v31 = vmul.f32 %v7968_v6, %v8336_v58 }
 0x1b5   :  { %v8463_v32 = vpop.xlane.xlu1 %1258  ;;  %v8465_v2 = vpop.xlane.xlu0 %1194 }
 0x1b8   :  { %949 = vadd.xlane.f32.xlu1 %v829_v39 }
 0x1b9   :  { %v8469_v1 = vpop.xlane.xlu1 %1192  ;;  %v862_v61 = vpop.xlane.xlu0 %861 }
 0x1ba   :  { %978 = vst.msk [vmem:[#allocation3 + $0x60] sm:$0xff] %vm965_vm1, %v862_v61  ;;  %v833_v61 = vmul.f32 %v7968_v6, %v8394_v19 }
 0x1bc   :  { %951 = vadd.xlane.f32.xlu1 %v830_v36 }
 0x1bd   :  { %v868_v60 = vpop.xlane.xlu1 %867  ;;  %v8474_v42 = vpop.xlane.xlu0 %1256 }
 0x1be   :  { %981 = vst.msk [vmem:[#allocation3 + $0x78] sm:$0xff] %vm965_vm1, %v868_v60  ;;  %v835_v60 = vmul.f32 %v7968_v6, %v8424_v47 }
 0x1c0   :  { %955 = vadd.xlane.f32.xlu1 %v832_v31  ;;  %v836_v31 = vmul.f32 %v7968_v6, %v8402_v18 }
 0x1c1   :  { %v8479_v50 = vpop.xlane.xlu1 %1262  ;;  %v8481_v39 = vpop.xlane.xlu0 %1198 }
 0x1c4   :  { %957 = vadd.xlane.f32.xlu1 %v833_v61 }
 0x1c5   :  { %v8485_v52 = vpop.xlane.xlu1 %1196  ;;  %v866_v36 = vpop.xlane.xlu0 %865 }
 0x1c6   :  { %980 = vst.msk [vmem:[#allocation3 + $0x70] sm:$0xff] %vm965_vm1, %v866_v36 }
 0x1c8   :  { %961 = vadd.xlane.f32.xlu1 %v835_v60 }
 0x1c9   :  { %v872_v62 = vpop.xlane.xlu1 %871  ;;  %v8490_v58 = vpop.xlane.xlu0 %1260 }
 0x1ca   :  { %983 = vst.msk [vmem:[#allocation3 + $0x88] sm:$0xff] %vm965_vm1, %v872_v62 }
 0x1cc   :  { %963 = vadd.xlane.f32.xlu1 %v836_v31  ;;  %v1424_v31 = vld [vmem:[#allocation3] sm:$0xff] }
 0x1cd   :  { %v8495_v19 = vpop.xlane.xlu1 %1266  ;;  %1360 = vxpose.xlu0.b32.start [1/16] (narrow) %v8274_v55, 8  ;;  %v8498_v61 = vpop.xlane.xlu0 %1202 }
 0x1d1   :  { %v8500_v36 = vpop.xlane.xlu1 %1200  ;;  %1361 = vxpose.xlu0.b32.cont [2/16] (narrow) %v8238_v45, 8  ;;  %v870_v60 = vpop.xlane.xlu0 %869 }
 0x1d2   :  { %982 = vst.msk [vmem:[#allocation3 + $0x80] sm:$0xff] %vm965_vm1, %v870_v60 }
 0x1d5   :  { %v876_v47 = vpop.xlane.xlu1 %875  ;;  %1362 = vxpose.xlu0.b32.cont [3/16] (narrow) %v8307_v56, 8  ;;  %v8505_v62 = vpop.xlane.xlu0 %1264  ;;  %v1427_v56 = vld [vmem:[#allocation3 + $0x18] sm:$0xff] }
 0x1d6   :  { %985 = vst.msk [vmem:[#allocation3 + $0x98] sm:$0xff] %vm965_vm1, %v876_v47 }
 0x1d9   :  { %v8508_v6 = vpop.xlane.xlu1 %1270  ;;  %1363 = vxpose.xlu0.b32.cont [4/16] (narrow) %v8283_v28, 8  ;;  %v8511_v55 = vpop.xlane.xlu0 %1206  ;;  %v1429_v28 = vld [vmem:[#allocation3 + $0x28] sm:$0xff] }
 0x1dd   :  { %v8513_v18 = vpop.xlane.xlu1 %1204  ;;  %1490 = vperm.xlu1 %7365, %v1424_v31   ;;  %1364 = vxpose.xlu0.b32.cont [5/16] (narrow) %v8349_v8, 8  ;;  %v874_v45 = vpop.xlane.xlu0 %873  ;;  %v1431_v8 = vld [vmem:[#allocation3 + $0x38] sm:$0xff] }
 0x1de   :  { %984 = vst.msk [vmem:[#allocation3 + $0x90] sm:$0xff] %vm965_vm1, %v874_v45 }
 0x1e1   :  { %v880_v60 = vpop.xlane.xlu1 %879  ;;  %1505 = vperm.xlu1 %7365, %v1427_v56   ;;  %1365 = vxpose.xlu0.b32.cont [6/16] (narrow) %v8340_v38, 8  ;;  %v8518_v47 = vpop.xlane.xlu0 %1268  ;;  %v1433_v38 = vld [vmem:[#allocation3 + $0x48] sm:$0xff] }
 0x1e2   :  { %987 = vst.msk [vmem:[#allocation3 + $0xa8] sm:$0xff] %vm965_vm1, %v880_v60 }
 0x1e5   :  { %v8521_v24 = vpop.xlane.xlu1 %1274  ;;  %1515 = vperm.xlu1 %7365, %v1429_v28   ;;  %1366 = vxpose.xlu0.b32.cont [7/16] (narrow) %v8391_v41, 8  ;;  %v8524_v31 = vpop.xlane.xlu0 %1210  ;;  %v1435_v41 = vld [vmem:[#allocation3 + $0x58] sm:$0xff] }
 0x1e9   :  { %v8526_v15 = vpop.xlane.xlu1 %1208  ;;  %1525 = vperm.xlu1 %7365, %v1431_v8   ;;  %1367 = vxpose.xlu0.b32.cont [8/16] (narrow) %v8382_v14, 8  ;;  %v878_v45 = vpop.xlane.xlu0 %877  ;;  %v1437_v14 = vld [vmem:[#allocation3 + $0x68] sm:$0xff] }
 0x1ea   :  { %986 = vst.msk [vmem:[#allocation3 + $0xa0] sm:$0xff] %vm965_vm1, %v878_v45 }
 0x1ed   :  { %v884_v56 = vpop.xlane.xlu1 %883  ;;  %1535 = vperm.xlu1 %7365, %v1433_v38   ;;  %1368 = vxpose.xlu0.b32.cont [9/16] (narrow) %v8431_v57, 8  ;;  %v8531_v60 = vpop.xlane.xlu0 %1272  ;;  %v1439_v57 = vld [vmem:[#allocation3 + $0x78] sm:$0xff] }
 0x1ee   :  { %989 = vst.msk [vmem:[#allocation3 + $0xb8] sm:$0xff] %vm965_vm1, %v884_v56 }
 0x1f1   :  { %v8534_v28 = vpop.xlane.xlu1 %1278  ;;  %1545 = vperm.xlu1 %7365, %v1435_v41   ;;  %1369 = vxpose.xlu0.b32.cont [10/16] (narrow) %v8421_v63, 8  ;;  %v8537_v8 = vpop.xlane.xlu0 %1214  ;;  %v1440_v63 = vld [vmem:[#allocation3 + $0x80] sm:$0xff] }
 0x1f5   :  { %v1213_v20 = vpop.xlane.xlu1 %1212  ;;  %1555 = vperm.xlu1 %7365, %v1437_v14   ;;  %1370 = vxpose.xlu0.b32.cont [11/16] (narrow) %v8455_v51, 8  ;;  %v882_v45 = vpop.xlane.xlu0 %881  ;;  %v1442_v51 = vld [vmem:[#allocation3 + $0x90] sm:$0xff] }
 0x1f6   :  { %988 = vst.msk [vmem:[#allocation3 + $0xb0] sm:$0xff] %vm965_vm1, %v882_v45 }
 0x1f9   :  { %v888_v38 = vpop.xlane.xlu1 %887  ;;  %1565 = vperm.xlu1 %7365, %v1439_v57   ;;  %1371 = vxpose.xlu0.b32.cont [12/16] (narrow) %v8448_v5, 8  ;;  %v8542_v56 = vpop.xlane.xlu0 %1276  ;;  %v1443_v5 = vld [vmem:[#allocation3 + $0x98] sm:$0xff] }
 0x1fa   :  { %991 = vst.msk [vmem:[#allocation3 + $0xc8] sm:$0xff] %vm965_vm1, %v888_v38 }
 0x1fd   :  { %v8545_v41 = vpop.xlane.xlu1 %1282  ;;  %1372 = vxpose.xlu0.b32.cont [13/16] (narrow) %v8474_v42, 8  ;;  %1570 = vperm.xlu1 %7365, %v1440_v63   ;;  %v1219_v14 = vpop.xlane.xlu0 %1218  ;;  %v1445_v42 = vld [vmem:[#allocation3 + $0xa8] sm:$0xff] }
 0x201   :  { %v1217_v9 = vpop.xlane.xlu1 %1216  ;;  %1373 = vxpose.xlu0.b32.cont [14/16] (narrow) %v8463_v32, 8  ;;  %1580 = vperm.xlu1 %7365, %v1442_v51   ;;  %v886_v45 = vpop.xlane.xlu0 %885  ;;  %v1446_v51 = vld [vmem:[#allocation3 + $0xb0] sm:$0xff] }
 0x202   :  { %990 = vst.msk [vmem:[#allocation3 + $0xc0] sm:$0xff] %vm965_vm1, %v886_v45 }
 0x205   :  { %v892_v57 = vpop.xlane.xlu1 %891  ;;  %1374 = vxpose.xlu0.b32.cont [15/16] (narrow) %v8490_v58, 8  ;;  %1585 = vperm.xlu1 %7365, %v1443_v5   ;;  %v8551_v38 = vpop.xlane.xlu0 %1280 }
 0x206   :  { %993 = vst.msk [vmem:[#allocation3 + $0xd8] sm:$0xff] %vm965_vm1, %v892_v57 }
 0x209   :  { %v8554_v63 = vpop.xlane.xlu1 %1286  ;;  %1375 = vxpose.xlu0.b32.end [16/16] (narrow) %v8479_v50, 8  ;;  %1595 = vperm.xlu1 %7365, %v1445_v42   ;;  %v1223_v32 = vpop.xlane.xlu0 %1222  ;;  %v1448_v58 = vld [vmem:[#allocation3 + $0xc0] sm:$0xff] }
 0x20d   :  { %v1221_v46 = vpop.xlane.xlu1 %1220  ;;  %1328 = vxpose.xlu0.b32.start [1/16] (narrow) %v8500_v36, 8  ;;  %1600 = vperm.xlu1 %7365, %v1446_v51   ;;  %v890_v45 = vpop.xlane.xlu0 %889 }
 0x20e   :  { %992 = vst.msk [vmem:[#allocation3 + $0xd0] sm:$0xff] %vm965_vm1, %v890_v45 }
 0x211   :  { %v896_v5 = vpop.xlane.xlu1 %895  ;;  %1329 = vxpose.xlu0.b32.cont [2/16] (narrow) %v8498_v61, 8  ;;  %1610 = vperm.xlu1 %7365, %v1448_v58   ;;  %v8560_v57 = vpop.xlane.xlu0 %1284 }
 0x212   :  { %995 = vst.msk [vmem:[#allocation3 + $0xe8] sm:$0xff] %vm965_vm1, %v896_v5 }
 0x215   :  { %v8563_v50 = vpop.xlane.xlu1 %1290  ;;  %1330 = vxpose.xlu0.b32.cont [3/16] (narrow) %v8513_v18, 8  ;;  %v1227_v42 = vpop.xlane.xlu0 %1226 }
 0x216   :  { %15936 = vst [vmem:[#allocation71_spill] sm:$0xff] %v8563_v50 }
 0x219   :  { %v1225_v37 = vpop.xlane.xlu1 %1224  ;;  %1331 = vxpose.xlu0.b32.cont [4/16] (narrow) %v8511_v55, 8  ;;  %v894_v36 = vpop.xlane.xlu0 %893 }
 0x21a   :  { %994 = vst.msk [vmem:[#allocation3 + $0xe0] sm:$0xff] %vm965_vm1, %v894_v36 }
 0x21d   :  { %v900_v51 = vpop.xlane.xlu1 %899  ;;  %1332 = vxpose.xlu0.b32.cont [5/16] (narrow) %v8526_v15, 8  ;;  %v8569_v61 = vpop.xlane.xlu0 %1288 }
 0x21e   :  { %15937 = vst [vmem:[#allocation72_spill] sm:$0xff] %v8569_v61  ;;  %997 = vst.msk [vmem:[#allocation3 + $0xf8] sm:$0xff] %vm965_vm1, %v900_v51 }
 0x221   :  { %v8572_v45 = vpop.xlane.xlu1 %1294  ;;  %1333 = vxpose.xlu0.b32.cont [6/16] (narrow) %v8524_v31, 8  ;;  %v1231_v58 = vpop.xlane.xlu0 %1230 }
 0x222   :  { %15938 = vst [vmem:[#allocation73_spill] sm:$0xff] %v8572_v45 }
 0x225   :  { %v1229_v18 = vpop.xlane.xlu1 %1228  ;;  %1334 = vxpose.xlu0.b32.cont [7/16] (narrow) %v1213_v20, 8  ;;  %v898_v5 = vpop.xlane.xlu0 %897 }
 0x226   :  { %996 = vst.msk [vmem:[#allocation3 + $0xf0] sm:$0xff] %vm965_vm1, %v898_v5 }
 0x229   :  { %v924_v55 = vpop.xlane.xlu1 %923  ;;  %1335 = vxpose.xlu0.b32.cont [8/16] (narrow) %v8537_v8, 8 }
 0x22a   :  { %1009 = vst.msk [vmem:[#allocation3 + $0x158] sm:$0xff] %vm965_vm1, %v924_v55 }
 0x22d   :  { %v928_v15 = vpop.xlane.xlu1 %927  ;;  %1336 = vxpose.xlu0.b32.cont [9/16] (narrow) %v1217_v9, 8 }
 0x22e   :  { %1011 = vst.msk [vmem:[#allocation3 + $0x168] sm:$0xff] %vm965_vm1, %v928_v15 }
 0x231   :  { %v932_v36 = vpop.xlane.xlu1 %931  ;;  %1337 = vxpose.xlu0.b32.cont [10/16] (narrow) %v1219_v14, 8 }
 0x232   :  { %1013 = vst.msk [vmem:[#allocation3 + $0x178] sm:$0xff] %vm965_vm1, %v932_v36 }
 0x235   :  { %v936_v31 = vpop.xlane.xlu1 %935  ;;  %1338 = vxpose.xlu0.b32.cont [11/16] (narrow) %v1221_v46, 8 }
 0x236   :  { %1015 = vst.msk [vmem:[#allocation3 + $0x188] sm:$0xff] %vm965_vm1, %v936_v31  ;;  %v2597_v31 = vld [vmem:[%s15072_s5 + $0x28] sm:$0xff] }
 0x237   :  { %vm2661_vm7 = vnez %v2597_v31 }
 0x239   :  { %v940_v20 = vpop.xlane.xlu1 %939  ;;  %1339 = vxpose.xlu0.b32.cont [12/16] (narrow) %v1223_v32, 8 }
 0x23a   :  { %1017 = vst.msk [vmem:[#allocation3 + $0x198] sm:$0xff] %vm965_vm1, %v940_v20  ;;  %1296 = vxpose.xlu1.b32.start [1/16] (narrow) %v8259_v25, 8  ;;  %v2594_v25 = vld [vmem:[%s15072_s5 + $0x10] sm:$0xff]  ;;  %v2599_v20 = vld [vmem:[%s15072_s5 + $0x38] sm:$0xff] }
 0x23b   :  { %vm2658_vm4 = vnez %v2594_v25  ;;  %vm2663_vm9 = vnez %v2599_v20  ;;  %v2601_v25 = vld [vmem:[%s15072_s5 + $0x48] sm:$0xff] }
 0x23c   :  { %vm2665_vm11 = vnez %v2601_v25 }
 0x23d   :  { %v944_v8 = vpop.xlane.xlu1 %943  ;;  %1340 = vxpose.xlu0.b32.cont [13/16] (narrow) %v1225_v37, 8 }
 0x23e   :  { %1019 = vst.msk [vmem:[#allocation3 + $0x1a8] sm:$0xff] %vm965_vm1, %v944_v8  ;;  %1297 = vxpose.xlu1.b32.cont [2/16] (narrow) %v8247_v4, 8 }
 0x241   :  { %v950_v9 = vpop.xlane.xlu1 %949  ;;  %1341 = vxpose.xlu0.b32.cont [14/16] (narrow) %v1227_v42, 8 }
 0x242   :  { %1022 = vst.msk [vmem:[#allocation3 + $0x1c0] sm:$0xff] %vm965_vm1, %v950_v9  ;;  %1298 = vxpose.xlu1.b32.cont [3/16] (narrow) %v8316_v23, 8 }
 0x245   :  { %v952_v46 = vpop.xlane.xlu1 %951  ;;  %1342 = vxpose.xlu0.b32.cont [15/16] (narrow) %v1229_v18, 8 }
 0x246   :  { %1023 = vst.msk [vmem:[#allocation3 + $0x1c8] sm:$0xff] %vm965_vm1, %v952_v46  ;;  %1299 = vxpose.xlu1.b32.cont [4/16] (narrow) %v8292_v30, 8  ;;  %v2592_v30 = vld [vmem:[%s15072_s5] sm:$0xff] }
 0x247   :  { %vm2656_vm2 = vnez %v2592_v30 }
 0x249   :  { %v956_v14 = vpop.xlane.xlu1 %955  ;;  %1343 = vxpose.xlu0.b32.end [16/16] (narrow) %v1231_v58, 8 }
 0x24a   :  { %1025 = vst.msk [vmem:[#allocation3 + $0x1d8] sm:$0xff] %vm965_vm1, %v956_v14  ;;  %1300 = vxpose.xlu1.b32.cont [5/16] (narrow) %v8358_v7, 8  ;;  %v2593_v7 = vld [vmem:[%s15072_s5 + $0x8] sm:$0xff] }
 0x24b   :  { %vm2657_vm3 = vnez %v2593_v7 }
 0x24d   :  { %v958_v37 = vpop.xlane.xlu1 %957 }
 0x24e   :  { %1026 = vst.msk [vmem:[#allocation3 + $0x1e0] sm:$0xff] %vm965_vm1, %v958_v37  ;;  %1301 = vxpose.xlu1.b32.cont [6/16] (narrow) %v8325_v43, 8  ;;  %v2595_v43 = vld [vmem:[%s15072_s5 + $0x18] sm:$0xff] }
 0x24f   :  { %vm2659_vm5 = vnez %v2595_v43  ;;  %v2602_v43 = vld [vmem:[%s15072_s5 + $0x50] sm:$0xff] }
 0x250   :  { %vm2666_vm12 = vnez %v2602_v43 }
 0x251   :  { %v962_v4 = vpop.xlane.xlu1 %961 }
 0x252   :  { %1028 = vst.msk [vmem:[#allocation3 + $0x1f0] sm:$0xff] %vm965_vm1, %v962_v4  ;;  %1302 = vxpose.xlu1.b32.cont [7/16] (narrow) %v8406_v11, 8 }
 0x255   :  { %v964_v23 = vpop.xlane.xlu1 %963 }
 0x256   :  { %1029 = vst.msk [vmem:[#allocation3 + $0x1f8] sm:$0xff] %vm965_vm1, %v964_v23  ;;  %1303 = vxpose.xlu1.b32.cont [8/16] (narrow) %v8373_v22, 8  ;;  %v15940_v22 = vmov 0  }
 0x257   :  { %v8613_v32 = vsel %vm2656_vm2, 16843009, %v15940_v22  ;;  %v8616_v42 = vsel %vm2657_vm3, 16843009, %v15940_v22  ;;  %v8619_v51 = vsel %vm2658_vm4, 16843009, %v15940_v22 }
 0x258   :  { %15941 = vst [vmem:[#allocation75_spill] sm:$0xff] %v8613_v32  ;;  %15942 = vst [vmem:[#allocation76_spill] sm:$0xff] %v8616_v42  ;;  %v8622_v58 = vsel %vm2659_vm5, 16843009, %v15940_v22  ;;  %v2784_v5 = vunpack.c.0.s8 %v8613_v32  ;;  %v2785_v55 = vunpack.c.0.s8 %v8616_v42  ;;  %v2786_v15 = vunpack.c.0.s8 %v8619_v51 }
 0x259   :  { %v8609_v11 = vpop.permute.xlu1 %1490  ;;  %15943 = vst [vmem:[#allocation77_spill] sm:$0xff] %v8619_v51  ;;  %15944 = vst [vmem:[#allocation78_spill] sm:$0xff] %v8622_v58  ;;  %v2787_v36 = vunpack.c.0.s8 %v8622_v58  ;;  %v8652_v4 = vsel %vm2661_vm7, 16843009, %v15940_v22  ;;  %v2796_v30 = vunpack.c.3.s8 %v8613_v32  ;;  %v8663_v7 = vsel %vm2663_vm9, 16843009, %v15940_v22 }
 0x25a   :  { %15939 = vst [vmem:[#allocation74_spill] sm:$0xff] %v8609_v11  ;;  %1304 = vxpose.xlu1.b32.cont [9/16] (narrow) %v8438_v21, 8  ;;  %v2596_v21 = vld [vmem:[%s15072_s5 + $0x20] sm:$0xff]  ;;  %v3040_v9 = vpack.c.b16 %v2785_v55, %v2784_v5  ;;  %15949 = vst [vmem:[#allocation83_spill] sm:$0xff] %v8652_v4  ;;  %v2798_v5 = vunpack.c.3.s8 %v8619_v51  ;;  %v2799_v55 = vunpack.c.3.s8 %v8622_v58  ;;  %v2805_v31 = vunpack.c.1.s8 %v8652_v4 }
 0x25b   :  { %vm2660_vm6 = vnez %v2596_v21  ;;  %v3041_v46 = vpack.c.b16 %v2787_v36, %v2786_v15  ;;  %15951 = vst [vmem:[#allocation85_spill] sm:$0xff] %v8663_v7  ;;  %v2603_v15 = vld [vmem:[%s15072_s5 + $0x58] sm:$0xff]  ;;  %v2813_v40 = vunpack.c.3.s8 %v8652_v4  ;;  %v2815_v54 = vunpack.c.3.s8 %v8663_v7  ;;  %v2605_v4 = vld [vmem:[%s15072_s5 + $0x68] sm:$0xff] }
 0x25c   :  { %v8647_v14 = vsel %vm2660_vm6, 16843009, %v15940_v22  ;;  %vm2667_vm13 = vnez %v2603_v15  ;;  %v1808_v15 = vlaneseq  ;;  %v8707_v49 = vsel %vm2665_vm11, 16843009, %v15940_v22 }
 0x25d   :  { %v8624_v18 = vpop.permute.xlu1 %1505  ;;  %15947 = vst [vmem:[#allocation81_spill] sm:$0xff] %v8647_v14  ;;  %v3042_v21 = vpack.c.b8 %v3041_v46, %v3040_v9  ;;  %v2804_v36 = vunpack.c.1.s8 %v8647_v14  ;;  %v2807_v9 = vunpack.c.1.s8 %v8663_v7  ;;  %v2812_v46 = vunpack.c.3.s8 %v8647_v14  ;;  %15954 = vst [vmem:[#allocation88_spill] sm:$0xff] %v8707_v49 }
 0x25e   :  { %15945 = vst [vmem:[#allocation79_spill] sm:$0xff] %v8624_v18  ;;  %1305 = vxpose.xlu1.b32.cont [10/16] (narrow) %v8415_v17, 8  ;;  %v2598_v17 = vld [vmem:[%s15072_s5 + $0x30] sm:$0xff]  ;;  %v8710_v13 = vsel %vm2666_vm12, 16843009, %v15940_v22  ;;  %v3050_v7 = vpack.c.b16 %v2799_v55, %v2798_v5  ;;  %vm2669_vm0 = vnez %v2605_v4 }
 0x25f   :  { %vm2662_vm8 = vnez %v2598_v17  ;;  %15955 = vst [vmem:[#allocation89_spill] sm:$0xff] %v8710_v13  ;;  %vm8721_vm14 = vnez %v3042_v21  ;;  %v2607_v21 = vld [vmem:[%s15072_s5 + $0x78] sm:$0xff]  ;;  %v3055_v14 = vpack.c.b16 %v2805_v31, %v2804_v36  ;;  %v2822_v58 = vunpack.c.1.s8 %v8710_v13 }
 0x260   :  { %v8655_v23 = vsel %vm2662_vm8, 16843009, %v15940_v22  ;;  %vm2671_vm3 = vnez %v2607_v21 }
 0x261   :  { %v8643_v8 = vpop.permute.xlu1 %1515  ;;  %15950 = vst [vmem:[#allocation84_spill] sm:$0xff] %v8655_v23  ;;  %v2806_v17 = vunpack.c.1.s8 %v8655_v23  ;;  %v2814_v29 = vunpack.c.3.s8 %v8655_v23  ;;  %v8726_v23 = vsel %vm2667_vm13, 16843009, %v15940_v22 }
 0x262   :  { %15946 = vst [vmem:[#allocation80_spill] sm:$0xff] %v8643_v8  ;;  %1306 = vxpose.xlu1.b32.cont [11/16] (narrow) %v8453_v26, 8  ;;  %v2600_v26 = vld [vmem:[%s15072_s5 + $0x40] sm:$0xff]  ;;  %15959 = vst [vmem:[#allocation91_spill] sm:$0xff] %v8726_v23  ;;  %v2823_v51 = vunpack.c.1.s8 %v8726_v23 }
 0x263   :  { %vm2664_vm10 = vnez %v2600_v26  ;;  %v8694_v26 = vld [vmem:[%s15070_s3] ss:$0 sm:$0xff]  ;;  %v3062_v5 = vpack.c.b16 %v2815_v54, %v2814_v29  ;;  %v1809_v54 = vshrl.u32 %v1808_v15, 7 }
 0x264   :  { %v8689_v0 = vsel %vm2664_vm10, 16843009, %v15940_v22  ;;  %v817_v25 = vmul.f32 %v8694_v26, %v8155_v10  ;;  %v8704_v43 = vmul.f32 %v8694_v26, %v8203_v59  ;;  %v2604_v10 = vld [vmem:[%s15072_s5 + $0x60] sm:$0xff]  ;;  %v8745_v36 = vmul.f32 %v8694_v26, %v8262_v35 }
 0x265   :  { %v8649_v37 = vpop.permute.xlu1 %1525  ;;  %15953 = vst [vmem:[#allocation87_spill] sm:$0xff] %v8689_v0  ;;  %v2820_v55 = vunpack.c.1.s8 %v8689_v0  ;;  %vm2668_vm15 = vnez %v2604_v10  ;;  %v8749_v29 = vmul.f32 %v8694_v26, %v8295_v53  ;;  %v8759_v10 = vsel %vm8721_vm14, 16843009, %v15940_v22 }
 0x266   :  { %15948 = vst [vmem:[#allocation82_spill] sm:$0xff] %v8649_v37  ;;  %1307 = vxpose.xlu1.b32.cont [12/16] (narrow) %v8443_v44, 8  ;;  %v2797_v44 = vunpack.c.3.s8 %v8616_v42  ;;  %15960 = vst [vmem:[#allocation92_spill] sm:$0xff] %v8759_v10  ;;  %v8768_v4 = vmul.f32 %v8694_v26, %v8361_v12  ;;  %v8777_v59 = vsel %vm2671_vm3, 16843009, %v15940_v22  ;;  %v3068_v35 = vpack.c.b16 %v2823_v51, %v2822_v58  ;;  %v2608_v51 = vld [vmem:[%s15072_s5 + $0x80] sm:$0xff] }
 0x267   :  { %15964 = vst [vmem:[#allocation96_spill] sm:$0xff] %v8777_v59  ;;  %v2829_v53 = vunpack.c.3.s8 %v8707_v49  ;;  %v2830_v12 = vunpack.c.3.s8 %v8710_v13  ;;  %v2609_v58 = vld [vmem:[%s15072_s5 + $0x88] sm:$0xff]  ;;  %vm2672_vm7 = vnez %v2608_v51 }
 0x268   :  { %v3049_v27 = vpack.c.b16 %v2797_v44, %v2796_v30  ;;  %v3056_v30 = vpack.c.b16 %v2807_v9, %v2806_v17  ;;  %v3061_v44 = vpack.c.b16 %v2813_v40, %v2812_v46  ;;  %v8753_v40 = vmul.f32 %v8694_v26, %v8270_v48 }
 0x269   :  { %v8680_v20 = vpop.permute.xlu1 %1535  ;;  %v8771_v17 = vsel %vm2669_vm0, 16843009, %v15940_v22  ;;  %v2828_v48 = vunpack.c.3.s8 %v8689_v0  ;;  %vm2673_vm8 = vnez %v2609_v58 }
 0x26a   :  { %15952 = vst [vmem:[#allocation86_spill] sm:$0xff] %v8680_v20  ;;  %1308 = vxpose.xlu1.b32.cont [13/16] (narrow) %v8469_v1, 8  ;;  %v8700_v1 = vmul.f32 %v8694_v26, %v8179_v34  ;;  %v8719_v34 = vmul.f32 %v8694_v26, %v8227_v33  ;;  %v2606_v33 = vld [vmem:[%s15072_s5 + $0x70] sm:$0xff]  ;;  %v3051_v31 = vpack.c.b8 %v3050_v7, %v3049_v27  ;;  %15962 = vst [vmem:[#allocation94_spill] sm:$0xff] %v8771_v17 }
 0x26b   :  { %vm2670_vm2 = vnez %v2606_v33  ;;  %v3057_v46 = vpack.c.b8 %v3056_v30, %v3055_v14  ;;  %v3063_v15 = vpack.c.b8 %v3062_v5, %v3061_v44  ;;  %v2831_v27 = vunpack.c.3.s8 %v8726_v23  ;;  %v2610_v5 = vld [vmem:[%s15072_s5 + $0x90] sm:$0xff] }
 0x26c   :  { %v8774_v9 = vsel %vm2670_vm2, 16843009, %v15940_v22  ;;  %v2837_v42 = vunpack.c.1.s8 %v8771_v17  ;;  %v2839_v30 = vunpack.c.1.s8 %v8777_v59  ;;  %v8794_v44 = vsub.s32 0, %v1809_v54 }
 0x26d   :  { %v8712_v3 = vpop.permute.xlu1 %1545  ;;  %15963 = vst [vmem:[#allocation95_spill] sm:$0xff] %v8774_v9  ;;  %v2838_v14 = vunpack.c.1.s8 %v8774_v9  ;;  %vm8808_vm4 = vnez %v3051_v31  ;;  %vm8812_vm5 = vnez %v3057_v46  ;;  %vm8816_vm6 = vnez %v3063_v15 }
 0x26e   :  { %15956 = vst [vmem:[#allocation90_spill] sm:$0xff] %v8712_v3  ;;  %1309 = vxpose.xlu1.b32.cont [14/16] (narrow) %v8465_v2, 8  ;;  %v2821_v2 = vunpack.c.1.s8 %v8707_v49  ;;  %15965 = vst [vmem:[#allocation97_spill] sm:$0xff] %v8794_v44  ;;  %v3073_v49 = vpack.c.b16 %v2829_v53, %v2828_v48  ;;  %v3074_v0 = vpack.c.b16 %v2831_v27, %v2830_v12  ;;  %vm2674_vm9 = vnez %v2610_v5  ;;  %v2612_v53 = vld [vmem:[%s15072_s5 + $0xa0] sm:$0xff] }
 0x26f   :  { %v3080_v31 = vpack.c.b16 %v2839_v30, %v2838_v14  ;;  %v2845_v15 = vunpack.c.3.s8 %v8771_v17  ;;  %v8832_v48 = vsel %vm8808_vm4, 16843009, %v15940_v22  ;;  %v8835_v12 = vsel %vm2672_vm7, 16843009, %v15940_v22 }
 0x270   :  { %v3067_v21 = vpack.c.b16 %v2821_v2, %v2820_v55  ;;  %v2611_v55 = vld [vmem:[%s15072_s5 + $0x98] sm:$0xff]  ;;  %v8806_v2 = vmul.f32 %v8694_v26, %v8369_v16  ;;  %15972 = vst [vmem:[#allocation98_spill] sm:$0xff] %v8832_v48  ;;  %15973 = vst [vmem:[#allocation99_spill] sm:$0xff] %v8835_v12  ;;  %v8842_v27 = vsel %vm2674_vm9, 16843009, %v15940_v22  ;;  %v2848_v5 = vunpack.c.0.s8 %v8835_v12 }
 0x271   :  { %v8764_v33 = vpop.permute.xlu1 %1555  ;;  %vm2675_vm10 = vnez %v2611_v55  ;;  %15975 = vst [vmem:[#allocation101_spill] sm:$0xff] %v8842_v27  ;;  %v8854_v30 = vsel %vm8812_vm5, 16843009, %v15940_v22  ;;  %v2850_v54 = vunpack.c.0.s8 %v8842_v27  ;;  %vm2676_vm4 = vnez %v2612_v53 }
 0x272   :  { %1310 = vxpose.xlu1.b32.cont [15/16] (narrow) %v8485_v52, 8  ;;  %7366 = vset.pattern.permute.xlu0 %v15940_v22  ;;  %v8762_v52 = vsel %vm2668_vm15, 16843009, %v15940_v22  ;;  %15977 = vst [vmem:[#allocation103_spill] sm:$0xff] %v8854_v30 }
 0x273   :  { %15961 = vst [vmem:[#allocation93_spill] sm:$0xff] %v8762_v52  ;;  %v2836_v7 = vunpack.c.1.s8 %v8762_v52  ;;  %v2844_v46 = vunpack.c.3.s8 %v8762_v52 }
 0x275   :  { %v8820_v13 = vpop.permute.xlu1 %1565  ;;  %v3079_v26 = vpack.c.b16 %v2837_v42, %v2836_v7  ;;  %v8845_v7 = vsel %vm2675_vm10, 16843009, %v15940_v22  ;;  %v3085_v51 = vpack.c.b16 %v2845_v15, %v2844_v46 }
 0x276   :  { %1311 = vxpose.xlu1.b32.end [16/16] (narrow) %v8481_v39, 8  ;;  %925 = vadd.xlane.f32.xlu0 %v817_v25  ;;  %v3069_v25 = vpack.c.b8 %v3068_v35, %v3067_v21  ;;  %v2846_v35 = vunpack.c.3.s8 %v8774_v9  ;;  %v2847_v21 = vunpack.c.3.s8 %v8777_v59  ;;  %15976 = vst [vmem:[#allocation102_spill] sm:$0xff] %v8845_v7  ;;  %v2851_v42 = vunpack.c.0.s8 %v8845_v7 }
 0x277   :  { %v2859_v14 = vunpack.c.2.s8 %v8845_v7 }
 0x278   :  { %vm8863_vm11 = vnez %v3069_v25  ;;  %v3086_v58 = vpack.c.b16 %v2847_v21, %v2846_v35  ;;  %v3089_v25 = vpack.c.b16 %v2851_v42, %v2850_v54  ;;  %v2856_v35 = vunpack.c.2.s8 %v8835_v12  ;;  %v2619_v42 = vld [vmem:[%s15072_s5 + $0xd8] sm:$0xff] }
 0x279   :  { %vm2683_vm3 = vnez %v2619_v42 }
 0x27a   :  { %1392 = vxpose.xlu1.b32.start [1/16] (narrow) %v8505_v62, 8  ;;  %929 = vadd.xlane.f32.xlu0 %v8700_v1  ;;  %v8838_v62 = vsel %vm2673_vm8, 16843009, %v15940_v22  ;;  %v3075_v1 = vpack.c.b8 %v3074_v0, %v3073_v49  ;;  %v8859_v49 = vsel %vm8816_vm6, 16843009, %v15940_v22  ;;  %v8861_v0 = vpop.permute.xlu1 %1570 }
 0x27b   :  { %15974 = vst [vmem:[#allocation100_spill] sm:$0xff] %v8838_v62  ;;  %15978 = vst [vmem:[#allocation104_spill] sm:$0xff] %v8859_v49  ;;  %v2849_v55 = vunpack.c.0.s8 %v8838_v62  ;;  %v8979_v39 = vsel %vm2683_vm3, 16843009, %v15940_v22 }
 0x27c   :  { %vm3243_vm12 = vnez %v3075_v1  ;;  %v8885_v1 = vsel %vm8863_vm11, 16843009, %v15940_v22  ;;  %15995 = vst [vmem:[#allocation113_spill] sm:$0xff] %v8979_v39 }
 0x27d   :  { %15981 = vst [vmem:[#allocation105_spill] sm:$0xff] %v8885_v1  ;;  %v3088_v46 = vpack.c.b16 %v2849_v55, %v2848_v5  ;;  %v2616_v5 = vld [vmem:[%s15072_s5 + $0xc0] sm:$0xff]  ;;  %v2617_v55 = vld [vmem:[%s15072_s5 + $0xc8] sm:$0xff]  ;;  %v16019_v50 = vunpack.c.2.s8 %v8885_v1 }
 0x27e   :  { %1393 = vxpose.xlu1.b32.cont [2/16] (narrow) %v8495_v19, 8  ;;  %933 = vadd.xlane.f32.xlu0 %v8704_v43  ;;  %v3081_v43 = vpack.c.b8 %v3080_v31, %v3079_v26  ;;  %v8894_v15 = vpop.permute.xlu1 %1580  ;;  %v2857_v26 = vunpack.c.2.s8 %v8838_v62  ;;  %v2858_v19 = vunpack.c.2.s8 %v8842_v27  ;;  %vm2680_vm15 = vnez %v2616_v5 }
 0x27f   :  { %v3090_v54 = vpack.c.b8 %v3089_v25, %v3088_v46  ;;  %vm2681_vm0 = vnez %v2617_v55  ;;  %v2613_v46 = vld [vmem:[%s15072_s5 + $0xa8] sm:$0xff]  ;;  %v2861_v5 = vunpack.c.3.s8 %v8838_v62  ;;  %v2862_v55 = vunpack.c.3.s8 %v8842_v27 }
 0x280   :  { %vm8890_vm13 = vnez %v3081_v43  ;;  %v3094_v21 = vpack.c.b16 %v2857_v26, %v2856_v35  ;;  %v3095_v31 = vpack.c.b16 %v2859_v14, %v2858_v19  ;;  %v2860_v19 = vunpack.c.3.s8 %v8835_v12  ;;  %v2614_v43 = vld [vmem:[%s15072_s5 + $0xb0] sm:$0xff] }
 0x281   :  { %vm8969_vm5 = vnez %v3090_v54  ;;  %v2863_v54 = vunpack.c.3.s8 %v8845_v7  ;;  %vm2677_vm6 = vnez %v2613_v46  ;;  %vm2678_vm7 = vnez %v2614_v43 }
 0x282   :  { %1394 = vxpose.xlu1.b32.cont [3/16] (narrow) %v8518_v47, 8  ;;  %937 = vadd.xlane.f32.xlu0 %v8719_v34  ;;  %v3087_v47 = vpack.c.b8 %v3086_v58, %v3085_v51  ;;  %v8888_v34 = vsel %vm3243_vm12, 16843009, %v15940_v22  ;;  %v2618_v51 = vld [vmem:[%s15072_s5 + $0xd0] sm:$0xff]  ;;  %v8925_v58 = vpop.xlane.xlu0 %1292  ;;  %v8945_v25 = vpop.permute.xlu1 %1585  ;;  %v3096_v26 = vpack.c.b8 %v3095_v31, %v3094_v21  ;;  %v8991_v21 = vsel %vm2676_vm4, 16843009, %v15940_v22 }
 0x283   :  { %15982 = vst [vmem:[#allocation106_spill] sm:$0xff] %v8888_v34  ;;  %15987 = vst [vmem:[#allocation107_spill] sm:$0xff] %v8925_v58  ;;  %vm2682_vm2 = vnez %v2618_v51  ;;  %v2883_v46 = vunpack.c.0.s8 %v8979_v39  ;;  %v9004_v53 = vsel %vm8969_vm5, 16843009, %v15940_v22  ;;  %v16005_v39 = vunpack.c.2.s8 %v8832_v48 }
 0x284   :  { %vm8915_vm14 = vnez %v3087_v47  ;;  %v8932_v47 = vsel %vm8890_vm13, 16843009, %v15940_v22  ;;  %15989 = vst [vmem:[#allocation109_spill] sm:$0xff] %v8945_v25  ;;  %15997 = vst [vmem:[#allocation115_spill] sm:$0xff] %v8991_v21  ;;  %vm9013_vm9 = vnez %v3096_v26  ;;  %v3097_v26 = vpack.c.b16 %v2861_v5, %v2860_v19 }
 0x285   :  { %v8943_v23 = vsel %vm8915_vm14, 16843009, %v15940_v22  ;;  %15999 = vst [vmem:[#allocation117_spill] sm:$0xff] %v9004_v53  ;;  %vm9030_vm10 = vcmp.ne.s32.totalorder %v16005_v39, 0  ;;  %v2868_v7 = vunpack.c.1.s8 %v8991_v21  ;;  %v16008_v27 = vunpack.c.2.s8 %v8759_v10 }
 0x286   :  { %1395 = vxpose.xlu1.b32.cont [4/16] (narrow) %v8508_v6, 8  ;;  %941 = vadd.xlane.f32.xlu0 %v8745_v36  ;;  %15988 = vst [vmem:[#allocation108_spill] sm:$0xff] %v8943_v23  ;;  %v1376_v35 = vpop.trf.xlu0  ;;  %v2615_v36 = vld [vmem:[%s15072_s5 + $0xb8] sm:$0xff]  ;;  %v8975_v6 = vsel %vm2682_vm2, 16843009, %v15940_v22  ;;  %v8993_v51 = vpop.permute.xlu1 %1595  ;;  %v16011_v19 = vunpack.c.2.s8 %v8854_v30  ;;  %vm9080_vm14 = vcmp.ne.s32.totalorder %v16019_v50, 0  ;;  %v2872_v17 = vunpack.c.2.s8 %v8991_v21 }
 0x287   :  { %15994 = vst [vmem:[#allocation112_spill] sm:$0xff] %v8975_v6  ;;  %v8987_v31 = vrot.slane %v1376_v35, %v8794_v44  ;;  %vm2679_vm8 = vnez %v2615_v36  ;;  %15998 = vst [vmem:[#allocation116_spill] sm:$0xff] %v8993_v51  ;;  %v2882_v16 = vunpack.c.0.s8 %v8975_v6  ;;  %v9007_v36 = vsel %vm2677_vm6, 16843009, %v15940_v22 }
 0x288   :  { %16000 = vst [vmem:[#allocation118_spill] sm:$0xff] %v9007_v36  ;;  %v9021_v35 = vsel %vm2679_vm8, 16843009, %v15940_v22  ;;  %vm9038_vm11 = vcmp.ne.s32.totalorder %v16008_v27, 0  ;;  %v2869_v39 = vunpack.c.1.s8 %v9007_v36  ;;  %vm9047_vm12 = vcmp.ne.s32.totalorder %v16011_v19, 0 }
 0x289   :  { %15996 = vst [vmem:[#allocation114_spill] sm:$0xff] %v8987_v31  ;;  %v9011_v43 = vadd.f32 %v8987_v31, %v8624_v18  ;;  %16004 = vst [vmem:[#allocation120_spill] sm:$0xff] %v9021_v35  ;;  %v9026_v14 = vadd.f32 %v8987_v31, %v8609_v11  ;;  %v1846_v62 = vadd.f32 %v8987_v31, %v8643_v8  ;;  %v2873_v6 = vunpack.c.2.s8 %v9007_v36 }
 0x28a   :  { %1396 = vxpose.xlu1.b32.cont [5/16] (narrow) %v8531_v60, 8  ;;  %945 = vadd.xlane.f32.xlu0 %v8749_v29  ;;  %v8963_v60 = vsel %vm2680_vm15, 16843009, %v15940_v22  ;;  %v8967_v29 = vsel %vm2681_vm0, 16843009, %v15940_v22  ;;  %v3113_v59 = vpack.c.b16 %v2883_v46, %v2882_v16  ;;  %v9060_v46 = vpop.permute.xlu1 %1600  ;;  %v3103_v45 = vpack.c.b16 %v2869_v39, %v2868_v7 }
 0x28b   :  { %15990 = vst [vmem:[#allocation110_spill] sm:$0xff] %v8963_v60  ;;  %15991 = vst [vmem:[#allocation111_spill] sm:$0xff] %v8967_v29  ;;  %v2881_v42 = vunpack.c.0.s8 %v8967_v29  ;;  %v2094_v9 = vmul.f32 0.2, %v9011_v43  ;;  %v2082_v19 = vmul.f32 0.2, %v9026_v14  ;;  %v1870_v7 = vadd.f32 %v8987_v31, %v8712_v3 }
 0x28c   :  { %16014 = vst [vmem:[#allocation121_spill] sm:$0xff] %v9060_v46  ;;  %v9074_v16 = vsel %vm9013_vm9, 16843009, %v15940_v22  ;;  %v2102_v32 = vmul.f32 0.2, %v1846_v62  ;;  %v16022_v39 = vunpack.c.2.s8 %v8888_v34 }
 0x28d   :  { %16018 = vst [vmem:[#allocation122_spill] sm:$0xff] %v9074_v16  ;;  %v2338_v50 = vmax.f32 %v9026_v14, %v2082_v19  ;;  %v16026_v14 = vunpack.c.2.s8 %v8932_v47  ;;  %v16062_v19 = vunpack.c.2.s8 %v9074_v16 }
 0x28e   :  { %1397 = vxpose.xlu1.b32.cont [6/16] (narrow) %v8521_v24, 8  ;;  %947 = vadd.xlane.f32.xlu0 %v8753_v40  ;;  %v2880_v24 = vunpack.c.0.s8 %v8963_v60  ;;  %v9018_v40 = vsel %vm2678_vm7, 16843009, %v15940_v22  ;;  %v3098_v60 = vpack.c.b16 %v2863_v54, %v2862_v55  ;;  %v2871_v54 = vunpack.c.1.s8 %v9021_v35 }
 0x28f   :  { %16003 = vst [vmem:[#allocation119_spill] sm:$0xff] %v9018_v40  ;;  %v2870_v55 = vunpack.c.1.s8 %v9018_v40  ;;  %vm9095_vm15 = vcmp.ne.s32.totalorder %v16022_v39, 0  ;;  %vm9108_vm2 = vcmp.ne.s32.totalorder %v16026_v14, 0 }
 0x290   :  { %v3112_v12 = vpack.c.b16 %v2881_v42, %v2880_v24  ;;  %v1854_v24 = vadd.f32 %v8987_v31, %v8649_v37  ;;  %v3426_v42 = vunpack.c.2.s8 %v9004_v53  ;;  %v3099_v52 = vpack.c.b8 %v3098_v60, %v3097_v26 }
 0x291   :  { %v3104_v61 = vpack.c.b16 %v2871_v54, %v2870_v55  ;;  %v2874_v53 = vunpack.c.2.s8 %v9018_v40  ;;  %v2350_v60 = vmax.f32 %v9011_v43, %v2094_v9  ;;  %v2358_v40 = vmax.f32 %v1846_v62, %v2102_v32 }
 0x292   :  { %953 = vadd.xlane.f32.xlu0 %v8768_v4  ;;  %1398 = vxpose.xlu1.b32.cont [7/16] (narrow) %v8542_v56, 8  ;;  %v16015_v56 = vunpack.c.2.s8 %v8859_v49  ;;  %v3114_v58 = vpack.c.b8 %v3113_v59, %v3112_v12  ;;  %v2110_v26 = vmul.f32 0.2, %v1854_v24  ;;  %v2875_v59 = vunpack.c.2.s8 %v9021_v35  ;;  %v1344_v12 = vpop.trf.xlu0 }
 0x293   :  { %v1878_v35 = vadd.f32 %v8987_v31, %v8764_v33  ;;  %vm9112_vm3 = vnez %v3099_v52  ;;  %v3105_v54 = vpack.c.b8 %v3104_v61, %v3103_v45  ;;  %v3106_v9 = vpack.c.b16 %v2873_v6, %v2872_v17 }
 0x294   :  { %vm9066_vm13 = vcmp.ne.s32.totalorder %v16015_v56, 0  ;;  %vm3256_vm0 = vnez %v3114_v58  ;;  %v9117_v32 = vrot.slane %v1344_v12, %v8794_v44  ;;  %v9121_v62 = vsel %vm9030_vm10, %v2350_v60, -1e+30 }
 0x295   :  { %16032 = vst [vmem:[#allocation125_spill] sm:$0xff] %v9121_v62  ;;  %v2366_v58 = vmax.f32 %v1854_v24, %v2110_v26  ;;  %v2126_v43 = vmul.f32 0.2, %v1870_v7  ;;  %v3107_v21 = vpack.c.b16 %v2875_v59, %v2874_v53  ;;  %v9126_v52 = vsel %vm9038_vm11, %v2338_v50, -1e+30 }
 0x296   :  { %959 = vadd.xlane.f32.xlu0 %v8806_v2  ;;  %v1862_v2 = vadd.f32 %v8987_v31, %v8680_v20  ;;  %1399 = vxpose.xlu1.b32.cont [8/16] (narrow) %v8534_v28, 8  ;;  %v9104_v28 = vpop.permute.xlu1 %1610  ;;  %16031 = vst [vmem:[#allocation124_spill] sm:$0xff] %v9117_v32  ;;  %16033 = vst [vmem:[#allocation126_spill] sm:$0xff] %v9126_v52  ;;  %v1886_v61 = vadd.f32 %v8987_v31, %v8820_v13  ;;  %v9131_v45 = vsel %vm3256_vm0, 16843009, %v15940_v22 }
 0x297   :  { %16025 = vst [vmem:[#allocation123_spill] sm:$0xff] %v9104_v28  ;;  %16034 = vst [vmem:[#allocation127_spill] sm:$0xff] %v9131_v45  ;;  %v1921_v17 = vadd.f32 %v9117_v32, %v9104_v28  ;;  %v9137_v29 = vsel %vm9047_vm12, %v2358_v40, -1e+30  ;;  %v2134_v24 = vmul.f32 0.2, %v1878_v35  ;;  %v1890_v6 = vadd.f32 %v8987_v31, %v8861_v0 }
 0x298   :  { %v2118_v36 = vmul.f32 0.2, %v1862_v2  ;;  %16035 = vst [vmem:[#allocation128_spill] sm:$0xff] %v9137_v29  ;;  %v4266_v60 = vmax.f32 %v9126_v52, %v9121_v62  ;;  %vm9149_vm5 = vcmp.ne.s32.totalorder %v3426_v42, 0  ;;  %v9156_v40 = vsel %vm9112_vm3, 16843009, %v15940_v22 }
 0x299   :  { %16041 = vst [vmem:[#allocation129_spill] sm:$0xff] %v9156_v40  ;;  %vm9158_vm6 = vnez %v3105_v54  ;;  %v1825_v5 = vadd.f32 %v9117_v32, %v8609_v11  ;;  %v9172_v42 = vsel %vm9066_vm13, %v2366_v58, -1e+30  ;;  %v2382_v12 = vmax.f32 %v1870_v7, %v2126_v43 }
 0x29a   :  { %1400 = vxpose.xlu1.b32.cont [9/16] (narrow) %v8551_v38, 8  ;;  %v2374_v53 = vmax.f32 %v1862_v2, %v2118_v36  ;;  %v16036_v38 = vunpack.c.2.s8 %v8943_v23  ;;  %v16044_v2 = vunpack.c.1.s8 %v8759_v10  ;;  %16047 = vst [vmem:[#allocation130_spill] sm:$0xff] %v9172_v42  ;;  %v3108_v50 = vpack.c.b8 %v3107_v21, %v3106_v9 }
 0x29b   :  { %v3457_v54 = vunpack.c.1.s8 %v9131_v45  ;;  %v4267_v14 = vmax.f32 %v4266_v60, %v9137_v29  ;;  %v2142_v39 = vmul.f32 0.2, %v1886_v61  ;;  %v2390_v27 = vmax.f32 %v1878_v35, %v2134_v24 }
 0x29c   :  { %vm9141_vm4 = vcmp.ne.s32.totalorder %v16036_v38, 0  ;;  %vm9166_vm7 = vcmp.ne.s32.totalorder %v16044_v2, 0  ;;  %v1898_v38 = vadd.f32 %v8987_v31, %v8894_v15  ;;  %v2177_v2 = vmul.f32 0.2, %v1921_v17 }
 0x29d   :  { %v9181_v62 = vsel %vm9080_vm14, %v2374_v53, -1e+30  ;;  %v2146_v58 = vmul.f32 0.2, %v1890_v6  ;;  %v1902_v21 = vadd.f32 %v8987_v31, %v8945_v25  ;;  %v4268_v7 = vmax.f32 %v4267_v14, %v9172_v42 }
 0x29e   :  { %1401 = vxpose.xlu1.b32.cont [10/16] (narrow) %v8545_v41, 8  ;;  %16048 = vst [vmem:[#allocation131_spill] sm:$0xff] %v9181_v62  ;;  %v3438_v41 = vunpack.c.2.s8 %v9156_v40  ;;  %v1837_v9 = vadd.f32 %v9117_v32, %v8624_v18  ;;  %v2081_v43 = vmul.f32 0.2, %v1825_v5  ;;  %v16049_v60 = vunpack.c.1.s8 %v8832_v48 }
 0x29f   :  { %v9197_v35 = vsel %vm9095_vm15, %v2382_v12, -1e+30  ;;  %v9202_v56 = vsel %vm9158_vm6, 16843009, %v15940_v22  ;;  %vm9204_vm9 = vnez %v3108_v50  ;;  %vm9208_vm10 = vcmp.ne.s32.totalorder %v3457_v54, 0 }
 0x2a0   :  { %vm9191_vm8 = vcmp.ne.s32.totalorder %v16049_v60, 0  ;;  %16052 = vst [vmem:[#allocation132_spill] sm:$0xff] %v9197_v35  ;;  %16053 = vst [vmem:[#allocation133_spill] sm:$0xff] %v9202_v56  ;;  %v4269_v14 = vmax.f32 %v4268_v7, %v9181_v62  ;;  %v2398_v55 = vmax.f32 %v1886_v61, %v2142_v39  ;;  %v2154_v12 = vmul.f32 0.2, %v1898_v38 }
 0x2a1   :  { %v2433_v60 = vmax.f32 %v1921_v17, %v2177_v2  ;;  %v9216_v36 = vsel %vm9108_vm2, %v2390_v27, -1e+30  ;;  %v2402_v42 = vmax.f32 %v1890_v6, %v2146_v58  ;;  %v2158_v50 = vmul.f32 0.2, %v1902_v21 }
 0x2a2   :  { %1402 = vxpose.xlu1.b32.cont [11/16] (narrow) %v8560_v57, 8  ;;  %16058 = vst [vmem:[#allocation134_spill] sm:$0xff] %v9216_v36  ;;  %v1910_v52 = vadd.f32 %v8987_v31, %v8993_v51  ;;  %v4270_v54 = vmax.f32 %v4269_v14, %v9197_v35  ;;  %v9223_v23 = vadd.f32 %v9117_v32, %v8643_v8  ;;  %v2093_v57 = vmul.f32 0.2, %v1837_v9  ;;  %v1425_v14 = vld [vmem:[#allocation3 + $0x8] sm:$0xff]  ;;  %v1432_v35 = vld [vmem:[#allocation3 + $0x40] sm:$0xff] }
 0x2a3   :  { %v2337_v7 = vmax.f32 %v1825_v5, %v2081_v43  ;;  %v16059_v61 = vunpack.c.1.s8 %v8854_v30  ;;  %vm9233_vm12 = vcmp.ne.s32.totalorder %v16062_v19, 0  ;;  %vm9237_vm13 = vcmp.ne.s32.totalorder %v3438_v41, 0 }
 0x2a4   :  { %v3446_v2 = vunpack.c.2.s8 %v9202_v56  ;;  %v9245_v5 = vsel %vm9204_vm9, 16843009, %v15940_v22  ;;  %v4271_v27 = vmax.f32 %v4270_v54, %v9216_v36  ;;  %v9251_v58 = vsel %vm9141_vm4, %v2398_v55, -1e+30  ;;  %v16084_v54 = vld [vmem:[#allocation71_spill] sm:$0xff] }
 0x2a5   :  { %vm9227_vm11 = vcmp.ne.s32.totalorder %v16059_v61, 0  ;;  %16067 = vst [vmem:[#allocation135_spill] sm:$0xff] %v9245_v5  ;;  %16068 = vst [vmem:[#allocation136_spill] sm:$0xff] %v9251_v58  ;;  %v2410_v43 = vmax.f32 %v1898_v38, %v2154_v12  ;;  %v9255_v41 = vsel %vm9208_vm10, %v2433_v60, -1e+30  ;;  %v2414_v53 = vmax.f32 %v1902_v21, %v2158_v50 }
 0x2a6   :  { %1403 = vxpose.xlu1.b32.cont [12/16] (narrow) %v8554_v63, 8  ;;  %16069 = vst [vmem:[#allocation137_spill] sm:$0xff] %v9255_v41  ;;  %v9259_v61 = vsel %vm9149_vm5, %v2402_v42, -1e+30  ;;  %v2166_v19 = vmul.f32 0.2, %v1910_v52  ;;  %v1914_v63 = vadd.f32 %v8987_v31, %v9060_v46  ;;  %v9265_v4 = vadd.f32 %v9117_v32, %v8649_v37 }
 0x2a7   :  { %16070 = vst [vmem:[#allocation138_spill] sm:$0xff] %v9259_v61  ;;  %v2101_v38 = vmul.f32 0.2, %v9223_v23  ;;  %v2349_v24 = vmax.f32 %v1837_v9, %v2093_v57  ;;  %v9270_v55 = vsel %vm9166_vm7, %v2337_v7, -1e+30  ;;  %v16072_v26 = vunpack.c.1.s8 %v8859_v49  ;;  %v16075_v9 = vld [vmem:[#allocation72_spill] sm:$0xff] }
 0x2a8   :  { %16071 = vst [vmem:[#allocation139_spill] sm:$0xff] %v9270_v55  ;;  %v4272_v21 = vmax.f32 %v4271_v27, %v9251_v58  ;;  %v4197_v50 = vmax.f32 %v9270_v55, %v9255_v41  ;;  %v9286_v59 = vsel %vm9233_vm12, %v2410_v43, -1e+30  ;;  %vm9289_vm15 = vcmp.ne.s32.totalorder %v3446_v2, 0  ;;  %v1426_v27 = vld [vmem:[#allocation3 + $0x10] sm:$0xff] }
 0x2a9   :  { %vm9274_vm14 = vcmp.ne.s32.totalorder %v16072_v26, 0  ;;  %16076 = vst [vmem:[#allocation72_spill] sm:$0xff] %v9286_v59  ;;  %v3450_v7 = vunpack.c.2.s8 %v9245_v5  ;;  %v9297_v26 = vsel %vm9237_vm13, %v2414_v53, -1e+30  ;;  %v2170_v12 = vmul.f32 0.2, %v1914_v63 }
 0x2aa   :  { %1404 = vxpose.xlu1.b32.cont [13/16] (narrow) %v16075_v9, 8  ;;  %16079 = vst [vmem:[#allocation140_spill] sm:$0xff] %v9297_v26  ;;  %v2422_v9 = vmax.f32 %v1910_v52, %v2166_v19  ;;  %v9301_v6 = vadd.f32 %v9117_v32, %v8680_v20  ;;  %v2109_v2 = vmul.f32 0.2, %v9265_v4  ;;  %v2357_v43 = vmax.f32 %v9223_v23, %v2101_v38  ;;  %v16092_v19 = vld [vmem:[#allocation107_spill] sm:$0xff] }
 0x2ab   :  { %v9307_v60 = vsel %vm9191_vm8, %v2349_v24, -1e+30  ;;  %vm9329_vm2 = vcmp.ne.s32.totalorder %v3450_v7, 0  ;;  %v16089_v7 = vunpack.c.1.s8 %v8888_v34  ;;  %v16094_v17 = vunpack.c.0.s8 %v8759_v10  ;;  %v16127_v10 = vld [vmem:[#allocation117_spill] sm:$0xff] }
 0x2ac   :  { %1495 = vperm.xlu0 %7366, %v1425_v14   ;;  %v4273_v14 = vmax.f32 %v4272_v21, %v9259_v61  ;;  %16080 = vst [vmem:[#allocation141_spill] sm:$0xff] %v9307_v60  ;;  %v16081_v21 = vunpack.c.1.s8 %v8885_v1  ;;  %v2117_v29 = vmul.f32 0.2, %v9301_v6  ;;  %v2365_v38 = vmax.f32 %v9265_v4, %v2109_v2 }
 0x2ad   :  { %vm9345_vm3 = vcmp.ne.s32.totalorder %v16089_v7, 0  ;;  %vm9358_vm4 = vcmp.ne.s32.totalorder %v16094_v17, 0  ;;  %v9365_v7 = vadd.f32 %v9117_v32, %v8764_v33  ;;  %v9413_v42 = vadd.f32 %v9117_v32, %v8861_v0 }
 0x2ae   :  { %vm9311_vm0 = vcmp.ne.s32.totalorder %v16081_v21, 0  ;;  %v4274_v52 = vmax.f32 %v4273_v14, %v9286_v59  ;;  %1405 = vxpose.xlu1.b32.cont [14/16] (narrow) %v16084_v54, 8  ;;  %v1428_v21 = vld [vmem:[#allocation3 + $0x20] sm:$0xff]  ;;  %v9327_v14 = vsel %vm9289_vm15, %v2422_v9, -1e+30  ;;  %v9335_v54 = vadd.f32 %v9117_v32, %v8712_v3 }
 0x2af   :  { %16085 = vst [vmem:[#allocation71_spill] sm:$0xff] %v9327_v14  ;;  %v2373_v23 = vmax.f32 %v9301_v6, %v2117_v29  ;;  %v9393_v53 = vsel %vm9274_vm14, %v2365_v38, -1e+30  ;;  %v9417_v6 = vadd.f32 %v9117_v32, %v8894_v15  ;;  %v9421_v29 = vadd.f32 %v9117_v32, %v8945_v25 }
 0x2b0   :  { %1500 = vperm.xlu0 %7366, %v1426_v27   ;;  %v4198_v27 = vmax.f32 %v4197_v50, %v9307_v60  ;;  %v4275_v41 = vmax.f32 %v4274_v52, %v9297_v26  ;;  %v2426_v50 = vmax.f32 %v1914_v63, %v2170_v12  ;;  %v9341_v52 = vsel %vm9227_vm11, %v2357_v43, -1e+30  ;;  %16101 = vst [vmem:[#allocation144_spill] sm:$0xff] %v9393_v53 }
 0x2b1   :  { %16088 = vst [vmem:[#allocation142_spill] sm:$0xff] %v9341_v52  ;;  %v3458_v63 = vunpack.c.2.s8 %v9131_v45  ;;  %v16109_v62 = vunpack.c.0.s8 %v8859_v49 }
 0x2b2   :  { %1406 = vxpose.xlu1.b32.cont [15/16] (narrow) %v16092_v19, 8  ;;  %v4276_v43 = vmax.f32 %v4275_v41, %v9327_v14  ;;  %v1430_v19 = vld [vmem:[#allocation3 + $0x30] sm:$0xff]  ;;  %v9377_v17 = vsel %vm9329_vm2, %v2426_v50, -1e+30  ;;  %v9381_v41 = vadd.f32 %v9117_v32, %v8820_v13  ;;  %v16102_v14 = vunpack.c.0.s8 %v8854_v30 }
 0x2b3   :  { %16100 = vst [vmem:[#allocation143_spill] sm:$0xff] %v9377_v17  ;;  %vm9436_vm8 = vcmp.ne.s32.totalorder %v16109_v62, 0  ;;  %v9454_v62 = vadd.f32 %v8987_v31, %v9104_v28  ;;  %vm9470_vm10 = vcmp.ne.s32.totalorder %v3458_v63, 0  ;;  %v1434_v31 = vld [vmem:[#allocation3 + $0x50] sm:$0xff]  ;;  %v9489_v63 = vmul.f32 0.2, %v9421_v29 }
 0x2b4   :  { %1510 = vperm.xlu0 %7366, %v1428_v21   ;;  %v4199_v21 = vmax.f32 %v4198_v27, %v9341_v52  ;;  %vm9401_vm6 = vcmp.ne.s32.totalorder %v16102_v14, 0  ;;  %v16108_v14 = vld [vmem:[#allocation73_spill] sm:$0xff]  ;;  %v9449_v60 = vmul.f32 0.2, %v9381_v41  ;;  %v16131_v28 = vunpack.c.1.s8 %v9074_v16 }
 0x2b5   :  { %v2413_v26 = vmax.f32 %v9421_v29, %v9489_v63 }
 0x2b6   :  { %v1312_v57 = vpop.trf.xlu1  ;;  %v4200_v38 = vmax.f32 %v4199_v21, %v9393_v53  ;;  %1407 = vxpose.xlu1.b32.end [16/16] (narrow) %v16108_v14, 8  ;;  %v9441_v21 = vmax.f32 %v4276_v43, %v9377_v17  ;;  %v9445_v14 = vadd.f32 %v9117_v32, %v9060_v46  ;;  %v2133_v53 = vmul.f32 0.2, %v9365_v7 }
 0x2b7   :  { %v9354_v4 = vrot.slane %v1312_v57, %v8794_v44  ;;  %v16097_v57 = vunpack.c.0.s8 %v8832_v48  ;;  %v9458_v43 = vsel %vm9311_vm0, %v2373_v23, -1e+30  ;;  %v16128_v44 = vunpack.c.1.s8 %v16127_v10 }
 0x2b8   :  { %1520 = vperm.xlu0 %7366, %v1430_v19   ;;  %v16105_v19 = vunpack.c.1.s8 %v8932_v47  ;;  %16112 = vst [vmem:[#allocation73_spill] sm:$0xff] %v9441_v21  ;;  %16113 = vst [vmem:[#allocation145_spill] sm:$0xff] %v9458_v43  ;;  %vm9505_vm13 = vcmp.ne.s32.totalorder %v16131_v28, 0  ;;  %v16138_v28 = vunpack.c.1.s8 %v9202_v56 }
 0x2b9   :  { %16093 = vst [vmem:[#allocation107_spill] sm:$0xff] %v9354_v4  ;;  %vm9371_vm5 = vcmp.ne.s32.totalorder %v16097_v57, 0  ;;  %v1824_v24 = vadd.f32 %v9354_v4, %v8609_v11  ;;  %v9387_v27 = vadd.f32 %v9354_v4, %v8624_v18  ;;  %v2125_v57 = vmul.f32 0.2, %v9335_v54  ;;  %v16126_v11 = vld [vmem:[#allocation78_spill] sm:$0xff] }
 0x2ba   :  { %v9397_v50 = vadd.f32 %v9354_v4, %v8643_v8  ;;  %vm9407_vm7 = vcmp.ne.s32.totalorder %v16105_v19, 0  ;;  %v9427_v19 = vadd.f32 %v9117_v32, %v8993_v51  ;;  %v9431_v61 = vadd.f32 %v9354_v4, %v8649_v37  ;;  %v16114_v32 = vld [vmem:[#allocation108_spill] sm:$0xff] }
 0x2bb   :  { %v2080_v58 = vmul.f32 0.2, %v1824_v24  ;;  %v2092_v36 = vmul.f32 0.2, %v9387_v27  ;;  %v2381_v55 = vmax.f32 %v9335_v54, %v2125_v57  ;;  %v16115_v49 = vunpack.c.1.s8 %v16114_v32  ;;  %v1441_v54 = vld [vmem:[#allocation3 + $0x88] sm:$0xff] }
 0x2bc   :  { %1530 = vperm.xlu0 %7366, %v1432_v35   ;;  %v2100_v17 = vmul.f32 0.2, %v9397_v50  ;;  %v9468_v35 = vmul.f32 0.2, %v9413_v42  ;;  %v4201_v57 = vmax.f32 %v4200_v38, %v9458_v43  ;;  %v9477_v39 = vadd.f32 %v9354_v4, %v8680_v20  ;;  %v16123_v20 = vld [vmem:[#allocation75_spill] sm:$0xff] }
 0x2bd   :  { %vm9463_vm9 = vcmp.ne.s32.totalorder %v16115_v49, 0  ;;  %v2336_v23 = vmax.f32 %v1824_v24, %v2080_v58  ;;  %v16120_v49 = vunpack.c.0.s8 %v8885_v1  ;;  %v9486_v8 = vmul.f32 0.2, %v9417_v6  ;;  %v16124_v24 = vld [vmem:[#allocation76_spill] sm:$0xff]  ;;  %v16125_v1 = vld [vmem:[#allocation77_spill] sm:$0xff] }
 0x2be   :  { %v2108_v38 = vmul.f32 0.2, %v9431_v61  ;;  %v2348_v43 = vmax.f32 %v9387_v27, %v2092_v36  ;;  %v2788_v58 = vunpack.c.1.s8 %v16123_v20  ;;  %v2789_v18 = vunpack.c.1.s8 %v16124_v24 }
 0x2bf   :  { %vm9481_vm11 = vcmp.ne.s32.totalorder %v16120_v49, 0  ;;  %v2790_v49 = vunpack.c.1.s8 %v16125_v1  ;;  %v2791_v48 = vunpack.c.1.s8 %v16126_v11  ;;  %vm9499_vm12 = vcmp.ne.s32.totalorder %v16128_v44, 0 }
 0x2c0   :  { %1540 = vperm.xlu0 %7366, %v1434_v31   ;;  %v16134_v31 = vunpack.c.1.s8 %v9156_v40  ;;  %v2389_v27 = vmax.f32 %v9365_v7, %v2133_v53  ;;  %v2178_v51 = vmul.f32 0.2, %v9454_v62  ;;  %v9519_v44 = vsel %vm9345_vm3, %v2381_v55, -1e+30  ;;  %v1436_v55 = vld [vmem:[#allocation3 + $0x60] sm:$0xff]  ;;  %v16170_v53 = vld [vmem:[#allocation81_spill] sm:$0xff] }
 0x2c1   :  { %16137 = vst [vmem:[#allocation108_spill] sm:$0xff] %v9519_v44  ;;  %v2356_v25 = vmax.f32 %v9397_v50, %v2100_v17  ;;  %vm9524_vm15 = vcmp.ne.s32.totalorder %v16138_v28, 0  ;;  %v1868_v40 = vadd.f32 %v9354_v4, %v8712_v3  ;;  %v2116_v7 = vmul.f32 0.2, %v9477_v39 }
 0x2c2   :  { %vm9511_vm14 = vcmp.ne.s32.totalorder %v16134_v31, 0  ;;  %v4202_v31 = vmax.f32 %v4201_v57, %v9519_v44  ;;  %v9534_v9 = vsel %vm9358_vm4, %v2336_v23, -1e+30  ;;  %v16142_v17 = vunpack.c.0.s8 %v8888_v34 }
 0x2c3   :  { %16141 = vst [vmem:[#allocation75_spill] sm:$0xff] %v9534_v9  ;;  %v16145_v50 = vunpack.c.1.s8 %v9245_v5  ;;  %v2165_v28 = vmul.f32 0.2, %v9427_v19  ;;  %v2169_v44 = vmul.f32 0.2, %v9445_v14  ;;  %v2364_v2 = vmax.f32 %v9431_v61, %v2108_v38  ;;  %v1438_v38 = vld [vmem:[#allocation3 + $0x70] sm:$0xff] }
 0x2c4   :  { %vm9538_vm0 = vcmp.ne.s32.totalorder %v16142_v17, 0  ;;  %v9553_v23 = vsel %vm9371_vm5, %v2348_v43, -1e+30  ;;  %v2397_v17 = vmax.f32 %v9381_v41, %v9449_v60  ;;  %1550 = vperm.xlu0 %7366, %v1436_v55   ;;  %v3044_v3 = vpack.c.b16 %v2791_v48, %v2790_v49 }
 0x2c5   :  { %vm9544_vm2 = vcmp.ne.s32.totalorder %v16145_v50, 0  ;;  %16148 = vst [vmem:[#allocation76_spill] sm:$0xff] %v9553_v23  ;;  %v4128_v34 = vmax.f32 %v9534_v9, %v9553_v23  ;;  %v3043_v50 = vpack.c.b16 %v2789_v18, %v2788_v58  ;;  %v2434_v5 = vmax.f32 %v9454_v62, %v2178_v51 }
 0x2c6   :  { %v9562_v56 = vsel %vm9407_vm7, %v2389_v27, -1e+30  ;;  %v1876_v61 = vadd.f32 %v9354_v4, %v8764_v33  ;;  %v9568_v12 = vsel %vm9401_vm6, %v2356_v25, -1e+30  ;;  %v16151_v60 = vunpack.c.0.s8 %v8932_v47 }
 0x2c7   :  { %16149 = vst [vmem:[#allocation77_spill] sm:$0xff] %v9562_v56  ;;  %16150 = vst [vmem:[#allocation78_spill] sm:$0xff] %v9568_v12  ;;  %v4203_v18 = vmax.f32 %v4202_v31, %v9562_v56  ;;  %v2124_v48 = vmul.f32 0.2, %v1868_v40  ;;  %v2372_v51 = vmax.f32 %v9477_v39, %v2116_v7  ;;  %v4129_v59 = vmax.f32 %v4128_v34, %v9568_v12 }
 0x2c8   :  { %vm9572_vm3 = vcmp.ne.s32.totalorder %v16151_v60, 0  ;;  %v2401_v62 = vmax.f32 %v9413_v42, %v9468_v35  ;;  %v2409_v25 = vmax.f32 %v9417_v6, %v9486_v8  ;;  %v9587_v43 = vsel %vm9436_vm8, %v2364_v2, -1e+30  ;;  %1560 = vperm.xlu0 %7366, %v1438_v38   ;;  %v1444_v2 = vld [vmem:[#allocation3 + $0xa0] sm:$0xff] }
 0x2c9   :  { %16154 = vst [vmem:[#allocation117_spill] sm:$0xff] %v9587_v43  ;;  %v2421_v58 = vmax.f32 %v9427_v19, %v2165_v28  ;;  %v2425_v39 = vmax.f32 %v9445_v14, %v2169_v44  ;;  %v4130_v34 = vmax.f32 %v4129_v59, %v9587_v43  ;;  %v3045_v49 = vpack.c.b8 %v3044_v3, %v3043_v50 }
 0x2ca   :  { %v9594_v42 = vsel %vm9470_vm10, %v2434_v5, -1e+30  ;;  %v9598_v8 = vsel %vm9463_vm9, %v2397_v17, -1e+30  ;;  %v9602_v52 = vadd.f32 %v9354_v4, %v8820_v13  ;;  %v2132_v6 = vmul.f32 0.2, %v1876_v61 }
 0x2cb   :  { %16155 = vst [vmem:[#allocation146_spill] sm:$0xff] %v9594_v42  ;;  %16156 = vst [vmem:[#allocation147_spill] sm:$0xff] %v9598_v8  ;;  %v4204_v29 = vmax.f32 %v4203_v18, %v9598_v8  ;;  %v2380_v19 = vmax.f32 %v1868_v40, %v2124_v48  ;;  %v9607_v14 = vsel %vm9481_vm11, %v2372_v51, -1e+30  ;;  %v2792_v3 = vunpack.c.2.s8 %v16123_v20  ;;  %v16171_v18 = vld [vmem:[#allocation83_spill] sm:$0xff]  ;;  %v16172_v51 = vld [vmem:[#allocation84_spill] sm:$0xff] }
 0x2cc   :  { %16157 = vst [vmem:[#allocation148_spill] sm:$0xff] %v9607_v14  ;;  %v16158_v5 = vunpack.c.0.s8 %v16114_v32  ;;  %v4131_v35 = vmax.f32 %v4130_v34, %v9607_v14  ;;  %v2793_v63 = vunpack.c.2.s8 %v16124_v24  ;;  %v2794_v27 = vunpack.c.2.s8 %v16125_v1  ;;  %1575 = vperm.xlu0 %7366, %v1441_v54   ;;  %v16178_v34 = vld [vmem:[#allocation85_spill] sm:$0xff] }
 0x2cd   :  { %v2795_v40 = vunpack.c.2.s8 %v16126_v11  ;;  %v9622_v30 = vsel %vm9499_vm12, %v2401_v62, -1e+30  ;;  %v9626_v20 = vsel %vm9505_vm13, %v2409_v25, -1e+30  ;;  %v9630_v44 = vsel %vm9511_vm14, %v2413_v26, -1e+30 }
 0x2ce   :  { %vm9612_vm4 = vcmp.ne.s32.totalorder %v16158_v5, 0  ;;  %16161 = vst [vmem:[#allocation149_spill] sm:$0xff] %v9622_v30  ;;  %16162 = vst [vmem:[#allocation150_spill] sm:$0xff] %v9626_v20  ;;  %vm3233_vm5 = vnez %v3045_v49  ;;  %v9634_v24 = vsel %vm9524_vm15, %v2421_v58, -1e+30  ;;  %v9638_v11 = vadd.f32 %v9354_v4, %v8861_v0  ;;  %v16173_v62 = vld [vmem:[#allocation122_spill] sm:$0xff] }
 0x2cf   :  { %16163 = vst [vmem:[#allocation151_spill] sm:$0xff] %v9630_v44  ;;  %16164 = vst [vmem:[#allocation152_spill] sm:$0xff] %v9634_v24  ;;  %v2140_v1 = vmul.f32 0.2, %v9602_v52  ;;  %v2388_v45 = vmax.f32 %v1876_v61, %v2132_v6  ;;  %v4205_v36 = vmax.f32 %v4204_v29, %v9622_v30  ;;  %v9646_v31 = vsel %vm9544_vm2, %v2425_v39, -1e+30 }
 0x2d0   :  { %16165 = vst [vmem:[#allocation153_spill] sm:$0xff] %v9646_v31  ;;  %v9650_v16 = vsel %vm9538_vm0, %v2380_v19, -1e+30  ;;  %v16167_v7 = vunpack.c.0.s8 %v16127_v10  ;;  %v9660_v17 = vsel %vm3233_vm5, 16843009, %v15940_v22  ;;  %v3046_v50 = vpack.c.b16 %v2793_v63, %v2792_v3  ;;  %1590 = vperm.xlu0 %7366, %v1444_v2   ;;  %v16186_v2 = vld [vmem:[#allocation123_spill] sm:$0xff] }
 0x2d1   :  { %16166 = vst [vmem:[#allocation154_spill] sm:$0xff] %v9650_v16  ;;  %v4132_v28 = vmax.f32 %v4131_v35, %v9650_v16  ;;  %v3047_v57 = vpack.c.b16 %v2795_v40, %v2794_v27  ;;  %v9664_v61 = vadd.f32 %v9354_v4, %v8894_v15  ;;  %v2800_v60 = vunpack.c.0.s8 %v16170_v53  ;;  %v16179_v35 = vld [vmem:[#allocation109_spill] sm:$0xff]  ;;  %v1447_v27 = vld [vmem:[#allocation3 + $0xb8] sm:$0xff]  ;;  %v16195_v30 = vld [vmem:[#allocation127_spill] sm:$0xff] }
 0x2d2   :  { %vm9654_vm6 = vcmp.ne.s32.totalorder %v16167_v7, 0  ;;  %v2801_v48 = vunpack.c.0.s8 %v16171_v18  ;;  %v2802_v59 = vunpack.c.0.s8 %v16172_v51  ;;  %v16174_v25 = vunpack.c.0.s8 %v16173_v62  ;;  %v16181_v40 = vld [vmem:[#allocation129_spill] sm:$0xff] }
 0x2d3   :  { %v2144_v38 = vmul.f32 0.2, %v9638_v11  ;;  %v2396_v58 = vmax.f32 %v9602_v52, %v2140_v1  ;;  %v9679_v39 = vsel %vm9572_vm3, %v2388_v45, -1e+30  ;;  %v2803_v49 = vunpack.c.0.s8 %v16178_v34  ;;  %v16180_v52 = vld [vmem:[#allocation116_spill] sm:$0xff]  ;;  %v16185_v7 = vld [vmem:[#allocation121_spill] sm:$0xff] }
 0x2d4   :  { %vm9671_vm7 = vcmp.ne.s32.totalorder %v16174_v25, 0  ;;  %16177 = vst [vmem:[#allocation81_spill] sm:$0xff] %v9679_v39  ;;  %v2808_v6 = vunpack.c.2.s8 %v16170_v53  ;;  %v2809_v29 = vunpack.c.2.s8 %v16171_v18  ;;  %v2810_v19 = vunpack.c.2.s8 %v16172_v51  ;;  %1605 = vperm.xlu0 %7366, %v1447_v27   ;;  %v16187_v51 = vld [vmem:[#allocation133_spill] sm:$0xff] }
 0x2d5   :  { %v2811_v3 = vunpack.c.2.s8 %v16178_v34  ;;  %v4206_v5 = vmax.f32 %v4205_v36, %v9626_v20  ;;  %v9689_v54 = vadd.f32 %v9354_v4, %v16179_v35  ;;  %v9693_v41 = vadd.f32 %v9354_v4, %v16180_v52  ;;  %v1454_v27 = vld [vmem:[#allocation3 + $0xf0] sm:$0xff] }
 0x2d6   :  { %v4133_v63 = vmax.f32 %v4132_v28, %v9679_v39  ;;  %v16182_v1 = vunpack.c.0.s8 %v16181_v40  ;;  %v9704_v36 = vadd.f32 %v9354_v4, %v16185_v7  ;;  %v9708_v53 = vadd.f32 %v9354_v4, %v16186_v2  ;;  %1640 = vperm.xlu1 %7365, %v1454_v27   ;;  %v16286_v31 = vld [vmem:[#allocation113_spill] sm:$0xff] }
 0x2d7   :  { %v2152_v18 = vmul.f32 0.2, %v9664_v61  ;;  %v16188_v25 = vunpack.c.0.s8 %v16187_v51  ;;  %v16196_v8 = vunpack.c.0.s8 %v16195_v30  ;;  %v3048_v28 = vpack.c.b8 %v3047_v57, %v3046_v50  ;;  %v1449_v50 = vld [vmem:[#allocation3 + $0xc8] sm:$0xff] }
 0x2d8   :  { %vm9698_vm8 = vcmp.ne.s32.totalorder %v16182_v1, 0  ;;  %v16191_v1 = vld [vmem:[#allocation135_spill] sm:$0xff]  ;;  %v3052_v39 = vpack.c.b16 %v2801_v48, %v2800_v60  ;;  %v2400_v16 = vmax.f32 %v9638_v11, %v2144_v38  ;;  %v9734_v14 = vsel %vm9612_vm4, %v2396_v58, -1e+30  ;;  %1615 = vperm.xlu0 %7366, %v1449_v50   ;;  %v1450_v50 = vld [vmem:[#allocation3 + $0xd0] sm:$0xff]  ;;  %v1451_v48 = vld [vmem:[#allocation3 + $0xd8] sm:$0xff] }
 0x2d9   :  { %vm9714_vm9 = vcmp.ne.s32.totalorder %v16188_v25, 0  ;;  %v16192_v46 = vunpack.c.0.s8 %v16191_v1  ;;  %vm9726_vm11 = vcmp.ne.s32.totalorder %v16196_v8, 0  ;;  %v3053_v25 = vpack.c.b16 %v2803_v49, %v2802_v59  ;;  %16199 = vst [vmem:[#allocation83_spill] sm:$0xff] %v9734_v14  ;;  %v16202_v38 = vld [vmem:[#allocation87_spill] sm:$0xff]  ;;  %v16203_v49 = vld [vmem:[#allocation88_spill] sm:$0xff] }
 0x2da   :  { %v3059_v43 = vpack.c.b16 %v2811_v3, %v2810_v19  ;;  %v4207_v12 = vmax.f32 %v4206_v5, %v9630_v44  ;;  %v2156_v8 = vmul.f32 0.2, %v9689_v54  ;;  %v2164_v23 = vmul.f32 0.2, %v9693_v41  ;;  %v16205_v3 = vld [vmem:[#allocation89_spill] sm:$0xff]  ;;  %v16206_v5 = vld [vmem:[#allocation91_spill] sm:$0xff] }
 0x2db   :  { %vm9720_vm10 = vcmp.ne.s32.totalorder %v16192_v46, 0  ;;  %v3058_v46 = vpack.c.b16 %v2809_v29, %v2808_v6  ;;  %v4134_v9 = vmax.f32 %v4133_v63, %v9734_v14  ;;  %v2168_v57 = vmul.f32 0.2, %v9704_v36  ;;  %v1464_v60 = vld [vmem:[#allocation3 + $0x140] sm:$0xff] }
 0x2dc   :  { %v2176_v11 = vmul.f32 0.2, %v9708_v53  ;;  %v2408_v37 = vmax.f32 %v9664_v61, %v2152_v18  ;;  %vm9744_vm12 = vnez %v3048_v28  ;;  %v3054_v59 = vpack.c.b8 %v3053_v25, %v3052_v39  ;;  %v1456_v25 = vld [vmem:[#allocation3 + $0x100] sm:$0xff]  ;;  %1620 = vperm.xlu0 %7366, %v1450_v50  }
 0x2dd   :  { %v2816_v58 = vunpack.c.0.s8 %v16202_v38  ;;  %v2817_v6 = vunpack.c.0.s8 %v16203_v49  ;;  %v9752_v29 = vsel %vm9654_vm6, %v2400_v16, -1e+30  ;;  %v3060_v19 = vpack.c.b8 %v3059_v43, %v3058_v46  ;;  %1650 = vperm.xlu1 %7365, %v1456_v25   ;;  %v16221_v25 = vld [vmem:[#allocation94_spill] sm:$0xff]  ;;  %v16262_v44 = vld [vmem:[#allocation103_spill] sm:$0xff] }
 0x2de   :  { %16204 = vst [vmem:[#allocation84_spill] sm:$0xff] %v9752_v29  ;;  %v2818_v61 = vunpack.c.0.s8 %v16205_v3  ;;  %v2819_v63 = vunpack.c.0.s8 %v16206_v5  ;;  %v9757_v18 = vmax.f32 %v4207_v12, %v9634_v24  ;;  %v2412_v28 = vmax.f32 %v9689_v54, %v2156_v8  ;;  %v1455_v24 = vld [vmem:[#allocation3 + $0xf8] sm:$0xff] }
 0x2df   :  { %v2420_v39 = vmax.f32 %v9693_v41, %v2164_v23  ;;  %v4135_v27 = vmax.f32 %v4134_v9, %v9752_v29  ;;  %v2424_v55 = vmax.f32 %v9704_v36, %v2168_v57  ;;  %v2432_v16 = vmax.f32 %v9708_v53, %v2176_v11  ;;  %v16223_v23 = vld [vmem:[#allocation96_spill] sm:$0xff] }
 0x2e0   :  { %16207 = vst [vmem:[#allocation122_spill] sm:$0xff] %v9757_v18  ;;  %v9766_v43 = vsel %vm9671_vm7, %v2408_v37, -1e+30  ;;  %v9771_v12 = vsel %vm9744_vm12, 16843009, %v15940_v22  ;;  %vm9773_vm13 = vnez %v3054_v59  ;;  %v3064_v9 = vpack.c.b16 %v2817_v6, %v2816_v58  ;;  %v1458_v37 = vld [vmem:[#allocation3 + $0x110] sm:$0xff]  ;;  %1625 = vperm.xlu0 %7366, %v1451_v48  }
 0x2e1   :  { %16208 = vst [vmem:[#allocation85_spill] sm:$0xff] %v9766_v43  ;;  %16209 = vst [vmem:[#allocation109_spill] sm:$0xff] %v9771_v12  ;;  %v2824_v54 = vunpack.c.2.s8 %v16202_v38  ;;  %v2825_v41 = vunpack.c.2.s8 %v16203_v49  ;;  %vm9779_vm14 = vnez %v3060_v19  ;;  %v3065_v36 = vpack.c.b16 %v2819_v63, %v2818_v61  ;;  %1660 = vperm.xlu1 %7365, %v1458_v37   ;;  %v16228_v48 = vld [vmem:[#allocation101_spill] sm:$0xff]  ;;  %v16229_v6 = vld [vmem:[#allocation102_spill] sm:$0xff] }
 0x2e2   :  { %v2826_v53 = vunpack.c.2.s8 %v16205_v3  ;;  %v2827_v46 = vunpack.c.2.s8 %v16206_v5  ;;  %v4136_v57 = vmax.f32 %v4135_v27, %v9766_v43  ;;  %v9790_v11 = vsel %vm9698_vm8, %v2412_v28, -1e+30  ;;  %v16220_v5 = vld [vmem:[#allocation93_spill] sm:$0xff]  ;;  %v1452_v27 = vld [vmem:[#allocation3 + $0xe0] sm:$0xff] }
 0x2e3   :  { %16214 = vst [vmem:[#allocation116_spill] sm:$0xff] %v9790_v11  ;;  %v9795_v38 = vsel %vm9714_vm9, %v2420_v39, -1e+30  ;;  %v9799_v58 = vsel %vm9720_vm10, %v2424_v55, -1e+30  ;;  %v3066_v56 = vpack.c.b8 %v3065_v36, %v3064_v9  ;;  %v3070_v3 = vpack.c.b16 %v2825_v41, %v2824_v54  ;;  %v1460_v39 = vld [vmem:[#allocation3 + $0x120] sm:$0xff] }
 0x2e4   :  { %16215 = vst [vmem:[#allocation129_spill] sm:$0xff] %v9795_v38  ;;  %16216 = vst [vmem:[#allocation121_spill] sm:$0xff] %v9799_v58  ;;  %v9803_v49 = vsel %vm9726_vm11, %v2432_v16, -1e+30  ;;  %v9811_v34 = vsel %vm9773_vm13, 16843009, %v15940_v22  ;;  %v3071_v61 = vpack.c.b16 %v2827_v46, %v2826_v53  ;;  %v2832_v63 = vunpack.c.0.s8 %v16220_v5  ;;  %1630 = vperm.xlu0 %7366, %v1452_v27  }
 0x2e5   :  { %16217 = vst [vmem:[#allocation123_spill] sm:$0xff] %v9803_v49  ;;  %16218 = vst [vmem:[#allocation133_spill] sm:$0xff] %v9811_v34  ;;  %v9816_v20 = vsel %vm9779_vm14, 16843009, %v15940_v22  ;;  %v4137_v28 = vmax.f32 %v4136_v57, %v9790_v11  ;;  %v2833_v50 = vunpack.c.0.s8 %v16221_v25  ;;  %v16222_v55 = vld [vmem:[#allocation95_spill] sm:$0xff]  ;;  %v2835_v37 = vunpack.c.0.s8 %v16223_v23  ;;  %1670 = vperm.xlu1 %7365, %v1460_v39   ;;  %v1462_v54 = vld [vmem:[#allocation3 + $0x130] sm:$0xff] }
 0x2e6   :  { %16219 = vst [vmem:[#allocation135_spill] sm:$0xff] %v9816_v20  ;;  %v2834_v16 = vunpack.c.0.s8 %v16222_v55  ;;  %v2840_v36 = vunpack.c.2.s8 %v16220_v5  ;;  %v2841_v53 = vunpack.c.2.s8 %v16221_v25  ;;  %v2842_v46 = vunpack.c.2.s8 %v16222_v55  ;;  %v1453_v5 = vld [vmem:[#allocation3 + $0xe8] sm:$0xff]  ;;  %v2620_v55 = vld [vmem:[%s15072_s5 + $0xe0] sm:$0xff]  ;;  %v16281_v49 = vld [vmem:[#allocation90_spill] sm:$0xff] }
 0x2e7   :  { %v2843_v57 = vunpack.c.2.s8 %v16223_v23  ;;  %vm9834_vm15 = vnez %v3066_v56  ;;  %v4138_v41 = vmax.f32 %v4137_v28, %v9795_v38  ;;  %v3072_v9 = vpack.c.b8 %v3071_v61, %v3070_v3  ;;  %v16226_v23 = vld [vmem:[#allocation99_spill] sm:$0xff]  ;;  %v16227_v27 = vld [vmem:[#allocation100_spill] sm:$0xff]  ;;  %v2622_v61 = vld [vmem:[%s15072_s5 + $0xf0] sm:$0xff] }
 0x2e8   :  { %v3076_v25 = vpack.c.b16 %v2833_v50, %v2832_v63  ;;  %v3077_v26 = vpack.c.b16 %v2835_v37, %v2834_v16  ;;  %1635 = vperm.xlu0 %7366, %v1453_v5   ;;  %v2852_v39 = vunpack.c.1.s8 %v16226_v23  ;;  %v2853_v56 = vunpack.c.1.s8 %v16227_v27  ;;  %v2621_v3 = vld [vmem:[%s15072_s5 + $0xe8] sm:$0xff]  ;;  %v2623_v63 = vld [vmem:[%s15072_s5 + $0xf8] sm:$0xff]  ;;  %v16230_v16 = vld [vmem:[#allocation115_spill] sm:$0xff] }
 0x2e9   :  { %1680 = vperm.xlu1 %7365, %v1462_v54   ;;  %v2854_v19 = vunpack.c.1.s8 %v16228_v48  ;;  %v2855_v45 = vunpack.c.1.s8 %v16229_v6  ;;  %v3082_v28 = vpack.c.b16 %v2841_v53, %v2840_v36  ;;  %v3083_v50 = vpack.c.b16 %v2843_v57, %v2842_v46  ;;  %v16231_v54 = vld [vmem:[#allocation118_spill] sm:$0xff]  ;;  %v16232_v27 = vld [vmem:[#allocation119_spill] sm:$0xff]  ;;  %v16233_v23 = vld [vmem:[#allocation120_spill] sm:$0xff] }
 0x2ea   :  { %v2864_v37 = vunpack.c.0.s8 %v16230_v16  ;;  %v2865_v48 = vunpack.c.0.s8 %v16231_v54  ;;  %v2866_v5 = vunpack.c.0.s8 %v16232_v27  ;;  %v2867_v59 = vunpack.c.0.s8 %v16233_v23  ;;  %v1459_v53 = vld [vmem:[#allocation3 + $0x118] sm:$0xff]  ;;  %v1465_v11 = vld [vmem:[#allocation3 + $0x148] sm:$0xff]  ;;  %v16354_v18 = vld [vmem:[#allocation109_spill] sm:$0xff] }
 0x2eb   :  { %vm2684_vm0 = vnez %v2620_v55  ;;  %v3078_v38 = vpack.c.b8 %v3077_v26, %v3076_v25  ;;  %vm2685_vm2 = vnez %v2621_v3  ;;  %vm2686_vm3 = vnez %v2622_v61  ;;  %v2627_v55 = vld [vmem:[%s15072_s5 + $0x118] sm:$0xff] }
 0x2ec   :  { %vm2687_vm4 = vnez %v2623_v63  ;;  %1645 = vperm.xlu0 %7366, %v1455_v24   ;;  %v9863_v36 = vsel %vm9834_vm15, 16843009, %v15940_v22  ;;  %vm9865_vm5 = vnez %v3072_v9  ;;  %v3091_v46 = vpack.c.b16 %v2853_v56, %v2852_v39 }
 0x2ed   :  { %1690 = vperm.xlu1 %7365, %v1464_v60   ;;  %16234 = vst [vmem:[#allocation127_spill] sm:$0xff] %v9863_v36  ;;  %v3092_v57 = vpack.c.b16 %v2855_v45, %v2854_v19  ;;  %v9870_v6 = vmax.f32 %v4138_v41, %v9799_v58  ;;  %v3084_v26 = vpack.c.b8 %v3083_v50, %v3082_v28  ;;  %v9874_v60 = vsel %vm2684_vm0, 16843009, %v15940_v22  ;;  %v1466_v45 = vld [vmem:[#allocation3 + $0x150] sm:$0xff]  ;;  %v1457_v19 = vld [vmem:[#allocation3 + $0x108] sm:$0xff]  ;;  %v16258_v41 = vld [vmem:[#allocation79_spill] sm:$0xff] }
 0x2ee   :  { %v3100_v25 = vpack.c.b16 %v2865_v48, %v2864_v37  ;;  %v3101_v24 = vpack.c.b16 %v2867_v59, %v2866_v5  ;;  %v9877_v8 = vsel %vm2685_vm2, 16843009, %v15940_v22  ;;  %v9880_v9 = vsel %vm2686_vm3, 16843009, %v15940_v22  ;;  %v2624_v59 = vld [vmem:[%s15072_s5 + $0x100] sm:$0xff] }
 0x2ef   :  { %16237 = vst [vmem:[#allocation87_spill] sm:$0xff] %v9870_v6  ;;  %v9883_v3 = vsel %vm2687_vm4, 16843009, %v15940_v22  ;;  %vm3244_vm6 = vnez %v3078_v38  ;;  %v9893_v61 = vsel %vm9865_vm5, 16843009, %v15940_v22  ;;  %v3093_v63 = vpack.c.b8 %v3092_v57, %v3091_v46 }
 0x2f0   :  { %1655 = vperm.xlu0 %7366, %v1457_v19   ;;  %16238 = vst [vmem:[#allocation88_spill] sm:$0xff] %v9893_v61  ;;  %v2904_v28 = vunpack.c.2.s8 %v9874_v60  ;;  %v2905_v50 = vunpack.c.2.s8 %v9877_v8  ;;  %v2906_v37 = vunpack.c.2.s8 %v9880_v9  ;;  %v2907_v38 = vunpack.c.2.s8 %v9883_v3  ;;  %v16274_v61 = vld [vmem:[#allocation111_spill] sm:$0xff] }
 0x2f1   :  { %1700 = vperm.xlu1 %7365, %v1466_v45   ;;  %v9902_v5 = vsel %vm3244_vm6, 16843009, %v15940_v22  ;;  %vm3246_vm7 = vnez %v3084_v26  ;;  %v3102_v45 = vpack.c.b8 %v3101_v24, %v3100_v25  ;;  %v2876_v19 = vunpack.c.3.s8 %v16230_v16  ;;  %v2625_v16 = vld [vmem:[%s15072_s5 + $0x108] sm:$0xff]  ;;  %v2626_v25 = vld [vmem:[%s15072_s5 + $0x110] sm:$0xff] }
 0x2f2   :  { %16239 = vst [vmem:[#allocation89_spill] sm:$0xff] %v9902_v5  ;;  %v2877_v46 = vunpack.c.3.s8 %v16231_v54  ;;  %v2878_v57 = vunpack.c.3.s8 %v16232_v27  ;;  %v2879_v56 = vunpack.c.3.s8 %v16233_v23  ;;  %v9919_v54 = vsel %vm3246_vm7, 16843009, %v15940_v22  ;;  %v16247_v27 = vld [vmem:[#allocation97_spill] sm:$0xff] }
 0x2f3   :  { %16240 = vst [vmem:[#allocation91_spill] sm:$0xff] %v9919_v54  ;;  %vm9921_vm8 = vnez %v3093_v63  ;;  %v3130_v23 = vpack.c.b16 %v2905_v50, %v2904_v28  ;;  %v3131_v24 = vpack.c.b16 %v2907_v38, %v2906_v37  ;;  %vm2688_vm9 = vnez %v2624_v59  ;;  %v1461_v63 = vld [vmem:[#allocation3 + $0x128] sm:$0xff] }
 0x2f4   :  { %1665 = vperm.xlu0 %7366, %v1459_v53   ;;  %vm9934_vm10 = vnez %v3102_v45  ;;  %v3109_v28 = vpack.c.b16 %v2877_v46, %v2876_v19  ;;  %v3110_v50 = vpack.c.b16 %v2879_v56, %v2878_v57  ;;  %vm2689_vm11 = vnez %v2625_v16  ;;  %v16248_v19 = vld [vmem:[#allocation92_spill] sm:$0xff] }
 0x2f5   :  { %v9944_v39 = vsel %vm9921_vm8, 16843009, %v15940_v22  ;;  %v3132_v59 = vpack.c.b8 %v3131_v24, %v3130_v23  ;;  %vm2690_vm12 = vnez %v2626_v25  ;;  %vm2691_vm13 = vnez %v2627_v55  ;;  %v1463_v24 = vld [vmem:[#allocation3 + $0x138] sm:$0xff] }
 0x2f6   :  { %16245 = vst [vmem:[#allocation93_spill] sm:$0xff] %v9944_v39  ;;  %v9947_v45 = vsel %vm2688_vm9, 16843009, %v15940_v22  ;;  %v1408_v56 = vpop.trf.xlu1  ;;  %v9954_v57 = vsel %vm9934_vm10, 16843009, %v15940_v22  ;;  %v3111_v38 = vpack.c.b8 %v3110_v50, %v3109_v28  ;;  %v16249_v37 = vunpack.c.3.s8 %v16248_v19  ;;  %v16253_v28 = vld [vmem:[#allocation98_spill] sm:$0xff] }
 0x2f7   :  { %16246 = vst [vmem:[#allocation94_spill] sm:$0xff] %v9954_v57  ;;  %v9957_v16 = vsel %vm2689_vm11, 16843009, %v15940_v22  ;;  %v9960_v23 = vrot.slane %v1408_v56, %v16247_v27  ;;  %v9973_v53 = vsel %vm2690_vm12, 16843009, %v15940_v22  ;;  %v2912_v27 = vunpack.c.0.s8 %v9947_v45  ;;  %v16257_v19 = vld [vmem:[#allocation74_spill] sm:$0xff] }
 0x2f8   :  { %1675 = vperm.xlu0 %7366, %v1461_v63   ;;  %vm9966_vm14 = vcmp.ne.s32.totalorder %v16249_v37, 0  ;;  %v9977_v56 = vsel %vm2691_vm13, 16843009, %v15940_v22  ;;  %v16254_v50 = vunpack.c.3.s8 %v16253_v28  ;;  %vm9992_vm0 = vnez %v3132_v59  ;;  %v16261_v63 = vld [vmem:[#allocation80_spill] sm:$0xff] }
 0x2f9   :  { %16252 = vst [vmem:[#allocation95_spill] sm:$0xff] %v9977_v56  ;;  %v9990_v25 = vadd.f32 %v9960_v23, %v16258_v41  ;;  %v2913_v55 = vunpack.c.0.s8 %v9957_v16  ;;  %v9999_v28 = vadd.f32 %v9960_v23, %v16261_v63  ;;  %v16263_v41 = vunpack.c.3.s8 %v16262_v44 }
 0x2fa   :  { %vm9982_vm15 = vcmp.ne.s32.totalorder %v16254_v50, 0  ;;  %vm10012_vm3 = vnez %v3111_v38  ;;  %v2914_v48 = vunpack.c.0.s8 %v9973_v53  ;;  %v2915_v58 = vunpack.c.0.s8 %v9977_v56  ;;  %v16269_v38 = vld [vmem:[#allocation104_spill] sm:$0xff] }
 0x2fb   :  { %vm10006_vm2 = vcmp.ne.s32.totalorder %v16263_v41, 0  ;;  %v2095_v29 = vmul.f32 0.2, %v9990_v25  ;;  %v16270_v43 = vunpack.c.3.s8 %v16269_v38  ;;  %v10035_v54 = vpack.c.b16 %v2913_v55, %v2912_v27  ;;  %v16276_v38 = vld [vmem:[#allocation112_spill] sm:$0xff]  ;;  %v16277_v27 = vld [vmem:[#allocation105_spill] sm:$0xff] }
 0x2fc   :  { %1685 = vperm.xlu0 %7366, %v1463_v24   ;;  %v1827_v24 = vadd.f32 %v9960_v23, %v16257_v19  ;;  %v16268_v19 = vld [vmem:[#allocation82_spill] sm:$0xff]  ;;  %v2885_v36 = vunpack.c.1.s8 %v16274_v61  ;;  %v2103_v26 = vmul.f32 0.2, %v9999_v28  ;;  %v2886_v39 = vunpack.c.1.s8 %v16276_v38 }
 0x2fd   :  { %v10020_v44 = vadd.f32 %v9960_v23, %v16268_v19  ;;  %vm10030_vm4 = vcmp.ne.s32.totalorder %v16270_v43, 0  ;;  %v16273_v19 = vld [vmem:[#allocation110_spill] sm:$0xff]  ;;  %v10047_v43 = vsel %vm10012_vm3, 16843009, %v15940_v22  ;;  %v16278_v55 = vunpack.c.3.s8 %v16277_v27 }
 0x2fe   :  { %v2083_v41 = vmul.f32 0.2, %v1827_v24  ;;  %v2884_v5 = vunpack.c.1.s8 %v16273_v19  ;;  %v10062_v6 = vadd.f32 %v9960_v23, %v16281_v49  ;;  %v3137_v34 = vpack.c.b16 %v2915_v58, %v2914_v48 }
 0x2ff   :  { %v926_v50 = vpop.xlane.xlu0 %925  ;;  %vm10052_vm5 = vcmp.ne.s32.totalorder %v16278_v55, 0  ;;  %v2111_v27 = vmul.f32 0.2, %v10020_v44  ;;  %v2351_v55 = vmax.f32 %v9990_v25, %v2095_v29  ;;  %v2887_v12 = vunpack.c.1.s8 %v16286_v31 }
 0x300   :  { %1010 = vst.msk [vmem:[#allocation3 + $0x160] sm:$0xff] %vm965_vm1, %v926_v50  ;;  %1695 = vperm.xlu0 %7366, %v1465_v11   ;;  %v10026_v50 = vsel %vm9992_vm0, 16843009, %v15940_v22  ;;  %v16275_v11 = vld [vmem:[#allocation86_spill] sm:$0xff]  ;;  %v2339_v21 = vmax.f32 %v1827_v24, %v2083_v41  ;;  %v10075_v49 = vpack.c.b16 %v2885_v36, %v2884_v5  ;;  %v10079_v4 = vadd.f32 %v9960_v23, %v8764_v33  ;;  %v1469_v5 = vld [vmem:[#allocation3 + $0x168] sm:$0xff] }
 0x301   :  { %v10041_v20 = vadd.f32 %v9960_v23, %v16275_v11  ;;  %v1467_v11 = vld [vmem:[#allocation3 + $0x158] sm:$0xff]  ;;  %v2359_v58 = vmax.f32 %v9999_v28, %v2103_v26  ;;  %v10092_v36 = vadd.f32 %v9960_v23, %v8820_v13  ;;  %v16291_v26 = vunpack.c.3.s8 %v16114_v32 }
 0x302   :  { %v16282_v24 = vld [vmem:[#allocation106_spill] sm:$0xff]  ;;  %v10096_v33 = vsel %vm9966_vm14, %v2339_v21, -1e+30  ;;  %v2127_v13 = vmul.f32 0.2, %v10062_v6  ;;  %v2367_v46 = vmax.f32 %v10020_v44, %v2111_v27  ;;  %v10120_v32 = vadd.f32 %v9960_v23, %v8894_v15 }
 0x303   :  { %v930_v42 = vpop.xlane.xlu0 %929  ;;  %v16283_v41 = vunpack.c.3.s8 %v16282_v24  ;;  %v2119_v29 = vmul.f32 0.2, %v10041_v20  ;;  %v16287_v24 = vunpack.c.3.s8 %v8932_v47  ;;  %16290 = vst [vmem:[#allocation96_spill] sm:$0xff] %v10096_v33  ;;  %vm10103_vm8 = vcmp.ne.s32.totalorder %v16291_v26, 0 }
 0x304   :  { %1012 = vst.msk [vmem:[#allocation3 + $0x170] sm:$0xff] %vm965_vm1, %v930_v42  ;;  %1705 = vperm.xlu0 %7366, %v1467_v11   ;;  %v10111_v21 = vsel %vm9982_vm15, %v2351_v55, -1e+30  ;;  %v10124_v26 = vadd.f32 %v9960_v23, %v16179_v35  ;;  %v10130_v44 = vadd.f32 %v9960_v23, %v16180_v52  ;;  %v16296_v27 = vunpack.c.3.s8 %v16127_v10  ;;  %v2628_v42 = vld [vmem:[%s15072_s5 + $0x120] sm:$0xff]  ;;  %v16352_v35 = vld [vmem:[#allocation124_spill] sm:$0xff] }
 0x305   :  { %vm10068_vm6 = vcmp.ne.s32.totalorder %v16283_v41, 0  ;;  %vm10086_vm7 = vcmp.ne.s32.totalorder %v16287_v24, 0  ;;  %16294 = vst [vmem:[#allocation99_spill] sm:$0xff] %v10111_v21  ;;  %v4335_v37 = vmax.f32 %v10096_v33, %v10111_v21  ;;  %v10146_v55 = vadd.f32 %v9960_v23, %v16185_v7 }
 0x306   :  { %vm10140_vm9 = vcmp.ne.s32.totalorder %v16296_v27, 0  ;;  %v10150_v52 = vadd.f32 %v9960_v23, %v16186_v2  ;;  %v16299_v10 = vunpack.c.3.s8 %v16173_v62  ;;  %v2383_v7 = vmax.f32 %v10062_v6, %v2127_v13 }
 0x307   :  { %v934_v48 = vpop.xlane.xlu0 %933  ;;  %v1468_v25 = vld [vmem:[#allocation3 + $0x160] sm:$0xff]  ;;  %v10166_v27 = vpack.c.b16 %v2887_v12, %v2886_v39  ;;  %v10171_v62 = vmul.f32 0.2, %v10120_v32  ;;  %v16303_v14 = vunpack.c.3.s8 %v16181_v40  ;;  %v16306_v12 = vunpack.c.3.s8 %v16187_v51 }
 0x308   :  { %1014 = vst.msk [vmem:[#allocation3 + $0x180] sm:$0xff] %vm965_vm1, %v934_v48  ;;  %1710 = vperm.xlu1 %7365, %v1468_v25   ;;  %1715 = vperm.xlu0 %7366, %v1469_v5   ;;  %v3138_v48 = vpack.c.b8 %v3137_v34, %v10035_v54  ;;  %v10116_v25 = vadd.f32 %v9960_v23, %v8861_v0  ;;  %v2135_v34 = vmul.f32 0.2, %v10079_v4  ;;  %v10136_v54 = vsel %vm10006_vm2, %v2359_v58, -1e+30 }
 0x309   :  { %v2375_v0 = vmax.f32 %v10041_v20, %v2119_v29  ;;  %16295 = vst [vmem:[#allocation100_spill] sm:$0xff] %v10136_v54  ;;  %v2143_v20 = vmul.f32 0.2, %v10092_v36  ;;  %v4336_v59 = vmax.f32 %v4335_v37, %v10136_v54  ;;  %v1471_v29 = vld [vmem:[#allocation3 + $0x178] sm:$0xff]  ;;  %vm10157_vm10 = vcmp.ne.s32.totalorder %v16299_v10, 0 }
 0x30a   :  { %v10164_v5 = vsel %vm10030_vm4, %v2367_v46, -1e+30  ;;  %v2920_v37 = vunpack.c.2.s8 %v9947_v45  ;;  %v10174_v10 = vmul.f32 0.2, %v10124_v26  ;;  %vm10179_vm11 = vcmp.ne.s32.totalorder %v16303_v14, 0 }
 0x30b   :  { %v938_v15 = vpop.xlane.xlu0 %937  ;;  %16302 = vst [vmem:[#allocation101_spill] sm:$0xff] %v10164_v5  ;;  %v1470_v2 = vld [vmem:[#allocation3 + $0x170] sm:$0xff]  ;;  %v4337_v6 = vmax.f32 %v4336_v59, %v10164_v5  ;;  %vm10185_vm12 = vcmp.ne.s32.totalorder %v16306_v12, 0  ;;  %v10190_v46 = vmul.f32 0.2, %v10130_v44  ;;  %vm10197_vm13 = vnez %v3138_v48  ;;  %v1473_v48 = vld [vmem:[#allocation3 + $0x188] sm:$0xff] }
 0x30c   :  { %1016 = vst.msk [vmem:[#allocation3 + $0x190] sm:$0xff] %vm965_vm1, %v938_v15  ;;  %1725 = vperm.xlu0 %7366, %v1471_v29   ;;  %v2147_v15 = vmul.f32 0.2, %v10116_v25  ;;  %1720 = vperm.xlu1 %7365, %v1470_v2   ;;  %v2391_v29 = vmax.f32 %v10079_v4, %v2135_v34  ;;  %v10195_v59 = vsel %vm10052_vm5, %v2375_v0, -1e+30  ;;  %v16312_v51 = vunpack.c.3.s8 %v16191_v1 }
 0x30d   :  { %16309 = vst [vmem:[#allocation102_spill] sm:$0xff] %v10195_v59  ;;  %v10208_v47 = vmul.f32 0.2, %v10146_v55  ;;  %v10211_v4 = vmul.f32 0.2, %v10150_v52  ;;  %v2399_v57 = vmax.f32 %v10092_v36, %v2143_v20  ;;  %v4338_v34 = vmax.f32 %v4337_v6, %v10195_v59 }
 0x30e   :  { %vm10203_vm14 = vcmp.ne.s32.totalorder %v16312_v51, 0  ;;  %v16315_v0 = vunpack.c.3.s8 %v16195_v30  ;;  %v10224_v51 = vsel %vm10068_vm6, %v2383_v7, -1e+30  ;;  %v2921_v28 = vunpack.c.2.s8 %v9957_v16 }
 0x30f   :  { %v942_v40 = vpop.xlane.xlu0 %941  ;;  %v1472_v2 = vld [vmem:[#allocation3 + $0x180] sm:$0xff]  ;;  %16318 = vst [vmem:[#allocation115_spill] sm:$0xff] %v10224_v51  ;;  %v2922_v36 = vunpack.c.2.s8 %v9973_v53  ;;  %v2923_v20 = vunpack.c.2.s8 %v9977_v56  ;;  %v2403_v6 = vmax.f32 %v10116_v25, %v2147_v15  ;;  %v2411_v30 = vmax.f32 %v10120_v32, %v10171_v62  ;;  %v2629_v62 = vld [vmem:[%s15072_s5 + $0x128] sm:$0xff] }
 0x310   :  { %1018 = vst.msk [vmem:[#allocation3 + $0x1a0] sm:$0xff] %vm965_vm1, %v942_v40  ;;  %vm10218_vm15 = vcmp.ne.s32.totalorder %v16315_v0, 0  ;;  %1735 = vperm.xlu0 %7366, %v1473_v48   ;;  %v2415_v40 = vmax.f32 %v10124_v26, %v10174_v10  ;;  %v4339_v0 = vmax.f32 %v4338_v34, %v10224_v51  ;;  %1730 = vperm.xlu1 %7365, %v1472_v2   ;;  %v10242_v48 = vsel %vm10086_vm7, %v2391_v29, -1e+30  ;;  %v2630_v10 = vld [vmem:[%s15072_s5 + $0x130] sm:$0xff] }
 0x311   :  { %v2423_v7 = vmax.f32 %v10130_v44, %v10190_v46  ;;  %16319 = vst [vmem:[#allocation118_spill] sm:$0xff] %v10242_v48  ;;  %v2888_v32 = vunpack.c.2.s8 %v16273_v19  ;;  %v2889_v26 = vunpack.c.2.s8 %v16274_v61  ;;  %v10255_v41 = vsel %vm10103_vm8, %v2399_v57, -1e+30  ;;  %v1475_v46 = vld [vmem:[#allocation3 + $0x198] sm:$0xff] }
 0x312   :  { %v4340_v44 = vmax.f32 %v4339_v0, %v10242_v48  ;;  %16320 = vst [vmem:[#allocation119_spill] sm:$0xff] %v10255_v41  ;;  %v3117_v29 = vpack.c.b8 %v10166_v27, %v10075_v49  ;;  %v2890_v2 = vunpack.c.2.s8 %v16276_v38  ;;  %v3142_v34 = vpack.c.b16 %v2921_v28, %v2920_v37  ;;  %v2631_v0 = vld [vmem:[%s15072_s5 + $0x138] sm:$0xff] }
 0x313   :  { %v946_v25 = vpop.xlane.xlu0 %945  ;;  %v1474_v15 = vld [vmem:[#allocation3 + $0x190] sm:$0xff]  ;;  %v3143_v11 = vpack.c.b16 %v2923_v20, %v2922_v36  ;;  %v2891_v63 = vunpack.c.2.s8 %v16286_v31  ;;  %vm2692_vm0 = vnez %v2628_v42  ;;  %v2427_v24 = vmax.f32 %v10146_v55, %v10208_v47 }
 0x314   :  { %1020 = vst.msk [vmem:[#allocation3 + $0x1b0] sm:$0xff] %vm965_vm1, %v946_v25  ;;  %1745 = vperm.xlu0 %7366, %v1475_v46   ;;  %v4341_v57 = vmax.f32 %v4340_v44, %v10255_v41  ;;  %1740 = vperm.xlu1 %7365, %v1474_v15   ;;  %vm2693_vm2 = vnez %v2629_v62  ;;  %vm2694_vm3 = vnez %v2630_v10  ;;  %v2435_v49 = vmax.f32 %v10150_v52, %v10211_v4  ;;  %v1477_v25 = vld [vmem:[#allocation3 + $0x1a8] sm:$0xff]  ;;  %v1484_v10 = vld [vmem:[#allocation3 + $0x1e0] sm:$0xff] }
 0x315   :  { %v10272_v28 = vsel %vm10140_vm9, %v2403_v6, -1e+30  ;;  %v3118_v37 = vpack.c.b16 %v2889_v26, %v2888_v32  ;;  %v3119_v36 = vpack.c.b16 %v2891_v63, %v2890_v2  ;;  %v10277_v47 = vsel %vm10157_vm10, %v2411_v30, -1e+30 }
 0x316   :  { %16321 = vst [vmem:[#allocation120_spill] sm:$0xff] %v10272_v28  ;;  %v4342_v20 = vmax.f32 %v4341_v57, %v10272_v28  ;;  %16322 = vst [vmem:[#allocation97_spill] sm:$0xff] %v10277_v47  ;;  %vm2695_vm4 = vnez %v2631_v0  ;;  %v10281_v15 = vsel %vm2692_vm0, 16843009, %v15940_v22  ;;  %vm10284_vm5 = vnez %v3117_v29  ;;  %v16353_v57 = vld [vmem:[#allocation114_spill] sm:$0xff] }
 0x317   :  { %v1476_v27 = vld [vmem:[#allocation3 + $0x1a0] sm:$0xff]  ;;  %v948_v55 = vpop.xlane.xlu0 %947  ;;  %16323 = vst [vmem:[#allocation92_spill] sm:$0xff] %v10281_v15  ;;  %v3144_v63 = vpack.c.b8 %v3143_v11, %v3142_v34  ;;  %v10290_v52 = vsel %vm2693_vm2, 16843009, %v15940_v22  ;;  %v10294_v58 = vsel %vm2694_vm3, 16843009, %v15940_v22  ;;  %v3120_v26 = vpack.c.b8 %v3119_v36, %v3118_v37 }
 0x318   :  { %1021 = vst.msk [vmem:[#allocation3 + $0x1b8] sm:$0xff] %vm965_vm1, %v948_v55  ;;  %1755 = vperm.xlu0 %7366, %v1477_v25   ;;  %16326 = vst [vmem:[#allocation98_spill] sm:$0xff] %v10290_v52  ;;  %v4343_v4 = vmax.f32 %v4342_v20, %v10277_v47  ;;  %v10299_v6 = vsel %vm10179_vm11, %v2415_v40, -1e+30  ;;  %v10303_v30 = vsel %vm10185_vm12, %v2423_v7, -1e+30  ;;  %1750 = vperm.xlu1 %7365, %v1476_v27   ;;  %v2928_v39 = vunpack.c.0.s8 %v10281_v15 }
 0x319   :  { %16327 = vst [vmem:[#allocation74_spill] sm:$0xff] %v10294_v58  ;;  %16328 = vst [vmem:[#allocation79_spill] sm:$0xff] %v10299_v6  ;;  %v10308_v11 = vsel %vm10197_vm13, 16843009, %v15940_v22  ;;  %v10312_v42 = vsel %vm10203_vm14, %v2427_v24, -1e+30  ;;  %v2929_v62 = vunpack.c.0.s8 %v10290_v52  ;;  %v2930_v12 = vunpack.c.0.s8 %v10294_v58 }
 0x31a   :  { %16329 = vst [vmem:[#allocation80_spill] sm:$0xff] %v10303_v30  ;;  %16330 = vst [vmem:[#allocation103_spill] sm:$0xff] %v10312_v42  ;;  %v10316_v13 = vsel %vm2695_vm4, 16843009, %v15940_v22  ;;  %v4344_v40 = vmax.f32 %v4343_v4, %v10299_v6  ;;  %v10322_v7 = vsel %vm10218_vm15, %v2435_v49, -1e+30  ;;  %vm3266_vm6 = vnez %v3144_v63 }
 0x31b   :  { %v1478_v32 = vld [vmem:[#allocation3 + $0x1b0] sm:$0xff]  ;;  %16331 = vst [vmem:[#allocation82_spill] sm:$0xff] %v10316_v13  ;;  %16332 = vst [vmem:[#allocation104_spill] sm:$0xff] %v10322_v7  ;;  %v954_v14 = vpop.xlane.xlu0 %953  ;;  %v2892_v46 = vunpack.c.3.s8 %v16273_v19  ;;  %v10333_v1 = vsel %vm10284_vm5, 16843009, %v15940_v22  ;;  %v2931_v29 = vunpack.c.0.s8 %v10316_v13  ;;  %v3148_v2 = vpack.c.b16 %v2929_v62, %v2928_v39  ;;  %v1480_v55 = vld [vmem:[#allocation3 + $0x1c0] sm:$0xff] }
 0x31c   :  { %1024 = vst.msk [vmem:[#allocation3 + $0x1d0] sm:$0xff] %vm965_vm1, %v954_v14  ;;  %1760 = vperm.xlu1 %7365, %v1478_v32   ;;  %v2893_v34 = vunpack.c.3.s8 %v16274_v61  ;;  %v4345_v0 = vmax.f32 %v4344_v40, %v10303_v30  ;;  %vm10340_vm7 = vnez %v3120_v26  ;;  %v10345_v37 = vsel %vm3266_vm6, 16843009, %v15940_v22 }
 0x31d   :  { %v3149_v36 = vpack.c.b16 %v2931_v29, %v2930_v12  ;;  %v2894_v20 = vunpack.c.3.s8 %v16276_v38  ;;  %v2895_v61 = vunpack.c.3.s8 %v16286_v31  ;;  %v10357_v38 = vsel %vm10340_vm7, 16843009, %v15940_v22  ;;  %v1481_v12 = vld [vmem:[#allocation3 + $0x1c8] sm:$0xff] }
 0x31e   :  { %v3121_v4 = vpack.c.b16 %v2893_v34, %v2892_v46  ;;  %v10360_v39 = vmax.f32 %v4345_v0, %v10312_v42  ;;  %v2936_v14 = vunpack.c.2.s8 %v10281_v15  ;;  %v2937_v62 = vunpack.c.2.s8 %v10290_v52  ;;  %v16381_v34 = vld [vmem:[#allocation123_spill] sm:$0xff] }
 0x31f   :  { %v960_v19 = vpop.xlane.xlu0 %959  ;;  %v1479_v27 = vld [vmem:[#allocation3 + $0x1b8] sm:$0xff]  ;;  %v3150_v31 = vpack.c.b8 %v3149_v36, %v3148_v2  ;;  %v3122_v26 = vpack.c.b16 %v2895_v61, %v2894_v20  ;;  %v16335_v29 = vunpack.c.0.s8 %v9660_v17  ;;  %v16338_v2 = vunpack.c.1.s8 %v9660_v17 }
 0x320   :  { %1027 = vst.msk [vmem:[#allocation3 + $0x1e8] sm:$0xff] %vm965_vm1, %v960_v19  ;;  %1765 = vperm.xlu0 %7366, %v1479_v27   ;;  %1770 = vperm.xlu1 %7365, %v1480_v55   ;;  %v16341_v0 = vunpack.c.2.s8 %v9660_v17  ;;  %v2938_v20 = vunpack.c.2.s8 %v10294_v58  ;;  %v2939_v61 = vunpack.c.2.s8 %v10316_v13  ;;  %v16346_v55 = vunpack.c.3.s8 %v9660_v17  ;;  %v16351_v27 = vld [vmem:[#allocation107_spill] sm:$0xff] }
 0x321   :  { %vm10367_vm1 = vcmp.ne.s32.totalorder %v16335_v29, 0  ;;  %vm10373_vm8 = vcmp.ne.s32.totalorder %v16338_v2, 0  ;;  %vm10383_vm10 = vnez %v3150_v31  ;;  %v3123_v36 = vpack.c.b8 %v3122_v26, %v3121_v4  ;;  %v1483_v26 = vld [vmem:[#allocation3 + $0x1d8] sm:$0xff] }
 0x322   :  { %vm10379_vm9 = vcmp.ne.s32.totalorder %v16341_v0, 0  ;;  %vm10391_vm11 = vcmp.ne.s32.totalorder %v16346_v55, 0  ;;  %v2897_v17 = vunpack.c.0.s8 %v9877_v8  ;;  %v10407_v2 = vsel %vm10383_vm10, 16843009, %v15940_v22  ;;  %v16367_v0 = vld [vmem:[#allocation133_spill] sm:$0xff] }
 0x323   :  { %v1482_v46 = vld [vmem:[#allocation3 + $0x1d0] sm:$0xff]  ;;  %v2898_v31 = vunpack.c.0.s8 %v9880_v9  ;;  %v2899_v40 = vunpack.c.0.s8 %v9883_v3  ;;  %vm10413_vm12 = vnez %v3123_v36  ;;  %v10417_v32 = vpack.c.b16 %v2937_v62, %v2936_v14 }
 0x324   :  { %1775 = vperm.xlu0 %7366, %v1481_v12   ;;  %1780 = vperm.xlu1 %7365, %v1482_v46   ;;  %v2896_v12 = vunpack.c.0.s8 %v9874_v60  ;;  %v10419_v55 = vpack.c.b16 %v2939_v61, %v2938_v20  ;;  %v16355_v36 = vunpack.c.0.s8 %v16354_v18  ;;  %v16358_v14 = vunpack.c.1.s8 %v16354_v18 }
 0x325   :  { %v16361_v20 = vunpack.c.2.s8 %v16354_v18  ;;  %v10448_v6 = vpack.c.b16 %v2899_v40, %v2898_v31  ;;  %v16364_v28 = vunpack.c.3.s8 %v16354_v18  ;;  %v16368_v5 = vunpack.c.0.s8 %v16367_v0  ;;  %v16387_v40 = vld [vmem:[#allocation146_spill] sm:$0xff] }
 0x326   :  { %vm10427_vm13 = vcmp.ne.s32.totalorder %v16355_v36, 0  ;;  %vm10433_vm14 = vcmp.ne.s32.totalorder %v16358_v14, 0  ;;  %v10446_v36 = vpack.c.b16 %v2897_v17, %v2896_v12  ;;  %v10460_v12 = vsel %vm10413_vm12, 16843009, %v15940_v22 }
 0x327   :  { %v1496_v4 = vpop.permute.xlu0 %1495  ;;  %vm10439_vm15 = vcmp.ne.s32.totalorder %v16361_v20, 0  ;;  %vm10452_vm0 = vcmp.ne.s32.totalorder %v16364_v28, 0  ;;  %v1486_v28 = vld [vmem:[#allocation3 + $0x1f0] sm:$0xff]  ;;  %vm10470_vm2 = vcmp.ne.s32.totalorder %v16368_v5, 0  ;;  %v16407_v46 = vmax.f32 %v10360_v39, %v10322_v7 }
 0x328   :  { %v1828_v63 = vadd.f32 %v16351_v27, %v1496_v4  ;;  %v1829_v25 = vadd.f32 %v16352_v35, %v1496_v4  ;;  %v1830_v24 = vadd.f32 %v16353_v57, %v1496_v4  ;;  %v1831_v44 = vadd.f32 %v9960_v23, %v1496_v4  ;;  %1785 = vperm.xlu0 %7366, %v1483_v26  }
 0x329   :  { %1790 = vperm.xlu1 %7365, %v1484_v10   ;;  %v1485_v10 = vld [vmem:[#allocation3 + $0x1e8] sm:$0xff] }
 0x32a   :  { %v2084_v42 = vmul.f32 0.2, %v1828_v63  ;;  %v2085_v30 = vmul.f32 0.2, %v1829_v25  ;;  %v2086_v14 = vmul.f32 0.2, %v1830_v24 }
 0x32b   :  { %v2087_v47 = vmul.f32 0.2, %v1831_v44  ;;  %v1501_v41 = vpop.permute.xlu0 %1500 }
 0x32c   :  { %v2340_v31 = vmax.f32 %v1828_v63, %v2084_v42  ;;  %v2341_v17 = vmax.f32 %v1829_v25, %v2085_v30  ;;  %v2342_v26 = vmax.f32 %v1830_v24, %v2086_v14  ;;  %v1832_v18 = vadd.f32 %v16351_v27, %v1501_v41  ;;  %1795 = vperm.xlu0 %7366, %v1485_v10   ;;  %v16380_v63 = vld [vmem:[#allocation87_spill] sm:$0xff]  ;;  %v16383_v14 = vld [vmem:[#allocation122_spill] sm:$0xff]  ;;  %v16386_v25 = vld [vmem:[#allocation73_spill] sm:$0xff] }
 0x32d   :  { %v2343_v48 = vmax.f32 %v1831_v44, %v2087_v47  ;;  %v1833_v51 = vadd.f32 %v16352_v35, %v1501_v41  ;;  %v1834_v4 = vadd.f32 %v16353_v57, %v1501_v41  ;;  %v1835_v59 = vadd.f32 %v9960_v23, %v1501_v41  ;;  %1800 = vperm.xlu1 %7365, %v1486_v28  }
 0x32e   :  { %v16371_v30 = vunpack.c.1.s8 %v16367_v0  ;;  %v10482_v47 = vsel %vm10367_vm1, %v2340_v31, -1e+30  ;;  %v10486_v41 = vsel %vm10373_vm8, %v2341_v17, -1e+30  ;;  %v10490_v5 = vsel %vm10379_vm9, %v2342_v26, -1e+30 }
 0x32f   :  { %16374 = vst [vmem:[#allocation110_spill] sm:$0xff] %v10482_v47  ;;  %16375 = vst [vmem:[#allocation111_spill] sm:$0xff] %v10486_v41  ;;  %v16377_v44 = vunpack.c.2.s8 %v16367_v0  ;;  %v16382_v10 = vmax.f32 %v16380_v63, %v16381_v34  ;;  %v16384_v31 = vld [vmem:[#allocation153_spill] sm:$0xff]  ;;  %v10510_v17 = vsel %vm10391_vm11, %v2343_v48, -1e+30  ;;  %v1511_v28 = vpop.permute.xlu0 %1510  ;;  %v16388_v21 = vmax.f32 %v16386_v25, %v16387_v40 }
 0x330   :  { %vm10476_vm3 = vcmp.ne.s32.totalorder %v16371_v30, 0  ;;  %16376 = vst [vmem:[#allocation86_spill] sm:$0xff] %v10490_v5  ;;  %v16385_v19 = vmax.f32 %v16383_v14, %v16384_v31  ;;  %v1487_v30 = vld [vmem:[#allocation3 + $0x1f8] sm:$0xff]  ;;  %v2088_v63 = vmul.f32 0.2, %v1832_v18  ;;  %v1840_v29 = vadd.f32 %v16351_v27, %v1511_v28 }
 0x331   :  { %vm10494_vm4 = vcmp.ne.s32.totalorder %v16377_v44, 0  ;;  %v4141_v49 = vmax.f32 %v16382_v10, %v10482_v47  ;;  %v4279_v33 = vmax.f32 %v16388_v21, %v10490_v5  ;;  %v2089_v10 = vmul.f32 0.2, %v1833_v51  ;;  %1805 = vperm.xlu0 %7366, %v1487_v30   ;;  %v16392_v5 = vld [vmem:[#allocation135_spill] sm:$0xff] }
 0x332   :  { %v4210_v26 = vmax.f32 %v16385_v19, %v10486_v41  ;;  %v2090_v34 = vmul.f32 0.2, %v1834_v4  ;;  %v16389_v47 = vunpack.c.3.s8 %v16367_v0  ;;  %v2091_v48 = vmul.f32 0.2, %v1835_v59 }
 0x333   :  { %v1841_v19 = vadd.f32 %v16352_v35, %v1511_v28  ;;  %v1842_v44 = vadd.f32 %v16353_v57, %v1511_v28  ;;  %v2344_v31 = vmax.f32 %v1832_v18, %v2088_v63  ;;  %v2345_v25 = vmax.f32 %v1833_v51, %v2089_v10 }
 0x334   :  { %vm10519_vm5 = vcmp.ne.s32.totalorder %v16389_v47, 0  ;;  %v2346_v21 = vmax.f32 %v1834_v4, %v2090_v34  ;;  %v1843_v40 = vadd.f32 %v9960_v23, %v1511_v28  ;;  %v16393_v41 = vunpack.c.0.s8 %v16392_v5 }
 0x335   :  { %v16396_v47 = vunpack.c.1.s8 %v16392_v5  ;;  %v2347_v13 = vmax.f32 %v1835_v59, %v2091_v48  ;;  %v2096_v58 = vmul.f32 0.2, %v1840_v29  ;;  %v2097_v52 = vmul.f32 0.2, %v1841_v19 }
 0x336   :  { %vm10529_vm6 = vcmp.ne.s32.totalorder %v16393_v41, 0  ;;  %v2098_v18 = vmul.f32 0.2, %v1842_v44  ;;  %v16399_v51 = vunpack.c.2.s8 %v16392_v5  ;;  %v1521_v41 = vpop.permute.xlu0 %1520  ;;  %v10547_v34 = vsel %vm10427_vm13, %v2344_v31, -1e+30 }
 0x337   :  { %vm10535_vm7 = vcmp.ne.s32.totalorder %v16396_v47, 0  ;;  %v10551_v28 = vsel %vm10433_vm14, %v2345_v25, -1e+30  ;;  %v10555_v59 = vsel %vm10439_vm15, %v2346_v21, -1e+30  ;;  %v16404_v63 = vunpack.c.3.s8 %v16392_v5 }
 0x338   :  { %vm10541_vm1 = vcmp.ne.s32.totalorder %v16399_v51, 0  ;;  %16402 = vst [vmem:[#allocation112_spill] sm:$0xff] %v10551_v28  ;;  %16403 = vst [vmem:[#allocation105_spill] sm:$0xff] %v10555_v59  ;;  %v1848_v48 = vadd.f32 %v16351_v27, %v1521_v41  ;;  %v4348_v31 = vmax.f32 %v16407_v46, %v10510_v17  ;;  %v4142_v62 = vmax.f32 %v4141_v49, %v10547_v34  ;;  %v16409_v46 = vld [vmem:[#allocation127_spill] sm:$0xff] }
 0x339   :  { %vm10559_vm8 = vcmp.ne.s32.totalorder %v16404_v63, 0  ;;  %v4211_v25 = vmax.f32 %v4210_v26, %v10551_v28  ;;  %v4280_v61 = vmax.f32 %v4279_v33, %v10555_v59  ;;  %v10573_v5 = vsel %vm10452_vm0, %v2347_v13, -1e+30 }
 0x33a   :  { %16408 = vst [vmem:[#allocation90_spill] sm:$0xff] %v10573_v5  ;;  %v2099_v21 = vmul.f32 0.2, %v1843_v40  ;;  %v2352_v47 = vmax.f32 %v1840_v29, %v2096_v58  ;;  %v2353_v51 = vmax.f32 %v1841_v19, %v2097_v52  ;;  %v2354_v63 = vmax.f32 %v1842_v44, %v2098_v18  ;;  %v1531_v33 = vpop.permute.xlu0 %1530 }
 0x33b   :  { %v1849_v15 = vadd.f32 %v16352_v35, %v1521_v41  ;;  %v1850_v56 = vadd.f32 %v16353_v57, %v1521_v41  ;;  %v1851_v39 = vadd.f32 %v9960_v23, %v1521_v41  ;;  %v16410_v49 = vunpack.c.0.s8 %v16409_v46 }
 0x33c   :  { %v2355_v20 = vmax.f32 %v1843_v40, %v2099_v21  ;;  %v10586_v13 = vsel %vm10470_vm2, %v2352_v47, -1e+30  ;;  %v10590_v52 = vsel %vm10476_vm3, %v2353_v51, -1e+30  ;;  %v2104_v58 = vmul.f32 0.2, %v1848_v48 }
 0x33d   :  { %vm10580_vm9 = vcmp.ne.s32.totalorder %v16410_v49, 0  ;;  %16413 = vst [vmem:[#allocation106_spill] sm:$0xff] %v10586_v13  ;;  %16414 = vst [vmem:[#allocation113_spill] sm:$0xff] %v10590_v52  ;;  %v16415_v44 = vunpack.c.1.s8 %v16409_v46  ;;  %v16418_v19 = vunpack.c.2.s8 %v16409_v46  ;;  %v4349_v54 = vmax.f32 %v4348_v31, %v10573_v5 }
 0x33e   :  { %v4143_v40 = vmax.f32 %v4142_v62, %v10586_v13  ;;  %v10608_v42 = vsel %vm10494_vm4, %v2354_v63, -1e+30  ;;  %v2105_v41 = vmul.f32 0.2, %v1849_v15  ;;  %v4212_v21 = vmax.f32 %v4211_v25, %v10590_v52  ;;  %v1541_v7 = vpop.permute.xlu0 %1540 }
 0x33f   :  { %vm10594_vm10 = vcmp.ne.s32.totalorder %v16415_v44, 0  ;;  %vm10600_vm11 = vcmp.ne.s32.totalorder %v16418_v19, 0  ;;  %16421 = vst [vmem:[#allocation107_spill] sm:$0xff] %v10608_v42  ;;  %v4281_v47 = vmax.f32 %v4280_v61, %v10608_v42  ;;  %v2106_v51 = vmul.f32 0.2, %v1850_v56 }
 0x340   :  { %v2107_v49 = vmul.f32 0.2, %v1851_v39  ;;  %v16422_v44 = vunpack.c.3.s8 %v16409_v46  ;;  %v10620_v31 = vsel %vm10519_vm5, %v2355_v20, -1e+30  ;;  %v2360_v24 = vmax.f32 %v1848_v48, %v2104_v58  ;;  %v16426_v46 = vld [vmem:[#allocation88_spill] sm:$0xff] }
 0x341   :  { %16425 = vst [vmem:[#allocation124_spill] sm:$0xff] %v10620_v31  ;;  %v2361_v62 = vmax.f32 %v1849_v15, %v2105_v41  ;;  %v1856_v63 = vadd.f32 %v16351_v27, %v1531_v33  ;;  %v2362_v25 = vmax.f32 %v1850_v56, %v2106_v51  ;;  %v1857_v61 = vadd.f32 %v16352_v35, %v1531_v33 }
 0x342   :  { %vm10614_vm12 = vcmp.ne.s32.totalorder %v16422_v44, 0  ;;  %v2363_v52 = vmax.f32 %v1851_v39, %v2107_v49  ;;  %v1858_v42 = vadd.f32 %v16353_v57, %v1531_v33  ;;  %v16427_v44 = vunpack.c.0.s8 %v16426_v46 }
 0x343   :  { %v16430_v14 = vunpack.c.1.s8 %v16426_v46  ;;  %v16433_v15 = vunpack.c.2.s8 %v16426_v46  ;;  %v10645_v39 = vsel %vm10529_vm6, %v2360_v24, -1e+30  ;;  %v10649_v20 = vsel %vm10535_vm7, %v2361_v62, -1e+30 }
 0x344   :  { %vm10627_vm13 = vcmp.ne.s32.totalorder %v16427_v44, 0  ;;  %16436 = vst [vmem:[#allocation114_spill] sm:$0xff] %v10645_v39  ;;  %16437 = vst [vmem:[#allocation109_spill] sm:$0xff] %v10649_v20  ;;  %v1859_v58 = vadd.f32 %v9960_v23, %v1531_v33  ;;  %v2112_v41 = vmul.f32 0.2, %v1856_v63  ;;  %v16438_v51 = vunpack.c.3.s8 %v16426_v46 }
 0x345   :  { %vm10633_vm14 = vcmp.ne.s32.totalorder %v16430_v14, 0  ;;  %vm10639_vm15 = vcmp.ne.s32.totalorder %v16433_v15, 0  ;;  %v4350_v44 = vmax.f32 %v4349_v54, %v10620_v31  ;;  %v4144_v14 = vmax.f32 %v4143_v40, %v10645_v39  ;;  %v1551_v15 = vpop.permute.xlu0 %1550  ;;  %v16444_v39 = vld [vmem:[#allocation89_spill] sm:$0xff] }
 0x346   :  { %vm10654_vm0 = vcmp.ne.s32.totalorder %v16438_v51, 0  ;;  %v4213_v0 = vmax.f32 %v4212_v21, %v10649_v20  ;;  %v10663_v30 = vsel %vm10541_vm1, %v2362_v25, -1e+30  ;;  %v10668_v33 = vsel %vm10559_vm8, %v2363_v52, -1e+30 }
 0x347   :  { %16441 = vst [vmem:[#allocation133_spill] sm:$0xff] %v10663_v30  ;;  %v4282_v24 = vmax.f32 %v4281_v47, %v10663_v30  ;;  %16442 = vst [vmem:[#allocation87_spill] sm:$0xff] %v10668_v33  ;;  %v2113_v62 = vmul.f32 0.2, %v1857_v61  ;;  %v2114_v46 = vmul.f32 0.2, %v1858_v42  ;;  %v2368_v5 = vmax.f32 %v1856_v63, %v2112_v41 }
 0x348   :  { %v2115_v51 = vmul.f32 0.2, %v1859_v58  ;;  %v1864_v54 = vadd.f32 %v16351_v27, %v1541_v7  ;;  %v1865_v40 = vadd.f32 %v16352_v35, %v1541_v7  ;;  %v1866_v4 = vadd.f32 %v16353_v57, %v1541_v7 }
 0x349   :  { %v2369_v21 = vmax.f32 %v1857_v61, %v2113_v62  ;;  %v2370_v20 = vmax.f32 %v1858_v42, %v2114_v46  ;;  %v1867_v25 = vadd.f32 %v9960_v23, %v1541_v7  ;;  %v10676_v10 = vsel %vm10580_vm9, %v2368_v5, -1e+30  ;;  %v1561_v29 = vpop.permute.xlu0 %1560 }
 0x34a   :  { %v2371_v47 = vmax.f32 %v1859_v58, %v2115_v51  ;;  %16443 = vst [vmem:[#allocation122_spill] sm:$0xff] %v10676_v10  ;;  %v2120_v52 = vmul.f32 0.2, %v1864_v54  ;;  %v2121_v30 = vmul.f32 0.2, %v1865_v40  ;;  %v16445_v31 = vunpack.c.0.s8 %v16444_v39 }
 0x34b   :  { %v16448_v61 = vunpack.c.1.s8 %v16444_v39  ;;  %v16451_v7 = vunpack.c.2.s8 %v16444_v39  ;;  %v4351_v5 = vmax.f32 %v4350_v44, %v10668_v33  ;;  %v10703_v58 = vsel %vm10600_vm11, %v2370_v20, -1e+30 }
 0x34c   :  { %vm10680_vm2 = vcmp.ne.s32.totalorder %v16445_v31, 0  ;;  %v10699_v31 = vsel %vm10594_vm10, %v2369_v21, -1e+30  ;;  %16455 = vst [vmem:[#allocation135_spill] sm:$0xff] %v10703_v58  ;;  %v2122_v41 = vmul.f32 0.2, %v1866_v4  ;;  %v4145_v62 = vmax.f32 %v4144_v14, %v10676_v10 }
 0x34d   :  { %vm10686_vm3 = vcmp.ne.s32.totalorder %v16448_v61, 0  ;;  %vm10692_vm4 = vcmp.ne.s32.totalorder %v16451_v7, 0  ;;  %16454 = vst [vmem:[#allocation73_spill] sm:$0xff] %v10699_v31  ;;  %v4214_v46 = vmax.f32 %v4213_v0, %v10699_v31  ;;  %v4283_v51 = vmax.f32 %v4282_v24, %v10703_v58 }
 0x34e   :  { %v2123_v61 = vmul.f32 0.2, %v1867_v25  ;;  %v16456_v7 = vunpack.c.3.s8 %v16444_v39  ;;  %v10716_v18 = vsel %vm10614_vm12, %v2371_v47, -1e+30  ;;  %v2376_v20 = vmax.f32 %v1864_v54, %v2120_v52  ;;  %v16460_v39 = vld [vmem:[#allocation91_spill] sm:$0xff] }
 0x34f   :  { %16459 = vst [vmem:[#allocation127_spill] sm:$0xff] %v10716_v18  ;;  %v2377_v21 = vmax.f32 %v1865_v40, %v2121_v30  ;;  %v2378_v33 = vmax.f32 %v1866_v4, %v2122_v41  ;;  %v1872_v0 = vadd.f32 %v16351_v27, %v1551_v15  ;;  %v1873_v24 = vadd.f32 %v16352_v35, %v1551_v15 }
 0x350   :  { %vm10710_vm5 = vcmp.ne.s32.totalorder %v16456_v7, 0  ;;  %v2379_v14 = vmax.f32 %v1867_v25, %v2123_v61  ;;  %v1874_v58 = vadd.f32 %v16353_v57, %v1551_v15  ;;  %v16461_v7 = vunpack.c.0.s8 %v16460_v39 }
 0x351   :  { %v16464_v19 = vunpack.c.1.s8 %v16460_v39  ;;  %v10735_v30 = vsel %vm10627_vm13, %v2376_v20, -1e+30  ;;  %v10739_v54 = vsel %vm10633_vm14, %v2377_v21, -1e+30  ;;  %v10743_v40 = vsel %vm10639_vm15, %v2378_v33, -1e+30 }
 0x352   :  { %vm10723_vm6 = vcmp.ne.s32.totalorder %v16461_v7, 0  ;;  %16467 = vst [vmem:[#allocation88_spill] sm:$0xff] %v10735_v30  ;;  %16468 = vst [vmem:[#allocation89_spill] sm:$0xff] %v10739_v54  ;;  %v1875_v4 = vadd.f32 %v9960_v23, %v1551_v15  ;;  %v16470_v25 = vunpack.c.2.s8 %v16460_v39  ;;  %v4352_v13 = vmax.f32 %v4351_v5, %v10716_v18 }
 0x353   :  { %vm10729_vm7 = vcmp.ne.s32.totalorder %v16464_v19, 0  ;;  %16469 = vst [vmem:[#allocation91_spill] sm:$0xff] %v10743_v40  ;;  %v4146_v41 = vmax.f32 %v4145_v62, %v10735_v30  ;;  %v4215_v48 = vmax.f32 %v4214_v46, %v10739_v54  ;;  %v10757_v61 = vsel %vm10654_vm0, %v2379_v14, -1e+30  ;;  %v1576_v14 = vpop.permute.xlu0 %1575  ;;  %v16477_v54 = vld [vmem:[#allocation93_spill] sm:$0xff] }
 0x354   :  { %vm10748_vm1 = vcmp.ne.s32.totalorder %v16470_v25, 0  ;;  %16473 = vst [vmem:[#allocation155_spill] sm:$0xff] %v10757_v61  ;;  %v4284_v56 = vmax.f32 %v4283_v51, %v10743_v40  ;;  %v2128_v33 = vmul.f32 0.2, %v1872_v0  ;;  %v2129_v15 = vmul.f32 0.2, %v1873_v24 }
 0x355   :  { %v2130_v20 = vmul.f32 0.2, %v1874_v58  ;;  %v16474_v21 = vunpack.c.3.s8 %v16460_v39  ;;  %v2131_v5 = vmul.f32 0.2, %v1875_v4  ;;  %v1880_v62 = vadd.f32 %v16351_v27, %v1561_v29 }
 0x356   :  { %v1881_v46 = vadd.f32 %v16352_v35, %v1561_v29  ;;  %v1882_v49 = vadd.f32 %v16353_v57, %v1561_v29  ;;  %v2384_v19 = vmax.f32 %v1872_v0, %v2128_v33  ;;  %v2385_v25 = vmax.f32 %v1873_v24, %v2129_v15 }
 0x357   :  { %vm10762_vm8 = vcmp.ne.s32.totalorder %v16474_v21, 0  ;;  %v2386_v51 = vmax.f32 %v1874_v58, %v2130_v20  ;;  %v1883_v40 = vadd.f32 %v9960_v23, %v1561_v29  ;;  %v16478_v30 = vunpack.c.0.s8 %v16477_v54  ;;  %v1591_v31 = vpop.permute.xlu0 %1590 }
 0x358   :  { %v16481_v21 = vunpack.c.1.s8 %v16477_v54  ;;  %v2387_v10 = vmax.f32 %v1875_v4, %v2131_v5  ;;  %v2136_v59 = vmul.f32 0.2, %v1880_v62  ;;  %v2137_v28 = vmul.f32 0.2, %v1881_v46 }
 0x359   :  { %vm10772_vm9 = vcmp.ne.s32.totalorder %v16478_v30, 0  ;;  %v2138_v0 = vmul.f32 0.2, %v1882_v49  ;;  %v16484_v58 = vunpack.c.2.s8 %v16477_v54  ;;  %v10790_v24 = vsel %vm10680_vm2, %v2384_v19, -1e+30 }
 0x35a   :  { %vm10778_vm10 = vcmp.ne.s32.totalorder %v16481_v21, 0  ;;  %16487 = vst [vmem:[#allocation93_spill] sm:$0xff] %v10790_v24  ;;  %v10794_v30 = vsel %vm10686_vm3, %v2385_v25, -1e+30  ;;  %v10798_v4 = vsel %vm10692_vm4, %v2386_v51, -1e+30  ;;  %v16490_v33 = vunpack.c.3.s8 %v16477_v54 }
 0x35b   :  { %vm10784_vm11 = vcmp.ne.s32.totalorder %v16484_v58, 0  ;;  %16488 = vst [vmem:[#allocation156_spill] sm:$0xff] %v10794_v30  ;;  %16489 = vst [vmem:[#allocation157_spill] sm:$0xff] %v10798_v4  ;;  %v1892_v20 = vadd.f32 %v16351_v27, %v1576_v14  ;;  %v4353_v63 = vmax.f32 %v4352_v13, %v10757_v61  ;;  %v4147_v5 = vmax.f32 %v4146_v41, %v10790_v24  ;;  %v16494_v61 = vld [vmem:[#allocation94_spill] sm:$0xff] }
 0x35c   :  { %vm10802_vm12 = vcmp.ne.s32.totalorder %v16490_v33, 0  ;;  %v4216_v42 = vmax.f32 %v4215_v48, %v10794_v30  ;;  %v4285_v19 = vmax.f32 %v4284_v56, %v10798_v4  ;;  %v10813_v26 = vsel %vm10710_vm5, %v2387_v10, -1e+30 }
 0x35d   :  { %16493 = vst [vmem:[#allocation158_spill] sm:$0xff] %v10813_v26  ;;  %v2139_v25 = vmul.f32 0.2, %v1883_v40  ;;  %v2392_v54 = vmax.f32 %v1880_v62, %v2136_v59  ;;  %v2393_v51 = vmax.f32 %v1881_v46, %v2137_v28  ;;  %v2394_v21 = vmax.f32 %v1882_v49, %v2138_v0 }
 0x35e   :  { %v1893_v58 = vadd.f32 %v16352_v35, %v1576_v14  ;;  %v1894_v33 = vadd.f32 %v16353_v57, %v1576_v14  ;;  %v1895_v13 = vadd.f32 %v9960_v23, %v1576_v14  ;;  %v16495_v41 = vunpack.c.0.s8 %v16494_v61 }
 0x35f   :  { %v2395_v56 = vmax.f32 %v1883_v40, %v2139_v25  ;;  %v10826_v10 = vsel %vm10723_vm6, %v2392_v54, -1e+30  ;;  %v10830_v28 = vsel %vm10729_vm7, %v2393_v51, -1e+30  ;;  %v2148_v59 = vmul.f32 0.2, %v1892_v20 }
 0x360   :  { %vm10820_vm13 = vcmp.ne.s32.totalorder %v16495_v41, 0  ;;  %16498 = vst [vmem:[#allocation94_spill] sm:$0xff] %v10826_v10  ;;  %16499 = vst [vmem:[#allocation159_spill] sm:$0xff] %v10830_v28  ;;  %v16500_v44 = vunpack.c.1.s8 %v16494_v61  ;;  %v16503_v46 = vunpack.c.2.s8 %v16494_v61  ;;  %v4354_v40 = vmax.f32 %v4353_v63, %v10813_v26  ;;  %v16929_v26 = vld [vmem:[#allocation121_spill] sm:$0xff] }
 0x361   :  { %v4148_v47 = vmax.f32 %v4147_v5, %v10826_v10  ;;  %v10848_v14 = vsel %vm10748_vm1, %v2394_v21, -1e+30  ;;  %v2149_v0 = vmul.f32 0.2, %v1893_v58  ;;  %v4217_v25 = vmax.f32 %v4216_v42, %v10830_v28 }
 0x362   :  { %vm10834_vm14 = vcmp.ne.s32.totalorder %v16500_v44, 0  ;;  %vm10840_vm15 = vcmp.ne.s32.totalorder %v16503_v46, 0  ;;  %16506 = vst [vmem:[#allocation160_spill] sm:$0xff] %v10848_v14  ;;  %v4286_v54 = vmax.f32 %v4285_v19, %v10848_v14  ;;  %v2150_v51 = vmul.f32 0.2, %v1894_v33 }
 0x363   :  { %v2151_v41 = vmul.f32 0.2, %v1895_v13  ;;  %v16507_v44 = vunpack.c.3.s8 %v16494_v61  ;;  %v10860_v63 = vsel %vm10762_vm8, %v2395_v56, -1e+30  ;;  %v2404_v52 = vmax.f32 %v1892_v20, %v2148_v59 }
 0x364   :  { %16510 = vst [vmem:[#allocation161_spill] sm:$0xff] %v10860_v63  ;;  %v2405_v5 = vmax.f32 %v1893_v58, %v2149_v0  ;;  %v1904_v21 = vadd.f32 %v16351_v27, %v1591_v31  ;;  %v2406_v10 = vmax.f32 %v1894_v33, %v2150_v51  ;;  %v1905_v19 = vadd.f32 %v16352_v35, %v1591_v31 }
 0x365   :  { %vm10854_vm0 = vcmp.ne.s32.totalorder %v16507_v44, 0  ;;  %v2407_v42 = vmax.f32 %v1895_v13, %v2151_v41  ;;  %v1906_v14 = vadd.f32 %v16353_v57, %v1591_v31  ;;  %v16511_v61 = vunpack.c.0.s8 %v10026_v50 }
 0x366   :  { %v16514_v7 = vunpack.c.1.s8 %v10026_v50  ;;  %v16517_v20 = vunpack.c.2.s8 %v10026_v50  ;;  %v10885_v33 = vsel %vm10772_vm9, %v2404_v52, -1e+30  ;;  %v10889_v13 = vsel %vm10778_vm10, %v2405_v5, -1e+30 }
 0x367   :  { %vm10867_vm2 = vcmp.ne.s32.totalorder %v16511_v61, 0  ;;  %16520 = vst [vmem:[#allocation162_spill] sm:$0xff] %v10885_v33  ;;  %16521 = vst [vmem:[#allocation163_spill] sm:$0xff] %v10889_v13  ;;  %v1907_v59 = vadd.f32 %v9960_v23, %v1591_v31  ;;  %v2160_v0 = vmul.f32 0.2, %v1904_v21  ;;  %v16522_v51 = vunpack.c.3.s8 %v10026_v50  ;;  %v1641_v61 = vpop.permute.xlu1 %1640 }
 0x368   :  { %vm10873_vm3 = vcmp.ne.s32.totalorder %v16514_v7, 0  ;;  %vm10879_vm4 = vcmp.ne.s32.totalorder %v16517_v20, 0  ;;  %v4355_v7 = vmax.f32 %v4354_v40, %v10860_v63  ;;  %v4149_v39 = vmax.f32 %v4148_v47, %v10885_v33 }
 0x369   :  { %vm10894_vm5 = vcmp.ne.s32.totalorder %v16522_v51, 0  ;;  %v4218_v52 = vmax.f32 %v4217_v25, %v10889_v13  ;;  %v10903_v18 = vsel %vm10784_vm11, %v2406_v10, -1e+30  ;;  %v10908_v50 = vsel %vm10802_vm12, %v2407_v42, -1e+30 }
 0x36a   :  { %16525 = vst [vmem:[#allocation164_spill] sm:$0xff] %v10903_v18  ;;  %v4287_v31 = vmax.f32 %v4286_v54, %v10903_v18  ;;  %16526 = vst [vmem:[#allocation165_spill] sm:$0xff] %v10908_v50  ;;  %v2161_v5 = vmul.f32 0.2, %v1905_v19  ;;  %v2162_v20 = vmul.f32 0.2, %v1906_v14  ;;  %v2416_v28 = vmax.f32 %v1904_v21, %v2160_v0 }
 0x36b   :  { %v2163_v51 = vmul.f32 0.2, %v1907_v59  ;;  %v1944_v40 = vadd.f32 %v16351_v27, %v1641_v61  ;;  %v1945_v47 = vadd.f32 %v16352_v35, %v1641_v61  ;;  %v1946_v29 = vadd.f32 %v16353_v57, %v1641_v61 }
 0x36c   :  { %v2417_v33 = vmax.f32 %v1905_v19, %v2161_v5  ;;  %v2418_v25 = vmax.f32 %v1906_v14, %v2162_v20  ;;  %v1947_v10 = vadd.f32 %v9960_v23, %v1641_v61  ;;  %v10916_v15 = vsel %vm10820_vm13, %v2416_v28, -1e+30  ;;  %v1606_v5 = vpop.permute.xlu0 %1605 }
 0x36d   :  { %v2419_v13 = vmax.f32 %v1907_v59, %v2163_v51  ;;  %16527 = vst [vmem:[#allocation166_spill] sm:$0xff] %v10916_v15  ;;  %v2200_v54 = vmul.f32 0.2, %v1944_v40  ;;  %v2201_v42 = vmul.f32 0.2, %v1945_v47  ;;  %v16528_v18 = vunpack.c.0.s8 %v10047_v43 }
 0x36e   :  { %v16531_v19 = vunpack.c.1.s8 %v10047_v43  ;;  %v16534_v59 = vunpack.c.2.s8 %v10047_v43  ;;  %v4356_v28 = vmax.f32 %v4355_v7, %v10908_v50  ;;  %v10939_v0 = vsel %vm10834_vm14, %v2417_v33, -1e+30 }
 0x36f   :  { %vm10920_vm6 = vcmp.ne.s32.totalorder %v16528_v18, 0  ;;  %16537 = vst [vmem:[#allocation167_spill] sm:$0xff] %v10939_v0  ;;  %v10943_v61 = vsel %vm10840_vm15, %v2418_v25, -1e+30  ;;  %v2202_v18 = vmul.f32 0.2, %v1946_v29  ;;  %v4150_v20 = vmax.f32 %v4149_v39, %v10916_v15 }
 0x370   :  { %vm10926_vm7 = vcmp.ne.s32.totalorder %v16531_v19, 0  ;;  %vm10932_vm1 = vcmp.ne.s32.totalorder %v16534_v59, 0  ;;  %16538 = vst [vmem:[#allocation168_spill] sm:$0xff] %v10943_v61  ;;  %v4219_v51 = vmax.f32 %v4218_v52, %v10939_v0  ;;  %v4288_v19 = vmax.f32 %v4287_v31, %v10943_v61 }
 0x371   :  { %v2203_v59 = vmul.f32 0.2, %v1947_v10  ;;  %v16539_v63 = vunpack.c.3.s8 %v10047_v43  ;;  %v10956_v62 = vsel %vm10854_vm0, %v2419_v13, -1e+30  ;;  %v2456_v49 = vmax.f32 %v1944_v40, %v2200_v54 }
 0x372   :  { %16542 = vst [vmem:[#allocation169_spill] sm:$0xff] %v10956_v62  ;;  %v2457_v33 = vmax.f32 %v1945_v47, %v2201_v42  ;;  %v2458_v25 = vmax.f32 %v1946_v29, %v2202_v18  ;;  %v1916_v39 = vadd.f32 %v16351_v27, %v1606_v5  ;;  %v1917_v52 = vadd.f32 %v16352_v35, %v1606_v5  ;;  %v1651_v18 = vpop.permute.xlu1 %1650 }
 0x373   :  { %vm10950_vm8 = vcmp.ne.s32.totalorder %v16539_v63, 0  ;;  %v2459_v50 = vmax.f32 %v1947_v10, %v2203_v59  ;;  %v1918_v31 = vadd.f32 %v16353_v57, %v1606_v5  ;;  %v16543_v43 = vunpack.c.0.s8 %v10308_v11 }
 0x374   :  { %v16546_v46 = vunpack.c.1.s8 %v10308_v11  ;;  %v10975_v40 = vsel %vm10867_vm2, %v2456_v49, -1e+30  ;;  %v10979_v47 = vsel %vm10873_vm3, %v2457_v33, -1e+30  ;;  %v10983_v29 = vsel %vm10879_vm4, %v2458_v25, -1e+30 }
 0x375   :  { %vm10963_vm9 = vcmp.ne.s32.totalorder %v16543_v43, 0  ;;  %16549 = vst [vmem:[#allocation170_spill] sm:$0xff] %v10975_v40  ;;  %16550 = vst [vmem:[#allocation171_spill] sm:$0xff] %v10979_v47  ;;  %v1919_v10 = vadd.f32 %v9960_v23, %v1606_v5  ;;  %v16552_v54 = vunpack.c.2.s8 %v10308_v11  ;;  %v4357_v44 = vmax.f32 %v4356_v28, %v10956_v62 }
 0x376   :  { %vm10969_vm10 = vcmp.ne.s32.totalorder %v16546_v46, 0  ;;  %16551 = vst [vmem:[#allocation172_spill] sm:$0xff] %v10983_v29  ;;  %v4151_v59 = vmax.f32 %v4150_v20, %v10975_v40  ;;  %v4220_v56 = vmax.f32 %v4219_v51, %v10979_v47  ;;  %v10997_v58 = vsel %vm10894_vm5, %v2459_v50, -1e+30  ;;  %v1616_v50 = vpop.permute.xlu0 %1615  ;;  %v1661_v63 = vpop.permute.xlu1 %1660 }
 0x377   :  { %vm10988_vm11 = vcmp.ne.s32.totalorder %v16552_v54, 0  ;;  %16555 = vst [vmem:[#allocation173_spill] sm:$0xff] %v10997_v58  ;;  %v4289_v49 = vmax.f32 %v4288_v19, %v10983_v29  ;;  %v2172_v5 = vmul.f32 0.2, %v1916_v39  ;;  %v2173_v33 = vmul.f32 0.2, %v1917_v52 }
 0x378   :  { %v2174_v25 = vmul.f32 0.2, %v1918_v31  ;;  %v16556_v43 = vunpack.c.3.s8 %v10308_v11  ;;  %v2175_v28 = vmul.f32 0.2, %v1919_v10  ;;  %v1952_v20 = vadd.f32 %v16351_v27, %v1651_v18 }
 0x379   :  { %v1953_v51 = vadd.f32 %v16352_v35, %v1651_v18  ;;  %v1954_v41 = vadd.f32 %v16353_v57, %v1651_v18  ;;  %v2428_v54 = vmax.f32 %v1916_v39, %v2172_v5  ;;  %v2429_v47 = vmax.f32 %v1917_v52, %v2173_v33 }
 0x37a   :  { %vm11002_vm12 = vcmp.ne.s32.totalorder %v16556_v43, 0  ;;  %v2430_v19 = vmax.f32 %v1918_v31, %v2174_v25  ;;  %v1955_v29 = vadd.f32 %v9960_v23, %v1651_v18  ;;  %v16559_v40 = vunpack.c.0.s8 %v10333_v1 }
 0x37b   :  { %v16562_v43 = vunpack.c.1.s8 %v10333_v1  ;;  %v2431_v61 = vmax.f32 %v1919_v10, %v2175_v28  ;;  %v2208_v0 = vmul.f32 0.2, %v1952_v20  ;;  %v2209_v15 = vmul.f32 0.2, %v1953_v51 }
 0x37c   :  { %vm11012_vm13 = vcmp.ne.s32.totalorder %v16559_v40, 0  ;;  %v2210_v39 = vmul.f32 0.2, %v1954_v41  ;;  %v16565_v52 = vunpack.c.2.s8 %v10333_v1  ;;  %v11030_v40 = vsel %vm10920_vm6, %v2428_v54, -1e+30 }
 0x37d   :  { %vm11018_vm14 = vcmp.ne.s32.totalorder %v16562_v43, 0  ;;  %16568 = vst [vmem:[#allocation174_spill] sm:$0xff] %v11030_v40  ;;  %v11034_v18 = vsel %vm10926_vm7, %v2429_v47, -1e+30  ;;  %v11038_v10 = vsel %vm10932_vm1, %v2430_v19, -1e+30  ;;  %v16569_v5 = vunpack.c.3.s8 %v10333_v1 }
 0x37e   :  { %vm11024_vm15 = vcmp.ne.s32.totalorder %v16565_v52, 0  ;;  %v1924_v25 = vadd.f32 %v16351_v27, %v1616_v50  ;;  %v4358_v21 = vmax.f32 %v4357_v44, %v10997_v58  ;;  %v4152_v28 = vmax.f32 %v4151_v59, %v11030_v40 }
 0x37f   :  { %vm11042_vm0 = vcmp.ne.s32.totalorder %v16569_v5, 0  ;;  %v4221_v14 = vmax.f32 %v4220_v56, %v11034_v18  ;;  %v4290_v47 = vmax.f32 %v4289_v49, %v11038_v10  ;;  %v11053_v48 = vsel %vm10950_vm8, %v2431_v61, -1e+30  ;;  %v11276_v56 = vld [vmem:[%s15072_s5 + $0x140] sm:$0xff] }
 0x380   :  { %16572 = vst [vmem:[#allocation175_spill] sm:$0xff] %v11053_v48  ;;  %v2211_v54 = vmul.f32 0.2, %v1955_v29  ;;  %v2464_v1 = vmax.f32 %v1952_v20, %v2208_v0  ;;  %v2465_v19 = vmax.f32 %v1953_v51, %v2209_v15  ;;  %v2466_v43 = vmax.f32 %v1954_v41, %v2210_v39 }
 0x381   :  { %v1925_v52 = vadd.f32 %v16352_v35, %v1616_v50  ;;  %v1926_v5 = vadd.f32 %v16353_v57, %v1616_v50  ;;  %v1927_v44 = vadd.f32 %v9960_v23, %v1616_v50  ;;  %v16573_v59 = vunpack.c.0.s8 %v10345_v37 }
 0x382   :  { %v2467_v49 = vmax.f32 %v1955_v29, %v2211_v54  ;;  %v11066_v61 = vsel %vm10963_vm9, %v2464_v1, -1e+30  ;;  %v11070_v15 = vsel %vm10969_vm10, %v2465_v19, -1e+30  ;;  %v2180_v0 = vmul.f32 0.2, %v1924_v25 }
 0x383   :  { %vm11060_vm2 = vcmp.ne.s32.totalorder %v16573_v59, 0  ;;  %16576 = vst [vmem:[#allocation176_spill] sm:$0xff] %v11066_v61  ;;  %16577 = vst [vmem:[#allocation177_spill] sm:$0xff] %v11070_v15  ;;  %v16578_v7 = vunpack.c.1.s8 %v10345_v37  ;;  %v16581_v51 = vunpack.c.2.s8 %v10345_v37  ;;  %v4359_v29 = vmax.f32 %v4358_v21, %v11053_v48 }
 0x384   :  { %v4153_v13 = vmax.f32 %v4152_v28, %v11066_v61  ;;  %v11088_v50 = vsel %vm10988_vm11, %v2466_v43, -1e+30  ;;  %v2181_v39 = vmul.f32 0.2, %v1925_v52  ;;  %v16585_v54 = vunpack.c.3.s8 %v10345_v37 }
 0x385   :  { %vm11074_vm3 = vcmp.ne.s32.totalorder %v16578_v7, 0  ;;  %vm11080_vm4 = vcmp.ne.s32.totalorder %v16581_v51, 0  ;;  %16584 = vst [vmem:[#allocation178_spill] sm:$0xff] %v11088_v50  ;;  %v4222_v19 = vmax.f32 %v4221_v14, %v11070_v15  ;;  %v4291_v59 = vmax.f32 %v4290_v47, %v11088_v50 }
 0x386   :  { %vm11092_vm5 = vcmp.ne.s32.totalorder %v16585_v54, 0  ;;  %v2182_v7 = vmul.f32 0.2, %v1926_v5  ;;  %v2183_v51 = vmul.f32 0.2, %v1927_v44  ;;  %v2436_v42 = vmax.f32 %v1924_v25, %v2180_v0 }
 0x387   :  { %v11100_v21 = vsel %vm11002_vm12, %v2467_v49, -1e+30  ;;  %v2437_v28 = vmax.f32 %v1925_v52, %v2181_v39  ;;  %v1960_v43 = vadd.f32 %v16351_v27, %v1661_v63  ;;  %v1961_v54 = vadd.f32 %v16352_v35, %v1661_v63 }
 0x388   :  { %16588 = vst [vmem:[#allocation179_spill] sm:$0xff] %v11100_v21  ;;  %v2438_v61 = vmax.f32 %v1926_v5, %v2182_v7  ;;  %v2439_v37 = vmax.f32 %v1927_v44, %v2183_v51  ;;  %v1962_v58 = vadd.f32 %v16353_v57, %v1661_v63  ;;  %v16589_v14 = vunpack.c.0.s8 %v10357_v38  ;;  %v1621_v7 = vpop.permute.xlu0 %1620 }
 0x389   :  { %v16592_v46 = vunpack.c.2.s8 %v10357_v38  ;;  %v11119_v25 = vsel %vm11012_vm13, %v2436_v42, -1e+30  ;;  %v11123_v52 = vsel %vm11018_vm14, %v2437_v28, -1e+30  ;;  %v1963_v5 = vadd.f32 %v9960_v23, %v1661_v63 }
 0x38a   :  { %vm11107_vm6 = vcmp.ne.s32.totalorder %v16589_v14, 0  ;;  %16595 = vst [vmem:[#allocation180_spill] sm:$0xff] %v11123_v52  ;;  %v2216_v44 = vmul.f32 0.2, %v1960_v43  ;;  %v16596_v0 = vunpack.c.1.s8 %v10357_v38  ;;  %v4360_v51 = vmax.f32 %v4359_v29, %v11100_v21 }
 0x38b   :  { %vm11113_vm7 = vcmp.ne.s32.totalorder %v16592_v46, 0  ;;  %v4154_v11 = vmax.f32 %v4153_v13, %v11119_v25  ;;  %v4223_v42 = vmax.f32 %v4222_v19, %v11123_v52  ;;  %v11137_v62 = vsel %vm11024_vm15, %v2438_v61, -1e+30 }
 0x38c   :  { %vm11128_vm1 = vcmp.ne.s32.totalorder %v16596_v0, 0  ;;  %16599 = vst [vmem:[#allocation181_spill] sm:$0xff] %v11137_v62  ;;  %v4292_v63 = vmax.f32 %v4291_v59, %v11137_v62  ;;  %v11142_v28 = vsel %vm11042_vm0, %v2439_v37, -1e+30  ;;  %v2217_v14 = vmul.f32 0.2, %v1961_v54  ;;  %v1626_v49 = vpop.permute.xlu0 %1625 }
 0x38d   :  { %16600 = vst [vmem:[#allocation182_spill] sm:$0xff] %v11142_v28  ;;  %v2218_v46 = vmul.f32 0.2, %v1962_v58  ;;  %v16601_v0 = vunpack.c.3.s8 %v10357_v38  ;;  %v2219_v13 = vmul.f32 0.2, %v1963_v5  ;;  %v2472_v19 = vmax.f32 %v1960_v43, %v2216_v44 }
 0x38e   :  { %v1928_v31 = vadd.f32 %v16351_v27, %v1621_v7  ;;  %v1929_v61 = vadd.f32 %v16352_v35, %v1621_v7  ;;  %v2473_v21 = vmax.f32 %v1961_v54, %v2217_v14  ;;  %v1930_v33 = vadd.f32 %v16353_v57, %v1621_v7 }
 0x38f   :  { %vm11146_vm8 = vcmp.ne.s32.totalorder %v16601_v0, 0  ;;  %v2474_v59 = vmax.f32 %v1962_v58, %v2218_v46  ;;  %v1931_v37 = vadd.f32 %v9960_v23, %v1621_v7  ;;  %v2475_v50 = vmax.f32 %v1963_v5, %v2219_v13  ;;  %v1671_v46 = vpop.permute.xlu1 %1670 }
 0x390   :  { %v11156_v38 = vsel %vm11060_vm2, %v2472_v19, -1e+30  ;;  %v2184_v0 = vmul.f32 0.2, %v1928_v31  ;;  %v2185_v15 = vmul.f32 0.2, %v1929_v61  ;;  %v16605_v62 = vunpack.c.0.s8 %v10407_v2 }
 0x391   :  { %16604 = vst [vmem:[#allocation183_spill] sm:$0xff] %v11156_v38  ;;  %v16608_v54 = vunpack.c.1.s8 %v10407_v2  ;;  %v16611_v5 = vunpack.c.2.s8 %v10407_v2  ;;  %v4361_v44 = vmax.f32 %v4360_v51, %v11142_v28  ;;  %v11179_v7 = vsel %vm11074_vm3, %v2473_v21, -1e+30 }
 0x392   :  { %vm11160_vm9 = vcmp.ne.s32.totalorder %v16605_v62, 0  ;;  %16614 = vst [vmem:[#allocation184_spill] sm:$0xff] %v11179_v7  ;;  %v11183_v62 = vsel %vm11080_vm4, %v2474_v59, -1e+30  ;;  %v2186_v14 = vmul.f32 0.2, %v1930_v33  ;;  %v4155_v13 = vmax.f32 %v4154_v11, %v11156_v38 }
 0x393   :  { %vm11166_vm10 = vcmp.ne.s32.totalorder %v16608_v54, 0  ;;  %vm11172_vm11 = vcmp.ne.s32.totalorder %v16611_v5, 0  ;;  %16615 = vst [vmem:[#allocation185_spill] sm:$0xff] %v11183_v62  ;;  %v4224_v19 = vmax.f32 %v4223_v42, %v11179_v7  ;;  %v11189_v54 = vsel %vm11092_vm5, %v2475_v50, -1e+30  ;;  %v2635_v42 = vld [vmem:[%s15072_s5 + $0x158] sm:$0xff] }
 0x394   :  { %16616 = vst [vmem:[#allocation186_spill] sm:$0xff] %v11189_v54  ;;  %v2187_v5 = vmul.f32 0.2, %v1931_v37  ;;  %v4293_v51 = vmax.f32 %v4292_v63, %v11183_v62  ;;  %v2440_v20 = vmax.f32 %v1928_v31, %v2184_v0  ;;  %v2441_v21 = vmax.f32 %v1929_v61, %v2185_v15 }
 0x395   :  { %v2442_v28 = vmax.f32 %v1930_v33, %v2186_v14  ;;  %v16617_v41 = vunpack.c.3.s8 %v10407_v2  ;;  %v16620_v11 = vpack.c.b8 %v10419_v55, %v10417_v32  ;;  %v1968_v1 = vadd.f32 %v16351_v27, %v1671_v46 }
 0x396   :  { %v2443_v50 = vmax.f32 %v1931_v37, %v2187_v5  ;;  %v1969_v63 = vadd.f32 %v16352_v35, %v1671_v46  ;;  %v1970_v15 = vadd.f32 %v16353_v57, %v1671_v46  ;;  %v4362_v2 = vmax.f32 %v4361_v44, %v11189_v54 }
 0x397   :  { %vm11194_vm12 = vcmp.ne.s32.totalorder %v16617_v41, 0  ;;  %vm11201_vm13 = vnez %v16620_v11  ;;  %v11211_v31 = vsel %vm11107_vm6, %v2440_v20, -1e+30  ;;  %v11215_v32 = vsel %vm11113_vm7, %v2442_v28, -1e+30 }
 0x398   :  { %16623 = vst [vmem:[#allocation187_spill] sm:$0xff] %v11211_v31  ;;  %16624 = vst [vmem:[#allocation188_spill] sm:$0xff] %v11215_v32  ;;  %v1971_v55 = vadd.f32 %v9960_v23, %v1671_v46  ;;  %v11220_v61 = vsel %vm11128_vm1, %v2441_v21, -1e+30  ;;  %v3469_v33 = vunpack.c.1.s8 %v10460_v12  ;;  %v3470_v37 = vunpack.c.2.s8 %v10460_v12 }
 0x399   :  { %16625 = vst [vmem:[#allocation189_spill] sm:$0xff] %v11220_v61  ;;  %v3471_v0 = vunpack.c.3.s8 %v10460_v12  ;;  %v4156_v47 = vmax.f32 %v4155_v13, %v11211_v31  ;;  %v2224_v44 = vmul.f32 0.2, %v1968_v1  ;;  %v2225_v14 = vmul.f32 0.2, %v1969_v63 }
 0x39a   :  { %v2226_v5 = vmul.f32 0.2, %v1970_v15  ;;  %v4225_v28 = vmax.f32 %v4224_v19, %v11220_v61  ;;  %v4294_v46 = vmax.f32 %v4293_v51, %v11215_v32  ;;  %v11230_v39 = vsel %vm11146_vm8, %v2443_v50, -1e+30 }
 0x39b   :  { %16626 = vst [vmem:[#allocation190_spill] sm:$0xff] %v11230_v39  ;;  %v2227_v20 = vmul.f32 0.2, %v1971_v55  ;;  %v4363_v21 = vmax.f32 %v4362_v2, %v11230_v39  ;;  %v2480_v41 = vmax.f32 %v1968_v1, %v2224_v44  ;;  %v2481_v11 = vmax.f32 %v1969_v63, %v2225_v14 }
 0x39c   :  { %v2482_v54 = vmax.f32 %v1970_v15, %v2226_v5  ;;  %v1932_v13 = vadd.f32 %v16351_v27, %v1626_v49  ;;  %v1933_v7 = vadd.f32 %v16352_v35, %v1626_v49  ;;  %v1934_v38 = vadd.f32 %v16353_v57, %v1626_v49 }
 0x39d   :  { %v2483_v62 = vmax.f32 %v1971_v55, %v2227_v20  ;;  %v16627_v19 = vpack.c.b8 %v10448_v6, %v10446_v36  ;;  %v11245_v51 = vsel %vm11160_vm9, %v2480_v41, -1e+30  ;;  %v11249_v50 = vsel %vm11166_vm10, %v2481_v11, -1e+30  ;;  %v11299_v11 = vld [vmem:[%s15072_s5 + $0x150] sm:$0xff] }
 0x39e   :  { %16630 = vst [vmem:[#allocation191_spill] sm:$0xff] %v11245_v51  ;;  %16631 = vst [vmem:[#allocation192_spill] sm:$0xff] %v11249_v50  ;;  %v11253_v1 = vsel %vm11172_vm11, %v2482_v54, -1e+30  ;;  %v1935_v63 = vadd.f32 %v9960_v23, %v1626_v49  ;;  %v11257_v6 = vmax.f32 %v4156_v47, %v11245_v51  ;;  %v16633_v36 = vunpack.c.0.s8 %v10460_v12  ;;  %v11281_v12 = vld [vmem:[%s15072_s5 + $0x148] sm:$0xff] }
 0x39f   :  { %vm11239_vm14 = vnez %v16627_v19  ;;  %16632 = vst [vmem:[#allocation193_spill] sm:$0xff] %v11253_v1  ;;  %vm11265_vm0 = vcmp.ne.s32.totalorder %v3469_v33, 0  ;;  %vm11269_vm2 = vcmp.ne.s32.totalorder %v3470_v37, 0  ;;  %v11284_v54 = vmax.f32 %v4225_v28, %v11249_v50  ;;  %v1681_v37 = vpop.permute.xlu1 %1680  ;;  %v16940_v40 = vld [vmem:[#allocation188_spill] sm:$0xff] }
 0x3a0   :  { %vm11261_vm15 = vcmp.ne.s32.totalorder %v16633_v36, 0  ;;  %v2188_v2 = vmul.f32 0.2, %v1932_v13  ;;  %v2189_v55 = vmul.f32 0.2, %v1933_v7  ;;  %v11287_v47 = vmax.f32 %v4294_v46, %v11253_v1 }
 0x3a1   :  { %v2190_v33 = vmul.f32 0.2, %v1934_v38  ;;  %v11291_v44 = vsel %vm11194_vm12, %v2483_v62, -1e+30  ;;  %v2191_v14 = vmul.f32 0.2, %v1935_v63  ;;  %v1976_v59 = vadd.f32 %v16351_v27, %v1681_v37 }
 0x3a2   :  { %16640 = vst [vmem:[#allocation194_spill] sm:$0xff] %v11291_v44  ;;  %v3334_v5 = vsel %vm11201_vm13, 16843009, %v15940_v22  ;;  %v2444_v49 = vmax.f32 %v1932_v13, %v2188_v2  ;;  %v2445_v20 = vmax.f32 %v1933_v7, %v2189_v55  ;;  %v1977_v62 = vadd.f32 %v16352_v35, %v1681_v37 }
 0x3a3   :  { %v2446_v28 = vmax.f32 %v1934_v38, %v2190_v33  ;;  %v3512_v41 = vunpack.c.0.s8 %v3334_v5  ;;  %v3513_v46 = vunpack.c.1.s8 %v3334_v5  ;;  %v3514_v19 = vunpack.c.2.s8 %v3334_v5 }
 0x3a4   :  { %v11308_v7 = vsel %vm11261_vm15, %v2444_v49, -1e+30  ;;  %v3515_v13 = vunpack.c.3.s8 %v3334_v5  ;;  %v1978_v36 = vadd.f32 %v16353_v57, %v1681_v37  ;;  %vm2696_vm3 = vnez %v11276_v56 }
 0x3a5   :  { %16641 = vst [vmem:[#allocation195_spill] sm:$0xff] %v11308_v7  ;;  %v11312_v38 = vsel %vm11269_vm2, %v2446_v28, -1e+30  ;;  %vm2697_vm4 = vnez %v11281_v12  ;;  %v11318_v2 = vmax.f32 %v4363_v21, %v11291_v44  ;;  %vm11320_vm5 = vcmp.ne.s32.totalorder %v3471_v0, 0 }
 0x3a6   :  { %16642 = vst [vmem:[#allocation196_spill] sm:$0xff] %v11312_v38  ;;  %v2447_v15 = vmax.f32 %v1935_v63, %v2191_v14  ;;  %v11326_v58 = vsel %vm11265_vm0, %v2445_v20, -1e+30  ;;  %vm2698_vm6 = vnez %v11299_v11  ;;  %v4158_v33 = vmax.f32 %v11257_v6, %v11308_v7  ;;  %v1631_v6 = vpop.permute.xlu0 %1630 }
 0x3a7   :  { %16645 = vst [vmem:[#allocation197_spill] sm:$0xff] %v11326_v58  ;;  %v4227_v5 = vmax.f32 %v11284_v54, %v11326_v58  ;;  %v4296_v21 = vmax.f32 %v11287_v47, %v11312_v38  ;;  %vm11335_vm7 = vcmp.ne.s32.totalorder %v3512_v41, 0  ;;  %vm2699_vm1 = vnez %v2635_v42 }
 0x3a8   :  { %vm11339_vm8 = vcmp.ne.s32.totalorder %v3513_v46, 0  ;;  %v1979_v43 = vadd.f32 %v9960_v23, %v1681_v37  ;;  %v2232_v14 = vmul.f32 0.2, %v1976_v59  ;;  %v2233_v49 = vmul.f32 0.2, %v1977_v62 }
 0x3a9   :  { %vm11344_vm9 = vcmp.ne.s32.totalorder %v3514_v19, 0  ;;  %vm11348_vm10 = vcmp.ne.s32.totalorder %v3515_v13, 0  ;;  %v2234_v47 = vmul.f32 0.2, %v1978_v36  ;;  %v3324_v28 = vsel %vm11239_vm14, 16843009, %v15940_v22 }
 0x3aa   :  { %v2235_v41 = vmul.f32 0.2, %v1979_v43  ;;  %v2488_v46 = vmax.f32 %v1976_v59, %v2232_v14  ;;  %v2489_v44 = vmax.f32 %v1977_v62, %v2233_v49  ;;  %v3472_v37 = vunpack.c.0.s8 %v3324_v28 }
 0x3ab   :  { %v2490_v1 = vmax.f32 %v1978_v36, %v2234_v47  ;;  %v3473_v50 = vunpack.c.1.s8 %v3324_v28  ;;  %v3474_v51 = vunpack.c.2.s8 %v3324_v28  ;;  %v1936_v19 = vadd.f32 %v16351_v27, %v1631_v6 }
 0x3ac   :  { %v11358_v13 = vsel %vm11320_vm5, %v2447_v15, -1e+30  ;;  %v2491_v38 = vmax.f32 %v1979_v43, %v2235_v41  ;;  %v11362_v58 = vsel %vm11335_vm7, %v2488_v46, -1e+30  ;;  %v1937_v29 = vadd.f32 %v16352_v35, %v1631_v6  ;;  %v16942_v4 = vld [vmem:[#allocation195_spill] sm:$0xff] }
 0x3ad   :  { %16654 = vst [vmem:[#allocation198_spill] sm:$0xff] %v11358_v13  ;;  %16655 = vst [vmem:[#allocation199_spill] sm:$0xff] %v11362_v58  ;;  %v4365_v59 = vmax.f32 %v11318_v2, %v11358_v13  ;;  %v11369_v62 = vsel %vm11339_vm8, %v2489_v44, -1e+30  ;;  %v3475_v36 = vunpack.c.3.s8 %v3324_v28  ;;  %vm11371_vm11 = vcmp.ne.s32.totalorder %v3472_v37, 0 }
 0x3ae   :  { %16656 = vst [vmem:[#allocation200_spill] sm:$0xff] %v11369_v62  ;;  %v11376_v55 = vmax.f32 %v4158_v33, %v11362_v58  ;;  %v11380_v15 = vsel %vm11344_vm9, %v2490_v1, -1e+30  ;;  %v11384_v0 = vsel %vm11348_vm10, %v2491_v38, -1e+30  ;;  %vm11386_vm12 = vcmp.ne.s32.totalorder %v3473_v50, 0  ;;  %v1691_v38 = vpop.permute.xlu1 %1690 }
 0x3af   :  { %16659 = vst [vmem:[#allocation201_spill] sm:$0xff] %v11380_v15  ;;  %16660 = vst [vmem:[#allocation202_spill] sm:$0xff] %v11384_v0  ;;  %vm11390_vm13 = vcmp.ne.s32.totalorder %v3474_v51, 0  ;;  %v1938_v63 = vadd.f32 %v16353_v57, %v1631_v6  ;;  %v1939_v33 = vadd.f32 %v9960_v23, %v1631_v6  ;;  %v2192_v43 = vmul.f32 0.2, %v1936_v19  ;;  %v16943_v48 = vld [vmem:[#allocation197_spill] sm:$0xff] }
 0x3b0   :  { %v11397_v1 = vmax.f32 %v4227_v5, %v11369_v62  ;;  %v2193_v49 = vmul.f32 0.2, %v1937_v29  ;;  %v11402_v50 = vsel %vm2696_vm3, 16843009, %v15940_v22  ;;  %v11407_v51 = vsel %vm2697_vm4, 16843009, %v15940_v22 }
 0x3b1   :  { %v2194_v20 = vmul.f32 0.2, %v1938_v63  ;;  %v2195_v54 = vmul.f32 0.2, %v1939_v33  ;;  %v2448_v47 = vmax.f32 %v1936_v19, %v2192_v43  ;;  %v11412_v5 = vsel %vm2698_vm6, 16843009, %v15940_v22 }
 0x3b2   :  { %v2449_v6 = vmax.f32 %v1937_v29, %v2193_v49  ;;  %v11416_v56 = vsel %vm2699_vm1, 16843009, %v15940_v22  ;;  %v2944_v28 = vunpack.c.0.s8 %v11402_v50  ;;  %v2945_v12 = vunpack.c.0.s8 %v11407_v51 }
 0x3b3   :  { %v2450_v41 = vmax.f32 %v1938_v63, %v2194_v20  ;;  %v11422_v46 = vsel %vm11371_vm11, %v2448_v47, -1e+30  ;;  %v2946_v37 = vunpack.c.0.s8 %v11412_v5  ;;  %v1984_v11 = vadd.f32 %v16351_v27, %v1691_v38 }
 0x3b4   :  { %16665 = vst [vmem:[#allocation203_spill] sm:$0xff] %v11422_v46  ;;  %v11427_v19 = vmax.f32 %v4296_v21, %v11380_v15  ;;  %vm11429_vm14 = vcmp.ne.s32.totalorder %v3475_v36, 0  ;;  %v2947_v29 = vunpack.c.0.s8 %v11416_v56  ;;  %v3160_v43 = vpack.c.b16 %v2945_v12, %v2944_v28 }
 0x3b5   :  { %v11435_v63 = vmax.f32 %v4365_v59, %v11384_v0  ;;  %v2451_v14 = vmax.f32 %v1939_v33, %v2195_v54  ;;  %v11439_v49 = vsel %vm11390_vm13, %v2450_v41, -1e+30  ;;  %v1985_v20 = vadd.f32 %v16352_v35, %v1691_v38 }
 0x3b6   :  { %16668 = vst [vmem:[#allocation204_spill] sm:$0xff] %v11439_v49  ;;  %v4160_v21 = vmax.f32 %v11376_v55, %v11422_v46  ;;  %v11446_v36 = vsel %vm11386_vm12, %v2449_v6, -1e+30  ;;  %v3161_v47 = vpack.c.b16 %v2947_v29, %v2946_v37  ;;  %v1986_v28 = vadd.f32 %v16353_v57, %v1691_v38  ;;  %v1636_v55 = vpop.permute.xlu0 %1635 }
 0x3b7   :  { %16669 = vst [vmem:[#allocation205_spill] sm:$0xff] %v11446_v36  ;;  %v1987_v59 = vadd.f32 %v9960_v23, %v1691_v38  ;;  %v2240_v12 = vmul.f32 0.2, %v1984_v11  ;;  %v2241_v33 = vmul.f32 0.2, %v1985_v20  ;;  %v2900_v44 = vunpack.c.1.s8 %v9874_v60 }
 0x3b8   :  { %v3162_v54 = vpack.c.b8 %v3161_v47, %v3160_v43  ;;  %v2242_v41 = vmul.f32 0.2, %v1986_v28  ;;  %v2901_v0 = vunpack.c.1.s8 %v9877_v8  ;;  %v2902_v15 = vunpack.c.1.s8 %v9880_v9 }
 0x3b9   :  { %v4229_v2 = vmax.f32 %v11397_v1, %v11446_v36  ;;  %v2243_v6 = vmul.f32 0.2, %v1987_v59  ;;  %v2496_v37 = vmax.f32 %v1984_v11, %v2240_v12  ;;  %v2903_v29 = vunpack.c.1.s8 %v9883_v3 }
 0x3ba   :  { %vm3272_vm15 = vnez %v3162_v54  ;;  %v2497_v38 = vmax.f32 %v1985_v20, %v2241_v33  ;;  %v2498_v62 = vmax.f32 %v1986_v28, %v2242_v41  ;;  %v3127_v58 = vpack.c.b16 %v2901_v0, %v2900_v44 }
 0x3bb   :  { %v3336_v46 = vsel %vm3272_vm15, 16843009, %v15940_v22  ;;  %v2499_v43 = vmax.f32 %v1987_v59, %v2243_v6  ;;  %v3128_v47 = vpack.c.b16 %v2903_v29, %v2902_v15  ;;  %v1940_v13 = vadd.f32 %v16351_v27, %v1636_v55 }
 0x3bc   :  { %v3520_v7 = vunpack.c.0.s8 %v3336_v46  ;;  %v3521_v39 = vunpack.c.1.s8 %v3336_v46  ;;  %v3522_v32 = vunpack.c.2.s8 %v3336_v46  ;;  %v3523_v61 = vunpack.c.3.s8 %v3336_v46 }
 0x3bd   :  { %v11460_v1 = vsel %vm11429_vm14, %v2451_v14, -1e+30  ;;  %v3129_v11 = vpack.c.b8 %v3128_v47, %v3127_v58  ;;  %v1941_v12 = vadd.f32 %v16352_v35, %v1636_v55  ;;  %v1942_v20 = vadd.f32 %v16353_v57, %v1636_v55 }
 0x3be   :  { %16670 = vst [vmem:[#allocation206_spill] sm:$0xff] %v11460_v1  ;;  %vm3776_vm0 = vcmp.ne.s32.totalorder %v3520_v7, 0  ;;  %vm3777_vm2 = vcmp.ne.s32.totalorder %v3521_v39, 0  ;;  %vm3778_vm3 = vcmp.ne.s32.totalorder %v3522_v32, 0  ;;  %vm3779_vm4 = vcmp.ne.s32.totalorder %v3523_v61, 0 }
 0x3bf   :  { %v11464_v15 = vsel %vm3776_vm0, %v2496_v37, -1e+30  ;;  %vm3261_vm5 = vnez %v3129_v11  ;;  %v11467_v0 = vadd.f32 %v9960_v23, %v1636_v55  ;;  %v2196_v46 = vmul.f32 0.2, %v1940_v13 }
 0x3c0   :  { %16671 = vst [vmem:[#allocation207_spill] sm:$0xff] %v11464_v15  ;;  %v4298_v42 = vmax.f32 %v11427_v19, %v11439_v49  ;;  %v11471_v14 = vsel %vm3777_vm2, %v2497_v38, -1e+30  ;;  %v11473_v58 = vsel %vm3778_vm3, %v2498_v62, -1e+30  ;;  %v4367_v32 = vmax.f32 %v11435_v63, %v11460_v1  ;;  %v1701_v38 = vpop.permute.xlu1 %1700 }
 0x3c1   :  { %16672 = vst [vmem:[#allocation208_spill] sm:$0xff] %v11471_v14  ;;  %16673 = vst [vmem:[#allocation209_spill] sm:$0xff] %v11473_v58  ;;  %v11475_v28 = vsel %vm3779_vm4, %v2499_v43, -1e+30  ;;  %v3325_v61 = vsel %vm3261_vm5, 16843009, %v15940_v22  ;;  %v2452_v19 = vmax.f32 %v1940_v13, %v2196_v46  ;;  %v11484_v6 = vmax.f32 %v4160_v21, %v11464_v15 }
 0x3c2   :  { %16674 = vst [vmem:[#allocation210_spill] sm:$0xff] %v11475_v28  ;;  %v2197_v39 = vmul.f32 0.2, %v1941_v12  ;;  %v2198_v7 = vmul.f32 0.2, %v1942_v20  ;;  %v3476_v59 = vunpack.c.0.s8 %v3325_v61  ;;  %v3477_v33 = vunpack.c.1.s8 %v3325_v61 }
 0x3c3   :  { %v3478_v44 = vunpack.c.2.s8 %v3325_v61  ;;  %v3479_v54 = vunpack.c.3.s8 %v3325_v61  ;;  %v11481_v41 = vmul.f32 0.2, %v11467_v0  ;;  %v11487_v63 = vmax.f32 %v4229_v2, %v11471_v14 }
 0x3c4   :  { %v2453_v55 = vmax.f32 %v1941_v12, %v2197_v39  ;;  %v2454_v62 = vmax.f32 %v1942_v20, %v2198_v7  ;;  %vm3732_vm6 = vcmp.ne.s32.totalorder %v3476_v59, 0  ;;  %vm3733_vm7 = vcmp.ne.s32.totalorder %v3477_v33, 0 }
 0x3c5   :  { %vm3734_vm1 = vcmp.ne.s32.totalorder %v3478_v44, 0  ;;  %v11490_v37 = vmax.f32 %v4298_v42, %v11473_v58  ;;  %v11493_v29 = vmax.f32 %v4367_v32, %v11475_v28  ;;  %v2455_v13 = vmax.f32 %v11467_v0, %v11481_v41 }
 0x3c6   :  { %v11497_v43 = vsel %vm3732_vm6, %v2452_v19, -1e+30  ;;  %v11499_v21 = vsel %vm3733_vm7, %v2453_v55, -1e+30  ;;  %v2952_v47 = vunpack.c.2.s8 %v11402_v50  ;;  %vm11502_vm8 = vcmp.ne.s32.totalorder %v3479_v54, 0  ;;  %v1646_v55 = vpop.permute.xlu0 %1645 }
 0x3c7   :  { %16675 = vst [vmem:[#allocation211_spill] sm:$0xff] %v11497_v43  ;;  %16676 = vst [vmem:[#allocation212_spill] sm:$0xff] %v11499_v21  ;;  %v11506_v2 = vsel %vm3734_vm1, %v2454_v62, -1e+30  ;;  %v2953_v12 = vunpack.c.2.s8 %v11407_v51  ;;  %v2954_v20 = vunpack.c.2.s8 %v11412_v5  ;;  %v2955_v46 = vunpack.c.2.s8 %v11416_v56 }
 0x3c8   :  { %16679 = vst [vmem:[#allocation213_spill] sm:$0xff] %v11506_v2  ;;  %v4162_v0 = vmax.f32 %v11484_v6, %v11497_v43  ;;  %v1992_v42 = vadd.f32 %v16351_v27, %v1701_v38  ;;  %v1993_v32 = vadd.f32 %v16352_v35, %v1701_v38  ;;  %v1994_v61 = vadd.f32 %v16353_v57, %v1701_v38 }
 0x3c9   :  { %v3166_v39 = vpack.c.b16 %v2953_v12, %v2952_v47  ;;  %v3167_v7 = vpack.c.b16 %v2955_v46, %v2954_v20  ;;  %v1995_v59 = vadd.f32 %v9960_v23, %v1701_v38  ;;  %v2908_v33 = vunpack.c.3.s8 %v9874_v60 }
 0x3ca   :  { %v2248_v44 = vmul.f32 0.2, %v1992_v42  ;;  %v2249_v54 = vmul.f32 0.2, %v1993_v32  ;;  %v2250_v41 = vmul.f32 0.2, %v1994_v61  ;;  %v2909_v19 = vunpack.c.3.s8 %v9877_v8 }
 0x3cb   :  { %v4231_v62 = vmax.f32 %v11487_v63, %v11499_v21  ;;  %v3168_v6 = vpack.c.b8 %v3167_v7, %v3166_v39  ;;  %v2910_v28 = vunpack.c.3.s8 %v9880_v9  ;;  %v2911_v58 = vunpack.c.3.s8 %v9883_v3 }
 0x3cc   :  { %v4300_v47 = vmax.f32 %v11490_v37, %v11506_v2  ;;  %v2251_v38 = vmul.f32 0.2, %v1995_v59  ;;  %v2504_v12 = vmax.f32 %v1992_v42, %v2248_v44  ;;  %v3133_v60 = vpack.c.b16 %v2909_v19, %v2908_v33 }
 0x3cd   :  { %vm3274_vm9 = vnez %v3168_v6  ;;  %v2505_v20 = vmax.f32 %v1993_v32, %v2249_v54  ;;  %v3134_v46 = vpack.c.b16 %v2911_v58, %v2910_v28  ;;  %v1948_v8 = vadd.f32 %v16351_v27, %v1646_v55  ;;  %v1656_v6 = vpop.permute.xlu0 %1655 }
 0x3ce   :  { %v3338_v14 = vsel %vm3274_vm9, 16843009, %v15940_v22  ;;  %v2506_v15 = vmax.f32 %v1994_v61, %v2250_v41  ;;  %v1949_v63 = vadd.f32 %v16352_v35, %v1646_v55  ;;  %v1950_v9 = vadd.f32 %v16353_v57, %v1646_v55 }
 0x3cf   :  { %v3528_v39 = vunpack.c.0.s8 %v3338_v14  ;;  %v3529_v3 = vunpack.c.1.s8 %v3338_v14  ;;  %v3530_v7 = vunpack.c.2.s8 %v3338_v14  ;;  %v3531_v21 = vunpack.c.3.s8 %v3338_v14 }
 0x3d0   :  { %v2507_v37 = vmax.f32 %v1995_v59, %v2251_v38  ;;  %v3135_v2 = vpack.c.b8 %v3134_v46, %v3133_v60  ;;  %v1951_v42 = vadd.f32 %v9960_v23, %v1646_v55  ;;  %v2204_v33 = vmul.f32 0.2, %v1948_v8 }
 0x3d1   :  { %vm3784_vm10 = vcmp.ne.s32.totalorder %v3528_v39, 0  ;;  %vm3785_vm11 = vcmp.ne.s32.totalorder %v3529_v3, 0  ;;  %vm3786_vm12 = vcmp.ne.s32.totalorder %v3530_v7, 0  ;;  %vm3787_vm13 = vcmp.ne.s32.totalorder %v3531_v21, 0  ;;  %v16690_v7 = vld [vmem:[#allocation95_spill] sm:$0xff] }
 0x3d2   :  { %v11532_v58 = vsel %vm11502_vm8, %v2455_v13, -1e+30  ;;  %vm3263_vm14 = vnez %v3135_v2  ;;  %v2205_v28 = vmul.f32 0.2, %v1949_v63  ;;  %v2206_v32 = vmul.f32 0.2, %v1950_v9 }
 0x3d3   :  { %16680 = vst [vmem:[#allocation214_spill] sm:$0xff] %v11532_v58  ;;  %v4369_v61 = vmax.f32 %v11493_v29, %v11532_v58  ;;  %v11536_v14 = vsel %vm3784_vm10, %v2504_v12, -1e+30  ;;  %v11538_v59 = vsel %vm3785_vm11, %v2505_v20, -1e+30  ;;  %v2460_v11 = vmax.f32 %v1948_v8, %v2204_v33 }
 0x3d4   :  { %16681 = vst [vmem:[#allocation215_spill] sm:$0xff] %v11536_v14  ;;  %16682 = vst [vmem:[#allocation216_spill] sm:$0xff] %v11538_v59  ;;  %v11540_v44 = vsel %vm3786_vm12, %v2506_v15, -1e+30  ;;  %v11542_v54 = vsel %vm3787_vm13, %v2507_v37, -1e+30  ;;  %v11546_v38 = vmax.f32 %v4162_v0, %v11536_v14  ;;  %v2461_v29 = vmax.f32 %v1949_v63, %v2205_v28 }
 0x3d5   :  { %16683 = vst [vmem:[#allocation217_spill] sm:$0xff] %v11540_v44  ;;  %16684 = vst [vmem:[#allocation218_spill] sm:$0xff] %v11542_v54  ;;  %v3327_v21 = vsel %vm3263_vm14, 16843009, %v15940_v22  ;;  %v2207_v41 = vmul.f32 0.2, %v1951_v42  ;;  %v2462_v12 = vmax.f32 %v1950_v9, %v2206_v32  ;;  %v2916_v60 = vunpack.c.1.s8 %v9947_v45 }
 0x3d6   :  { %v3484_v13 = vunpack.c.0.s8 %v3327_v21  ;;  %v3485_v19 = vunpack.c.1.s8 %v3327_v21  ;;  %v3486_v2 = vunpack.c.2.s8 %v3327_v21  ;;  %v3487_v55 = vunpack.c.3.s8 %v3327_v21  ;;  %v1666_v21 = vpop.permute.xlu0 %1665 }
 0x3d7   :  { %v11550_v15 = vmax.f32 %v4231_v62, %v11538_v59  ;;  %v11553_v20 = vmax.f32 %v4300_v47, %v11540_v44  ;;  %v11556_v46 = vmax.f32 %v4369_v61, %v11542_v54  ;;  %v2917_v0 = vunpack.c.1.s8 %v9957_v16 }
 0x3d8   :  { %vm3740_vm15 = vcmp.ne.s32.totalorder %v3484_v13, 0  ;;  %vm3741_vm0 = vcmp.ne.s32.totalorder %v3485_v19, 0  ;;  %vm3742_vm2 = vcmp.ne.s32.totalorder %v3486_v2, 0  ;;  %vm11558_vm3 = vcmp.ne.s32.totalorder %v3487_v55, 0 }
 0x3d9   :  { %v2463_v63 = vmax.f32 %v1951_v42, %v2207_v41  ;;  %v11563_v9 = vsel %vm3740_vm15, %v2460_v11, -1e+30  ;;  %v11565_v62 = vsel %vm3741_vm0, %v2461_v29, -1e+30  ;;  %v11567_v39 = vsel %vm3742_vm2, %v2462_v12, -1e+30 }
 0x3da   :  { %16687 = vst [vmem:[#allocation219_spill] sm:$0xff] %v11563_v9  ;;  %16688 = vst [vmem:[#allocation220_spill] sm:$0xff] %v11565_v62  ;;  %v2918_v3 = vunpack.c.1.s8 %v9973_v53  ;;  %v2919_v37 = vunpack.c.1.s8 %v16690_v7  ;;  %v3139_v33 = vpack.c.b16 %v2917_v0, %v2916_v60  ;;  %v1956_v28 = vadd.f32 %v16351_v27, %v1656_v6 }
 0x3db   :  { %16689 = vst [vmem:[#allocation221_spill] sm:$0xff] %v11567_v39  ;;  %v1957_v32 = vadd.f32 %v16352_v35, %v1656_v6  ;;  %v1958_v42 = vadd.f32 %v16353_v57, %v1656_v6  ;;  %v1959_v61 = vadd.f32 %v9960_v23, %v1656_v6  ;;  %v2924_v11 = vunpack.c.3.s8 %v9947_v45 }
 0x3dc   :  { %v3140_v41 = vpack.c.b16 %v2919_v37, %v2918_v3  ;;  %v2925_v13 = vunpack.c.3.s8 %v9957_v16  ;;  %v2926_v19 = vunpack.c.3.s8 %v9973_v53  ;;  %v2212_v2 = vmul.f32 0.2, %v1956_v28 }
 0x3dd   :  { %v2213_v55 = vmul.f32 0.2, %v1957_v32  ;;  %v2214_v29 = vmul.f32 0.2, %v1958_v42  ;;  %v2927_v12 = vunpack.c.3.s8 %v16690_v7  ;;  %v11583_v60 = vsel %vm11558_vm3, %v2463_v63, -1e+30 }
 0x3de   :  { %16691 = vst [vmem:[#allocation95_spill] sm:$0xff] %v11583_v60  ;;  %v3141_v0 = vpack.c.b8 %v3140_v41, %v3139_v33  ;;  %v3145_v47 = vpack.c.b16 %v2925_v13, %v2924_v11  ;;  %v1964_v6 = vadd.f32 %v16351_v27, %v1666_v21  ;;  %v2215_v3 = vmul.f32 0.2, %v1959_v61 }
 0x3df   :  { %v2468_v37 = vmax.f32 %v1956_v28, %v2212_v2  ;;  %v2469_v45 = vmax.f32 %v1957_v32, %v2213_v55  ;;  %v3146_v54 = vpack.c.b16 %v2927_v12, %v2926_v19  ;;  %v2470_v16 = vmax.f32 %v1958_v42, %v2214_v29 }
 0x3e0   :  { %vm3265_vm4 = vnez %v3141_v0  ;;  %v1965_v53 = vadd.f32 %v16352_v35, %v1666_v21  ;;  %v1966_v44 = vadd.f32 %v16353_v57, %v1666_v21  ;;  %v1967_v8 = vadd.f32 %v9960_v23, %v1666_v21 }
 0x3e1   :  { %v3329_v7 = vsel %vm3265_vm4, 16843009, %v15940_v22  ;;  %v3147_v59 = vpack.c.b8 %v3146_v54, %v3145_v47  ;;  %v2220_v63 = vmul.f32 0.2, %v1964_v6  ;;  %v2471_v14 = vmax.f32 %v1959_v61, %v2215_v3 }
 0x3e2   :  { %v3492_v33 = vunpack.c.0.s8 %v3329_v7  ;;  %v3493_v41 = vunpack.c.1.s8 %v3329_v7  ;;  %v3494_v11 = vunpack.c.2.s8 %v3329_v7  ;;  %v3495_v13 = vunpack.c.3.s8 %v3329_v7 }
 0x3e3   :  { %vm11590_vm5 = vnez %v3147_v59  ;;  %v2221_v32 = vmul.f32 0.2, %v1965_v53  ;;  %v2222_v42 = vmul.f32 0.2, %v1966_v44  ;;  %v4233_v54 = vmax.f32 %v11550_v15, %v11565_v62 }
 0x3e4   :  { %vm3748_vm6 = vcmp.ne.s32.totalorder %v3492_v33, 0  ;;  %vm3749_vm7 = vcmp.ne.s32.totalorder %v3493_v41, 0  ;;  %vm3750_vm1 = vcmp.ne.s32.totalorder %v3494_v11, 0  ;;  %vm3751_vm8 = vcmp.ne.s32.totalorder %v3495_v13, 0  ;;  %v1676_v33 = vpop.permute.xlu0 %1675  ;;  %v16698_v41 = vld [vmem:[#allocation92_spill] sm:$0xff]  ;;  %v16699_v11 = vld [vmem:[#allocation98_spill] sm:$0xff] }
 0x3e5   :  { %v4302_v47 = vmax.f32 %v11553_v20, %v11567_v39  ;;  %v4371_v21 = vmax.f32 %v11556_v46, %v11583_v60  ;;  %v2223_v61 = vmul.f32 0.2, %v1967_v8  ;;  %v11600_v59 = vsel %vm3748_vm6, %v2468_v37, -1e+30  ;;  %v16700_v13 = vld [vmem:[#allocation74_spill] sm:$0xff] }
 0x3e6   :  { %16694 = vst [vmem:[#allocation222_spill] sm:$0xff] %v11600_v59  ;;  %v11602_v19 = vsel %vm3749_vm7, %v2469_v45, -1e+30  ;;  %v11604_v2 = vsel %vm3750_vm1, %v2470_v16, -1e+30  ;;  %v2476_v55 = vmax.f32 %v1964_v6, %v2220_v63  ;;  %v2477_v12 = vmax.f32 %v1965_v53, %v2221_v32  ;;  %v16702_v63 = vld [vmem:[#allocation82_spill] sm:$0xff] }
 0x3e7   :  { %16695 = vst [vmem:[#allocation223_spill] sm:$0xff] %v11602_v19  ;;  %16696 = vst [vmem:[#allocation224_spill] sm:$0xff] %v11604_v2  ;;  %v11606_v29 = vsel %vm3751_vm8, %v2471_v14, -1e+30  ;;  %v3331_v15 = vsel %vm11590_vm5, 16843009, %v15940_v22  ;;  %v2478_v0 = vmax.f32 %v1966_v44, %v2222_v42  ;;  %v2479_v37 = vmax.f32 %v1967_v8, %v2223_v61 }
 0x3e8   :  { %16697 = vst [vmem:[#allocation225_spill] sm:$0xff] %v11606_v29  ;;  %v3500_v20 = vunpack.c.0.s8 %v3331_v15  ;;  %v3501_v3 = vunpack.c.1.s8 %v3331_v15  ;;  %v3502_v7 = vunpack.c.2.s8 %v3331_v15  ;;  %v3503_v46 = vunpack.c.3.s8 %v3331_v15 }
 0x3e9   :  { %v2932_v45 = vunpack.c.1.s8 %v16698_v41  ;;  %v2933_v16 = vunpack.c.1.s8 %v16699_v11  ;;  %v2934_v6 = vunpack.c.1.s8 %v16700_v13  ;;  %v16701_v14 = vmax.f32 %v11546_v38, %v11563_v9 }
 0x3ea   :  { %vm3756_vm9 = vcmp.ne.s32.totalorder %v3500_v20, 0  ;;  %vm3757_vm10 = vcmp.ne.s32.totalorder %v3501_v3, 0  ;;  %vm3758_vm11 = vcmp.ne.s32.totalorder %v3502_v7, 0  ;;  %vm3759_vm12 = vcmp.ne.s32.totalorder %v3503_v46, 0 }
 0x3eb   :  { %v4165_v44 = vmax.f32 %v16701_v14, %v11600_v59  ;;  %v11619_v53 = vmax.f32 %v4233_v54, %v11602_v19  ;;  %v11622_v8 = vmax.f32 %v4302_v47, %v11604_v2  ;;  %v2935_v28 = vunpack.c.1.s8 %v16702_v63 }
 0x3ec   :  { %v11626_v32 = vmax.f32 %v4371_v21, %v11606_v29  ;;  %v11628_v42 = vsel %vm3756_vm9, %v2476_v55, -1e+30  ;;  %v11630_v61 = vsel %vm3757_vm10, %v2477_v12, -1e+30  ;;  %v11632_v15 = vsel %vm3758_vm11, %v2478_v0, -1e+30  ;;  %v1686_v55 = vpop.permute.xlu0 %1685 }
 0x3ed   :  { %16703 = vst [vmem:[#allocation92_spill] sm:$0xff] %v11630_v61  ;;  %16704 = vst [vmem:[#allocation98_spill] sm:$0xff] %v11632_v15  ;;  %v11634_v20 = vsel %vm3759_vm12, %v2479_v37, -1e+30  ;;  %v3151_v38 = vpack.c.b16 %v2933_v16, %v2932_v45  ;;  %v3152_v3 = vpack.c.b16 %v2935_v28, %v2934_v6  ;;  %v1972_v54 = vadd.f32 %v16351_v27, %v1676_v33 }
 0x3ee   :  { %16705 = vst [vmem:[#allocation74_spill] sm:$0xff] %v11634_v20  ;;  %v1973_v47 = vadd.f32 %v16352_v35, %v1676_v33  ;;  %v1974_v7 = vadd.f32 %v16353_v57, %v1676_v33  ;;  %v1975_v46 = vadd.f32 %v9960_v23, %v1676_v33  ;;  %v2940_v21 = vunpack.c.3.s8 %v16698_v41 }
 0x3ef   :  { %v3153_v14 = vpack.c.b8 %v3152_v3, %v3151_v38  ;;  %v2228_v12 = vmul.f32 0.2, %v1972_v54  ;;  %v2941_v0 = vunpack.c.3.s8 %v16699_v11  ;;  %v2942_v37 = vunpack.c.3.s8 %v16700_v13 }
 0x3f0   :  { %v2229_v29 = vmul.f32 0.2, %v1973_v47  ;;  %v2230_v45 = vmul.f32 0.2, %v1974_v7  ;;  %v2231_v16 = vmul.f32 0.2, %v1975_v46  ;;  %v2943_v6 = vunpack.c.3.s8 %v16702_v63 }
 0x3f1   :  { %vm3269_vm13 = vnez %v3153_v14  ;;  %v2484_v28 = vmax.f32 %v1972_v54, %v2228_v12  ;;  %v3157_v2 = vpack.c.b16 %v2941_v0, %v2940_v21  ;;  %v1980_v19 = vadd.f32 %v16351_v27, %v1686_v55 }
 0x3f2   :  { %v3333_v33 = vsel %vm3269_vm13, 16843009, %v15940_v22  ;;  %v2485_v41 = vmax.f32 %v1973_v47, %v2229_v29  ;;  %v2486_v59 = vmax.f32 %v1974_v7, %v2230_v45  ;;  %v2487_v38 = vmax.f32 %v1975_v46, %v2231_v16  ;;  %v1696_v16 = vpop.permute.xlu0 %1695 }
 0x3f3   :  { %v3508_v3 = vunpack.c.0.s8 %v3333_v33  ;;  %v3509_v60 = vunpack.c.1.s8 %v3333_v33  ;;  %v3510_v11 = vunpack.c.2.s8 %v3333_v33  ;;  %v3511_v39 = vunpack.c.3.s8 %v3333_v33 }
 0x3f4   :  { %v3158_v13 = vpack.c.b16 %v2943_v6, %v2942_v37  ;;  %v1981_v62 = vadd.f32 %v16352_v35, %v1686_v55  ;;  %v1982_v9 = vadd.f32 %v16353_v57, %v1686_v55  ;;  %v1983_v63 = vadd.f32 %v9960_v23, %v1686_v55 }
 0x3f5   :  { %vm3764_vm14 = vcmp.ne.s32.totalorder %v3508_v3, 0  ;;  %vm3765_vm15 = vcmp.ne.s32.totalorder %v3509_v60, 0  ;;  %vm3766_vm0 = vcmp.ne.s32.totalorder %v3510_v11, 0  ;;  %vm3767_vm2 = vcmp.ne.s32.totalorder %v3511_v39, 0 }
 0x3f6   :  { %v4166_v54 = vmax.f32 %v4165_v44, %v11628_v42  ;;  %v4235_v29 = vmax.f32 %v11619_v53, %v11630_v61  ;;  %v11652_v47 = vsel %vm3764_vm14, %v2484_v28, -1e+30  ;;  %v3159_v7 = vpack.c.b8 %v3158_v13, %v3157_v2 }
 0x3f7   :  { %16706 = vst [vmem:[#allocation82_spill] sm:$0xff] %v11652_v47  ;;  %v4304_v46 = vmax.f32 %v11622_v8, %v11632_v15  ;;  %v4373_v21 = vmax.f32 %v11626_v32, %v11634_v20  ;;  %v11658_v14 = vsel %vm3765_vm15, %v2485_v41, -1e+30  ;;  %v11660_v55 = vsel %vm3766_vm0, %v2486_v59, -1e+30 }
 0x3f8   :  { %16707 = vst [vmem:[#allocation226_spill] sm:$0xff] %v11658_v14  ;;  %16708 = vst [vmem:[#allocation227_spill] sm:$0xff] %v11660_v55  ;;  %v11662_v60 = vsel %vm3767_vm2, %v2487_v38, -1e+30  ;;  %vm3271_vm3 = vnez %v3159_v7  ;;  %v2236_v39 = vmul.f32 0.2, %v1980_v19  ;;  %v11665_v53 = vmax.f32 %v4166_v54, %v11652_v47 }
 0x3f9   :  { %16709 = vst [vmem:[#allocation228_spill] sm:$0xff] %v11662_v60  ;;  %v2237_v44 = vmul.f32 0.2, %v1981_v62  ;;  %v3335_v2 = vsel %vm3271_vm3, 16843009, %v15940_v22  ;;  %v2948_v33 = vunpack.c.1.s8 %v11402_v50  ;;  %v11670_v41 = vmax.f32 %v4235_v29, %v11658_v14 }
 0x3fa   :  { %v2238_v12 = vmul.f32 0.2, %v1982_v9  ;;  %v2239_v0 = vmul.f32 0.2, %v1983_v63  ;;  %v3516_v8 = vunpack.c.0.s8 %v3335_v2  ;;  %v3517_v37 = vunpack.c.1.s8 %v3335_v2 }
 0x3fb   :  { %v3518_v45 = vunpack.c.2.s8 %v3335_v2  ;;  %v3519_v32 = vunpack.c.3.s8 %v3335_v2  ;;  %v2492_v6 = vmax.f32 %v1980_v19, %v2236_v39  ;;  %v2493_v59 = vmax.f32 %v1981_v62, %v2237_v44 }
 0x3fc   :  { %v2494_v28 = vmax.f32 %v1982_v9, %v2238_v12  ;;  %vm3772_vm4 = vcmp.ne.s32.totalorder %v3516_v8, 0  ;;  %vm3773_vm5 = vcmp.ne.s32.totalorder %v3517_v37, 0  ;;  %v11673_v38 = vmax.f32 %v4304_v46, %v11660_v55  ;;  %v1706_v12 = vpop.permute.xlu0 %1705 }
 0x3fd   :  { %vm3774_vm6 = vcmp.ne.s32.totalorder %v3518_v45, 0  ;;  %v11676_v3 = vmax.f32 %v4373_v21, %v11662_v60  ;;  %v11678_v11 = vsel %vm3772_vm4, %v2492_v6, -1e+30  ;;  %v2949_v19 = vunpack.c.1.s8 %v11407_v51 }
 0x3fe   :  { %16710 = vst [vmem:[#allocation229_spill] sm:$0xff] %v11678_v11  ;;  %vm11681_vm7 = vcmp.ne.s32.totalorder %v3519_v32, 0  ;;  %v2495_v62 = vmax.f32 %v1983_v63, %v2239_v0  ;;  %v11685_v13 = vsel %vm3773_vm5, %v2493_v59, -1e+30  ;;  %v11687_v54 = vsel %vm3774_vm6, %v2494_v28, -1e+30 }
 0x3ff   :  { %16713 = vst [vmem:[#allocation230_spill] sm:$0xff] %v11685_v13  ;;  %16714 = vst [vmem:[#allocation231_spill] sm:$0xff] %v11687_v54  ;;  %v2950_v7 = vunpack.c.1.s8 %v11412_v5  ;;  %v2951_v46 = vunpack.c.1.s8 %v11416_v56  ;;  %v3163_v21 = vpack.c.b16 %v2949_v19, %v2948_v33  ;;  %v1988_v39 = vadd.f32 %v16351_v27, %v1696_v16 }
 0x400   :  { %v1989_v44 = vadd.f32 %v16352_v35, %v1696_v16  ;;  %v1990_v2 = vadd.f32 %v16353_v57, %v1696_v16  ;;  %v1991_v63 = vadd.f32 %v9960_v23, %v1696_v16  ;;  %v2956_v8 = vunpack.c.3.s8 %v11402_v50 }
 0x401   :  { %v3164_v0 = vpack.c.b16 %v2951_v46, %v2950_v7  ;;  %v2957_v37 = vunpack.c.3.s8 %v11407_v51  ;;  %v2958_v45 = vunpack.c.3.s8 %v11412_v5  ;;  %v2244_v32 = vmul.f32 0.2, %v1988_v39 }
 0x402   :  { %v2245_v6 = vmul.f32 0.2, %v1989_v44  ;;  %v2246_v59 = vmul.f32 0.2, %v1990_v2  ;;  %v2959_v28 = vunpack.c.3.s8 %v11416_v56  ;;  %v11703_v33 = vsel %vm11681_vm7, %v2495_v62, -1e+30 }
 0x403   :  { %16715 = vst [vmem:[#allocation232_spill] sm:$0xff] %v11703_v33  ;;  %v3165_v19 = vpack.c.b8 %v3164_v0, %v3163_v21  ;;  %v3169_v29 = vpack.c.b16 %v2957_v37, %v2956_v8  ;;  %v1996_v16 = vadd.f32 %v16351_v27, %v1706_v12  ;;  %v2247_v7 = vmul.f32 0.2, %v1991_v63 }
 0x404   :  { %v2500_v46 = vmax.f32 %v1988_v39, %v2244_v32  ;;  %v2501_v50 = vmax.f32 %v1989_v44, %v2245_v6  ;;  %v3170_v60 = vpack.c.b16 %v2959_v28, %v2958_v45  ;;  %v2502_v51 = vmax.f32 %v1990_v2, %v2246_v59  ;;  %v2637_v32 = vld [vmem:[%s15072_s5 + $0x168] sm:$0xff] }
 0x405   :  { %vm3273_vm1 = vnez %v3165_v19  ;;  %v1997_v5 = vadd.f32 %v16352_v35, %v1706_v12  ;;  %v1998_v55 = vadd.f32 %v16353_v57, %v1706_v12  ;;  %v11710_v9 = vadd.f32 %v9960_v23, %v1706_v12 }
 0x406   :  { %v3337_v56 = vsel %vm3273_vm1, 16843009, %v15940_v22  ;;  %v3171_v14 = vpack.c.b8 %v3170_v60, %v3169_v29  ;;  %v2252_v62 = vmul.f32 0.2, %v1996_v16  ;;  %v2503_v39 = vmax.f32 %v1991_v63, %v2247_v7  ;;  %v2636_v63 = vld [vmem:[%s15072_s5 + $0x160] sm:$0xff] }
 0x407   :  { %v3524_v21 = vunpack.c.0.s8 %v3337_v56  ;;  %v3525_v0 = vunpack.c.1.s8 %v3337_v56  ;;  %v3526_v8 = vunpack.c.2.s8 %v3337_v56  ;;  %v3527_v37 = vunpack.c.3.s8 %v3337_v56  ;;  %v2638_v56 = vld [vmem:[%s15072_s5 + $0x170] sm:$0xff] }
 0x408   :  { %vm11712_vm8 = vnez %v3171_v14  ;;  %v2253_v2 = vmul.f32 0.2, %v1997_v5  ;;  %v2254_v45 = vmul.f32 0.2, %v1998_v55  ;;  %v4237_v60 = vmax.f32 %v11670_v41, %v11685_v13 }
 0x409   :  { %vm3780_vm9 = vcmp.ne.s32.totalorder %v3524_v21, 0  ;;  %vm3781_vm10 = vcmp.ne.s32.totalorder %v3525_v0, 0  ;;  %vm3782_vm11 = vcmp.ne.s32.totalorder %v3526_v8, 0  ;;  %vm3783_vm12 = vcmp.ne.s32.totalorder %v3527_v37, 0 }
 0x40a   :  { %v4306_v29 = vmax.f32 %v11673_v38, %v11687_v54  ;;  %v4375_v12 = vmax.f32 %v11676_v3, %v11703_v33  ;;  %v2255_v14 = vmul.f32 0.2, %v11710_v9  ;;  %v11729_v6 = vsel %vm3780_vm9, %v2500_v46, -1e+30 }
 0x40b   :  { %16718 = vst [vmem:[#allocation233_spill] sm:$0xff] %v11729_v6  ;;  %v11731_v59 = vsel %vm3781_vm10, %v2501_v50, -1e+30  ;;  %v11733_v41 = vsel %vm3782_vm11, %v2502_v51, -1e+30  ;;  %v2508_v38 = vmax.f32 %v1996_v16, %v2252_v62  ;;  %v2509_v19 = vmax.f32 %v1997_v5, %v2253_v2  ;;  %v2639_v16 = vld [vmem:[%s15072_s5 + $0x178] sm:$0xff] }
 0x40c   :  { %16719 = vst [vmem:[#allocation234_spill] sm:$0xff] %v11731_v59  ;;  %16720 = vst [vmem:[#allocation235_spill] sm:$0xff] %v11733_v41  ;;  %v11735_v28 = vsel %vm3783_vm12, %v2503_v39, -1e+30  ;;  %v3339_v3 = vsel %vm11712_vm8, 16843009, %v15940_v22  ;;  %v2510_v7 = vmax.f32 %v1998_v55, %v2254_v45  ;;  %v16722_v51 = vmax.f32 %v11665_v53, %v11678_v11  ;;  %v1711_v45 = vpop.permute.xlu1 %1710 }
 0x40d   :  { %16721 = vst [vmem:[#allocation236_spill] sm:$0xff] %v11735_v28  ;;  %v3532_v21 = vunpack.c.0.s8 %v3339_v3  ;;  %v3533_v46 = vunpack.c.1.s8 %v3339_v3  ;;  %v3534_v0 = vunpack.c.2.s8 %v3339_v3  ;;  %v3535_v50 = vunpack.c.3.s8 %v3339_v3 }
 0x40e   :  { %v11750_v62 = vmax.f32 %v16722_v51, %v11729_v6  ;;  %v11753_v55 = vmax.f32 %v4237_v60, %v11731_v59  ;;  %vm2700_vm13 = vnez %v2636_v63  ;;  %vm2701_vm14 = vnez %v2637_v32 }
 0x40f   :  { %vm3788_vm15 = vcmp.ne.s32.totalorder %v3532_v21, 0  ;;  %vm3789_vm0 = vcmp.ne.s32.totalorder %v3533_v46, 0  ;;  %vm3790_vm2 = vcmp.ne.s32.totalorder %v3534_v0, 0  ;;  %vm2702_vm3 = vnez %v2638_v56 }
 0x410   :  { %v11756_v5 = vmax.f32 %v4306_v29, %v11733_v41  ;;  %v11759_v8 = vmax.f32 %v4375_v12, %v11735_v28  ;;  %v11761_v37 = vsel %vm3788_vm15, %v2508_v38, -1e+30  ;;  %vm2703_vm4 = vnez %v2639_v16  ;;  %v1716_v28 = vpop.permute.xlu0 %1715 }
 0x411   :  { %16723 = vst [vmem:[#allocation237_spill] sm:$0xff] %v11761_v37  ;;  %vm11763_vm5 = vcmp.ne.s32.totalorder %v3535_v50, 0  ;;  %v2511_v39 = vmax.f32 %v11710_v9, %v2255_v14  ;;  %v11768_v44 = vsel %vm3789_vm0, %v2509_v19, -1e+30  ;;  %v11770_v2 = vsel %vm3790_vm2, %v2510_v7, -1e+30 }
 0x412   :  { %16726 = vst [vmem:[#allocation238_spill] sm:$0xff] %v11768_v44  ;;  %16727 = vst [vmem:[#allocation239_spill] sm:$0xff] %v11770_v2  ;;  %v4170_v60 = vmax.f32 %v11750_v62, %v11761_v37  ;;  %v11776_v29 = vsel %vm2700_vm13, 16843009, %v15940_v22  ;;  %v11780_v12 = vsel %vm2701_vm14, 16843009, %v15940_v22  ;;  %v2000_v7 = vadd.f32 %v16351_v27, %v1711_v45 }
 0x413   :  { %v11783_v38 = vsel %vm2702_vm3, 16843009, %v15940_v22  ;;  %v11786_v9 = vsel %vm2703_vm4, 16843009, %v15940_v22  ;;  %v2960_v14 = vunpack.c.0.s8 %v11776_v29  ;;  %v2961_v3 = vunpack.c.0.s8 %v11780_v12 }
 0x414   :  { %v2962_v19 = vunpack.c.0.s8 %v11783_v38  ;;  %v2963_v63 = vunpack.c.0.s8 %v11786_v9  ;;  %v2001_v32 = vadd.f32 %v16352_v35, %v1711_v45  ;;  %v2002_v56 = vadd.f32 %v16353_v57, %v1711_v45 }
 0x415   :  { %v3172_v21 = vpack.c.b16 %v2961_v3, %v2960_v14  ;;  %v2003_v46 = vadd.f32 %v9960_v23, %v1711_v45  ;;  %v2964_v0 = vunpack.c.1.s8 %v11776_v29  ;;  %v2965_v50 = vunpack.c.1.s8 %v11780_v12 }
 0x416   :  { %v3173_v16 = vpack.c.b16 %v2963_v63, %v2962_v19  ;;  %v2256_v51 = vmul.f32 0.2, %v2000_v7  ;;  %v2257_v62 = vmul.f32 0.2, %v2001_v32  ;;  %v2258_v37 = vmul.f32 0.2, %v2002_v56 }
 0x417   :  { %v4239_v41 = vmax.f32 %v11753_v55, %v11768_v44  ;;  %v2966_v59 = vunpack.c.1.s8 %v11783_v38  ;;  %v2967_v6 = vunpack.c.1.s8 %v11786_v9  ;;  %v3175_v33 = vpack.c.b16 %v2965_v50, %v2964_v0 }
 0x418   :  { %v11804_v45 = vsel %vm11763_vm5, %v2511_v39, -1e+30  ;;  %v3174_v14 = vpack.c.b8 %v3173_v16, %v3172_v21  ;;  %v2259_v3 = vmul.f32 0.2, %v2003_v46  ;;  %v2512_v54 = vmax.f32 %v2000_v7, %v2256_v51 }
 0x419   :  { %16728 = vst [vmem:[#allocation240_spill] sm:$0xff] %v11804_v45  ;;  %v2513_v19 = vmax.f32 %v2001_v32, %v2257_v62  ;;  %v3176_v63 = vpack.c.b16 %v2967_v6, %v2966_v59  ;;  %v2004_v13 = vadd.f32 %v16351_v27, %v1716_v28  ;;  %v2005_v11 = vadd.f32 %v16352_v35, %v1716_v28 }
 0x41a   :  { %vm3276_vm6 = vnez %v3174_v14  ;;  %v2514_v55 = vmax.f32 %v2002_v56, %v2258_v37  ;;  %v2006_v44 = vadd.f32 %v16353_v57, %v1716_v28  ;;  %v11810_v47 = vadd.f32 %v9960_v23, %v1716_v28 }
 0x41b   :  { %v3340_v53 = vsel %vm3276_vm6, 16843009, %v15940_v22  ;;  %v3177_v39 = vpack.c.b8 %v3176_v63, %v3175_v33  ;;  %v2260_v0 = vmul.f32 0.2, %v2004_v13  ;;  %v2261_v21 = vmul.f32 0.2, %v2005_v11 }
 0x41c   :  { %v3536_v50 = vunpack.c.0.s8 %v3340_v53  ;;  %v3537_v7 = vunpack.c.1.s8 %v3340_v53  ;;  %v3538_v32 = vunpack.c.2.s8 %v3340_v53  ;;  %v3539_v6 = vunpack.c.3.s8 %v3340_v53 }
 0x41d   :  { %v4308_v59 = vmax.f32 %v11756_v5, %v11770_v2  ;;  %v2515_v16 = vmax.f32 %v2003_v46, %v2259_v3  ;;  %vm11815_vm7 = vnez %v3177_v39  ;;  %v2262_v56 = vmul.f32 0.2, %v2006_v44  ;;  %v1721_v39 = vpop.permute.xlu1 %1720 }
 0x41e   :  { %vm3792_vm1 = vcmp.ne.s32.totalorder %v3536_v50, 0  ;;  %vm3793_vm8 = vcmp.ne.s32.totalorder %v3537_v7, 0  ;;  %vm3794_vm9 = vcmp.ne.s32.totalorder %v3538_v32, 0  ;;  %vm3795_vm10 = vcmp.ne.s32.totalorder %v3539_v6, 0 }
 0x41f   :  { %v4377_v33 = vmax.f32 %v11759_v8, %v11804_v45  ;;  %v11821_v28 = vsel %vm3792_vm1, %v2512_v54, -1e+30  ;;  %v2263_v51 = vmul.f32 0.2, %v11810_v47  ;;  %v2968_v62 = vunpack.c.2.s8 %v11776_v29 }
 0x420   :  { %16731 = vst [vmem:[#allocation241_spill] sm:$0xff] %v11821_v28  ;;  %v11825_v5 = vsel %vm3793_vm8, %v2513_v19, -1e+30  ;;  %v11827_v46 = vsel %vm3794_vm9, %v2514_v55, -1e+30  ;;  %v2516_v14 = vmax.f32 %v2004_v13, %v2260_v0  ;;  %v2517_v3 = vmax.f32 %v2005_v11, %v2261_v21 }
 0x421   :  { %16732 = vst [vmem:[#allocation242_spill] sm:$0xff] %v11825_v5  ;;  %16733 = vst [vmem:[#allocation243_spill] sm:$0xff] %v11827_v46  ;;  %v11830_v63 = vmax.f32 %v4170_v60, %v11821_v28  ;;  %v11832_v53 = vsel %vm3795_vm10, %v2515_v16, -1e+30  ;;  %v3341_v54 = vsel %vm11815_vm7, 16843009, %v15940_v22  ;;  %v2518_v8 = vmax.f32 %v2006_v44, %v2262_v56 }
 0x422   :  { %16734 = vst [vmem:[#allocation244_spill] sm:$0xff] %v11832_v53  ;;  %v3540_v50 = vunpack.c.0.s8 %v3341_v54  ;;  %v3541_v7 = vunpack.c.1.s8 %v3341_v54  ;;  %v3542_v32 = vunpack.c.2.s8 %v3341_v54  ;;  %v3543_v19 = vunpack.c.3.s8 %v3341_v54 }
 0x423   :  { %v11838_v55 = vmax.f32 %v4239_v41, %v11825_v5  ;;  %v2969_v11 = vunpack.c.2.s8 %v11780_v12  ;;  %v2970_v13 = vunpack.c.2.s8 %v11783_v38  ;;  %v2971_v60 = vunpack.c.2.s8 %v11786_v9 }
 0x424   :  { %vm3796_vm11 = vcmp.ne.s32.totalorder %v3540_v50, 0  ;;  %vm3797_vm12 = vcmp.ne.s32.totalorder %v3541_v7, 0  ;;  %vm3798_vm13 = vcmp.ne.s32.totalorder %v3542_v32, 0  ;;  %v2008_v0 = vadd.f32 %v16351_v27, %v1721_v39 }
 0x425   :  { %v11845_v44 = vmax.f32 %v4308_v59, %v11827_v46  ;;  %v11848_v21 = vmax.f32 %v4377_v33, %v11832_v53  ;;  %vm11850_vm14 = vcmp.ne.s32.totalorder %v3543_v19, 0  ;;  %v3178_v6 = vpack.c.b16 %v2969_v11, %v2968_v62  ;;  %v1726_v11 = vpop.permute.xlu0 %1725 }
 0x426   :  { %v2519_v16 = vmax.f32 %v11810_v47, %v2263_v51  ;;  %v11855_v37 = vsel %vm3796_vm11, %v2516_v14, -1e+30  ;;  %v11857_v56 = vsel %vm3797_vm12, %v2517_v3, -1e+30  ;;  %v11859_v54 = vsel %vm3798_vm13, %v2518_v8, -1e+30 }
 0x427   :  { %16737 = vst [vmem:[#allocation245_spill] sm:$0xff] %v11855_v37  ;;  %16738 = vst [vmem:[#allocation246_spill] sm:$0xff] %v11857_v56  ;;  %v4172_v59 = vmax.f32 %v11830_v63, %v11855_v37  ;;  %v3179_v50 = vpack.c.b16 %v2971_v60, %v2970_v13  ;;  %v2009_v33 = vadd.f32 %v16352_v35, %v1721_v39  ;;  %v2264_v19 = vmul.f32 0.2, %v2008_v0 }
 0x428   :  { %16739 = vst [vmem:[#allocation247_spill] sm:$0xff] %v11859_v54  ;;  %v2010_v7 = vadd.f32 %v16353_v57, %v1721_v39  ;;  %v2011_v32 = vadd.f32 %v9960_v23, %v1721_v39  ;;  %v2972_v62 = vunpack.c.3.s8 %v11776_v29  ;;  %v2973_v47 = vunpack.c.3.s8 %v11780_v12 }
 0x429   :  { %v3180_v51 = vpack.c.b8 %v3179_v50, %v3178_v6  ;;  %v2265_v14 = vmul.f32 0.2, %v2009_v33  ;;  %v2974_v8 = vunpack.c.3.s8 %v11783_v38  ;;  %v4241_v63 = vmax.f32 %v11838_v55, %v11857_v56 }
 0x42a   :  { %v2266_v3 = vmul.f32 0.2, %v2010_v7  ;;  %v2267_v13 = vmul.f32 0.2, %v2011_v32  ;;  %v2975_v60 = vunpack.c.3.s8 %v11786_v9  ;;  %v3181_v37 = vpack.c.b16 %v2973_v47, %v2972_v62 }
 0x42b   :  { %v11874_v39 = vsel %vm11850_vm14, %v2519_v16, -1e+30  ;;  %vm3278_vm15 = vnez %v3180_v51  ;;  %v2520_v29 = vmax.f32 %v2008_v0, %v2264_v19  ;;  %v2521_v12 = vmax.f32 %v2009_v33, %v2265_v14 }
 0x42c   :  { %16740 = vst [vmem:[#allocation248_spill] sm:$0xff] %v11874_v39  ;;  %v3342_v6 = vsel %vm3278_vm15, 16843009, %v15940_v22  ;;  %v2522_v50 = vmax.f32 %v2010_v7, %v2266_v3  ;;  %v3182_v53 = vpack.c.b16 %v2975_v60, %v2974_v8  ;;  %v2012_v38 = vadd.f32 %v16351_v27, %v1726_v11  ;;  %v2642_v60 = vld [vmem:[%s15072_s5 + $0x190] sm:$0xff] }
 0x42d   :  { %v3544_v46 = vunpack.c.0.s8 %v3342_v6  ;;  %v3545_v5 = vunpack.c.1.s8 %v3342_v6  ;;  %v3546_v55 = vunpack.c.2.s8 %v3342_v6  ;;  %v3547_v56 = vunpack.c.3.s8 %v3342_v6 }
 0x42e   :  { %v2523_v28 = vmax.f32 %v2011_v32, %v2267_v13  ;;  %v3183_v9 = vpack.c.b8 %v3182_v53, %v3181_v37  ;;  %v2013_v62 = vadd.f32 %v16352_v35, %v1726_v11  ;;  %v2014_v41 = vadd.f32 %v16353_v57, %v1726_v11 }
 0x42f   :  { %vm3800_vm0 = vcmp.ne.s32.totalorder %v3544_v46, 0  ;;  %vm3801_vm2 = vcmp.ne.s32.totalorder %v3545_v5, 0  ;;  %vm3802_vm3 = vcmp.ne.s32.totalorder %v3546_v55, 0  ;;  %v11881_v0 = vadd.f32 %v9960_v23, %v1726_v11 }
 0x430   :  { %vm3803_vm4 = vcmp.ne.s32.totalorder %v3547_v56, 0  ;;  %v11883_v16 = vsel %vm3800_vm0, %v2520_v29, -1e+30  ;;  %vm3279_vm5 = vnez %v3183_v9  ;;  %v2268_v33 = vmul.f32 0.2, %v2012_v38  ;;  %v2643_v29 = vld [vmem:[%s15072_s5 + $0x198] sm:$0xff] }
 0x431   :  { %16741 = vst [vmem:[#allocation249_spill] sm:$0xff] %v11883_v16  ;;  %v4310_v7 = vmax.f32 %v11845_v44, %v11859_v54  ;;  %v4379_v53 = vmax.f32 %v11848_v21, %v11874_v39  ;;  %v11889_v37 = vsel %vm3801_vm2, %v2521_v12, -1e+30  ;;  %v11891_v32 = vsel %vm3802_vm3, %v2522_v50, -1e+30 }
 0x432   :  { %16742 = vst [vmem:[#allocation250_spill] sm:$0xff] %v11889_v37  ;;  %16743 = vst [vmem:[#allocation251_spill] sm:$0xff] %v11891_v32  ;;  %v11894_v5 = vmax.f32 %v4172_v59, %v11883_v16  ;;  %v3343_v46 = vsel %vm3279_vm5, 16843009, %v15940_v22  ;;  %v2269_v56 = vmul.f32 0.2, %v2013_v62  ;;  %v2524_v21 = vmax.f32 %v2012_v38, %v2268_v33 }
 0x433   :  { %v2270_v19 = vmul.f32 0.2, %v2014_v41  ;;  %v11897_v47 = vsel %vm3803_vm4, %v2523_v28, -1e+30  ;;  %v3548_v51 = vunpack.c.0.s8 %v3343_v46  ;;  %v3549_v14 = vunpack.c.1.s8 %v3343_v46  ;;  %v2640_v59 = vld [vmem:[%s15072_s5 + $0x180] sm:$0xff]  ;;  %v2641_v28 = vld [vmem:[%s15072_s5 + $0x188] sm:$0xff] }
 0x434   :  { %16744 = vst [vmem:[#allocation252_spill] sm:$0xff] %v11897_v47  ;;  %v3550_v3 = vunpack.c.2.s8 %v3343_v46  ;;  %v11900_v44 = vmul.f32 0.2, %v11881_v0  ;;  %v2525_v8 = vmax.f32 %v2013_v62, %v2269_v56  ;;  %v3551_v13 = vunpack.c.3.s8 %v3343_v46 }
 0x435   :  { %v2526_v11 = vmax.f32 %v2014_v41, %v2270_v19  ;;  %vm3804_vm6 = vcmp.ne.s32.totalorder %v3548_v51, 0  ;;  %vm3805_vm7 = vcmp.ne.s32.totalorder %v3549_v14, 0  ;;  %v11915_v12 = vmax.f32 %v4241_v63, %v11889_v37  ;;  %v1731_v63 = vpop.permute.xlu1 %1730 }
 0x436   :  { %vm3806_vm1 = vcmp.ne.s32.totalorder %v3550_v3, 0  ;;  %v11918_v6 = vmax.f32 %v4310_v7, %v11891_v32  ;;  %v11921_v50 = vmax.f32 %v4379_v53, %v11897_v47  ;;  %v2527_v38 = vmax.f32 %v11881_v0, %v11900_v44 }
 0x437   :  { %v11925_v55 = vsel %vm3804_vm6, %v2524_v21, -1e+30  ;;  %v11927_v9 = vsel %vm3805_vm7, %v2525_v8, -1e+30  ;;  %vm2704_vm8 = vnez %v2640_v59  ;;  %v11929_v62 = vsel %vm3806_vm1, %v2526_v11, -1e+30 }
 0x438   :  { %16745 = vst [vmem:[#allocation253_spill] sm:$0xff] %v11925_v55  ;;  %16746 = vst [vmem:[#allocation254_spill] sm:$0xff] %v11927_v9  ;;  %vm2705_vm9 = vnez %v2641_v28  ;;  %vm2706_vm10 = vnez %v2642_v60  ;;  %vm2707_vm11 = vnez %v2643_v29  ;;  %vm11931_vm12 = vcmp.ne.s32.totalorder %v3551_v13, 0 }
 0x439   :  { %16747 = vst [vmem:[#allocation255_spill] sm:$0xff] %v11929_v62  ;;  %v4174_v33 = vmax.f32 %v11894_v5, %v11925_v55  ;;  %v11938_v0 = vsel %vm2704_vm8, 16843009, %v15940_v22  ;;  %v11941_v7 = vsel %vm2705_vm9, 16843009, %v15940_v22  ;;  %v2016_v14 = vadd.f32 %v16351_v27, %v1731_v63  ;;  %v1736_v55 = vpop.permute.xlu0 %1735 }
 0x43a   :  { %v11944_v53 = vsel %vm2706_vm10, 16843009, %v15940_v22  ;;  %v11947_v46 = vsel %vm2707_vm11, 16843009, %v15940_v22  ;;  %v2976_v56 = vunpack.c.0.s8 %v11938_v0  ;;  %v2977_v19 = vunpack.c.0.s8 %v11941_v7 }
 0x43b   :  { %v2978_v51 = vunpack.c.0.s8 %v11944_v53  ;;  %v2979_v5 = vunpack.c.0.s8 %v11947_v46  ;;  %v2017_v3 = vadd.f32 %v16352_v35, %v1731_v63  ;;  %v2018_v44 = vadd.f32 %v16353_v57, %v1731_v63 }
 0x43c   :  { %v3184_v21 = vpack.c.b16 %v2977_v19, %v2976_v56  ;;  %v2019_v8 = vadd.f32 %v9960_v23, %v1731_v63  ;;  %v2980_v11 = vunpack.c.1.s8 %v11938_v0  ;;  %v2981_v59 = vunpack.c.1.s8 %v11941_v7 }
 0x43d   :  { %v3185_v13 = vpack.c.b16 %v2979_v5, %v2978_v51  ;;  %v2272_v28 = vmul.f32 0.2, %v2016_v14  ;;  %v2273_v60 = vmul.f32 0.2, %v2017_v3  ;;  %v2274_v29 = vmul.f32 0.2, %v2018_v44 }
 0x43e   :  { %v4243_v47 = vmax.f32 %v11915_v12, %v11927_v9  ;;  %v2982_v32 = vunpack.c.1.s8 %v11944_v53  ;;  %v2983_v37 = vunpack.c.1.s8 %v11947_v46  ;;  %v3187_v16 = vpack.c.b16 %v2981_v59, %v2980_v11 }
 0x43f   :  { %v4312_v63 = vmax.f32 %v11918_v6, %v11929_v62  ;;  %v3186_v56 = vpack.c.b8 %v3185_v13, %v3184_v21  ;;  %v2275_v19 = vmul.f32 0.2, %v2019_v8  ;;  %v2528_v39 = vmax.f32 %v2016_v14, %v2272_v28 }
 0x440   :  { %v2529_v54 = vmax.f32 %v2017_v3, %v2273_v60  ;;  %v3188_v51 = vpack.c.b16 %v2983_v37, %v2982_v32  ;;  %v2020_v5 = vadd.f32 %v16351_v27, %v1736_v55  ;;  %v2021_v45 = vadd.f32 %v16352_v35, %v1736_v55 }
 0x441   :  { %vm3280_vm13 = vnez %v3186_v56  ;;  %v2530_v2 = vmax.f32 %v2018_v44, %v2274_v29  ;;  %v2022_v12 = vadd.f32 %v16353_v57, %v1736_v55  ;;  %v11969_v9 = vadd.f32 %v9960_v23, %v1736_v55 }
 0x442   :  { %v3344_v11 = vsel %vm3280_vm13, 16843009, %v15940_v22  ;;  %v3189_v59 = vpack.c.b8 %v3188_v51, %v3187_v16  ;;  %v2276_v6 = vmul.f32 0.2, %v2020_v5  ;;  %v2277_v21 = vmul.f32 0.2, %v2021_v45 }
 0x443   :  { %v3552_v13 = vunpack.c.0.s8 %v3344_v11  ;;  %v3553_v14 = vunpack.c.1.s8 %v3344_v11  ;;  %v3554_v3 = vunpack.c.2.s8 %v3344_v11  ;;  %v3555_v37 = vunpack.c.3.s8 %v3344_v11 }
 0x444   :  { %v11974_v32 = vsel %vm11931_vm12, %v2527_v38, -1e+30  ;;  %v2531_v28 = vmax.f32 %v2019_v8, %v2275_v19  ;;  %vm11976_vm14 = vnez %v3189_v59  ;;  %v2278_v55 = vmul.f32 0.2, %v2022_v12  ;;  %v1741_v59 = vpop.permute.xlu1 %1740 }
 0x445   :  { %16750 = vst [vmem:[#allocation256_spill] sm:$0xff] %v11974_v32  ;;  %vm3808_vm15 = vcmp.ne.s32.totalorder %v3552_v13, 0  ;;  %vm3809_vm0 = vcmp.ne.s32.totalorder %v3553_v14, 0  ;;  %vm3810_vm2 = vcmp.ne.s32.totalorder %v3554_v3, 0  ;;  %vm3811_vm3 = vcmp.ne.s32.totalorder %v3555_v37, 0 }
 0x446   :  { %v4381_v16 = vmax.f32 %v11921_v50, %v11974_v32  ;;  %v11982_v60 = vsel %vm3808_vm15, %v2528_v39, -1e+30  ;;  %v2279_v29 = vmul.f32 0.2, %v11969_v9  ;;  %v2984_v38 = vunpack.c.2.s8 %v11938_v0 }
 0x447   :  { %16753 = vst [vmem:[#allocation257_spill] sm:$0xff] %v11982_v60  ;;  %v11986_v41 = vsel %vm3809_vm0, %v2529_v54, -1e+30  ;;  %v11988_v8 = vsel %vm3810_vm2, %v2530_v2, -1e+30  ;;  %v2532_v56 = vmax.f32 %v2020_v5, %v2276_v6  ;;  %v2533_v19 = vmax.f32 %v2021_v45, %v2277_v21 }
 0x448   :  { %16754 = vst [vmem:[#allocation258_spill] sm:$0xff] %v11986_v41  ;;  %16755 = vst [vmem:[#allocation259_spill] sm:$0xff] %v11988_v8  ;;  %v11991_v51 = vmax.f32 %v4174_v33, %v11982_v60  ;;  %v11993_v11 = vsel %vm3811_vm3, %v2531_v28, -1e+30  ;;  %v3345_v39 = vsel %vm11976_vm14, 16843009, %v15940_v22  ;;  %v2534_v50 = vmax.f32 %v2022_v12, %v2278_v55 }
 0x449   :  { %16756 = vst [vmem:[#allocation260_spill] sm:$0xff] %v11993_v11  ;;  %v3556_v13 = vunpack.c.0.s8 %v3345_v39  ;;  %v3557_v14 = vunpack.c.1.s8 %v3345_v39  ;;  %v3558_v3 = vunpack.c.2.s8 %v3345_v39  ;;  %v3559_v54 = vunpack.c.3.s8 %v3345_v39 }
 0x44a   :  { %v11999_v2 = vmax.f32 %v4243_v47, %v11986_v41  ;;  %v2985_v45 = vunpack.c.2.s8 %v11941_v7  ;;  %v2986_v33 = vunpack.c.2.s8 %v11944_v53  ;;  %v2987_v5 = vunpack.c.2.s8 %v11947_v46 }
 0x44b   :  { %vm3812_vm4 = vcmp.ne.s32.totalorder %v3556_v13, 0  ;;  %vm3813_vm5 = vcmp.ne.s32.totalorder %v3557_v14, 0  ;;  %vm3814_vm6 = vcmp.ne.s32.totalorder %v3558_v3, 0  ;;  %v2024_v6 = vadd.f32 %v16351_v27, %v1741_v59 }
 0x44c   :  { %v12006_v12 = vmax.f32 %v4312_v63, %v11988_v8  ;;  %v12009_v21 = vmax.f32 %v4381_v16, %v11993_v11  ;;  %vm12011_vm7 = vcmp.ne.s32.totalorder %v3559_v54, 0  ;;  %v3190_v37 = vpack.c.b16 %v2985_v45, %v2984_v38  ;;  %v1746_v45 = vpop.permute.xlu0 %1745 }
 0x44d   :  { %v2535_v28 = vmax.f32 %v11969_v9, %v2279_v29  ;;  %v12016_v44 = vsel %vm3812_vm4, %v2532_v56, -1e+30  ;;  %v12018_v55 = vsel %vm3813_vm5, %v2533_v19, -1e+30  ;;  %v12020_v39 = vsel %vm3814_vm6, %v2534_v50, -1e+30 }
 0x44e   :  { %16759 = vst [vmem:[#allocation261_spill] sm:$0xff] %v12016_v44  ;;  %16760 = vst [vmem:[#allocation262_spill] sm:$0xff] %v12018_v55  ;;  %v4176_v63 = vmax.f32 %v11991_v51, %v12016_v44  ;;  %v3191_v13 = vpack.c.b16 %v2987_v5, %v2986_v33  ;;  %v2025_v16 = vadd.f32 %v16352_v35, %v1741_v59  ;;  %v2280_v54 = vmul.f32 0.2, %v2024_v6 }
 0x44f   :  { %16761 = vst [vmem:[#allocation263_spill] sm:$0xff] %v12020_v39  ;;  %v2026_v14 = vadd.f32 %v16353_v57, %v1741_v59  ;;  %v2027_v3 = vadd.f32 %v9960_v23, %v1741_v59  ;;  %v2988_v38 = vunpack.c.3.s8 %v11938_v0  ;;  %v2989_v9 = vunpack.c.3.s8 %v11941_v7 }
 0x450   :  { %v3192_v29 = vpack.c.b8 %v3191_v13, %v3190_v37  ;;  %v2281_v56 = vmul.f32 0.2, %v2025_v16  ;;  %v2990_v50 = vunpack.c.3.s8 %v11944_v53  ;;  %v4245_v51 = vmax.f32 %v11999_v2, %v12018_v55 }
 0x451   :  { %v2282_v19 = vmul.f32 0.2, %v2026_v14  ;;  %v2283_v33 = vmul.f32 0.2, %v2027_v3  ;;  %v2991_v5 = vunpack.c.3.s8 %v11947_v46  ;;  %v3193_v44 = vpack.c.b16 %v2989_v9, %v2988_v38 }
 0x452   :  { %v12035_v59 = vsel %vm12011_vm7, %v2535_v28, -1e+30  ;;  %vm3282_vm1 = vnez %v3192_v29  ;;  %v2536_v0 = vmax.f32 %v2024_v6, %v2280_v54  ;;  %v2537_v7 = vmax.f32 %v2025_v16, %v2281_v56 }
 0x453   :  { %16762 = vst [vmem:[#allocation264_spill] sm:$0xff] %v12035_v59  ;;  %v3346_v37 = vsel %vm3282_vm1, 16843009, %v15940_v22  ;;  %v2538_v13 = vmax.f32 %v2026_v14, %v2282_v19  ;;  %v3194_v11 = vpack.c.b16 %v2991_v5, %v2990_v50  ;;  %v2028_v53 = vadd.f32 %v16351_v27, %v1746_v45  ;;  %v2646_v5 = vld [vmem:[%s15072_s5 + $0x1b0] sm:$0xff] }
 0x454   :  { %v3560_v8 = vunpack.c.0.s8 %v3346_v37  ;;  %v3561_v41 = vunpack.c.1.s8 %v3346_v37  ;;  %v3562_v2 = vunpack.c.2.s8 %v3346_v37  ;;  %v3563_v55 = vunpack.c.3.s8 %v3346_v37 }
 0x455   :  { %v2539_v60 = vmax.f32 %v2027_v3, %v2283_v33  ;;  %v3195_v46 = vpack.c.b8 %v3194_v11, %v3193_v44  ;;  %v2029_v38 = vadd.f32 %v16352_v35, %v1746_v45  ;;  %v2030_v47 = vadd.f32 %v16353_v57, %v1746_v45 }
 0x456   :  { %vm3816_vm8 = vcmp.ne.s32.totalorder %v3560_v8, 0  ;;  %vm3817_vm9 = vcmp.ne.s32.totalorder %v3561_v41, 0  ;;  %vm3818_vm10 = vcmp.ne.s32.totalorder %v3562_v2, 0  ;;  %v12042_v6 = vadd.f32 %v9960_v23, %v1746_v45 }
 0x457   :  { %vm3819_vm11 = vcmp.ne.s32.totalorder %v3563_v55, 0  ;;  %v12044_v28 = vsel %vm3816_vm8, %v2536_v0, -1e+30  ;;  %vm3283_vm12 = vnez %v3195_v46  ;;  %v2284_v16 = vmul.f32 0.2, %v2028_v53  ;;  %v2647_v0 = vld [vmem:[%s15072_s5 + $0x1b8] sm:$0xff] }
 0x458   :  { %16763 = vst [vmem:[#allocation265_spill] sm:$0xff] %v12044_v28  ;;  %v4314_v14 = vmax.f32 %v12006_v12, %v12020_v39  ;;  %v4383_v11 = vmax.f32 %v12009_v21, %v12035_v59  ;;  %v12050_v44 = vsel %vm3817_vm9, %v2537_v7, -1e+30  ;;  %v12052_v3 = vsel %vm3818_vm10, %v2538_v13, -1e+30 }
 0x459   :  { %16764 = vst [vmem:[#allocation266_spill] sm:$0xff] %v12050_v44  ;;  %16765 = vst [vmem:[#allocation267_spill] sm:$0xff] %v12052_v3  ;;  %v12055_v41 = vmax.f32 %v4176_v63, %v12044_v28  ;;  %v3347_v8 = vsel %vm3283_vm12, 16843009, %v15940_v22  ;;  %v2285_v55 = vmul.f32 0.2, %v2029_v38  ;;  %v2540_v21 = vmax.f32 %v2028_v53, %v2284_v16 }
 0x45a   :  { %v2286_v54 = vmul.f32 0.2, %v2030_v47  ;;  %v12058_v9 = vsel %vm3819_vm11, %v2539_v60, -1e+30  ;;  %v3564_v29 = vunpack.c.0.s8 %v3347_v8  ;;  %v3565_v56 = vunpack.c.1.s8 %v3347_v8  ;;  %v2644_v63 = vld [vmem:[%s15072_s5 + $0x1a0] sm:$0xff]  ;;  %v2645_v60 = vld [vmem:[%s15072_s5 + $0x1a8] sm:$0xff] }
 0x45b   :  { %16766 = vst [vmem:[#allocation268_spill] sm:$0xff] %v12058_v9  ;;  %v3566_v19 = vunpack.c.2.s8 %v3347_v8  ;;  %v12061_v12 = vmul.f32 0.2, %v12042_v6  ;;  %v2541_v50 = vmax.f32 %v2029_v38, %v2285_v55  ;;  %v3567_v33 = vunpack.c.3.s8 %v3347_v8 }
 0x45c   :  { %v2542_v45 = vmax.f32 %v2030_v47, %v2286_v54  ;;  %vm3820_vm13 = vcmp.ne.s32.totalorder %v3564_v29, 0  ;;  %vm3821_vm14 = vcmp.ne.s32.totalorder %v3565_v56, 0  ;;  %v12076_v7 = vmax.f32 %v4245_v51, %v12050_v44  ;;  %v1751_v51 = vpop.permute.xlu1 %1750 }
 0x45d   :  { %vm3822_vm15 = vcmp.ne.s32.totalorder %v3566_v19, 0  ;;  %v12079_v37 = vmax.f32 %v4314_v14, %v12052_v3  ;;  %v12082_v13 = vmax.f32 %v4383_v11, %v12058_v9  ;;  %v2543_v53 = vmax.f32 %v12042_v6, %v12061_v12 }
 0x45e   :  { %v12086_v2 = vsel %vm3820_vm13, %v2540_v21, -1e+30  ;;  %v12088_v46 = vsel %vm3821_vm14, %v2541_v50, -1e+30  ;;  %vm2708_vm0 = vnez %v2644_v63  ;;  %v12090_v38 = vsel %vm3822_vm15, %v2542_v45, -1e+30 }
 0x45f   :  { %16767 = vst [vmem:[#allocation269_spill] sm:$0xff] %v12086_v2  ;;  %16768 = vst [vmem:[#allocation270_spill] sm:$0xff] %v12088_v46  ;;  %vm2709_vm2 = vnez %v2645_v60  ;;  %vm2710_vm3 = vnez %v2646_v5  ;;  %vm2711_vm4 = vnez %v2647_v0  ;;  %vm12092_vm5 = vcmp.ne.s32.totalorder %v3567_v33, 0  ;;  %v17031_v31 = vld [vmem:[#allocation265_spill] sm:$0xff] }
 0x460   :  { %16769 = vst [vmem:[#allocation271_spill] sm:$0xff] %v12090_v38  ;;  %v4178_v16 = vmax.f32 %v12055_v41, %v12086_v2  ;;  %v12099_v6 = vsel %vm2708_vm0, 16843009, %v15940_v22  ;;  %v12102_v14 = vsel %vm2709_vm2, 16843009, %v15940_v22  ;;  %v2032_v56 = vadd.f32 %v16351_v27, %v1751_v51  ;;  %v1756_v2 = vpop.permute.xlu0 %1755 }
 0x461   :  { %v12105_v11 = vsel %vm2710_vm3, 16843009, %v15940_v22  ;;  %v12108_v8 = vsel %vm2711_vm4, 16843009, %v15940_v22  ;;  %v2992_v55 = vunpack.c.0.s8 %v12099_v6  ;;  %v2993_v54 = vunpack.c.0.s8 %v12102_v14 }
 0x462   :  { %v2994_v29 = vunpack.c.0.s8 %v12105_v11  ;;  %v2995_v41 = vunpack.c.0.s8 %v12108_v8  ;;  %v2033_v19 = vadd.f32 %v16352_v35, %v1751_v51  ;;  %v2034_v12 = vadd.f32 %v16353_v57, %v1751_v51 }
 0x463   :  { %v3196_v21 = vpack.c.b16 %v2993_v54, %v2992_v55  ;;  %v2035_v50 = vadd.f32 %v9960_v23, %v1751_v51  ;;  %v2996_v45 = vunpack.c.1.s8 %v12099_v6  ;;  %v2997_v63 = vunpack.c.1.s8 %v12102_v14 }
 0x464   :  { %v3197_v33 = vpack.c.b16 %v2995_v41, %v2994_v29  ;;  %v2288_v60 = vmul.f32 0.2, %v2032_v56  ;;  %v2289_v5 = vmul.f32 0.2, %v2033_v19  ;;  %v2290_v0 = vmul.f32 0.2, %v2034_v12 }
 0x465   :  { %v4247_v9 = vmax.f32 %v12076_v7, %v12088_v46  ;;  %v2998_v3 = vunpack.c.1.s8 %v12105_v11  ;;  %v2999_v44 = vunpack.c.1.s8 %v12108_v8  ;;  %v3199_v28 = vpack.c.b16 %v2997_v63, %v2996_v45 }
 0x466   :  { %v4316_v51 = vmax.f32 %v12079_v37, %v12090_v38  ;;  %v3198_v55 = vpack.c.b8 %v3197_v33, %v3196_v21  ;;  %v2291_v54 = vmul.f32 0.2, %v2035_v50  ;;  %v2544_v59 = vmax.f32 %v2032_v56, %v2288_v60 }
 0x467   :  { %v2545_v39 = vmax.f32 %v2033_v19, %v2289_v5  ;;  %v3200_v29 = vpack.c.b16 %v2999_v44, %v2998_v3  ;;  %v2036_v41 = vadd.f32 %v16351_v27, %v1756_v2  ;;  %v2037_v32 = vadd.f32 %v16352_v35, %v1756_v2 }
 0x468   :  { %vm3284_vm6 = vnez %v3198_v55  ;;  %v2546_v62 = vmax.f32 %v2034_v12, %v2290_v0  ;;  %v2038_v7 = vadd.f32 %v16353_v57, %v1756_v2  ;;  %v12130_v46 = vadd.f32 %v9960_v23, %v1756_v2  ;;  %v2649_v12 = vld [vmem:[%s15072_s5 + $0x1c8] sm:$0xff] }
 0x469   :  { %v3348_v45 = vsel %vm3284_vm6, 16843009, %v15940_v22  ;;  %v3201_v63 = vpack.c.b8 %v3200_v29, %v3199_v28  ;;  %v2292_v37 = vmul.f32 0.2, %v2036_v41  ;;  %v2293_v21 = vmul.f32 0.2, %v2037_v32 }
 0x46a   :  { %v3568_v33 = vunpack.c.0.s8 %v3348_v45  ;;  %v3569_v56 = vunpack.c.1.s8 %v3348_v45  ;;  %v3570_v19 = vunpack.c.2.s8 %v3348_v45  ;;  %v3571_v44 = vunpack.c.3.s8 %v3348_v45 }
 0x46b   :  { %v12135_v3 = vsel %vm12092_vm5, %v2543_v53, -1e+30  ;;  %v2547_v60 = vmax.f32 %v2035_v50, %v2291_v54  ;;  %vm12137_vm7 = vnez %v3201_v63  ;;  %v2294_v2 = vmul.f32 0.2, %v2038_v7  ;;  %v1761_v63 = vpop.permute.xlu1 %1760 }
 0x46c   :  { %16772 = vst [vmem:[#allocation272_spill] sm:$0xff] %v12135_v3  ;;  %vm3824_vm1 = vcmp.ne.s32.totalorder %v3568_v33, 0  ;;  %vm3825_vm8 = vcmp.ne.s32.totalorder %v3569_v56, 0  ;;  %vm3826_vm9 = vcmp.ne.s32.totalorder %v3570_v19, 0  ;;  %vm3827_vm10 = vcmp.ne.s32.totalorder %v3571_v44, 0 }
 0x46d   :  { %v4385_v28 = vmax.f32 %v12082_v13, %v12135_v3  ;;  %v12143_v5 = vsel %vm3824_vm1, %v2544_v59, -1e+30  ;;  %v12146_v0 = vmul.f32 0.2, %v12130_v46  ;;  %v3000_v53 = vunpack.c.2.s8 %v12099_v6 }
 0x46e   :  { %16775 = vst [vmem:[#allocation273_spill] sm:$0xff] %v12143_v5  ;;  %v12149_v47 = vsel %vm3825_vm8, %v2545_v39, -1e+30  ;;  %v12151_v50 = vsel %vm3826_vm9, %v2546_v62, -1e+30  ;;  %v2548_v55 = vmax.f32 %v2036_v41, %v2292_v37  ;;  %v2549_v54 = vmax.f32 %v2037_v32, %v2293_v21 }
 0x46f   :  { %16776 = vst [vmem:[#allocation274_spill] sm:$0xff] %v12149_v47  ;;  %16777 = vst [vmem:[#allocation275_spill] sm:$0xff] %v12151_v50  ;;  %v12154_v29 = vmax.f32 %v4178_v16, %v12143_v5  ;;  %v12156_v45 = vsel %vm3827_vm10, %v2547_v60, -1e+30  ;;  %v3349_v59 = vsel %vm12137_vm7, 16843009, %v15940_v22  ;;  %v2550_v13 = vmax.f32 %v2038_v7, %v2294_v2 }
 0x470   :  { %16778 = vst [vmem:[#allocation276_spill] sm:$0xff] %v12156_v45  ;;  %v3572_v33 = vunpack.c.0.s8 %v3349_v59  ;;  %v3573_v56 = vunpack.c.1.s8 %v3349_v59  ;;  %v3574_v19 = vunpack.c.2.s8 %v3349_v59  ;;  %v3575_v39 = vunpack.c.3.s8 %v3349_v59  ;;  %v2648_v60 = vld [vmem:[%s15072_s5 + $0x1c0] sm:$0xff] }
 0x471   :  { %v12162_v62 = vmax.f32 %v4247_v9, %v12149_v47  ;;  %v3001_v32 = vunpack.c.2.s8 %v12102_v14  ;;  %v3002_v16 = vunpack.c.2.s8 %v12105_v11  ;;  %v3003_v41 = vunpack.c.2.s8 %v12108_v8 }
 0x472   :  { %vm3828_vm11 = vcmp.ne.s32.totalorder %v3572_v33, 0  ;;  %vm3829_vm12 = vcmp.ne.s32.totalorder %v3573_v56, 0  ;;  %vm3830_vm13 = vcmp.ne.s32.totalorder %v3574_v19, 0  ;;  %v2040_v37 = vadd.f32 %v16351_v27, %v1761_v63 }
 0x473   :  { %v12169_v7 = vmax.f32 %v4316_v51, %v12151_v50  ;;  %v12172_v21 = vmax.f32 %v4385_v28, %v12156_v45  ;;  %vm12174_vm14 = vcmp.ne.s32.totalorder %v3575_v39, 0  ;;  %v3202_v44 = vpack.c.b16 %v3001_v32, %v3000_v53  ;;  %v2650_v51 = vld [vmem:[%s15072_s5 + $0x1d0] sm:$0xff]  ;;  %v2651_v32 = vld [vmem:[%s15072_s5 + $0x1d8] sm:$0xff] }
 0x474   :  { %v2551_v2 = vmax.f32 %v12130_v46, %v12146_v0  ;;  %v12189_v28 = vsel %vm3828_vm11, %v2548_v55, -1e+30  ;;  %v12191_v59 = vsel %vm3829_vm12, %v2549_v54, -1e+30  ;;  %v12193_v53 = vsel %vm3830_vm13, %v2550_v13, -1e+30 }
 0x475   :  { %16781 = vst [vmem:[#allocation277_spill] sm:$0xff] %v12189_v28  ;;  %16782 = vst [vmem:[#allocation278_spill] sm:$0xff] %v12191_v59  ;;  %v4180_v33 = vmax.f32 %v12154_v29, %v12189_v28  ;;  %v3203_v56 = vpack.c.b16 %v3003_v41, %v3002_v16  ;;  %v2041_v19 = vadd.f32 %v16352_v35, %v1761_v63  ;;  %v2296_v0 = vmul.f32 0.2, %v2040_v37 }
 0x476   :  { %16783 = vst [vmem:[#allocation279_spill] sm:$0xff] %v12193_v53  ;;  %v2042_v39 = vadd.f32 %v16353_v57, %v1761_v63  ;;  %v12203_v46 = vadd.f32 %v9960_v23, %v1761_v63  ;;  %vm2712_vm15 = vnez %v2648_v60  ;;  %vm2713_vm0 = vnez %v2649_v12 }
 0x477   :  { %v3204_v55 = vpack.c.b8 %v3203_v56, %v3202_v44  ;;  %v2297_v54 = vmul.f32 0.2, %v2041_v19  ;;  %vm2714_vm2 = vnez %v2650_v51  ;;  %v4249_v29 = vmax.f32 %v12162_v62, %v12191_v59 }
 0x478   :  { %v2298_v13 = vmul.f32 0.2, %v2042_v39  ;;  %v2299_v16 = vmul.f32 0.2, %v12203_v46  ;;  %v2552_v41 = vmax.f32 %v2040_v37, %v2296_v0  ;;  %vm2715_vm3 = vnez %v2651_v32 }
 0x479   :  { %vm3286_vm4 = vnez %v3204_v55  ;;  %v2553_v28 = vmax.f32 %v2041_v19, %v2297_v54  ;;  %v12209_v45 = vsel %vm2712_vm15, 16843009, %v15940_v22  ;;  %v12212_v63 = vsel %vm2713_vm0, 16843009, %v15940_v22 }
 0x47a   :  { %v3350_v44 = vsel %vm3286_vm4, 16843009, %v15940_v22  ;;  %v2554_v60 = vmax.f32 %v2042_v39, %v2298_v13  ;;  %v12216_v12 = vsel %vm2714_vm2, 16843009, %v15940_v22  ;;  %v12219_v62 = vsel %vm2715_vm3, 16843009, %v15940_v22  ;;  %v1771_v13 = vpop.permute.xlu1 %1770 }
 0x47b   :  { %v3576_v51 = vunpack.c.0.s8 %v3350_v44  ;;  %v3577_v37 = vunpack.c.1.s8 %v3350_v44  ;;  %v3578_v56 = vunpack.c.2.s8 %v3350_v44  ;;  %v3579_v32 = vunpack.c.3.s8 %v3350_v44 }
 0x47c   :  { %v3008_v19 = vunpack.c.0.s8 %v12209_v45  ;;  %v3009_v0 = vunpack.c.0.s8 %v12212_v63  ;;  %v3010_v55 = vunpack.c.0.s8 %v12216_v12  ;;  %v3011_v54 = vunpack.c.0.s8 %v12219_v62  ;;  %v17043_v43 = vld [vmem:[#allocation277_spill] sm:$0xff] }
 0x47d   :  { %v12227_v39 = vsel %vm12174_vm14, %v2551_v2, -1e+30  ;;  %vm3832_vm5 = vcmp.ne.s32.totalorder %v3576_v51, 0  ;;  %vm3833_vm6 = vcmp.ne.s32.totalorder %v3577_v37, 0  ;;  %vm3834_vm7 = vcmp.ne.s32.totalorder %v3578_v56, 0 }
 0x47e   :  { %16784 = vst [vmem:[#allocation280_spill] sm:$0xff] %v12227_v39  ;;  %v4318_v59 = vmax.f32 %v12169_v7, %v12193_v53  ;;  %v4387_v44 = vmax.f32 %v12172_v21, %v12227_v39  ;;  %v12233_v50 = vsel %vm3832_vm5, %v2552_v41, -1e+30  ;;  %v3208_v47 = vpack.c.b16 %v3009_v0, %v3008_v19 }
 0x47f   :  { %16785 = vst [vmem:[#allocation281_spill] sm:$0xff] %v12233_v50  ;;  %vm12235_vm1 = vcmp.ne.s32.totalorder %v3579_v32, 0  ;;  %v2555_v9 = vmax.f32 %v12203_v46, %v2299_v16  ;;  %v12240_v2 = vsel %vm3833_vm6, %v2553_v28, -1e+30  ;;  %v12242_v51 = vsel %vm3834_vm7, %v2554_v60, -1e+30 }
 0x480   :  { %16788 = vst [vmem:[#allocation282_spill] sm:$0xff] %v12240_v2  ;;  %16789 = vst [vmem:[#allocation283_spill] sm:$0xff] %v12242_v51  ;;  %v12245_v37 = vmax.f32 %v4180_v33, %v12233_v50  ;;  %v3209_v7 = vpack.c.b16 %v3011_v54, %v3010_v55  ;;  %v2048_v56 = vadd.f32 %v16351_v27, %v1771_v13  ;;  %v3004_v19 = vunpack.c.3.s8 %v12099_v6 }
 0x481   :  { %v2049_v21 = vadd.f32 %v16352_v35, %v1771_v13  ;;  %v2050_v41 = vadd.f32 %v16353_v57, %v1771_v13  ;;  %v2051_v32 = vadd.f32 %v9960_v23, %v1771_v13  ;;  %v3005_v46 = vunpack.c.3.s8 %v12102_v14  ;;  %v1766_v13 = vpop.permute.xlu0 %1765 }
 0x482   :  { %v3210_v28 = vpack.c.b8 %v3209_v7, %v3208_v47  ;;  %v2304_v16 = vmul.f32 0.2, %v2048_v56  ;;  %v3006_v0 = vunpack.c.3.s8 %v12105_v11  ;;  %v3007_v55 = vunpack.c.3.s8 %v12108_v8 }
 0x483   :  { %v2305_v60 = vmul.f32 0.2, %v2049_v21  ;;  %v2306_v33 = vmul.f32 0.2, %v2050_v41  ;;  %v2307_v50 = vmul.f32 0.2, %v2051_v32  ;;  %v3205_v54 = vpack.c.b16 %v3005_v46, %v3004_v19 }
 0x484   :  { %v4250_v39 = vmax.f32 %v4249_v29, %v12240_v2  ;;  %vm3288_vm8 = vnez %v3210_v28  ;;  %v2560_v53 = vmax.f32 %v2048_v56, %v2304_v16  ;;  %v3206_v47 = vpack.c.b16 %v3007_v55, %v3006_v0 }
 0x485   :  { %v2561_v3 = vmax.f32 %v2049_v21, %v2305_v60  ;;  %v3352_v6 = vsel %vm3288_vm8, 16843009, %v15940_v22  ;;  %v2562_v38 = vmax.f32 %v2050_v41, %v2306_v33  ;;  %v2563_v14 = vmax.f32 %v2051_v32, %v2307_v50 }
 0x486   :  { %v3584_v7 = vunpack.c.0.s8 %v3352_v6  ;;  %v3585_v20 = vunpack.c.1.s8 %v3352_v6  ;;  %v3586_v15 = vunpack.c.2.s8 %v3352_v6  ;;  %v3587_v11 = vunpack.c.3.s8 %v3352_v6 }
 0x487   :  { %v12259_v61 = vsel %vm12235_vm1, %v2555_v9, -1e+30  ;;  %v3207_v8 = vpack.c.b8 %v3206_v47, %v3205_v54  ;;  %v2044_v29 = vadd.f32 %v16351_v27, %v1766_v13  ;;  %v2045_v56 = vadd.f32 %v16352_v35, %v1766_v13  ;;  %v1781_v47 = vpop.permute.xlu1 %1780 }
 0x488   :  { %16790 = vst [vmem:[#allocation284_spill] sm:$0xff] %v12259_v61  ;;  %vm3840_vm9 = vcmp.ne.s32.totalorder %v3584_v7, 0  ;;  %vm3841_vm10 = vcmp.ne.s32.totalorder %v3585_v20, 0  ;;  %vm3842_vm11 = vcmp.ne.s32.totalorder %v3586_v15, 0  ;;  %vm3843_vm12 = vcmp.ne.s32.totalorder %v3587_v11, 0 }
 0x489   :  { %v12263_v21 = vsel %vm3840_vm9, %v2560_v53, -1e+30  ;;  %vm3287_vm13 = vnez %v3207_v8  ;;  %v2046_v50 = vadd.f32 %v16353_v57, %v1766_v13  ;;  %v2047_v41 = vadd.f32 %v9960_v23, %v1766_v13 }
 0x48a   :  { %16791 = vst [vmem:[#allocation285_spill] sm:$0xff] %v12263_v21  ;;  %v12268_v5 = vmax.f32 %v4318_v59, %v12242_v51  ;;  %v12270_v9 = vsel %vm3841_vm10, %v2561_v3, -1e+30  ;;  %v12272_v32 = vsel %vm3842_vm11, %v2562_v38, -1e+30  ;;  %v12277_v20 = vmax.f32 %v4387_v44, %v12259_v61 }
 0x48b   :  { %16792 = vst [vmem:[#allocation286_spill] sm:$0xff] %v12270_v9  ;;  %16793 = vst [vmem:[#allocation287_spill] sm:$0xff] %v12272_v32  ;;  %v12274_v19 = vsel %vm3843_vm12, %v2563_v14, -1e+30  ;;  %v3351_v15 = vsel %vm3287_vm13, 16843009, %v15940_v22  ;;  %v4182_v38 = vmax.f32 %v12245_v37, %v12263_v21  ;;  %v4251_v54 = vmax.f32 %v4250_v39, %v12270_v9 }
 0x48c   :  { %16794 = vst [vmem:[#allocation288_spill] sm:$0xff] %v12274_v19  ;;  %v2300_v53 = vmul.f32 0.2, %v2044_v29  ;;  %v2301_v46 = vmul.f32 0.2, %v2045_v56  ;;  %v3580_v28 = vunpack.c.0.s8 %v3351_v15  ;;  %v3581_v16 = vunpack.c.1.s8 %v3351_v15 }
 0x48d   :  { %v3582_v60 = vunpack.c.2.s8 %v3351_v15  ;;  %v3583_v0 = vunpack.c.3.s8 %v3351_v15  ;;  %v2302_v33 = vmul.f32 0.2, %v2046_v50  ;;  %v2303_v59 = vmul.f32 0.2, %v2047_v41 }
 0x48e   :  { %v2556_v55 = vmax.f32 %v2044_v29, %v2300_v53  ;;  %v2557_v3 = vmax.f32 %v2045_v56, %v2301_v46  ;;  %vm3836_vm14 = vcmp.ne.s32.totalorder %v3580_v28, 0  ;;  %vm3837_vm15 = vcmp.ne.s32.totalorder %v3581_v16, 0 }
 0x48f   :  { %v4320_v44 = vmax.f32 %v12268_v5, %v12272_v32  ;;  %v4389_v13 = vmax.f32 %v12277_v20, %v12274_v19  ;;  %vm12287_vm0 = vcmp.ne.s32.totalorder %v3582_v60, 0  ;;  %vm12291_vm2 = vcmp.ne.s32.totalorder %v3583_v0, 0 }
 0x490   :  { %v2558_v37 = vmax.f32 %v2046_v50, %v2302_v33  ;;  %v2559_v7 = vmax.f32 %v2047_v41, %v2303_v59  ;;  %v3016_v39 = vunpack.c.2.s8 %v12209_v45  ;;  %v3017_v11 = vunpack.c.2.s8 %v12212_v63 }
 0x491   :  { %v12297_v8 = vsel %vm3836_vm14, %v2556_v55, -1e+30  ;;  %v12299_v29 = vsel %vm3837_vm15, %v2557_v3, -1e+30  ;;  %v3018_v56 = vunpack.c.2.s8 %v12216_v12  ;;  %v3019_v5 = vunpack.c.2.s8 %v12219_v62  ;;  %v1776_v55 = vpop.permute.xlu0 %1775 }
 0x492   :  { %16799 = vst [vmem:[#allocation289_spill] sm:$0xff] %v12297_v8  ;;  %16800 = vst [vmem:[#allocation290_spill] sm:$0xff] %v12299_v29  ;;  %v12304_v20 = vmax.f32 %v4182_v38, %v12297_v8  ;;  %v12307_v15 = vmax.f32 %v4251_v54, %v12299_v29  ;;  %v3214_v50 = vpack.c.b16 %v3017_v11, %v3016_v39  ;;  %v3012_v0 = vunpack.c.1.s8 %v12209_v45 }
 0x493   :  { %v2056_v41 = vadd.f32 %v16351_v27, %v1781_v47  ;;  %v3215_v53 = vpack.c.b16 %v3019_v5, %v3018_v56  ;;  %v2057_v46 = vadd.f32 %v16352_v35, %v1781_v47  ;;  %v2058_v28 = vadd.f32 %v16353_v57, %v1781_v47 }
 0x494   :  { %v2059_v16 = vadd.f32 %v9960_v23, %v1781_v47  ;;  %v3013_v33 = vunpack.c.1.s8 %v12212_v63  ;;  %v3014_v59 = vunpack.c.1.s8 %v12216_v12  ;;  %v12318_v3 = vsel %vm12287_vm0, %v2558_v37, -1e+30 }
 0x495   :  { %v2312_v60 = vmul.f32 0.2, %v2056_v41  ;;  %16801 = vst [vmem:[#allocation291_spill] sm:$0xff] %v12318_v3  ;;  %v3216_v38 = vpack.c.b8 %v3215_v53, %v3214_v50  ;;  %v2313_v54 = vmul.f32 0.2, %v2057_v46  ;;  %v3015_v56 = vunpack.c.1.s8 %v12219_v62 }
 0x496   :  { %v2314_v39 = vmul.f32 0.2, %v2058_v28  ;;  %v12322_v11 = vsel %vm12291_vm2, %v2559_v7, -1e+30  ;;  %v2315_v47 = vmul.f32 0.2, %v2059_v16  ;;  %v3211_v5 = vpack.c.b16 %v3013_v33, %v3012_v0 }
 0x497   :  { %16802 = vst [vmem:[#allocation292_spill] sm:$0xff] %v12322_v11  ;;  %vm3290_vm3 = vnez %v3216_v38  ;;  %v2568_v19 = vmax.f32 %v2056_v41, %v2312_v60  ;;  %v2569_v32 = vmax.f32 %v2057_v46, %v2313_v54  ;;  %v12326_v9 = vadd.f32 %v16351_v27, %v1776_v55 }
 0x498   :  { %v3354_v6 = vsel %vm3290_vm3, 16843009, %v15940_v22  ;;  %v2570_v37 = vmax.f32 %v2058_v28, %v2314_v39  ;;  %v3212_v50 = vpack.c.b16 %v3015_v56, %v3014_v59  ;;  %v12330_v53 = vadd.f32 %v16352_v35, %v1776_v55 }
 0x499   :  { %v3592_v14 = vunpack.c.0.s8 %v3354_v6  ;;  %v3593_v7 = vunpack.c.1.s8 %v3354_v6  ;;  %v3594_v21 = vunpack.c.2.s8 %v3354_v6  ;;  %v3595_v29 = vunpack.c.3.s8 %v3354_v6  ;;  %v2654_v6 = vld [vmem:[%s15072_s5 + $0x1f0] sm:$0xff] }
 0x49a   :  { %v2571_v8 = vmax.f32 %v2059_v16, %v2315_v47  ;;  %v3213_v61 = vpack.c.b8 %v3212_v50, %v3211_v5  ;;  %v2054_v0 = vadd.f32 %v16353_v57, %v1776_v55  ;;  %v12334_v41 = vadd.f32 %v9960_v23, %v1776_v55  ;;  %v2653_v5 = vld [vmem:[%s15072_s5 + $0x1e8] sm:$0xff] }
 0x49b   :  { %vm3848_vm4 = vcmp.ne.s32.totalorder %v3592_v14, 0  ;;  %vm3849_vm5 = vcmp.ne.s32.totalorder %v3593_v7, 0  ;;  %vm3850_vm6 = vcmp.ne.s32.totalorder %v3594_v21, 0  ;;  %vm3851_vm7 = vcmp.ne.s32.totalorder %v3595_v29, 0  ;;  %v1791_v14 = vpop.permute.xlu1 %1790 }
 0x49c   :  { %v12337_v46 = vmax.f32 %v4320_v44, %v12318_v3  ;;  %vm3289_vm1 = vnez %v3213_v61  ;;  %v2308_v28 = vmul.f32 0.2, %v12326_v9  ;;  %v2309_v60 = vmul.f32 0.2, %v12330_v53 }
 0x49d   :  { %v12342_v16 = vmax.f32 %v4389_v13, %v12322_v11  ;;  %v12344_v33 = vsel %vm3848_vm4, %v2568_v19, -1e+30  ;;  %v12346_v59 = vsel %vm3849_vm5, %v2569_v32, -1e+30  ;;  %v12348_v55 = vsel %vm3850_vm6, %v2570_v37, -1e+30  ;;  %v1786_v11 = vpop.permute.xlu0 %1785 }
 0x49e   :  { %16803 = vst [vmem:[#allocation293_spill] sm:$0xff] %v12344_v33  ;;  %16804 = vst [vmem:[#allocation294_spill] sm:$0xff] %v12346_v59  ;;  %v12350_v38 = vsel %vm3851_vm7, %v2571_v8, -1e+30  ;;  %v3353_v21 = vsel %vm3289_vm1, 16843009, %v15940_v22  ;;  %v4184_v32 = vmax.f32 %v12304_v20, %v12344_v33  ;;  %v4253_v8 = vmax.f32 %v12307_v15, %v12346_v59 }
 0x49f   :  { %16805 = vst [vmem:[#allocation295_spill] sm:$0xff] %v12348_v55  ;;  %16806 = vst [vmem:[#allocation296_spill] sm:$0xff] %v12350_v38  ;;  %v2310_v44 = vmul.f32 0.2, %v2054_v0  ;;  %v3588_v29 = vunpack.c.0.s8 %v3353_v21  ;;  %v3589_v61 = vunpack.c.1.s8 %v3353_v21  ;;  %v3590_v54 = vunpack.c.2.s8 %v3353_v21  ;;  %v2652_v13 = vld [vmem:[%s15072_s5 + $0x1e0] sm:$0xff]  ;;  %v2655_v20 = vld [vmem:[%s15072_s5 + $0x1f8] sm:$0xff] }
 0x4a0   :  { %v2311_v39 = vmul.f32 0.2, %v12334_v41  ;;  %v3591_v19 = vunpack.c.3.s8 %v3353_v21  ;;  %v4322_v47 = vmax.f32 %v12337_v46, %v12348_v55  ;;  %v2564_v15 = vmax.f32 %v12326_v9, %v2308_v28  ;;  %s7655_s5 = smov [#allocation4]  }
 0x4a1   :  { %v2565_v37 = vmax.f32 %v12330_v53, %v2309_v60  ;;  %v2566_v50 = vmax.f32 %v2054_v0, %v2310_v44  ;;  %vm2716_vm8 = vnez %v2652_v13  ;;  %vm12376_vm9 = vcmp.ne.s32.totalorder %v3588_v29, 0  ;;  %v1796_v51 = vpop.permute.xlu0 %1795  ;;  %s7106_s20 = sshll.u32 %s7655_s5, 4  ;;  %s7107_s20 = int_to_ptr.vmem [resolvable:$true] %s7106_s20 }
 0x4a2   :  { %vm12380_vm10 = vcmp.ne.s32.totalorder %v3589_v61, 0  ;;  %vm12384_vm11 = vcmp.ne.s32.totalorder %v3590_v54, 0  ;;  %v2567_v56 = vmax.f32 %v12334_v41, %v2311_v39  ;;  %vm12389_vm12 = vcmp.ne.s32.totalorder %v3591_v19, 0  ;;  %s7632_s21 = scalar_lea.vmem %s7107_s20, 8192  ;;  %p7637_p1 = scmp.lt.s32.totalorder %s7107_s20, %s7107_s20 }
 0x4a3   :  { %vm2717_vm13 = vnez %v2653_v5  ;;  %vm2718_vm14 = vnez %v2654_v6  ;;  %vm2719_vm15 = vnez %v2655_v20  ;;  %v12394_v53 = vsel %vm2716_vm8, 16843009, %v15940_v22  ;;  %p7633_p0 = scmp.ne.s32.totalorder %s7107_s20, %s7632_s21  ;;  %p7638_p2 = scmp.lt.s32.totalorder %s7632_s21, %s7632_s21 }
 0x4a4   :  { %v12397_v0 = vsel %vm2717_vm13, 16843009, %v15940_v22  ;;  %v12400_v28 = vsel %vm2718_vm14, 16843009, %v15940_v22  ;;  %v2064_v60 = vadd.f32 %v16351_v27, %v1791_v14  ;;  %v12404_v41 = vsel %vm2719_vm15, 16843009, %v15940_v22 }
 0x4a5   :  { %v3024_v44 = vunpack.c.0.s8 %v12394_v53  ;;  %v3025_v29 = vunpack.c.0.s8 %v12397_v0  ;;  %v3026_v61 = vunpack.c.0.s8 %v12400_v28  ;;  %v12411_v54 = vsel %vm12376_vm9, %v2564_v15, -1e+30  ;;  %p7639_p3 = por %p7638_p2, %p7637_p1 }
 0x4a6   :  { %16815 = vst [vmem:[#allocation297_spill] sm:$0xff] %v12411_v54  ;;  %v3027_v39 = vunpack.c.0.s8 %v12404_v41  ;;  %v2065_v13 = vadd.f32 %v16352_v35, %v1791_v14  ;;  %v2066_v19 = vadd.f32 %v16353_v57, %v1791_v14  ;;  %v2067_v6 = vadd.f32 %v9960_v23, %v1791_v14 }
 0x4a7   :  { %v3220_v5 = vpack.c.b16 %v3025_v29, %v3024_v44  ;;  %v3020_v20 = vunpack.c.3.s8 %v12209_v45  ;;  %v3021_v59 = vunpack.c.3.s8 %v12212_v63  ;;  %v12421_v55 = vsel %vm12380_vm10, %v2565_v37, -1e+30  ;;  %p7640_p4 = pnand %p7639_p3, %p7633_p0 }
 0x4a8   :  { %16816 = vst [vmem:[#allocation298_spill] sm:$0xff] %v12421_v55  ;;  %v12425_v15 = vsel %vm12384_vm11, %v2566_v50, -1e+30  ;;  %v3221_v7 = vpack.c.b16 %v3027_v39, %v3026_v61  ;;  %v2320_v33 = vmul.f32 0.2, %v2064_v60  ;;  %v12428_v3 = vmax.f32 %v4184_v32, %v12411_v54 }
 0x4a9   :  { %16817 = vst [vmem:[#allocation299_spill] sm:$0xff] %v12425_v15  ;;  %v3022_v14 = vunpack.c.3.s8 %v12216_v12  ;;  %v3023_v45 = vunpack.c.3.s8 %v12219_v62  ;;  %v3217_v44 = vpack.c.b16 %v3021_v59, %v3020_v20  ;;  %v12433_v63 = vmax.f32 %v4253_v8, %v12421_v55 }
 0x4aa   :  { %v12436_v37 = vmax.f32 %v4322_v47, %v12425_v15  ;;  %v3222_v46 = vpack.c.b8 %v3221_v7, %v3220_v5  ;;  %v2321_v50 = vmul.f32 0.2, %v2065_v13  ;;  %v2322_v21 = vmul.f32 0.2, %v2066_v19 }
 0x4ab   :  { %v2323_v29 = vmul.f32 0.2, %v2067_v6  ;;  %v3218_v61 = vpack.c.b16 %v3023_v45, %v3022_v14  ;;  %v2060_v39 = vadd.f32 %v16351_v27, %v1786_v11  ;;  %v12441_v32 = vsel %vm12389_vm12, %v2567_v56, -1e+30 }
 0x4ac   :  { %16818 = vst [vmem:[#allocation300_spill] sm:$0xff] %v12441_v32  ;;  %vm3292_vm0 = vnez %v3222_v46  ;;  %v2576_v12 = vmax.f32 %v2064_v60, %v2320_v33  ;;  %v2061_v62 = vadd.f32 %v16352_v35, %v1786_v11  ;;  %v12446_v47 = vadd.f32 %v16353_v57, %v1786_v11 }
 0x4ad   :  { %v3356_v59 = vsel %vm3292_vm0, 16843009, %v15940_v22  ;;  %v3219_v8 = vpack.c.b8 %v3218_v61, %v3217_v44  ;;  %v12449_v5 = vadd.f32 %v9960_v23, %v1786_v11  ;;  %v2577_v9 = vmax.f32 %v2065_v13, %v2321_v50 }
 0x4ae   :  { %v3600_v20 = vunpack.c.0.s8 %v3356_v59  ;;  %v3601_v7 = vunpack.c.1.s8 %v3356_v59  ;;  %v3602_v14 = vunpack.c.2.s8 %v3356_v59  ;;  %v3603_v45 = vunpack.c.3.s8 %v3356_v59 }
 0x4af   :  { %v2578_v56 = vmax.f32 %v2066_v19, %v2322_v21  ;;  %v2579_v55 = vmax.f32 %v2067_v6, %v2323_v29  ;;  %v2316_v46 = vmul.f32 0.2, %v2060_v39  ;;  %vm3291_vm5 = vnez %v3219_v8 }
 0x4b0   :  { %vm3856_vm2 = vcmp.ne.s32.totalorder %v3600_v20, 0  ;;  %vm3857_vm3 = vcmp.ne.s32.totalorder %v3601_v7, 0  ;;  %vm3858_vm4 = vcmp.ne.s32.totalorder %v3602_v14, 0  ;;  %vm3859_vm6 = vcmp.ne.s32.totalorder %v3603_v45, 0  ;;  %v1801_v14 = vpop.permute.xlu1 %1800  ;;  %v17059_v49 = vld [vmem:[#allocation299_spill] sm:$0xff] }
 0x4b1   :  { %v2317_v33 = vmul.f32 0.2, %v2061_v62  ;;  %v3032_v60 = vunpack.c.2.s8 %v12394_v53  ;;  %v3033_v44 = vunpack.c.2.s8 %v12397_v0  ;;  %v16819_v11 = vmax.f32 %v12342_v16, %v12350_v38 }
 0x4b2   :  { %v12459_v13 = vsel %vm3856_vm2, %v2576_v12, -1e+30  ;;  %v2318_v19 = vmul.f32 0.2, %v12446_v47  ;;  %v2319_v6 = vmul.f32 0.2, %v12449_v5  ;;  %v2572_v59 = vmax.f32 %v2060_v39, %v2316_v46 }
 0x4b3   :  { %v12457_v61 = vmax.f32 %v16819_v11, %v12441_v32  ;;  %16820 = vst [vmem:[#allocation301_spill] sm:$0xff] %v12459_v13  ;;  %v12463_v50 = vsel %vm3857_vm3, %v2577_v9, -1e+30  ;;  %v12465_v21 = vsel %vm3858_vm4, %v2578_v56, -1e+30  ;;  %v3034_v12 = vunpack.c.2.s8 %v12400_v28 }
 0x4b4   :  { %16821 = vst [vmem:[#allocation302_spill] sm:$0xff] %v12463_v50  ;;  %16822 = vst [vmem:[#allocation303_spill] sm:$0xff] %v12465_v21  ;;  %v3355_v29 = vsel %vm3291_vm5, 16843009, %v15940_v22  ;;  %v12468_v8 = vsel %vm3859_vm6, %v2579_v55, -1e+30  ;;  %v3035_v11 = vunpack.c.2.s8 %v12404_v41  ;;  %v3226_v38 = vpack.c.b16 %v3033_v44, %v3032_v60 }
 0x4b5   :  { %16823 = vst [vmem:[#allocation304_spill] sm:$0xff] %v12468_v8  ;;  %v3596_v20 = vunpack.c.0.s8 %v3355_v29  ;;  %v3597_v7 = vunpack.c.1.s8 %v3355_v29  ;;  %v3598_v16 = vunpack.c.2.s8 %v3355_v29  ;;  %v3599_v45 = vunpack.c.3.s8 %v3355_v29 }
 0x4b6   :  { %v4186_v9 = vmax.f32 %v12428_v3, %v12459_v13  ;;  %v4255_v56 = vmax.f32 %v12433_v63, %v12463_v50  ;;  %v4324_v55 = vmax.f32 %v12436_v37, %v12465_v21  ;;  %v2573_v39 = vmax.f32 %v2061_v62, %v2317_v33 }
 0x4b7   :  { %v4393_v46 = vmax.f32 %v12457_v61, %v12468_v8  ;;  %vm3852_vm7 = vcmp.ne.s32.totalorder %v3596_v20, 0  ;;  %v3227_v29 = vpack.c.b16 %v3035_v11, %v3034_v12  ;;  %v2072_v32 = vadd.f32 %v16351_v27, %v1801_v14 }
 0x4b8   :  { %vm3853_vm1 = vcmp.ne.s32.totalorder %v3597_v7, 0  ;;  %vm12481_vm8 = vcmp.ne.s32.totalorder %v3598_v16, 0  ;;  %v2574_v3 = vmax.f32 %v12446_v47, %v2318_v19  ;;  %v2575_v63 = vmax.f32 %v12449_v5, %v2319_v6 }
 0x4b9   :  { %vm12487_vm9 = vcmp.ne.s32.totalorder %v3599_v45, 0  ;;  %v3228_v37 = vpack.c.b8 %v3227_v29, %v3226_v38  ;;  %v2073_v62 = vadd.f32 %v16352_v35, %v1801_v14  ;;  %v2074_v33 = vadd.f32 %v16353_v57, %v1801_v14 }
 0x4ba   :  { %v12493_v61 = vsel %vm3852_vm7, %v2572_v59, -1e+30  ;;  %v2075_v20 = vadd.f32 %v9960_v23, %v1801_v14  ;;  %v3028_v7 = vunpack.c.1.s8 %v12394_v53  ;;  %v3029_v16 = vunpack.c.1.s8 %v12397_v0 }
 0x4bb   :  { %16828 = vst [vmem:[#allocation305_spill] sm:$0xff] %v12493_v61  ;;  %v12498_v47 = vsel %vm3853_vm1, %v2573_v39, -1e+30  ;;  %vm3294_vm10 = vnez %v3228_v37  ;;  %v2328_v5 = vmul.f32 0.2, %v2072_v32  ;;  %v3030_v45 = vunpack.c.1.s8 %v12400_v28 }
 0x4bc   :  { %16829 = vst [vmem:[#allocation306_spill] sm:$0xff] %v12498_v47  ;;  %v2329_v19 = vmul.f32 0.2, %v2073_v62  ;;  %v3358_v6 = vsel %vm3294_vm10, 16843009, %v15940_v22  ;;  %v3031_v12 = vunpack.c.1.s8 %v12404_v41  ;;  %v12504_v8 = vmax.f32 %v4186_v9, %v12493_v61 }
 0x4bd   :  { %v2330_v38 = vmul.f32 0.2, %v2074_v33  ;;  %v3608_v59 = vunpack.c.0.s8 %v3358_v6  ;;  %v3609_v11 = vunpack.c.1.s8 %v3358_v6  ;;  %v3610_v29 = vunpack.c.2.s8 %v3358_v6 }
 0x4be   :  { %v2331_v14 = vmul.f32 0.2, %v2075_v20  ;;  %v12508_v39 = vsel %vm12481_vm8, %v2574_v3, -1e+30  ;;  %v3611_v37 = vunpack.c.3.s8 %v3358_v6  ;;  %v3223_v50 = vpack.c.b16 %v3029_v16, %v3028_v7 }
 0x4bf   :  { %v12511_v21 = vmax.f32 %v4255_v56, %v12498_v47  ;;  %v12515_v13 = vsel %vm12487_vm9, %v2575_v63, -1e+30  ;;  %v2584_v15 = vmax.f32 %v2072_v32, %v2328_v5  ;;  %v2585_v54 = vmax.f32 %v2073_v62, %v2329_v19 }
 0x4c0   :  { %16830 = vst [vmem:[#allocation307_spill] sm:$0xff] %v12515_v13  ;;  %vm3864_vm11 = vcmp.ne.s32.totalorder %v3608_v59, 0  ;;  %vm3865_vm12 = vcmp.ne.s32.totalorder %v3609_v11, 0  ;;  %v2586_v9 = vmax.f32 %v2074_v33, %v2330_v38  ;;  %v3224_v61 = vpack.c.b16 %v3031_v12, %v3030_v45 }
 0x4c1   :  { %v4325_v60 = vmax.f32 %v4324_v55, %v12508_v39  ;;  %v12519_v3 = vmax.f32 %v4393_v46, %v12515_v13  ;;  %vm3866_vm13 = vcmp.ne.s32.totalorder %v3610_v29, 0  ;;  %v2587_v7 = vmax.f32 %v2075_v20, %v2331_v14 }
 0x4c2   :  { %vm12521_vm14 = vcmp.ne.s32.totalorder %v3611_v37, 0  ;;  %v3225_v63 = vpack.c.b8 %v3224_v61, %v3223_v50  ;;  %v2068_v32 = vadd.f32 %v16351_v27, %v1796_v51  ;;  %v2069_v44 = vadd.f32 %v16352_v35, %v1796_v51  ;;  %v1806_v37 = vpop.permute.xlu0 %1805  ;;  %v17062_v24 = vld [vmem:[#allocation305_spill] sm:$0xff] }
 0x4c3   :  { %v12527_v62 = vsel %vm3864_vm11, %v2584_v15, -1e+30  ;;  %v12529_v33 = vsel %vm3865_vm12, %v2585_v54, -1e+30  ;;  %v2070_v55 = vadd.f32 %v16353_v57, %v1796_v51  ;;  %v2071_v46 = vadd.f32 %v9960_v23, %v1796_v51 }
 0x4c4   :  { %v12533_v16 = vsel %vm3866_vm13, %v2586_v9, -1e+30  ;;  %vm3293_vm15 = vnez %v3225_v63  ;;  %v2324_v20 = vmul.f32 0.2, %v2068_v32  ;;  %v2325_v5 = vmul.f32 0.2, %v2069_v44 }
 0x4c5   :  { %v3357_v19 = vsel %vm3293_vm15, 16843009, %v15940_v22  ;;  %v2326_v50 = vmul.f32 0.2, %v2070_v55  ;;  %v3036_v61 = vunpack.c.3.s8 %v12394_v53  ;;  %v3037_v6 = vunpack.c.3.s8 %v12397_v0 }
 0x4c6   :  { %v3604_v15 = vunpack.c.0.s8 %v3357_v19  ;;  %v3605_v38 = vunpack.c.1.s8 %v3357_v19  ;;  %v3606_v54 = vunpack.c.2.s8 %v3357_v19  ;;  %v2327_v45 = vmul.f32 0.2, %v2071_v46 }
 0x4c7   :  { %v12540_v12 = vsel %vm12521_vm14, %v2587_v7, -1e+30  ;;  %v3607_v51 = vunpack.c.3.s8 %v3357_v19  ;;  %v3038_v59 = vunpack.c.3.s8 %v12400_v28  ;;  %v3039_v11 = vunpack.c.3.s8 %v12404_v41 }
 0x4c8   :  { %v4188_v29 = vmax.f32 %v12504_v8, %v12527_v62  ;;  %v4257_v53 = vmax.f32 %v12511_v21, %v12529_v33  ;;  %v2580_v0 = vmax.f32 %v2068_v32, %v2324_v20  ;;  %v2581_v14 = vmax.f32 %v2069_v44, %v2325_v5 }
 0x4c9   :  { %vm3860_vm0 = vcmp.ne.s32.totalorder %v3604_v15, 0  ;;  %vm3861_vm2 = vcmp.ne.s32.totalorder %v3605_v38, 0  ;;  %v2582_v9 = vmax.f32 %v2070_v55, %v2326_v50  ;;  %v3229_v56 = vpack.c.b16 %v3037_v6, %v3036_v61 }
 0x4ca   :  { %v4326_v7 = vmax.f32 %v4325_v60, %v12533_v16  ;;  %v4395_v28 = vmax.f32 %v12519_v3, %v12540_v12  ;;  %vm3862_vm3 = vcmp.ne.s32.totalorder %v3606_v54, 0  ;;  %v2583_v41 = vmax.f32 %v2071_v46, %v2327_v45 }
 0x4cb   :  { %vm12551_vm4 = vcmp.ne.s32.totalorder %v3607_v51, 0  ;;  %v3230_v8 = vpack.c.b16 %v3039_v11, %v3038_v59  ;;  %v2076_v21 = vadd.f32 %v16351_v27, %v1806_v37  ;;  %v2077_v32 = vadd.f32 %v16352_v35, %v1806_v37 }
 0x4cc   :  { %v12557_v44 = vsel %vm3860_vm0, %v2580_v0, -1e+30  ;;  %v12559_v55 = vsel %vm3861_vm2, %v2581_v14, -1e+30  ;;  %v2078_v60 = vadd.f32 %v16353_v57, %v1806_v37  ;;  %v2079_v20 = vadd.f32 %v9960_v23, %v1806_v37 }
 0x4cd   :  { %16835 = vst [vmem:[#allocation308_spill] sm:$0xff] %v12559_v55  ;;  %v12563_v3 = vsel %vm3862_vm3, %v2582_v9, -1e+30  ;;  %v3231_v46 = vpack.c.b8 %v3230_v8, %v3229_v56  ;;  %v2332_v5 = vmul.f32 0.2, %v2076_v21  ;;  %v4189_v50 = vmax.f32 %v4188_v29, %v12557_v44 }
 0x4ce   :  { %16836 = vst [vmem:[#allocation309_spill] sm:$0xff] %v12563_v3  ;;  %v2333_v19 = vmul.f32 0.2, %v2077_v32  ;;  %v4258_v61 = vmax.f32 %v4257_v53, %v12559_v55  ;;  %v2334_v27 = vmul.f32 0.2, %v2078_v60  ;;  %v4327_v35 = vmax.f32 %v4326_v7, %v12563_v3  ;;  %v16926_v55 = vld [vmem:[#allocation152_spill] sm:$0xff] }
 0x4cf   :  { %v2335_v6 = vmul.f32 0.2, %v2079_v20  ;;  %v12570_v15 = vsel %vm12551_vm4, %v2583_v41, -1e+30  ;;  %vm3295_vm5 = vnez %v3231_v46  ;;  %v2588_v57 = vmax.f32 %v2076_v21, %v2332_v5 }
 0x4d0   :  { %16837 = vst [vmem:[#allocation310_spill] sm:$0xff] %v12570_v15  ;;  %v3359_v23 = vsel %vm3295_vm5, 16843009, %v15940_v22  ;;  %v2589_v38 = vmax.f32 %v2077_v32, %v2333_v19  ;;  %v2590_v54 = vmax.f32 %v2078_v60, %v2334_v27  ;;  %v4396_v53 = vmax.f32 %v4395_v28, %v12570_v15  ;;  %v16928_v22 = vld [vmem:[#allocation80_spill] sm:$0xff] }
 0x4d1   :  { %v2591_v45 = vmax.f32 %v2079_v20, %v2335_v6  ;;  %v3612_v51 = vunpack.c.0.s8 %v3359_v23  ;;  %v3613_v59 = vunpack.c.1.s8 %v3359_v23  ;;  %v3614_v11 = vunpack.c.2.s8 %v3359_v23 }
 0x4d2   :  { %v3615_v29 = vunpack.c.3.s8 %v3359_v23 }
 0x4d3   :  { %vm3868_vm6 = vcmp.ne.s32.totalorder %v3612_v51, 0  ;;  %vm3869_vm7 = vcmp.ne.s32.totalorder %v3613_v59, 0  ;;  %vm3870_vm1 = vcmp.ne.s32.totalorder %v3614_v11, 0 }
 0x4d4   :  { %vm3871_vm8 = vcmp.ne.s32.totalorder %v3615_v29, 0  ;;  %v4124_v0 = vsel %vm3868_vm6, %v2588_v57, -1e+30  ;;  %v4125_v14 = vsel %vm3869_vm7, %v2589_v38, -1e+30 }
 0x4d5   :  { %v4126_v37 = vsel %vm3870_vm1, %v2590_v54, -1e+30  ;;  %v4190_v9 = vmax.f32 %v4189_v50, %v4124_v0  ;;  %v4259_v56 = vmax.f32 %v4258_v61, %v4125_v14  ;;  %v4127_v41 = vsel %vm3871_vm8, %v2591_v45, -1e+30 }
 0x4d6   :  { %v4328_v7 = vmax.f32 %v4327_v35, %v4126_v37  ;;  %v4397_v63 = vmax.f32 %v4396_v53, %v4127_v41 }
 0x4d7   :  { %v4191_v8 = vrot.slane %v4190_v9, 4  ;;  %v4260_v21 = vrot.slane %v4259_v56, 4 }
 0x4d8   :  { %v4329_v32 = vrot.slane %v4328_v7, 4  ;;  %v4398_v60 = vrot.slane %v4397_v63, 4 }
 0x4d9   :  { %v4192_v20 = vmax.f32 %v4190_v9, %v4191_v8  ;;  %v4261_v46 = vmax.f32 %v4259_v56, %v4260_v21 }
 0x4da   :  { %v4330_v5 = vmax.f32 %v4328_v7, %v4329_v32  ;;  %v4399_v28 = vmax.f32 %v4397_v63, %v4398_v60 }
 0x4db   :  { %v4193_v19 = vrot.slane %v4192_v20, 2  ;;  %v4262_v27 = vrot.slane %v4261_v46, 2 }
 0x4dc   :  { %v4331_v6 = vrot.slane %v4330_v5, 2  ;;  %v4400_v23 = vrot.slane %v4399_v28, 2 }
 0x4dd   :  { %v4194_v57 = vmax.f32 %v4192_v20, %v4193_v19  ;;  %v4263_v38 = vmax.f32 %v4261_v46, %v4262_v27  ;;  %v16845_v19 = vld [vmem:[#allocation139_spill] sm:$0xff] }
 0x4de   :  { %v4332_v54 = vmax.f32 %v4330_v5, %v4331_v6  ;;  %v4401_v50 = vmax.f32 %v4399_v28, %v4400_v23  ;;  %v16848_v6 = vld [vmem:[#allocation96_spill] sm:$0xff] }
 0x4df   :  { %v4195_v61 = vrot.slane %v4194_v57, 1  ;;  %v4264_v35 = vrot.slane %v4263_v38, 1  ;;  %v16887_v23 = vld [vmem:[#allocation108_spill] sm:$0xff] }
 0x4e0   :  { %v4333_v45 = vrot.slane %v4332_v54, 1  ;;  %v4402_v51 = vrot.slane %v4401_v50, 1 }
 0x4e1   :  { %v12574_v59 = vmax.f32 %v4194_v57, %v4195_v61  ;;  %v12576_v11 = vmax.f32 %v4263_v38, %v4264_v35  ;;  %v16849_v57 = vld [vmem:[#allocation110_spill] sm:$0xff]  ;;  %v16859_v35 = vld [vmem:[#allocation113_spill] sm:$0xff] }
 0x4e2   :  { %v12578_v29 = vmax.f32 %v4332_v54, %v4333_v45  ;;  %v12580_v53 = vmax.f32 %v4401_v50, %v4402_v51  ;;  %v16850_v54 = vld [vmem:[#allocation86_spill] sm:$0xff]  ;;  %v16851_v45 = vld [vmem:[#allocation112_spill] sm:$0xff]  ;;  %v16860_v50 = vld [vmem:[#allocation107_spill] sm:$0xff] }
 0x4e3   :  { %16838 = vst [vmem:[#allocation311_spill] sm:$0xff] %v12574_v59  ;;  %16839 = vst [vmem:[#allocation312_spill] sm:$0xff] %v12576_v11  ;;  %v4652_v9 = vsub.f32 %v12527_v62, %v12574_v59  ;;  %v4653_v56 = vsub.f32 %v12529_v33, %v12576_v11  ;;  %v4656_v63 = vsub.f32 %v4124_v0, %v12574_v59  ;;  %v16858_v51 = vld [vmem:[#allocation106_spill] sm:$0xff]  ;;  %v16870_v0 = vld [vmem:[#allocation117_spill] sm:$0xff] }
 0x4e4   :  { %16840 = vst [vmem:[#allocation313_spill] sm:$0xff] %v12578_v29  ;;  %16841 = vst [vmem:[#allocation314_spill] sm:$0xff] %v12580_v53  ;;  %v4654_v7 = vsub.f32 %v12533_v16, %v12578_v29  ;;  %v4655_v8 = vsub.f32 %v12540_v12, %v12580_v53  ;;  %v4657_v21 = vsub.f32 %v4125_v14, %v12576_v11  ;;  %v16844_v16 = vld [vmem:[#allocation75_spill] sm:$0xff]  ;;  %v16883_v38 = vld [vmem:[#allocation89_spill] sm:$0xff] }
 0x4e5   :  { %v4658_v32 = vsub.f32 %v4126_v37, %v12578_v29  ;;  %v4659_v60 = vsub.f32 %v4127_v41, %v12580_v53  ;;  %v4784_v20 = vpack.c.bf16 %v4656_v63, %v4652_v9  ;;  %v4405_v12 = vsub.f32 %v16845_v19, %v12576_v11  ;;  %v16846_v14 = vld [vmem:[#allocation111_spill] sm:$0xff]  ;;  %v16847_v37 = vld [vmem:[#allocation126_spill] sm:$0xff]  ;;  %v16852_v9 = vld [vmem:[#allocation105_spill] sm:$0xff] }
 0x4e6   :  { %v12594_v46 = vpack.c.bf16 %v4657_v21, %v4653_v56  ;;  %v4409_v27 = vsub.f32 %v16846_v14, %v12576_v11  ;;  %v16861_v41 = vld [vmem:[#allocation124_spill] sm:$0xff]  ;;  %v16866_v63 = vld [vmem:[#allocation114_spill] sm:$0xff]  ;;  %v16954_v15 = vsub.f32 %v16848_v6, %v12580_v53  ;;  %v16955_v30 = vsub.f32 %v10510_v17, %v12580_v53  ;;  %v17063_v6 = vld [vmem:[#allocation301_spill] sm:$0xff] }
 0x4e7   :  { %v4786_v62 = vpack.c.bf16 %v4658_v32, %v4654_v7  ;;  %v12596_v5 = vpack.c.bf16 %v4659_v60, %v4655_v8  ;;  %v5161_v33 = vmul.bf16 1069105081, %v4784_v20  ;;  %v16853_v7 = vld [vmem:[#allocation90_spill] sm:$0xff]  ;;  %v16854_v8 = vld [vmem:[#allocation76_spill] sm:$0xff]  ;;  %v16855_v32 = vld [vmem:[#allocation141_spill] sm:$0xff]  ;;  %v17065_v60 = vsub.f32 %v16844_v16, %v12574_v59 }
 0x4e8   :  { %16842 = vst [vmem:[#allocation315_spill] sm:$0xff] %v12594_v46  ;;  %v16856_v20 = vld [vmem:[#allocation125_spill] sm:$0xff]  ;;  %v4661_v14 = vpack.c.bf16 %v4409_v27, %v4405_v12  ;;  %v16864_v12 = vld [vmem:[#allocation128_spill] sm:$0xff]  ;;  %v16886_v61 = vld [vmem:[#allocation154_spill] sm:$0xff]  ;;  %v4663_v58 = vpack.c.bf16 %v16955_v30, %v16954_v15  ;;  %v17066_v1 = vsub.f32 %v16849_v57, %v12574_v59  ;;  %v17069_v30 = vsub.f32 %v10547_v34, %v12574_v59 }
 0x4e9   :  { %16843 = vst [vmem:[#allocation316_spill] sm:$0xff] %v12596_v5  ;;  %v5167_v28 = vmul.bf16 1069105081, %v4786_v62  ;;  %7367 = vpow.bf16 %v5161_v33  ;;  %v16857_v33 = vld [vmem:[#allocation99_spill] sm:$0xff]  ;;  %v16863_v62 = vld [vmem:[#allocation142_spill] sm:$0xff]  ;;  %v16865_v56 = vld [vmem:[#allocation100_spill] sm:$0xff]  ;;  %v17068_v5 = vsub.f32 %v16850_v54, %v12578_v29  ;;  %v17071_v16 = vsub.f32 %v16851_v45, %v12576_v11 }
 0x4ea   :  { %v4792_v19 = vmul.bf16 1069105081, %v4661_v14  ;;  %v16871_v14 = vld [vmem:[#allocation144_spill] sm:$0xff]  ;;  %v16927_v27 = vld [vmem:[#allocation71_spill] sm:$0xff]  ;;  %v4798_v36 = vmul.bf16 1069105081, %v4663_v58  ;;  %v13096_v2 = vpack.c.bf16 %v17066_v1, %v17065_v60  ;;  %v17072_v1 = vsub.f32 %v16855_v32, %v12576_v11 }
 0x4eb   :  { %7369 = vpow.bf16 %v5167_v28  ;;  %v16862_v28 = vld [vmem:[#allocation78_spill] sm:$0xff]  ;;  %v17058_v15 = vld [vmem:[#allocation297_spill] sm:$0xff]  ;;  %v17064_v17 = vld [vmem:[#allocation303_spill] sm:$0xff]  ;;  %v17076_v54 = vsub.f32 %v16857_v33, %v12580_v53  ;;  %v17077_v45 = vsub.f32 %v16858_v51, %v12574_v59  ;;  %v17081_v33 = vsub.f32 %v16860_v50, %v12578_v29 }
 0x4ec   :  { %7371 = vpow.bf16 %v4792_v19  ;;  %v16925_v19 = vld [vmem:[#allocation129_spill] sm:$0xff]  ;;  %v13118_v57 = vpack.c.bf16 %v17072_v1, %v17071_v16  ;;  %v17078_v32 = vsub.f32 %v16862_v28, %v12574_v59  ;;  %v17083_v28 = vsub.f32 %v16861_v41, %v12580_v53 }
 0x4ed   :  { %7373 = vpow.bf16 %v4798_v36  ;;  %v17060_v58 = vld [vmem:[#allocation293_spill] sm:$0xff]  ;;  %v17070_v36 = vsub.f32 %v16854_v8, %v12574_v59 }
 0x4ee   :  { %v13140_v60 = vpack.c.bf16 %v17078_v32, %v17077_v45  ;;  %v17087_v50 = vld [vmem:[#allocation109_spill] sm:$0xff]  ;;  %v17094_v45 = vld [vmem:[#allocation87_spill] sm:$0xff] }
 0x4ef   :  { %v13110_v3 = vpack.c.bf16 %v17070_v36, %v17069_v30  ;;  %v17082_v30 = vsub.f32 %v16864_v12, %v12578_v29  ;;  %v17084_v36 = vsub.f32 %v16865_v56, %v12580_v53  ;;  %v17088_v12 = vsub.f32 %v17087_v50, %v12576_v11  ;;  %v17096_v32 = vld [vmem:[#allocation101_spill] sm:$0xff] }
 0x4f0   :  { %v17105_v50 = vld [vmem:[#allocation145_spill] sm:$0xff] }
 0x4f1   :  { %v4670_v51 = vpack.c.bf16 %v17082_v30, %v17081_v33  ;;  %v13162_v16 = vpack.c.bf16 %v17084_v36, %v17083_v28  ;;  %v17099_v33 = vld [vmem:[#allocation122_spill] sm:$0xff]  ;;  %v17101_v30 = vld [vmem:[#allocation148_spill] sm:$0xff] }
 0x4f2   :  { %v17102_v28 = vsub.f32 %v17101_v30, %v12574_v59  ;;  %v17117_v30 = vld [vmem:[#allocation88_spill] sm:$0xff] }
 0x4f7   :  { %v12714_v21 = vpop.eup %7367 }
 0x4f8   :  { %16896 = vst [vmem:[#allocation75_spill] sm:$0xff] %v12714_v21  ;;  %v16964_v21 = vld [vmem:[#allocation223_spill] sm:$0xff] }
 0x4f9   :  { %v12732_v13 = vpop.eup %7369 }
 0x4fa   :  { %16905 = vst [vmem:[#allocation139_spill] sm:$0xff] %v12732_v13  ;;  %v12766_v47 = vpop.eup %7371  ;;  %v16946_v13 = vld [vmem:[#allocation203_spill] sm:$0xff] }
 0x4fb   :  { %16922 = vst [vmem:[#allocation111_spill] sm:$0xff] %v12766_v47  ;;  %6292 = vmatprep.mubr.bf16.mxu1 %v12766_v47  ;;  %v16944_v47 = vld [vmem:[#allocation196_spill] sm:$0xff]  ;;  %v13009_v52 = vpop.eup %7373 }
 0x4fc   :  { %17029 = vst [vmem:[#allocation126_spill] sm:$0xff] %v13009_v52  ;;  %6581 = vmatprep.mubr.bf16.mxu0 %v13009_v52  ;;  %v17067_v52 = vsub.f32 %v16847_v37, %v12578_v29  ;;  %v17073_v37 = vsub.f32 %v16852_v9, %v12578_v29  ;;  %v17079_v9 = vsub.f32 %v16859_v35, %v12576_v11 }
 0x4fd   :  { %v17085_v35 = vsub.f32 %v16866_v63, %v12574_v59 }
 0x4fe   :  { %v4662_v46 = vpack.c.bf16 %v17068_v5, %v17067_v52  ;;  %v17074_v52 = vsub.f32 %v16856_v20, %v12578_v29  ;;  %v17075_v5 = vsub.f32 %v16853_v7, %v12580_v53  ;;  %v17080_v20 = vsub.f32 %v16863_v62, %v12576_v11 }
 0x4ff   :  { %v17086_v62 = vsub.f32 %v16870_v0, %v12574_v59  ;;  %v17095_v0 = vsub.f32 %v17094_v45, %v12580_v53 }
 0x500   :  { %v4666_v34 = vpack.c.bf16 %v17074_v52, %v17073_v37  ;;  %v13132_v8 = vpack.c.bf16 %v17076_v54, %v17075_v5  ;;  %v13148_v7 = vpack.c.bf16 %v17080_v20, %v17079_v9  ;;  %v17089_v37 = vsub.f32 %v16871_v14, %v12576_v11  ;;  %v17090_v52 = vld [vmem:[#allocation133_spill] sm:$0xff]  ;;  %v17092_v5 = vld [vmem:[#allocation130_spill] sm:$0xff] }
 0x501   :  { %v13170_v1 = vpack.c.bf16 %v17086_v62, %v17085_v35  ;;  %v17091_v56 = vsub.f32 %v17090_v52, %v12578_v29  ;;  %v17093_v54 = vsub.f32 %v17092_v5, %v12578_v29  ;;  %v17097_v9 = vsub.f32 %v17096_v32, %v12580_v53  ;;  %v17103_v35 = vld [vmem:[#allocation73_spill] sm:$0xff]  ;;  %v17108_v52 = vld [vmem:[#allocation135_spill] sm:$0xff] }
 0x502   :  { %v13178_v41 = vpack.c.bf16 %v17089_v37, %v17088_v12  ;;  %v17100_v14 = vsub.f32 %v17099_v33, %v12574_v59  ;;  %v17104_v62 = vsub.f32 %v17103_v35, %v12576_v11  ;;  %v17106_v12 = vsub.f32 %v17105_v50, %v12576_v11  ;;  %v17110_v5 = vld [vmem:[#allocation131_spill] sm:$0xff] }
 0x503   :  { %v13186_v63 = vpack.c.bf16 %v17093_v54, %v17091_v56  ;;  %v13194_v20 = vpack.c.bf16 %v17097_v9, %v17095_v0  ;;  %v17109_v56 = vsub.f32 %v17108_v52, %v12578_v29  ;;  %v17111_v54 = vsub.f32 %v17110_v5, %v12578_v29  ;;  %v17112_v0 = vld [vmem:[#allocation127_spill] sm:$0xff]  ;;  %v17114_v9 = vld [vmem:[#allocation102_spill] sm:$0xff] }
 0x504   :  { %v13202_v36 = vpack.c.bf16 %v17102_v28, %v17100_v14  ;;  %v13210_v37 = vpack.c.bf16 %v17106_v12, %v17104_v62  ;;  %v17113_v32 = vsub.f32 %v17112_v0, %v12580_v53  ;;  %v17115_v33 = vsub.f32 %v17114_v9, %v12580_v53  ;;  %v17123_v5 = vld [vmem:[#allocation91_spill] sm:$0xff]  ;;  %v17125_v0 = vld [vmem:[#allocation132_spill] sm:$0xff] }
 0x505   :  { %17098 = vst [vmem:[#allocation96_spill] sm:$0xff] %v13194_v20  ;;  %v13218_v45 = vpack.c.bf16 %v17111_v54, %v17109_v56  ;;  %v17118_v28 = vsub.f32 %v17117_v30, %v12574_v59  ;;  %v17119_v35 = vsub.f32 %v16886_v61, %v12574_v59  ;;  %v17120_v50 = vsub.f32 %v16883_v38, %v12576_v11  ;;  %v17127_v61 = vld [vmem:[#allocation155_spill] sm:$0xff] }
 0x506   :  { %17107 = vst [vmem:[#allocation110_spill] sm:$0xff] %v13210_v37  ;;  %v13226_v14 = vpack.c.bf16 %v17115_v33, %v17113_v32  ;;  %v17121_v12 = vsub.f32 %v16887_v23, %v12576_v11  ;;  %v4795_v56 = vmul.bf16 1069105081, %v4662_v46  ;;  %v17124_v54 = vsub.f32 %v17123_v5, %v12578_v29  ;;  %v17129_v30 = vld [vmem:[#allocation115_spill] sm:$0xff]  ;;  %v17132_v23 = vld [vmem:[#allocation93_spill] sm:$0xff]  ;;  %v17137_v5 = vld [vmem:[#allocation156_spill] sm:$0xff] }
 0x507   :  { %v13234_v62 = vpack.c.bf16 %v17119_v35, %v17118_v28  ;;  %v17126_v32 = vsub.f32 %v17125_v0, %v12578_v29  ;;  %v17128_v33 = vsub.f32 %v17127_v61, %v12580_v53  ;;  %v17130_v38 = vsub.f32 %v17129_v30, %v12580_v53  ;;  %v17134_v46 = vld [vmem:[#allocation81_spill] sm:$0xff]  ;;  %v17144_v30 = vld [vmem:[#allocation134_spill] sm:$0xff] }
 0x508   :  { %17116 = vst [vmem:[#allocation86_spill] sm:$0xff] %v13226_v14  ;;  %v13242_v52 = vpack.c.bf16 %v17121_v12, %v17120_v50  ;;  %v17133_v35 = vsub.f32 %v17132_v23, %v12574_v59  ;;  %v17135_v50 = vsub.f32 %v17134_v46, %v12574_v59  ;;  %v17139_v0 = vld [vmem:[#allocation77_spill] sm:$0xff]  ;;  %v17148_v46 = vld [vmem:[#allocation118_spill] sm:$0xff]  ;;  %v17161_v14 = vld [vmem:[#allocation160_spill] sm:$0xff]  ;;  %7375 = vpow.bf16 %v4795_v56 }
 0x509   :  { %v13250_v9 = vpack.c.bf16 %v17126_v32, %v17124_v54  ;;  %v13258_v28 = vpack.c.bf16 %v17130_v38, %v17128_v33  ;;  %v17138_v54 = vsub.f32 %v17137_v5, %v12576_v11  ;;  %v17140_v32 = vsub.f32 %v17139_v0, %v12576_v11  ;;  %v17153_v0 = vld [vmem:[#allocation83_spill] sm:$0xff]  ;;  %v17180_v37 = vld [vmem:[#allocation138_spill] sm:$0xff]  ;;  %v17199_v56 = vld [vmem:[#allocation140_spill] sm:$0xff] }
 0x50a   :  { %17122 = vst [vmem:[#allocation112_spill] sm:$0xff] %v13242_v52  ;;  %v13266_v12 = vpack.c.bf16 %v17135_v50, %v17133_v35  ;;  %v17142_v52 = vld [vmem:[#allocation157_spill] sm:$0xff]  ;;  %v17145_v38 = vsub.f32 %v17144_v30, %v12578_v29  ;;  %v17149_v50 = vsub.f32 %v17148_v46, %v12580_v53  ;;  %v17158_v30 = vld [vmem:[#allocation147_spill] sm:$0xff]  ;;  %v17163_v46 = vld [vmem:[#allocation136_spill] sm:$0xff] }
 0x50b   :  { %17131 = vst [vmem:[#allocation105_spill] sm:$0xff] %v13258_v28  ;;  %v13274_v61 = vpack.c.bf16 %v17140_v32, %v17138_v54  ;;  %v17143_v33 = vsub.f32 %v17142_v52, %v12578_v29  ;;  %v17146_v28 = vld [vmem:[#allocation158_spill] sm:$0xff]  ;;  %v17154_v32 = vsub.f32 %v17153_v0, %v12574_v59  ;;  %v17167_v0 = vld [vmem:[#allocation119_spill] sm:$0xff] }
 0x50c   :  { %17136 = vst [vmem:[#allocation90_spill] sm:$0xff] %v13266_v12  ;;  %v17147_v35 = vsub.f32 %v17146_v28, %v12580_v53  ;;  %v17151_v12 = vld [vmem:[#allocation94_spill] sm:$0xff] }
 0x50d   :  { %17141 = vst [vmem:[#allocation76_spill] sm:$0xff] %v13274_v61  ;;  %v13282_v23 = vpack.c.bf16 %v17145_v38, %v17143_v33  ;;  %v17152_v54 = vsub.f32 %v17151_v12, %v12574_v59  ;;  %v17156_v61 = vld [vmem:[#allocation159_spill] sm:$0xff]  ;;  %v17159_v38 = vsub.f32 %v17158_v30, %v12576_v11  ;;  %v17172_v30 = vld [vmem:[#allocation162_spill] sm:$0xff] }
 0x50e   :  { %v13290_v5 = vpack.c.bf16 %v17149_v50, %v17147_v35  ;;  %v17157_v33 = vsub.f32 %v17156_v61, %v12576_v11  ;;  %v17162_v35 = vsub.f32 %v17161_v14, %v12578_v29  ;;  %v17164_v50 = vsub.f32 %v17163_v46, %v12578_v29  ;;  %v17177_v46 = vld [vmem:[#allocation163_spill] sm:$0xff] }
 0x50f   :  { %v13298_v52 = vpack.c.bf16 %v17154_v32, %v17152_v54  ;;  %v17168_v32 = vsub.f32 %v17167_v0, %v12580_v53  ;;  %v17182_v0 = vld [vmem:[#allocation164_spill] sm:$0xff] }
 0x510   :  { %17150 = vst [vmem:[#allocation141_spill] sm:$0xff] %v13290_v5  ;;  %v13306_v28 = vpack.c.bf16 %v17159_v38, %v17157_v33  ;;  %v13314_v12 = vpack.c.bf16 %v17164_v50, %v17162_v35  ;;  %v17165_v5 = vld [vmem:[#allocation161_spill] sm:$0xff]  ;;  %v17173_v38 = vsub.f32 %v17172_v30, %v12574_v59  ;;  %v17178_v50 = vsub.f32 %v17177_v46, %v12576_v11 }
 0x511   :  { %17155 = vst [vmem:[#allocation125_spill] sm:$0xff] %v13298_v52  ;;  %v17166_v54 = vsub.f32 %v17165_v5, %v12580_v53  ;;  %v17170_v52 = vld [vmem:[#allocation84_spill] sm:$0xff]  ;;  %v17186_v30 = vld [vmem:[#allocation165_spill] sm:$0xff] }
 0x512   :  { %17160 = vst [vmem:[#allocation99_spill] sm:$0xff] %v13306_v28  ;;  %v17171_v33 = vsub.f32 %v17170_v52, %v12574_v59  ;;  %v17175_v28 = vld [vmem:[#allocation149_spill] sm:$0xff] }
 0x513   :  { %v13322_v61 = vpack.c.bf16 %v17168_v32, %v17166_v54  ;;  %v17176_v35 = vsub.f32 %v17175_v28, %v12576_v11  ;;  %v17181_v54 = vsub.f32 %v17180_v37, %v12578_v29  ;;  %v17183_v32 = vsub.f32 %v17182_v0, %v12578_v29 }
 0x514   :  { %v13330_v14 = vpack.c.bf16 %v17173_v38, %v17171_v33  ;;  %v17187_v38 = vsub.f32 %v17186_v30, %v12580_v53  ;;  %v17200_v30 = vsub.f32 %v17199_v56, %v12578_v29  ;;  %v17210_v56 = vsub.f32 %v16926_v55, %v12576_v11 }
 0x515   :  { %17169 = vst [vmem:[#allocation106_spill] sm:$0xff] %v13322_v61  ;;  %v13338_v5 = vpack.c.bf16 %v17178_v50, %v17176_v35  ;;  %v13346_v52 = vpack.c.bf16 %v17183_v32, %v17181_v54  ;;  %v17184_v61 = vld [vmem:[#allocation120_spill] sm:$0xff]  ;;  %v17188_v35 = vld [vmem:[#allocation85_spill] sm:$0xff]  ;;  %v17193_v54 = vld [vmem:[#allocation150_spill] sm:$0xff]  ;;  %v17219_v55 = vsub.f32 %v16929_v26, %v12574_v59 }
 0x516   :  { %17174 = vst [vmem:[#allocation113_spill] sm:$0xff] %v13330_v14  ;;  %v17185_v33 = vsub.f32 %v17184_v61, %v12580_v53  ;;  %v4807_v14 = vmul.bf16 1069105081, %v4666_v34  ;;  %v17189_v46 = vsub.f32 %v17188_v35, %v12574_v59  ;;  %v17190_v50 = vld [vmem:[#allocation116_spill] sm:$0xff]  ;;  %v17194_v0 = vsub.f32 %v17193_v54, %v12576_v11  ;;  %v17195_v32 = vld [vmem:[#allocation151_spill] sm:$0xff]  ;;  %v17201_v35 = vld [vmem:[#allocation97_spill] sm:$0xff] }
 0x517   :  { %17179 = vst [vmem:[#allocation107_spill] sm:$0xff] %v13338_v5  ;;  %v17191_v37 = vsub.f32 %v17190_v50, %v12574_v59  ;;  %v17196_v61 = vsub.f32 %v17195_v32, %v12576_v11  ;;  %v17203_v50 = vld [vmem:[#allocation79_spill] sm:$0xff]  ;;  %v17207_v32 = vsub.f32 %v16925_v19, %v12574_v59 }
 0x518   :  { %v13354_v28 = vpack.c.bf16 %v17187_v38, %v17185_v33  ;;  %v17197_v33 = vld [vmem:[#allocation72_spill] sm:$0xff]  ;;  %7377 = vpow.bf16 %v4807_v14  ;;  %v17248_v14 = vld [vmem:[#allocation182_spill] sm:$0xff] }
 0x519   :  { %v13362_v5 = vpack.c.bf16 %v17191_v37, %v17189_v46  ;;  %v13370_v20 = vpack.c.bf16 %v17196_v61, %v17194_v0  ;;  %v17198_v34 = vsub.f32 %v17197_v33, %v12578_v29  ;;  %v17202_v46 = vsub.f32 %v17201_v35, %v12580_v53  ;;  %v17208_v33 = vld [vmem:[#allocation167_spill] sm:$0xff]  ;;  %v17212_v35 = vld [vmem:[#allocation168_spill] sm:$0xff] }
 0x51a   :  { %v17204_v37 = vsub.f32 %v17203_v50, %v12580_v53  ;;  %v17214_v50 = vsub.f32 %v16927_v27, %v12578_v29 }
 0x51b   :  { %17192 = vst [vmem:[#allocation124_spill] sm:$0xff] %v13362_v5  ;;  %v13378_v38 = vpack.c.bf16 %v17200_v30, %v17198_v34  ;;  %v17205_v5 = vld [vmem:[#allocation166_spill] sm:$0xff]  ;;  %v17209_v34 = vsub.f32 %v17208_v33, %v12576_v11 }
 0x51c   :  { %v13386_v54 = vpack.c.bf16 %v17204_v37, %v17202_v46  ;;  %v17206_v0 = vsub.f32 %v17205_v5, %v12574_v59  ;;  %v17213_v46 = vsub.f32 %v17212_v35, %v12578_v29  ;;  %v17215_v37 = vld [vmem:[#allocation169_spill] sm:$0xff]  ;;  %v17220_v33 = vld [vmem:[#allocation174_spill] sm:$0xff] }
 0x51d   :  { %v13402_v30 = vpack.c.bf16 %v17210_v56, %v17209_v34  ;;  %v17216_v19 = vsub.f32 %v17215_v37, %v12580_v53  ;;  %v17221_v34 = vsub.f32 %v17220_v33, %v12574_v59  ;;  %v17223_v35 = vld [vmem:[#allocation153_spill] sm:$0xff]  ;;  %v17227_v37 = vld [vmem:[#allocation143_spill] sm:$0xff] }
 0x51e   :  { %v13394_v61 = vpack.c.bf16 %v17207_v32, %v17206_v0  ;;  %v13410_v5 = vpack.c.bf16 %v17214_v50, %v17213_v46  ;;  %v17217_v0 = vsub.f32 %v16928_v22, %v12580_v53  ;;  %v17224_v27 = vsub.f32 %v17223_v35, %v12576_v11 }
 0x51f   :  { %17211 = vst [vmem:[#allocation78_spill] sm:$0xff] %v13402_v30  ;;  %v13426_v56 = vpack.c.bf16 %v17221_v34, %v17219_v55  ;;  %v17225_v46 = vsub.f32 %v11034_v18, %v12576_v11  ;;  %v17228_v22 = vsub.f32 %v17227_v37, %v12578_v29  ;;  %v17230_v55 = vld [vmem:[#allocation103_spill] sm:$0xff] }
 0x520   :  { %v13418_v32 = vpack.c.bf16 %v17217_v0, %v17216_v19  ;;  %v17229_v19 = vsub.f32 %v11038_v10, %v12578_v29  ;;  %v4789_v0 = vmul.bf16 1069105081, %v13096_v2  ;;  %v17231_v33 = vsub.f32 %v17230_v55, %v12580_v53  ;;  %v17232_v34 = vld [vmem:[#allocation175_spill] sm:$0xff] }
 0x521   :  { %17222 = vst [vmem:[#allocation128_spill] sm:$0xff] %v13426_v56  ;;  %v13434_v50 = vpack.c.bf16 %v17225_v46, %v17224_v27  ;;  %v17233_v35 = vsub.f32 %v17232_v34, %v12580_v53  ;;  %v17235_v18 = vld [vmem:[#allocation123_spill] sm:$0xff]  ;;  %v17237_v46 = vsub.f32 %v11119_v25, %v12574_v59  ;;  %v4819_v10 = vmul.bf16 1069105081, %v4670_v51  ;;  %v17246_v25 = vld [vmem:[#allocation104_spill] sm:$0xff] }
 0x522   :  { %17218 = vst [vmem:[#allocation142_spill] sm:$0xff] %v13418_v32  ;;  %v13442_v26 = vpack.c.bf16 %v17229_v19, %v17228_v22  ;;  %v17236_v27 = vsub.f32 %v17235_v18, %v12574_v59  ;;  %v17238_v22 = vld [vmem:[#allocation137_spill] sm:$0xff]  ;;  %v17240_v19 = vld [vmem:[#allocation180_spill] sm:$0xff]  ;;  %v17247_v51 = vsub.f32 %v17246_v25, %v12580_v53  ;;  %v17257_v25 = vsub.f32 %v16940_v40, %v12578_v29 }
 0x523   :  { %17226 = vst [vmem:[#allocation100_spill] sm:$0xff] %v13434_v50  ;;  %v13451_v56 = vpack.c.bf16 %v17233_v35, %v17231_v33  ;;  %v17239_v2 = vsub.f32 %v17238_v22, %v12576_v11  ;;  %v17241_v55 = vsub.f32 %v17240_v19, %v12576_v11  ;;  %v17242_v33 = vld [vmem:[#allocation146_spill] sm:$0xff]  ;;  %v17244_v35 = vld [vmem:[#allocation181_spill] sm:$0xff]  ;;  %v17250_v22 = vld [vmem:[#allocation187_spill] sm:$0xff]  ;;  %v17252_v19 = vsub.f32 %v16942_v4, %v12574_v59 }
 0x524   :  { %v13459_v37 = vpack.c.bf16 %v17237_v46, %v17236_v27  ;;  %v17243_v34 = vsub.f32 %v17242_v33, %v12578_v29  ;;  %v17245_v18 = vsub.f32 %v17244_v35, %v12578_v29  ;;  %v17249_v27 = vsub.f32 %v17248_v14, %v12580_v53  ;;  %v17253_v33 = vld [vmem:[#allocation189_spill] sm:$0xff] }
 0x525   :  { %17234 = vst [vmem:[#allocation114_spill] sm:$0xff] %v13451_v56  ;;  %v13467_v50 = vpack.c.bf16 %v17241_v55, %v17239_v2  ;;  %v17251_v2 = vsub.f32 %v17250_v22, %v12574_v59  ;;  %v17255_v35 = vsub.f32 %v16943_v48, %v12576_v11  ;;  %v17261_v22 = vld [vmem:[#allocation198_spill] sm:$0xff]  ;;  %v17264_v48 = vsub.f32 %v16946_v13, %v12574_v59 }
 0x526   :  { %v13475_v56 = vpack.c.bf16 %v17245_v18, %v17243_v34  ;;  %v13483_v46 = vpack.c.bf16 %v17249_v27, %v17247_v51  ;;  %v17254_v34 = vsub.f32 %v17253_v33, %v12576_v11  ;;  %v17258_v51 = vsub.f32 %v16944_v47, %v12578_v29  ;;  %v17259_v27 = vld [vmem:[#allocation190_spill] sm:$0xff]  ;;  %v17265_v33 = vld [vmem:[#allocation211_spill] sm:$0xff] }
 0x527   :  { %v13491_v55 = vpack.c.bf16 %v17252_v19, %v17251_v2  ;;  %v17260_v4 = vsub.f32 %v17259_v27, %v12580_v53  ;;  %v17262_v2 = vsub.f32 %v17261_v22, %v12580_v53  ;;  %v17275_v22 = vld [vmem:[#allocation213_spill] sm:$0xff]  ;;  %7379 = vpow.bf16 %v4789_v0  ;;  %v17292_v0 = vld [vmem:[#allocation172_spill] sm:$0xff] }
 0x528   :  { %v13499_v18 = vpack.c.bf16 %v17255_v35, %v17254_v34  ;;  %v13507_v14 = vpack.c.bf16 %v17258_v51, %v17257_v25  ;;  %v17266_v34 = vsub.f32 %v17265_v33, %v12574_v59  ;;  %v17268_v35 = vld [vmem:[#allocation205_spill] sm:$0xff]  ;;  %v17270_v25 = vld [vmem:[#allocation212_spill] sm:$0xff]  ;;  %v17279_v33 = vld [vmem:[#allocation214_spill] sm:$0xff]  ;;  %7381 = vpow.bf16 %v4819_v10 }
 0x529   :  { %v13515_v19 = vpack.c.bf16 %v17262_v2, %v17260_v4  ;;  %v17269_v47 = vsub.f32 %v17268_v35, %v12576_v11  ;;  %v17271_v51 = vsub.f32 %v17270_v25, %v12576_v11  ;;  %v17276_v2 = vsub.f32 %v17275_v22, %v12578_v29  ;;  %v17282_v25 = vld [vmem:[#allocation170_spill] sm:$0xff]  ;;  %v17287_v22 = vld [vmem:[#allocation171_spill] sm:$0xff] }
 0x52a   :  { %17256 = vst [vmem:[#allocation117_spill] sm:$0xff] %v13499_v18  ;;  %v13523_v40 = vpack.c.bf16 %v17266_v34, %v17264_v48  ;;  %v17273_v18 = vld [vmem:[#allocation204_spill] sm:$0xff]  ;;  %v17280_v34 = vsub.f32 %v17279_v33, %v12580_v53  ;;  %v17293_v33 = vsub.f32 %v17292_v0, %v12578_v29  ;;  %v17303_v10 = vld [vmem:[#allocation222_spill] sm:$0xff] }
 0x52b   :  { %17263 = vst [vmem:[#allocation144_spill] sm:$0xff] %v13515_v19  ;;  %v13531_v27 = vpack.c.bf16 %v17271_v51, %v17269_v47  ;;  %v17274_v4 = vsub.f32 %v17273_v18, %v12578_v29  ;;  %v17277_v19 = vld [vmem:[#allocation206_spill] sm:$0xff]  ;;  %v17283_v47 = vsub.f32 %v17282_v25, %v12574_v59  ;;  %v17284_v51 = vld [vmem:[#allocation219_spill] sm:$0xff] }
 0x52c   :  { %17267 = vst [vmem:[#allocation89_spill] sm:$0xff] %v13523_v40  ;;  %v17278_v48 = vsub.f32 %v17277_v19, %v12580_v53  ;;  %v17285_v18 = vsub.f32 %v17284_v51, %v12574_v59 }
 0x52d   :  { %17272 = vst [vmem:[#allocation154_spill] sm:$0xff] %v13531_v27  ;;  %v13539_v13 = vpack.c.bf16 %v17276_v2, %v17274_v4  ;;  %v17288_v4 = vsub.f32 %v17287_v22, %v12576_v11  ;;  %v17289_v2 = vld [vmem:[#allocation220_spill] sm:$0xff]  ;;  %v17298_v22 = vld [vmem:[#allocation95_spill] sm:$0xff] }
 0x52e   :  { %v13547_v35 = vpack.c.bf16 %v17280_v34, %v17278_v48  ;;  %v13555_v27 = vpack.c.bf16 %v17285_v18, %v17283_v47  ;;  %v17290_v19 = vsub.f32 %v17289_v2, %v12576_v11  ;;  %v4831_v48 = vmul.bf16 1069105081, %v13186_v63  ;;  %v17294_v34 = vld [vmem:[#allocation221_spill] sm:$0xff] }
 0x52f   :  { %v17295_v25 = vsub.f32 %v17294_v34, %v12578_v29  ;;  %v17296_v47 = vld [vmem:[#allocation173_spill] sm:$0xff]  ;;  %v4801_v34 = vmul.bf16 1069105081, %v13110_v3 }
 0x530   :  { %17281 = vst [vmem:[#allocation108_spill] sm:$0xff] %v13547_v35  ;;  %17286 = vst [vmem:[#allocation129_spill] sm:$0xff] %v13555_v27  ;;  %v13563_v40 = vpack.c.bf16 %v17290_v19, %v17288_v4  ;;  %v17297_v18 = vsub.f32 %v17296_v47, %v12580_v53  ;;  %v17299_v27 = vsub.f32 %v17298_v22, %v12580_v53  ;;  %v17301_v4 = vld [vmem:[#allocation176_spill] sm:$0xff]  ;;  %v17317_v3 = vld [vmem:[#allocation225_spill] sm:$0xff]  ;;  %7383 = vpow.bf16 %v4831_v48 }
 0x531   :  { %v13572_v51 = vpack.c.bf16 %v17295_v25, %v17293_v33  ;;  %v17302_v63 = vsub.f32 %v17301_v4, %v12574_v59  ;;  %v17304_v19 = vsub.f32 %v17303_v10, %v12574_v59  ;;  %v17306_v33 = vld [vmem:[#allocation177_spill] sm:$0xff]  ;;  %v17308_v47 = vsub.f32 %v16964_v21, %v12576_v11  ;;  %v17312_v22 = vld [vmem:[#allocation224_spill] sm:$0xff]  ;;  %v17366_v48 = vld [vmem:[#allocation230_spill] sm:$0xff] }
 0x532   :  { %17291 = vst [vmem:[#allocation152_spill] sm:$0xff] %v13563_v40  ;;  %v13580_v2 = vpack.c.bf16 %v17299_v27, %v17297_v18  ;;  %v17307_v25 = vsub.f32 %v17306_v33, %v12576_v11  ;;  %v17310_v27 = vld [vmem:[#allocation178_spill] sm:$0xff]  ;;  %v17313_v4 = vsub.f32 %v17312_v22, %v12578_v29  ;;  %v17326_v22 = vld [vmem:[#allocation92_spill] sm:$0xff]  ;;  %7385 = vpow.bf16 %v4801_v34 }
 0x533   :  { %v13588_v0 = vpack.c.bf16 %v17304_v19, %v17302_v63  ;;  %v17311_v18 = vsub.f32 %v17310_v27, %v12578_v29  ;;  %v17315_v63 = vld [vmem:[#allocation179_spill] sm:$0xff]  ;;  %v17318_v19 = vsub.f32 %v17317_v3, %v12580_v53  ;;  %v17324_v27 = vld [vmem:[#allocation184_spill] sm:$0xff]  ;;  %v17331_v3 = vld [vmem:[#allocation98_spill] sm:$0xff] }
 0x534   :  { %17300 = vst [vmem:[#allocation71_spill] sm:$0xff] %v13580_v2  ;;  %v13597_v40 = vpack.c.bf16 %v17308_v47, %v17307_v25  ;;  %v17316_v10 = vsub.f32 %v17315_v63, %v12580_v53  ;;  %v17322_v25 = vsub.f32 %v11628_v42, %v12574_v59 }
 0x535   :  { %17305 = vst [vmem:[#allocation80_spill] sm:$0xff] %v13588_v0  ;;  %v13605_v2 = vpack.c.bf16 %v17313_v4, %v17311_v18  ;;  %v17320_v0 = vld [vmem:[#allocation183_spill] sm:$0xff]  ;;  %v17325_v18 = vsub.f32 %v17324_v27, %v12576_v11  ;;  %v17327_v4 = vsub.f32 %v17326_v22, %v12576_v11  ;;  %v17341_v22 = vld [vmem:[#allocation82_spill] sm:$0xff] }
 0x536   :  { %17309 = vst [vmem:[#allocation121_spill] sm:$0xff] %v13597_v40  ;;  %v13613_v33 = vpack.c.bf16 %v17318_v19, %v17316_v10  ;;  %v17321_v21 = vsub.f32 %v17320_v0, %v12574_v59  ;;  %v17332_v19 = vsub.f32 %v17331_v3, %v12578_v29  ;;  %v17346_v3 = vld [vmem:[#allocation226_spill] sm:$0xff] }
 0x537   :  { %17314 = vst [vmem:[#allocation188_spill] sm:$0xff] %v13605_v2  ;;  %v13629_v63 = vpack.c.bf16 %v17327_v4, %v17325_v18  ;;  %v17329_v2 = vld [vmem:[#allocation185_spill] sm:$0xff]  ;;  %v17342_v4 = vsub.f32 %v17341_v22, %v12574_v59  ;;  %v4843_v22 = vmul.bf16 1069105081, %v13218_v45 }
 0x538   :  { %17319 = vst [vmem:[#allocation195_spill] sm:$0xff] %v13613_v33  ;;  %v13621_v47 = vpack.c.bf16 %v17322_v25, %v17321_v21  ;;  %v17330_v10 = vsub.f32 %v17329_v2, %v12578_v29  ;;  %v17334_v33 = vld [vmem:[#allocation186_spill] sm:$0xff] }
 0x539   :  { %17328 = vst [vmem:[#allocation196_spill] sm:$0xff] %v13629_v63  ;;  %v17335_v42 = vsub.f32 %v17334_v33, %v12580_v53  ;;  %v17336_v21 = vld [vmem:[#allocation74_spill] sm:$0xff]  ;;  %v17344_v63 = vld [vmem:[#allocation192_spill] sm:$0xff]  ;;  %7387 = vpow.bf16 %v4843_v22 }
 0x53a   :  { %17323 = vst [vmem:[#allocation197_spill] sm:$0xff] %v13621_v47  ;;  %v13637_v0 = vpack.c.bf16 %v17332_v19, %v17330_v10  ;;  %v17337_v25 = vsub.f32 %v17336_v21, %v12580_v53  ;;  %v17339_v47 = vld [vmem:[#allocation191_spill] sm:$0xff]  ;;  %v17345_v10 = vsub.f32 %v17344_v63, %v12576_v11  ;;  %v17347_v19 = vsub.f32 %v17346_v3, %v12576_v11  ;;  %v17356_v63 = vld [vmem:[#allocation228_spill] sm:$0xff] }
 0x53b   :  { %v17340_v18 = vsub.f32 %v17339_v47, %v12574_v59  ;;  %v17351_v21 = vld [vmem:[#allocation227_spill] sm:$0xff] }
 0x53c   :  { %17333 = vst [vmem:[#allocation203_spill] sm:$0xff] %v13637_v0  ;;  %v13645_v27 = vpack.c.bf16 %v17337_v25, %v17335_v42  ;;  %v13661_v33 = vpack.c.bf16 %v17347_v19, %v17345_v10  ;;  %v17349_v0 = vld [vmem:[#allocation193_spill] sm:$0xff]  ;;  %v17352_v25 = vsub.f32 %v17351_v21, %v12578_v29  ;;  %v17359_v10 = vld [vmem:[#allocation199_spill] sm:$0xff] }
 0x53d   :  { %v13653_v2 = vpack.c.bf16 %v17342_v4, %v17340_v18  ;;  %v17350_v42 = vsub.f32 %v17349_v0, %v12578_v29  ;;  %v17354_v18 = vld [vmem:[#allocation194_spill] sm:$0xff]  ;;  %v17360_v19 = vsub.f32 %v17359_v10, %v12574_v59  ;;  %v17361_v0 = vld [vmem:[#allocation229_spill] sm:$0xff]  ;;  %v17372_v10 = vld [vmem:[#allocation231_spill] sm:$0xff] }
 0x53e   :  { %17338 = vst [vmem:[#allocation223_spill] sm:$0xff] %v13645_v27  ;;  %17348 = vst [vmem:[#allocation277_spill] sm:$0xff] %v13661_v33  ;;  %v17355_v4 = vsub.f32 %v17354_v18, %v12580_v53  ;;  %v17362_v33 = vsub.f32 %v17361_v0, %v12574_v59 }
 0x53f   :  { %17343 = vst [vmem:[#allocation265_spill] sm:$0xff] %v13653_v2  ;;  %v13669_v47 = vpack.c.bf16 %v17352_v25, %v17350_v42  ;;  %v17357_v2 = vsub.f32 %v17356_v63, %v12580_v53  ;;  %v17364_v42 = vld [vmem:[#allocation200_spill] sm:$0xff]  ;;  %v17367_v25 = vsub.f32 %v17366_v48, %v12576_v11  ;;  %v13696_v63 = vpop.eup %7375 }
 0x540   :  { %v13686_v21 = vpack.c.bf16 %v17362_v33, %v17360_v19  ;;  %v17365_v45 = vsub.f32 %v17364_v42, %v12576_v11  ;;  %17369 = vst [vmem:[#allocation301_spill] sm:$0xff] %v13696_v63  ;;  %v17375_v33 = vld [vmem:[#allocation202_spill] sm:$0xff]  ;;  %v17377_v42 = vld [vmem:[#allocation232_spill] sm:$0xff]  ;;  %v13797_v22 = vpop.eup %7377 }
 0x541   :  { %17353 = vst [vmem:[#allocation297_spill] sm:$0xff] %v13669_v47  ;;  %v13678_v3 = vpack.c.bf16 %v17357_v2, %v17355_v4  ;;  %v17370_v2 = vld [vmem:[#allocation201_spill] sm:$0xff]  ;;  %v17376_v19 = vsub.f32 %v17375_v33, %v12580_v53  ;;  %v17385_v47 = vld [vmem:[#allocation208_spill] sm:$0xff]  ;;  %17429 = vst [vmem:[#allocation131_spill] sm:$0xff] %v13797_v22 }
 0x542   :  { %17363 = vst [vmem:[#allocation293_spill] sm:$0xff] %v13686_v21  ;;  %v13694_v18 = vpack.c.bf16 %v17367_v25, %v17365_v45  ;;  %v17371_v4 = vsub.f32 %v17370_v2, %v12578_v29  ;;  %v17378_v21 = vsub.f32 %v17377_v42, %v12580_v53  ;;  %v17380_v45 = vld [vmem:[#allocation207_spill] sm:$0xff]  ;;  %v17382_v25 = vld [vmem:[#allocation233_spill] sm:$0xff] }
 0x543   :  { %17358 = vst [vmem:[#allocation299_spill] sm:$0xff] %v13678_v3  ;;  %v17373_v3 = vsub.f32 %v17372_v10, %v12578_v29  ;;  %v17381_v34 = vsub.f32 %v17380_v45, %v12574_v59 }
 0x544   :  { %17368 = vst [vmem:[#allocation305_spill] sm:$0xff] %v13694_v18  ;;  %v13712_v48 = vpack.c.bf16 %v17378_v21, %v17376_v19  ;;  %v17383_v18 = vsub.f32 %v17382_v25, %v12574_v59  ;;  %v17392_v19 = vld [vmem:[#allocation235_spill] sm:$0xff] }
 0x545   :  { %v13704_v0 = vpack.c.bf16 %v17373_v3, %v17371_v4  ;;  %v17386_v3 = vsub.f32 %v17385_v47, %v12576_v11  ;;  %v17387_v4 = vld [vmem:[#allocation234_spill] sm:$0xff]  ;;  %v17393_v42 = vsub.f32 %v17392_v19, %v12578_v29 }
 0x546   :  { %17379 = vst [vmem:[#allocation109_spill] sm:$0xff] %v13712_v48  ;;  %v13720_v2 = vpack.c.bf16 %v17383_v18, %v17381_v34  ;;  %v17388_v10 = vsub.f32 %v17387_v4, %v12576_v11  ;;  %v17395_v48 = vld [vmem:[#allocation210_spill] sm:$0xff]  ;;  %v17397_v34 = vld [vmem:[#allocation236_spill] sm:$0xff]  ;;  %v17402_v4 = vld [vmem:[#allocation237_spill] sm:$0xff] }
 0x547   :  { %17374 = vst [vmem:[#allocation303_spill] sm:$0xff] %v13704_v0  ;;  %v17390_v0 = vld [vmem:[#allocation209_spill] sm:$0xff]  ;;  %v17396_v18 = vsub.f32 %v17395_v48, %v12580_v53  ;;  %v17398_v25 = vsub.f32 %v17397_v34, %v12580_v53  ;;  %v17407_v19 = vld [vmem:[#allocation238_spill] sm:$0xff]  ;;  %v17412_v34 = vld [vmem:[#allocation239_spill] sm:$0xff] }
 0x548   :  { %17384 = vst [vmem:[#allocation133_spill] sm:$0xff] %v13720_v2  ;;  %v13728_v33 = vpack.c.bf16 %v17388_v10, %v17386_v3  ;;  %v17391_v21 = vsub.f32 %v17390_v0, %v12578_v29  ;;  %v17400_v2 = vld [vmem:[#allocation215_spill] sm:$0xff]  ;;  %v17403_v10 = vsub.f32 %v17402_v4, %v12574_v59  ;;  %v17416_v4 = vld [vmem:[#allocation240_spill] sm:$0xff] }
 0x549   :  { %v13744_v47 = vpack.c.bf16 %v17398_v25, %v17396_v18  ;;  %v17401_v3 = vsub.f32 %v17400_v2, %v12574_v59  ;;  %v17413_v25 = vsub.f32 %v17412_v34, %v12578_v29 }
 0x54a   :  { %17389 = vst [vmem:[#allocation130_spill] sm:$0xff] %v13728_v33  ;;  %v13736_v45 = vpack.c.bf16 %v17393_v42, %v17391_v21  ;;  %v17405_v33 = vld [vmem:[#allocation216_spill] sm:$0xff]  ;;  %v17408_v42 = vsub.f32 %v17407_v19, %v12576_v11  ;;  %v4855_v19 = vmul.bf16 1069105081, %v13250_v9  ;;  %v5178_v9 = vunpack.c.h.bf16 %v13696_v63 }
 0x54b   :  { %17399 = vst [vmem:[#allocation101_spill] sm:$0xff] %v13744_v47  ;;  %v13752_v0 = vpack.c.bf16 %v17403_v10, %v17401_v3  ;;  %v17406_v21 = vsub.f32 %v17405_v33, %v12576_v11  ;;  %v17414_v47 = vld [vmem:[#allocation218_spill] sm:$0xff]  ;;  %v17417_v10 = vsub.f32 %v17416_v4, %v12580_v53 }
 0x54c   :  { %17394 = vst [vmem:[#allocation87_spill] sm:$0xff] %v13736_v45  ;;  %v17410_v45 = vld [vmem:[#allocation217_spill] sm:$0xff]  ;;  %v17415_v3 = vsub.f32 %v17414_v47, %v12580_v53  ;;  %v17426_v47 = vld [vmem:[#allocation247_spill] sm:$0xff]  ;;  %7389 = vpow.bf16 %v4855_v19 }
 0x54d   :  { %17404 = vst [vmem:[#allocation122_spill] sm:$0xff] %v13752_v0  ;;  %v13760_v48 = vpack.c.bf16 %v17408_v42, %v17406_v21  ;;  %v17411_v18 = vsub.f32 %v17410_v45, %v12578_v29  ;;  %v17419_v21 = vld [vmem:[#allocation241_spill] sm:$0xff]  ;;  %v17427_v11 = vsub.f32 %v17426_v47, %v12578_v29  ;;  %v17437_v47 = vld [vmem:[#allocation255_spill] sm:$0xff] }
 0x54e   :  { %v13776_v33 = vpack.c.bf16 %v17417_v10, %v17415_v3  ;;  %v17420_v42 = vsub.f32 %v17419_v21, %v12574_v59  ;;  %v17421_v45 = vld [vmem:[#allocation245_spill] sm:$0xff]  ;;  %v5174_v3 = vunpack.c.l.bf16 %v13696_v63 }
 0x54f   :  { %17409 = vst [vmem:[#allocation148_spill] sm:$0xff] %v13760_v48  ;;  %v13768_v2 = vpack.c.bf16 %v17413_v25, %v17411_v18  ;;  %v17422_v48 = vsub.f32 %v17421_v45, %v12574_v59  ;;  %v17424_v18 = vld [vmem:[#allocation243_spill] sm:$0xff]  ;;  %v17430_v10 = vld [vmem:[#allocation249_spill] sm:$0xff] }
 0x550   :  { %17418 = vst [vmem:[#allocation73_spill] sm:$0xff] %v13776_v33  ;;  %v17425_v25 = vsub.f32 %v17424_v18, %v12578_v29  ;;  %v17431_v21 = vsub.f32 %v17430_v10, %v12574_v59  ;;  %v17432_v45 = vld [vmem:[#allocation253_spill] sm:$0xff]  ;;  %v17435_v18 = vld [vmem:[#allocation251_spill] sm:$0xff]  ;;  %v5566_v19 = vadd.f32 %v5178_v9, %v5174_v3  ;;  %v4825_v9 = vmul.bf16 1069105081, %v13170_v1 }
 0x551   :  { %v13785_v34 = vpack.c.bf16 %v17422_v48, %v17420_v42  ;;  %v17433_v48 = vsub.f32 %v17432_v45, %v12574_v59  ;;  %v17436_v33 = vsub.f32 %v17435_v18, %v12578_v29  ;;  %v17439_v53 = vld [vmem:[#allocation257_spill] sm:$0xff]  ;;  %v17446_v45 = vld [vmem:[#allocation263_spill] sm:$0xff] }
 0x552   :  { %v13793_v4 = vpack.c.bf16 %v17427_v11, %v17425_v25  ;;  %v17438_v11 = vsub.f32 %v17437_v47, %v12578_v29  ;;  %v17440_v63 = vsub.f32 %v17439_v53, %v12574_v59  ;;  %v17449_v47 = vld [vmem:[#allocation269_spill] sm:$0xff] }
 0x553   :  { %17423 = vst [vmem:[#allocation145_spill] sm:$0xff] %v13785_v34  ;;  %v13805_v42 = vpack.c.bf16 %v17433_v48, %v17431_v21  ;;  %v17441_v34 = vld [vmem:[#allocation261_spill] sm:$0xff]  ;;  %v17447_v48 = vsub.f32 %v17446_v45, %v12578_v29  ;;  %v17459_v45 = vsub.f32 %v17043_v43, %v12574_v59  ;;  %v4867_v43 = vmul.bf16 1069105081, %v13282_v23 }
 0x554   :  { %17428 = vst [vmem:[#allocation135_spill] sm:$0xff] %v13793_v4  ;;  %v13813_v25 = vpack.c.bf16 %v17438_v11, %v17436_v33  ;;  %v17442_v0 = vsub.f32 %v17441_v34, %v12574_v59  ;;  %v17444_v4 = vld [vmem:[#allocation259_spill] sm:$0xff]  ;;  %v17448_v33 = vsub.f32 %v17031_v31, %v12574_v59  ;;  %v17450_v11 = vsub.f32 %v17449_v47, %v12574_v59 }
 0x555   :  { %17434 = vst [vmem:[#allocation127_spill] sm:$0xff] %v13805_v42  ;;  %v17445_v21 = vsub.f32 %v17444_v4, %v12578_v29  ;;  %v17452_v42 = vld [vmem:[#allocation267_spill] sm:$0xff]  ;;  %v5182_v23 = vunpack.c.l.bf16 %v13797_v22 }
 0x556   :  { %v13821_v10 = vpack.c.bf16 %v17442_v0, %v17440_v63  ;;  %v13837_v53 = vpack.c.bf16 %v17450_v11, %v17448_v33  ;;  %v17453_v63 = vsub.f32 %v17452_v42, %v12578_v29  ;;  %v17454_v0 = vld [vmem:[#allocation271_spill] sm:$0xff] }
 0x557   :  { %v13829_v18 = vpack.c.bf16 %v17447_v48, %v17445_v21  ;;  %v17455_v34 = vsub.f32 %v17454_v0, %v12578_v29  ;;  %v4813_v48 = vmul.bf16 1069105081, %v13140_v60  ;;  %v17460_v33 = vld [vmem:[#allocation275_spill] sm:$0xff]  ;;  %v13873_v60 = vpop.eup %7379 }
 0x558   :  { %17443 = vst [vmem:[#allocation102_spill] sm:$0xff] %v13821_v10  ;;  %17451 = vst [vmem:[#allocation88_spill] sm:$0xff] %v13837_v53  ;;  %v17457_v10 = vld [vmem:[#allocation273_spill] sm:$0xff]  ;;  %v17461_v47 = vsub.f32 %v17460_v33, %v12578_v29  ;;  %v17462_v11 = vld [vmem:[#allocation279_spill] sm:$0xff] }
 0x559   :  { %v13845_v4 = vpack.c.bf16 %v17455_v34, %v17453_v63  ;;  %v17458_v21 = vsub.f32 %v17457_v10, %v12574_v59  ;;  %v17463_v42 = vsub.f32 %v17462_v11, %v12578_v29  ;;  %v17464_v63 = vld [vmem:[#allocation281_spill] sm:$0xff]  ;;  %17469 = vst [vmem:[#allocation155_spill] sm:$0xff] %v13873_v60  ;;  %v17472_v33 = vld [vmem:[#allocation291_spill] sm:$0xff]  ;;  %7391 = vpow.bf16 %v4813_v48 }
 0x55a   :  { %v17465_v0 = vsub.f32 %v17464_v63, %v12574_v59  ;;  %v17466_v34 = vld [vmem:[#allocation289_spill] sm:$0xff]  ;;  %7393 = vpow.bf16 %v4867_v43  ;;  %v17490_v43 = vsub.f32 %v12557_v44, %v12574_v59 }
 0x55b   :  { %17456 = vst [vmem:[#allocation91_spill] sm:$0xff] %v13845_v4  ;;  %v13853_v31 = vpack.c.bf16 %v17459_v45, %v17458_v21  ;;  %v13862_v53 = vpack.c.bf16 %v17463_v42, %v17461_v47  ;;  %v17467_v10 = vsub.f32 %v17466_v34, %v12574_v59  ;;  %v17470_v21 = vld [vmem:[#allocation283_spill] sm:$0xff]  ;;  %v17473_v47 = vsub.f32 %v17472_v33, %v12578_v29  ;;  %v17474_v42 = vld [vmem:[#allocation285_spill] sm:$0xff] }
 0x55c   :  { %v17471_v45 = vsub.f32 %v17470_v21, %v12578_v29  ;;  %v17475_v63 = vsub.f32 %v17474_v42, %v12574_v59  ;;  %7395 = vpow.bf16 %v4825_v9 }
 0x55d   :  { %v13870_v4 = vpack.c.bf16 %v17467_v10, %v17465_v0  ;;  %v17476_v0 = vsub.f32 %v17058_v15, %v12574_v59  ;;  %v13892_v10 = vpop.eup %7381  ;;  %v17483_v15 = vsub.f32 %v17062_v24, %v12574_v59  ;;  %v17485_v24 = vld [vmem:[#allocation295_spill] sm:$0xff] }
 0x55e   :  { %v13881_v11 = vpack.c.bf16 %v17473_v47, %v17471_v45  ;;  %17478 = vst [vmem:[#allocation93_spill] sm:$0xff] %v13892_v10  ;;  %v17481_v45 = vsub.f32 %v17059_v49, %v12578_v29  ;;  %v17482_v47 = vsub.f32 %v17060_v58, %v12574_v59  ;;  %v4879_v49 = vmul.bf16 1069105081, %v13314_v12 }
 0x55f   :  { %17468 = vst [vmem:[#allocation132_spill] sm:$0xff] %v13870_v4  ;;  %v13889_v34 = vpack.c.bf16 %v17476_v0, %v17475_v63  ;;  %v17479_v4 = vld [vmem:[#allocation287_spill] sm:$0xff]  ;;  %v5172_v58 = vunpack.c.l.bf16 %v13873_v60  ;;  %v17489_v12 = vsub.f32 %v17063_v6, %v12574_v59  ;;  %v5194_v44 = vunpack.c.h.bf16 %v13892_v10  ;;  %v17500_v6 = vld [vmem:[#allocation86_spill] sm:$0xff] }
 0x560   :  { %v17480_v21 = vsub.f32 %v17479_v4, %v12578_v29  ;;  %v13908_v42 = vpack.c.bf16 %v17483_v15, %v17482_v47  ;;  %v17484_v63 = vld [vmem:[#allocation111_spill] sm:$0xff]  ;;  %v5186_v4 = vunpack.c.h.bf16 %v13797_v22  ;;  %v17487_v47 = vsub.f32 %v12508_v39, %v12578_v29 }
 0x561   :  { %17477 = vst [vmem:[#allocation115_spill] sm:$0xff] %v13889_v34  ;;  %v5173_v3 = vunpack.c.l.bf16 %v17484_v63  ;;  %v5177_v0 = vunpack.c.h.bf16 %v17484_v63  ;;  %v5567_v34 = vadd.f32 %v5566_v19, %v5182_v23  ;;  %v4837_v15 = vmul.bf16 1069105081, %v13202_v36  ;;  %v13927_v19 = vpop.eup %7383 }
 0x562   :  { %v13900_v33 = vpack.c.bf16 %v17481_v45, %v17480_v21  ;;  %v5176_v21 = vunpack.c.h.bf16 %v13873_v60  ;;  %v17486_v45 = vsub.f32 %v17485_v24, %v12578_v29  ;;  %v5190_v23 = vunpack.c.l.bf16 %v13892_v10  ;;  %17488 = vst [vmem:[#allocation81_spill] sm:$0xff] %v13927_v19  ;;  %v17492_v24 = vld [vmem:[#allocation309_spill] sm:$0xff] }
 0x563   :  { %v5568_v48 = vadd.f32 %v5567_v34, %v5186_v4  ;;  %v13935_v63 = vpack.c.bf16 %v17490_v43, %v17489_v12  ;;  %v17491_v39 = vsub.f32 %v17064_v17, %v12578_v29  ;;  %v13946_v4 = vpop.eup %7385  ;;  %v13949_v22 = vadd.f32 %v5177_v0, %v5173_v3  ;;  %v17498_v43 = vld [vmem:[#allocation96_spill] sm:$0xff]  ;;  %v17501_v3 = vld [vmem:[#allocation90_spill] sm:$0xff] }
 0x564   :  { %v13923_v1 = vpack.c.bf16 %v17487_v47, %v17486_v45  ;;  %v17493_v45 = vsub.f32 %v17492_v24, %v12578_v29  ;;  %17495 = vst [vmem:[#allocation156_spill] sm:$0xff] %v13946_v4  ;;  %v4891_v17 = vmul.bf16 1069105081, %v13346_v52  ;;  %7397 = vpow.bf16 %v4879_v49  ;;  %v13956_v34 = vpop.eup %7387  ;;  %v17499_v49 = vld [vmem:[#allocation110_spill] sm:$0xff]  ;;  %v17503_v52 = vld [vmem:[#allocation112_spill] sm:$0xff] }
 0x565   :  { %17496 = vst [vmem:[#allocation77_spill] sm:$0xff] %v13949_v22  ;;  %v5569_v12 = vadd.f32 %v5568_v48, %v5190_v23  ;;  %v5428_v24 = vadd.f32 %v5176_v21, %v5172_v58  ;;  %7399 = vpow.bf16 %v4837_v15  ;;  %17497 = vst [vmem:[#allocation157_spill] sm:$0xff] %v13956_v34  ;;  %v5180_v48 = vunpack.c.l.bf16 %v13946_v4  ;;  %v13969_v60 = vpop.eup %7389  ;;  %v17504_v58 = vld [vmem:[#allocation105_spill] sm:$0xff] }
 0x566   :  { %v13943_v36 = vpack.c.bf16 %v17493_v45, %v17491_v39  ;;  %v4849_v39 = vmul.bf16 1069105081, %v13234_v62  ;;  %v5198_v45 = vunpack.c.l.bf16 %v13927_v19  ;;  %v5202_v62 = vunpack.c.h.bf16 %v13927_v19  ;;  %17502 = vst [vmem:[#allocation134_spill] sm:$0xff] %v13969_v60  ;;  %v17505_v19 = vld [vmem:[#allocation76_spill] sm:$0xff] }
 0x567   :  { %v5570_v9 = vadd.f32 %v5569_v12, %v5194_v44  ;;  %v4903_v15 = vmul.bf16 1069105081, %v13378_v38  ;;  %7401 = vpow.bf16 %v4891_v17  ;;  %v5429_v12 = vadd.f32 %v5428_v24, %v5180_v48  ;;  %v17507_v48 = vld [vmem:[#allocation125_spill] sm:$0xff]  ;;  %v13980_v59 = vpop.eup %7391 }
 0x568   :  { %v4861_v10 = vmul.bf16 1069105081, %v17501_v3  ;;  %v5206_v0 = vunpack.c.l.bf16 %v13956_v34  ;;  %7403 = vpow.bf16 %v4849_v39  ;;  %v5210_v17 = vunpack.c.h.bf16 %v13956_v34  ;;  %17508 = vst [vmem:[#allocation158_spill] sm:$0xff] %v13980_v59  ;;  %v13984_v38 = vpop.eup %7393  ;;  %v17511_v34 = vld [vmem:[#allocation106_spill] sm:$0xff]  ;;  %v17512_v24 = vld [vmem:[#allocation113_spill] sm:$0xff] }
 0x569   :  { %v5571_v21 = vadd.f32 %v5570_v9, %v5198_v45  ;;  %v5184_v9 = vunpack.c.h.bf16 %v13946_v4  ;;  %v4915_v39 = vmul.bf16 1069105081, %v13410_v5  ;;  %7405 = vpow.bf16 %v4903_v15  ;;  %17510 = vst [vmem:[#allocation118_spill] sm:$0xff] %v13984_v38 }
 0x56a   :  { %v5214_v45 = vunpack.c.l.bf16 %v13969_v60  ;;  %7407 = vpow.bf16 %v4861_v10  ;;  %v5188_v5 = vunpack.c.l.bf16 %v13980_v59  ;;  %v5218_v22 = vunpack.c.h.bf16 %v13969_v60  ;;  %v13993_v29 = vpop.eup %7395 }
 0x56b   :  { %v5572_v23 = vadd.f32 %v5571_v21, %v5202_v62  ;;  %v4873_v62 = vmul.bf16 1069105081, %v17507_v48  ;;  %v5430_v21 = vadd.f32 %v5429_v12, %v5184_v9  ;;  %v17514_v12 = vld [vmem:[#allocation124_spill] sm:$0xff]  ;;  %17515 = vst [vmem:[#allocation94_spill] sm:$0xff] %v13993_v29  ;;  %v4927_v10 = vmul.bf16 1069105081, %v13442_v26 }
 0x56c   :  { %v4897_v9 = vmul.bf16 1069105081, %v17514_v12  ;;  %7409 = vpow.bf16 %v4915_v39  ;;  %v5222_v48 = vunpack.c.l.bf16 %v13984_v38  ;;  %v17518_v12 = vld [vmem:[#allocation128_spill] sm:$0xff] }
 0x56d   :  { %v5573_v3 = vadd.f32 %v5572_v23, %v5206_v0  ;;  %v4885_v0 = vmul.bf16 1069105081, %v17512_v24  ;;  %v17513_v23 = vld [vmem:[#allocation107_spill] sm:$0xff]  ;;  %7411 = vpow.bf16 %v4873_v62  ;;  %v17520_v39 = vld [vmem:[#allocation100_spill] sm:$0xff] }
 0x56e   :  { %7413 = vpow.bf16 %v4927_v10  ;;  %v17528_v10 = vld [vmem:[#allocation89_spill] sm:$0xff] }
 0x56f   :  { %v5574_v4 = vadd.f32 %v5573_v3, %v5210_v17  ;;  %v5192_v17 = vunpack.c.h.bf16 %v13980_v59  ;;  %v5431_v3 = vadd.f32 %v5430_v21, %v5188_v5  ;;  %v5226_v5 = vunpack.c.h.bf16 %v13984_v38  ;;  %v17521_v21 = vld [vmem:[#allocation114_spill] sm:$0xff] }
 0x570   :  { %7415 = vpow.bf16 %v4885_v0  ;;  %v4951_v0 = vmul.bf16 1069105081, %v13507_v14 }
 0x571   :  { %v5575_v47 = vadd.f32 %v5574_v4, %v5214_v45  ;;  %v4909_v4 = vmul.bf16 1069105081, %v13394_v61  ;;  %v5196_v45 = vunpack.c.l.bf16 %v13993_v29  ;;  %v5432_v60 = vadd.f32 %v5431_v3, %v5192_v17 }
 0x572   :  { %v13999_v15 = vpop.eup %7397  ;;  %v4921_v61 = vmul.bf16 1069105081, %v17518_v12 }
 0x573   :  { %v5576_v44 = vadd.f32 %v5575_v47, %v5218_v22  ;;  %17516 = vst [vmem:[#allocation83_spill] sm:$0xff] %v13999_v15  ;;  %v14004_v26 = vpop.eup %7399  ;;  %v4939_v22 = vmul.bf16 1069105081, %v13475_v56  ;;  %v5200_v47 = vunpack.c.h.bf16 %v13993_v29  ;;  %v5433_v62 = vadd.f32 %v5432_v60, %v5196_v45  ;;  %v17524_v60 = vld [vmem:[#allocation117_spill] sm:$0xff] }
 0x574   :  { %17517 = vst [vmem:[#allocation159_spill] sm:$0xff] %v14004_v26  ;;  %v5230_v59 = vunpack.c.l.bf16 %v13999_v15  ;;  %v5234_v12 = vunpack.c.h.bf16 %v13999_v15  ;;  %v17555_v15 = vld [vmem:[#allocation133_spill] sm:$0xff] }
 0x575   :  { %v5577_v24 = vadd.f32 %v5576_v44, %v5222_v48  ;;  %v14013_v3 = vpop.eup %7401  ;;  %v5204_v44 = vunpack.c.l.bf16 %v14004_v26  ;;  %v5434_v48 = vadd.f32 %v5433_v62, %v5200_v47  ;;  %7417 = vpow.bf16 %v4939_v22 }
 0x576   :  { %17519 = vst [vmem:[#allocation147_spill] sm:$0xff] %v14013_v3  ;;  %v14018_v56 = vpop.eup %7403  ;;  %v5238_v30 = vunpack.c.l.bf16 %v14013_v3  ;;  %7419 = vpow.bf16 %v4897_v9  ;;  %v5242_v32 = vunpack.c.h.bf16 %v14013_v3  ;;  %v4963_v9 = vmul.bf16 1069105081, %v13539_v13 }
 0x577   :  { %v5578_v17 = vadd.f32 %v5577_v24, %v5226_v5  ;;  %17522 = vst [vmem:[#allocation160_spill] sm:$0xff] %v14018_v56  ;;  %v5208_v24 = vunpack.c.h.bf16 %v14004_v26  ;;  %v5435_v5 = vadd.f32 %v5434_v48, %v5204_v44  ;;  %v14027_v62 = vpop.eup %7405  ;;  %v17527_v44 = vld [vmem:[#allocation126_spill] sm:$0xff]  ;;  %7421 = vpow.bf16 %v4951_v0 }
 0x578   :  { %17523 = vst [vmem:[#allocation136_spill] sm:$0xff] %v14027_v62  ;;  %v14032_v14 = vpop.eup %7407  ;;  %v5246_v29 = vunpack.c.l.bf16 %v14027_v62  ;;  %7423 = vpow.bf16 %v4909_v4  ;;  %v5250_v38 = vunpack.c.h.bf16 %v14027_v62 }
 0x579   :  { %v5579_v45 = vadd.f32 %v5578_v17, %v5230_v59  ;;  %v5212_v59 = vunpack.c.l.bf16 %v14018_v56  ;;  %v5436_v17 = vadd.f32 %v5435_v5, %v5208_v24  ;;  %17525 = vst [vmem:[#allocation161_spill] sm:$0xff] %v14032_v14  ;;  %7425 = vpow.bf16 %v4963_v9 }
 0x57a   :  { %v14041_v5 = vpop.eup %7409  ;;  %v5224_v4 = vunpack.c.h.bf16 %v14032_v14  ;;  %7427 = vpow.bf16 %v4921_v61 }
 0x57b   :  { %v5580_v47 = vadd.f32 %v5579_v45, %v5234_v12  ;;  %v5216_v12 = vunpack.c.h.bf16 %v14018_v56  ;;  %v5437_v45 = vadd.f32 %v5436_v17, %v5212_v59  ;;  %17529 = vst [vmem:[#allocation119_spill] sm:$0xff] %v14041_v5  ;;  %v14046_v13 = vpop.eup %7411  ;;  %v17532_v59 = vld [vmem:[#allocation129_spill] sm:$0xff]  ;;  %v5254_v56 = vunpack.c.l.bf16 %v14041_v5  ;;  %v17536_v17 = vld [vmem:[#allocation80_spill] sm:$0xff] }
 0x57c   :  { %17531 = vst [vmem:[#allocation84_spill] sm:$0xff] %v14046_v13  ;;  %v5258_v48 = vunpack.c.h.bf16 %v14041_v5  ;;  %v17544_v5 = vld [vmem:[#allocation203_spill] sm:$0xff] }
 0x57d   :  { %v5581_v26 = vadd.f32 %v5580_v47, %v5238_v30  ;;  %v5220_v30 = vunpack.c.l.bf16 %v14032_v14  ;;  %v5438_v47 = vadd.f32 %v5437_v45, %v5216_v12  ;;  %v14055_v45 = vpop.eup %7413  ;;  %v17540_v14 = vld [vmem:[#allocation197_spill] sm:$0xff] }
 0x57e   :  { %17534 = vst [vmem:[#allocation162_spill] sm:$0xff] %v14055_v45  ;;  %v5262_v0 = vunpack.c.l.bf16 %v14055_v45 }
 0x57f   :  { %v5582_v24 = vadd.f32 %v5581_v26, %v5242_v32  ;;  %v4975_v32 = vmul.bf16 1069105081, %v13572_v51  ;;  %v5439_v26 = vadd.f32 %v5438_v47, %v5220_v30  ;;  %v14060_v51 = vpop.eup %7415  ;;  %v17538_v30 = vld [vmem:[#allocation188_spill] sm:$0xff] }
 0x580   :  { %17537 = vst [vmem:[#allocation149_spill] sm:$0xff] %v14060_v51  ;;  %v4987_v47 = vmul.bf16 1069105081, %v17538_v30 }
 0x581   :  { %v5583_v3 = vadd.f32 %v5582_v24, %v5246_v29  ;;  %v5228_v29 = vunpack.c.l.bf16 %v14046_v13  ;;  %v5440_v24 = vadd.f32 %v5439_v26, %v5224_v4  ;;  %7429 = vpow.bf16 %v4975_v32 }
 0x582   :  { %v17541_v26 = vmul.bf16 1069105081, %v13459_v37 }
 0x583   :  { %v5584_v12 = vadd.f32 %v5583_v3, %v5250_v38  ;;  %v5232_v3 = vunpack.c.h.bf16 %v14046_v13  ;;  %v5441_v35 = vadd.f32 %v5440_v24, %v5228_v29  ;;  %v14071_v9 = vpop.eup %7417  ;;  %v17545_v24 = vld [vmem:[#allocation265_spill] sm:$0xff]  ;;  %v5240_v13 = vunpack.c.h.bf16 %v14060_v51 }
 0x584   :  { %7431 = vpow.bf16 %v17541_v26  ;;  %17542 = vst [vmem:[#allocation163_spill] sm:$0xff] %v14071_v9  ;;  %v14076_v61 = vpop.eup %7419  ;;  %v17547_v38 = vld [vmem:[#allocation297_spill] sm:$0xff]  ;;  %v5270_v30 = vunpack.c.l.bf16 %v14071_v9 }
 0x585   :  { %v5585_v62 = vadd.f32 %v5584_v12, %v5254_v56  ;;  %v4999_v56 = vmul.bf16 1069105081, %v17544_v5  ;;  %v5236_v12 = vunpack.c.l.bf16 %v14060_v51  ;;  %v5442_v32 = vadd.f32 %v5441_v35, %v5232_v3  ;;  %v14087_v29 = vpop.eup %7421 }
 0x586   :  { %7433 = vpow.bf16 %v4987_v47  ;;  %v5011_v5 = vmul.bf16 1069105081, %v17547_v38  ;;  %v17548_v3 = vmul.bf16 1069105081, %v13491_v55  ;;  %17549 = vst [vmem:[#allocation138_spill] sm:$0xff] %v14087_v29  ;;  %v14092_v26 = vpop.eup %7423  ;;  %v17553_v38 = vld [vmem:[#allocation303_spill] sm:$0xff]  ;;  %v5248_v37 = vunpack.c.h.bf16 %v14076_v61 }
 0x587   :  { %v5586_v4 = vadd.f32 %v5585_v62, %v5258_v48  ;;  %v5266_v62 = vunpack.c.h.bf16 %v14055_v45  ;;  %v5443_v40 = vadd.f32 %v5442_v32, %v5236_v12  ;;  %v17551_v45 = vld [vmem:[#allocation293_spill] sm:$0xff]  ;;  %v5023_v51 = vmul.bf16 1069105081, %v17553_v38  ;;  %v17554_v55 = vld [vmem:[#allocation87_spill] sm:$0xff]  ;;  %v14103_v32 = vpop.eup %7425 }
 0x588   :  { %7435 = vpow.bf16 %v17548_v3  ;;  %v17552_v12 = vld [vmem:[#allocation305_spill] sm:$0xff]  ;;  %v5035_v3 = vmul.bf16 1069105081, %v17554_v55  ;;  %v5278_v22 = vunpack.c.l.bf16 %v14087_v29  ;;  %17557 = vst [vmem:[#allocation164_spill] sm:$0xff] %v14103_v32  ;;  %v5047_v38 = vmul.bf16 1069105081, %v13768_v2 }
 0x589   :  { %v5587_v48 = vadd.f32 %v5586_v4, %v5262_v0  ;;  %v5244_v4 = vunpack.c.l.bf16 %v14076_v61  ;;  %v5444_v47 = vadd.f32 %v5443_v40, %v5240_v13  ;;  %7437 = vpow.bf16 %v4999_v56  ;;  %v14107_v56 = vpop.eup %7427  ;;  %v17558_v55 = vld [vmem:[#allocation135_spill] sm:$0xff] }
 0x58a   :  { %v17556_v13 = vmul.bf16 1069105081, %v17528_v10  ;;  %v5256_v10 = vunpack.c.h.bf16 %v14092_v26 }
 0x58b   :  { %v5588_v35 = vadd.f32 %v5587_v48, %v5266_v62  ;;  %v5274_v62 = vunpack.c.h.bf16 %v14071_v9  ;;  %v5445_v27 = vadd.f32 %v5444_v47, %v5244_v4  ;;  %v5059_v4 = vmul.bf16 1069105081, %v17558_v55 }
 0x58c   :  { %7439 = vpow.bf16 %v17556_v13  ;;  %v5282_v47 = vunpack.c.h.bf16 %v14087_v29  ;;  %v17559_v13 = vld [vmem:[#allocation122_spill] sm:$0xff] }
 0x58d   :  { %v5589_v48 = vadd.f32 %v5588_v35, %v5270_v30  ;;  %7441 = vpow.bf16 %v5011_v5  ;;  %v5252_v30 = vunpack.c.l.bf16 %v14092_v26  ;;  %v5446_v35 = vadd.f32 %v5445_v27, %v5248_v37 }
 0x58e   :  { %7443 = vpow.bf16 %v5023_v51  ;;  %v5286_v5 = vunpack.c.l.bf16 %v14103_v32  ;;  %v17560_v27 = vmul.bf16 1069105081, %v17532_v59  ;;  %v5083_v51 = vmul.bf16 1069105081, %v13829_v18  ;;  %v17580_v18 = vld [vmem:[#allocation115_spill] sm:$0xff] }
 0x58f   :  { %v5590_v40 = vadd.f32 %v5589_v48, %v5274_v62  ;;  %v5071_v62 = vmul.bf16 1069105081, %v13813_v25  ;;  %7445 = vpow.bf16 %v5035_v3  ;;  %v5447_v48 = vadd.f32 %v5446_v35, %v5252_v30  ;;  %v14117_v37 = vpop.eup %7429 }
 0x590   :  { %7447 = vpow.bf16 %v17560_v27  ;;  %17561 = vst [vmem:[#allocation120_spill] sm:$0xff] %v14117_v37  ;;  %v5290_v35 = vunpack.c.h.bf16 %v14103_v32  ;;  %v5264_v59 = vunpack.c.h.bf16 %v14107_v56  ;;  %v17563_v27 = vld [vmem:[#allocation145_spill] sm:$0xff] }
 0x591   :  { %v5591_v0 = vadd.f32 %v5590_v40, %v5278_v22  ;;  %7449 = vpow.bf16 %v5047_v38  ;;  %v5260_v22 = vunpack.c.l.bf16 %v14107_v56  ;;  %v5448_v25 = vadd.f32 %v5447_v48, %v5256_v10  ;;  %v17562_v40 = vld [vmem:[#allocation91_spill] sm:$0xff] }
 0x592   :  { %v14121_v3 = vpop.eup %7431  ;;  %v5095_v30 = vmul.bf16 1069105081, %v17562_v40  ;;  %7451 = vpow.bf16 %v5059_v4  ;;  %v5294_v38 = vunpack.c.l.bf16 %v14117_v37  ;;  %v17564_v10 = vmul.bf16 1069105081, %v17536_v17 }
 0x593   :  { %v5592_v9 = vadd.f32 %v5591_v0, %v5282_v47  ;;  %v5107_v0 = vmul.bf16 1069105081, %v13862_v53  ;;  %7453 = vpow.bf16 %v5071_v62  ;;  %v5449_v47 = vadd.f32 %v5448_v25, %v5260_v22 }
 0x594   :  { %7455 = vpow.bf16 %v17564_v10  ;;  %v14131_v48 = vpop.eup %7433  ;;  %v5119_v4 = vmul.bf16 1069105081, %v13881_v11  ;;  %v5298_v22 = vunpack.c.h.bf16 %v14117_v37  ;;  %v5143_v40 = vmul.bf16 1069105081, %v13923_v1 }
 0x595   :  { %v5593_v55 = vadd.f32 %v5592_v9, %v5286_v5  ;;  %17565 = vst [vmem:[#allocation165_spill] sm:$0xff] %v14131_v48  ;;  %7457 = vpow.bf16 %v5083_v51  ;;  %v5268_v9 = vunpack.c.l.bf16 %v14121_v3  ;;  %v5450_v53 = vadd.f32 %v5449_v47, %v5264_v59 }
 0x596   :  { %v14135_v62 = vpop.eup %7435  ;;  %v5131_v5 = vmul.bf16 1069105081, %v13900_v33  ;;  %7459 = vpow.bf16 %v5095_v30  ;;  %v5272_v17 = vunpack.c.h.bf16 %v14121_v3  ;;  %v5302_v51 = vunpack.c.l.bf16 %v14131_v48  ;;  %v17570_v33 = vld [vmem:[#allocation102_spill] sm:$0xff] }
 0x597   :  { %v5594_v2 = vadd.f32 %v5593_v55, %v5290_v35  ;;  %17566 = vst [vmem:[#allocation85_spill] sm:$0xff] %v14135_v62  ;;  %7461 = vpow.bf16 %v5107_v0  ;;  %v5451_v35 = vadd.f32 %v5450_v53, %v5268_v9  ;;  %v17567_v55 = vld [vmem:[#allocation127_spill] sm:$0xff]  ;;  %v17568_v59 = vmul.bf16 1069105081, %v17540_v14  ;;  %v14145_v47 = vpop.eup %7437  ;;  %v17573_v14 = vld [vmem:[#allocation88_spill] sm:$0xff] }
 0x598   :  { %17569 = vst [vmem:[#allocation116_spill] sm:$0xff] %v14145_v47  ;;  %v5306_v9 = vunpack.c.h.bf16 %v14131_v48 }
 0x599   :  { %v5595_v25 = vadd.f32 %v5594_v2, %v5294_v38  ;;  %7463 = vpow.bf16 %v17568_v59  ;;  %v5276_v2 = vunpack.c.l.bf16 %v14135_v62  ;;  %v5452_v1 = vadd.f32 %v5451_v35, %v5272_v17 }
 0x59a   :  { %7465 = vpow.bf16 %v5119_v4  ;;  %v14149_v0 = vpop.eup %7439  ;;  %v5155_v38 = vmul.bf16 1069105081, %v13943_v36  ;;  %v5280_v59 = vunpack.c.h.bf16 %v14135_v62  ;;  %v5310_v35 = vunpack.c.l.bf16 %v14145_v47 }
 0x59b   :  { %v5596_v10 = vadd.f32 %v5595_v25, %v5298_v22  ;;  %17571 = vst [vmem:[#allocation150_spill] sm:$0xff] %v14149_v0  ;;  %7467 = vpow.bf16 %v5131_v5  ;;  %v14153_v22 = vpop.eup %7441  ;;  %v5453_v30 = vadd.f32 %v5452_v1, %v5276_v2  ;;  %v17575_v36 = vmul.bf16 1069105081, %v17545_v24 }
 0x59c   :  { %17572 = vst [vmem:[#allocation151_spill] sm:$0xff] %v14153_v22  ;;  %7469 = vpow.bf16 %v5143_v40  ;;  %v14157_v4 = vpop.eup %7443  ;;  %v17578_v25 = vmul.bf16 1069105081, %v13118_v57  ;;  %v5284_v40 = vunpack.c.l.bf16 %v14149_v0  ;;  %v5288_v57 = vunpack.c.h.bf16 %v14149_v0 }
 0x59d   :  { %v5597_v53 = vadd.f32 %v5596_v10, %v5302_v51  ;;  %17574 = vst [vmem:[#allocation72_spill] sm:$0xff] %v14157_v4  ;;  %7471 = vpow.bf16 %v17575_v36  ;;  %v14163_v5 = vpop.eup %7445  ;;  %v17577_v51 = vld [vmem:[#allocation132_spill] sm:$0xff]  ;;  %v5454_v2 = vadd.f32 %v5453_v30, %v5280_v59  ;;  %v5318_v30 = vunpack.c.l.bf16 %v14153_v22 }
 0x59e   :  { %17576 = vst [vmem:[#allocation140_spill] sm:$0xff] %v14163_v5  ;;  %7473 = vpow.bf16 %v17578_v25  ;;  %v14169_v1 = vpop.eup %7447  ;;  %v5322_v59 = vunpack.c.h.bf16 %v14153_v22  ;;  %v17585_v36 = vmul.bf16 1069105081, %v13132_v8  ;;  %v5334_v22 = vunpack.c.l.bf16 %v14163_v5 }
 0x59f   :  { %v5598_v11 = vadd.f32 %v5597_v53, %v5306_v9  ;;  %17579 = vst [vmem:[#allocation97_spill] sm:$0xff] %v14169_v1  ;;  %7475 = vpow.bf16 %v5155_v38  ;;  %v5314_v9 = vunpack.c.h.bf16 %v14145_v47  ;;  %v14173_v24 = vpop.eup %7449  ;;  %v5455_v25 = vadd.f32 %v5454_v2, %v5284_v40 }
 0x5a0   :  { %17581 = vst [vmem:[#allocation79_spill] sm:$0xff] %v14173_v24  ;;  %v14178_v48 = vpop.eup %7451  ;;  %v17583_v38 = vmul.bf16 1069105081, %v17551_v45  ;;  %v5292_v10 = vunpack.c.l.bf16 %v14169_v1  ;;  %v5330_v47 = vunpack.c.h.bf16 %v14157_v4  ;;  %v17587_v45 = vmul.bf16 1069105081, %v13148_v7 }
 0x5a1   :  { %v5599_v53 = vadd.f32 %v5598_v11, %v5310_v35  ;;  %17582 = vst [vmem:[#allocation166_spill] sm:$0xff] %v14178_v48  ;;  %v14184_v11 = vpop.eup %7453  ;;  %v5326_v35 = vunpack.c.l.bf16 %v14157_v4  ;;  %v5456_v40 = vadd.f32 %v5455_v25, %v5288_v57  ;;  %v5342_v8 = vunpack.c.l.bf16 %v14173_v24 }
 0x5a2   :  { %7477 = vpow.bf16 %v17583_v38  ;;  %17584 = vst [vmem:[#allocation167_spill] sm:$0xff] %v14184_v11  ;;  %v14190_v2 = vpop.eup %7455  ;;  %v5338_v38 = vunpack.c.h.bf16 %v14163_v5  ;;  %v5346_v25 = vunpack.c.h.bf16 %v14173_v24  ;;  %v17603_v24 = vmul.bf16 1069105081, %v17563_v27 }
 0x5a3   :  { %v5600_v17 = vadd.f32 %v5599_v53, %v5314_v9  ;;  %7479 = vpow.bf16 %v17585_v36  ;;  %17586 = vst [vmem:[#allocation168_spill] sm:$0xff] %v14190_v2  ;;  %v14196_v53 = vpop.eup %7457  ;;  %v5296_v36 = vunpack.c.h.bf16 %v14169_v1  ;;  %v5457_v37 = vadd.f32 %v5456_v40, %v5292_v10 }
 0x5a4   :  { %7481 = vpow.bf16 %v17587_v45  ;;  %17588 = vst [vmem:[#allocation169_spill] sm:$0xff] %v14196_v53  ;;  %v14201_v57 = vpop.eup %7459  ;;  %v17592_v45 = vmul.bf16 1069105081, %v13162_v16  ;;  %v5300_v5 = vunpack.c.l.bf16 %v14190_v2  ;;  %v17608_v27 = vmul.bf16 1069105081, %v17503_v52 }
 0x5a5   :  { %v5601_v9 = vadd.f32 %v5600_v17, %v5318_v30  ;;  %17589 = vst [vmem:[#allocation174_spill] sm:$0xff] %v14201_v57  ;;  %v17590_v17 = vmul.bf16 1069105081, %v17555_v15  ;;  %v14207_v7 = vpop.eup %7461  ;;  %v5458_v10 = vadd.f32 %v5457_v37, %v5296_v36  ;;  %v17594_v15 = vmul.bf16 1069105081, %v13178_v41 }
 0x5a6   :  { %17591 = vst [vmem:[#allocation153_spill] sm:$0xff] %v14207_v7  ;;  %v17610_v52 = vmul.bf16 1069105081, %v17567_v55 }
 0x5a7   :  { %v5602_v32 = vadd.f32 %v5601_v9, %v5322_v59  ;;  %7483 = vpow.bf16 %v17590_v17  ;;  %v14213_v40 = vpop.eup %7463  ;;  %v5459_v30 = vadd.f32 %v5458_v10, %v5300_v5  ;;  %v17621_v17 = vmul.bf16 1069105081, %v17511_v34 }
 0x5a8   :  { %7485 = vpow.bf16 %v17592_v45  ;;  %17593 = vst [vmem:[#allocation143_spill] sm:$0xff] %v14213_v40  ;;  %v14219_v9 = vpop.eup %7465  ;;  %v5304_v45 = vunpack.c.h.bf16 %v14190_v2  ;;  %v5308_v16 = vunpack.c.l.bf16 %v14213_v40  ;;  %v17717_v2 = vld [vmem:[#allocation148_spill] sm:$0xff] }
 0x5a9   :  { %v5603_v59 = vadd.f32 %v5602_v32, %v5326_v35  ;;  %7487 = vpow.bf16 %v17594_v15  ;;  %17595 = vst [vmem:[#allocation103_spill] sm:$0xff] %v14219_v9  ;;  %v14224_v37 = vpop.eup %7467  ;;  %v17597_v32 = vmul.bf16 1069105081, %v17559_v13  ;;  %v17599_v15 = vmul.bf16 1069105081, %v17498_v43 }
 0x5aa   :  { %17596 = vst [vmem:[#allocation175_spill] sm:$0xff] %v14224_v37  ;;  %v14230_v41 = vpop.eup %7469  ;;  %v5460_v5 = vadd.f32 %v5459_v30, %v5304_v45  ;;  %v17601_v35 = vmul.bf16 1069105081, %v17499_v49  ;;  %v5312_v43 = vunpack.c.h.bf16 %v14213_v40  ;;  %v17606_v49 = vmul.bf16 1069105081, %v17500_v6 }
 0x5ab   :  { %v5604_v4 = vadd.f32 %v5603_v59, %v5330_v47  ;;  %7489 = vpow.bf16 %v17597_v32  ;;  %17598 = vst [vmem:[#allocation123_spill] sm:$0xff] %v14230_v41  ;;  %v14236_v10 = vpop.eup %7471  ;;  %v17609_v6 = vmul.bf16 1069105081, %v17504_v58 }
 0x5ac   :  { %7491 = vpow.bf16 %v17599_v15  ;;  %17600 = vst [vmem:[#allocation137_spill] sm:$0xff] %v14236_v10  ;;  %v14241_v59 = vpop.eup %7473  ;;  %v5461_v15 = vadd.f32 %v5460_v5, %v5308_v16  ;;  %v5316_v16 = vunpack.c.l.bf16 %v14236_v10 }
 0x5ad   :  { %v5605_v13 = vadd.f32 %v5604_v4, %v5334_v22  ;;  %7493 = vpow.bf16 %v17601_v35  ;;  %v14247_v30 = vpop.eup %7475  ;;  %v17604_v22 = vunpack.c.l.bf16 %v17527_v44  ;;  %v17605_v4 = vunpack.c.h.bf16 %v17527_v44 }
 0x5ae   :  { %17602 = vst [vmem:[#allocation180_spill] sm:$0xff] %v14247_v30  ;;  %7495 = vpow.bf16 %v17603_v24  ;;  %v5462_v35 = vadd.f32 %v5461_v15, %v5312_v43  ;;  %v5181_v24 = vunpack.c.l.bf16 %v14241_v59 }
 0x5af   :  { %v5606_v36 = vadd.f32 %v5605_v13, %v5338_v38  ;;  %v5635_v47 = vadd.f32 %v17605_v4, %v17604_v22  ;;  %7497 = vpow.bf16 %v17606_v49  ;;  %v5320_v4 = vunpack.c.h.bf16 %v14236_v10  ;;  %v17615_v49 = vld [vmem:[#allocation141_spill] sm:$0xff] }
 0x5b0   :  { %v14260_v5 = vpop.eup %7477  ;;  %7499 = vpow.bf16 %v17608_v27  ;;  %v5463_v43 = vadd.f32 %v5462_v35, %v5316_v16  ;;  %v17612_v38 = vmul.bf16 1069105081, %v17505_v19  ;;  %v17614_v16 = vunpack.c.l.bf16 %v14178_v48  ;;  %v17617_v19 = vld [vmem:[#allocation99_spill] sm:$0xff] }
 0x5b1   :  { %17607 = vst [vmem:[#allocation146_spill] sm:$0xff] %v14260_v5  ;;  %v5607_v13 = vadd.f32 %v5606_v36, %v5342_v8  ;;  %v14266_v44 = vpop.eup %7479  ;;  %7501 = vpow.bf16 %v17609_v6  ;;  %v17611_v36 = vld [vmem:[#allocation77_spill] sm:$0xff]  ;;  %v5324_v22 = vunpack.c.l.bf16 %v14260_v5  ;;  %v5185_v6 = vunpack.c.h.bf16 %v14241_v59 }
 0x5b2   :  { %v14272_v15 = vpop.eup %7481  ;;  %7503 = vpow.bf16 %v17610_v52  ;;  %v5498_v27 = vadd.f32 %v17611_v36, %v5181_v24  ;;  %v5464_v58 = vadd.f32 %v5463_v43, %v5320_v4  ;;  %v5183_v55 = vunpack.c.l.bf16 %v14266_v44 }
 0x5b3   :  { %v5608_v8 = vadd.f32 %v5607_v13, %v5346_v25  ;;  %7505 = vpow.bf16 %v17612_v38  ;;  %v17616_v25 = vmul.bf16 1069105081, %v17615_v49  ;;  %v5187_v13 = vunpack.c.h.bf16 %v14266_v44 }
 0x5b4   :  { %v17618_v38 = vmul.bf16 1069105081, %v17617_v19  ;;  %v5328_v4 = vunpack.c.h.bf16 %v14260_v5  ;;  %v5465_v43 = vadd.f32 %v5464_v58, %v5324_v22  ;;  %v5189_v52 = vunpack.c.l.bf16 %v14272_v15 }
 0x5b5   :  { %v14282_v32 = vpop.eup %7483  ;;  %v5609_v35 = vadd.f32 %v5608_v8, %v17614_v16  ;;  %7507 = vpow.bf16 %v17616_v25  ;;  %v17619_v8 = vunpack.c.h.bf16 %v14178_v48  ;;  %v17620_v16 = vmul.bf16 1069105081, %v17570_v33 }
 0x5b6   :  { %17613 = vst [vmem:[#allocation181_spill] sm:$0xff] %v14282_v32  ;;  %v14290_v24 = vpop.eup %7485  ;;  %7509 = vpow.bf16 %v17618_v38  ;;  %v5193_v25 = vunpack.c.h.bf16 %v14272_v15  ;;  %v5499_v45 = vadd.f32 %v5498_v27, %v5185_v6  ;;  %v5332_v19 = vunpack.c.l.bf16 %v14282_v32 }
 0x5b7   :  { %v14296_v36 = vpop.eup %7487  ;;  %v5610_v49 = vadd.f32 %v5609_v35, %v17619_v8  ;;  %7511 = vpow.bf16 %v17620_v16  ;;  %v5466_v38 = vadd.f32 %v5465_v43, %v5328_v4  ;;  %v5636_v22 = vadd.f32 %v5635_v47, %v5183_v55 }
 0x5b8   :  { %7513 = vpow.bf16 %v17621_v17  ;;  %v17623_v5 = vunpack.c.l.bf16 %v14184_v11  ;;  %v5191_v35 = vunpack.c.l.bf16 %v14290_v24  ;;  %v5195_v33 = vunpack.c.h.bf16 %v14290_v24 }
 0x5b9   :  { %v14306_v58 = vpop.eup %7489  ;;  %v5500_v8 = vadd.f32 %v5499_v45, %v5189_v52  ;;  %v17624_v27 = vmul.bf16 1069105081, %v17513_v23  ;;  %v5336_v34 = vunpack.c.h.bf16 %v14282_v32  ;;  %v5467_v17 = vadd.f32 %v5466_v38, %v5332_v19 }
 0x5ba   :  { %17622 = vst [vmem:[#allocation104_spill] sm:$0xff] %v14306_v58  ;;  %v5611_v10 = vadd.f32 %v5610_v49, %v17623_v5  ;;  %v14312_v16 = vpop.eup %7491  ;;  %v5197_v47 = vunpack.c.l.bf16 %v14296_v36  ;;  %v17625_v6 = vunpack.c.h.bf16 %v14184_v11  ;;  %v17626_v5 = vmul.bf16 1069105081, %v17573_v14 }
 0x5bb   :  { %7515 = vpow.bf16 %v17624_v27  ;;  %v5201_v4 = vunpack.c.h.bf16 %v14296_v36  ;;  %v5501_v43 = vadd.f32 %v5500_v8, %v5193_v25  ;;  %v14323_v45 = vpop.eup %7493  ;;  %v17627_v52 = vmul.bf16 1069105081, %v13354_v28 }
 0x5bc   :  { %v5612_v55 = vadd.f32 %v5611_v10, %v17625_v6  ;;  %7517 = vpow.bf16 %v17626_v5  ;;  %v5340_v23 = vunpack.c.l.bf16 %v14306_v58  ;;  %v5468_v49 = vadd.f32 %v5467_v17, %v5336_v34  ;;  %v14328_v38 = vpop.eup %7495 }
 0x5bd   :  { %7519 = vpow.bf16 %v17627_v52  ;;  %v5637_v19 = vadd.f32 %v5636_v22, %v5187_v13  ;;  %17628 = vst [vmem:[#allocation182_spill] sm:$0xff] %v14328_v38  ;;  %v17629_v27 = vunpack.c.l.bf16 %v14196_v53  ;;  %v5199_v14 = vunpack.c.l.bf16 %v14312_v16  ;;  %v14334_v25 = vpop.eup %7497 }
 0x5be   :  { %v5203_v6 = vunpack.c.h.bf16 %v14312_v16  ;;  %v5502_v5 = vadd.f32 %v5501_v43, %v5197_v47  ;;  %v17630_v8 = vmul.bf16 1069105081, %v13370_v20  ;;  %v5344_v28 = vunpack.c.h.bf16 %v14306_v58  ;;  %v14339_v13 = vpop.eup %7499 }
 0x5bf   :  { %v5613_v10 = vadd.f32 %v5612_v55, %v17629_v27  ;;  %v5469_v52 = vadd.f32 %v5468_v49, %v5340_v23  ;;  %v5638_v34 = vadd.f32 %v5637_v19, %v5191_v35  ;;  %v17631_v22 = vunpack.c.h.bf16 %v14196_v53  ;;  %v14346_v43 = vpop.eup %7501 }
 0x5c0   :  { %7521 = vpow.bf16 %v17630_v8  ;;  %v17632_v55 = vmul.bf16 1069105081, %v13853_v31  ;;  %v5205_v27 = vunpack.c.l.bf16 %v14323_v45  ;;  %v5503_v47 = vadd.f32 %v5502_v5, %v5201_v4  ;;  %v14350_v35 = vpop.eup %7503 }
 0x5c1   :  { %v5614_v17 = vadd.f32 %v5613_v10, %v17631_v22  ;;  %v5348_v20 = vunpack.c.l.bf16 %v14328_v38  ;;  %v5470_v8 = vadd.f32 %v5469_v52, %v5344_v28  ;;  %v5209_v11 = vunpack.c.h.bf16 %v14323_v45  ;;  %17633 = vst [vmem:[#allocation187_spill] sm:$0xff] %v14350_v35  ;;  %v14357_v4 = vpop.eup %7505 }
 0x5c2   :  { %7523 = vpow.bf16 %v17632_v55  ;;  %v5639_v23 = vadd.f32 %v5638_v34, %v5195_v33  ;;  %v17634_v49 = vunpack.c.l.bf16 %v14201_v57  ;;  %v17635_v10 = vmul.bf16 1069105081, %v13386_v54 }
 0x5c3   :  { %v5207_v31 = vunpack.c.l.bf16 %v14334_v25  ;;  %v5504_v22 = vadd.f32 %v5503_v47, %v5205_v27  ;;  %v5352_v5 = vunpack.c.h.bf16 %v14328_v38  ;;  %v5471_v55 = vadd.f32 %v5470_v8, %v5348_v20  ;;  %v14361_v33 = vpop.eup %7507  ;;  %v17638_v47 = vld [vmem:[#allocation78_spill] sm:$0xff] }
 0x5c4   :  { %v5615_v19 = vadd.f32 %v5614_v17, %v17634_v49  ;;  %7525 = vpow.bf16 %v17635_v10  ;;  %v5211_v28 = vunpack.c.h.bf16 %v14334_v25  ;;  %v5640_v52 = vadd.f32 %v5639_v23, %v5199_v14  ;;  %v14368_v27 = vpop.eup %7509 }
 0x5c5   :  { %v17636_v34 = vunpack.c.h.bf16 %v14201_v57  ;;  %v17637_v17 = vmul.bf16 1069105081, %v17577_v51  ;;  %v5213_v54 = vunpack.c.l.bf16 %v14339_v13  ;;  %v5505_v49 = vadd.f32 %v5504_v22, %v5209_v11  ;;  %v14373_v23 = vpop.eup %7511 }
 0x5c6   :  { %v17639_v10 = vmul.bf16 1069105081, %v17638_v47  ;;  %v5356_v20 = vunpack.c.l.bf16 %v14350_v35  ;;  %v5472_v8 = vadd.f32 %v5471_v55, %v5352_v5  ;;  %v5641_v14 = vadd.f32 %v5640_v52, %v5203_v6  ;;  %17640 = vst [vmem:[#allocation189_spill] sm:$0xff] %v14373_v23  ;;  %v14380_v22 = vpop.eup %7513 }
 0x5c7   :  { %v5616_v53 = vadd.f32 %v5615_v19, %v17636_v34  ;;  %7527 = vpow.bf16 %v17637_v17  ;;  %v17641_v57 = vunpack.c.l.bf16 %v14207_v7  ;;  %v17642_v34 = vld [vmem:[#allocation142_spill] sm:$0xff]  ;;  %v5217_v17 = vunpack.c.h.bf16 %v14339_v13 }
 0x5c8   :  { %7529 = vpow.bf16 %v17639_v10  ;;  %v17643_v51 = vmul.bf16 1069105081, %v17642_v34  ;;  %v5506_v11 = vadd.f32 %v5505_v49, %v5213_v54  ;;  %v5360_v47 = vunpack.c.h.bf16 %v14350_v35 }
 0x5c9   :  { %v5617_v19 = vadd.f32 %v5616_v53, %v17641_v57  ;;  %v5473_v10 = vadd.f32 %v5472_v8, %v5356_v20  ;;  %v5215_v48 = vunpack.c.l.bf16 %v14346_v43  ;;  %v5642_v5 = vadd.f32 %v5641_v14, %v5207_v31  ;;  %v14389_v34 = vpop.eup %7515 }
 0x5ca   :  { %7531 = vpow.bf16 %v17643_v51  ;;  %v17644_v6 = vunpack.c.h.bf16 %v14207_v7  ;;  %v17645_v52 = vmul.bf16 1069105081, %v17580_v18  ;;  %v5221_v53 = vunpack.c.l.bf16 %v14357_v4  ;;  %v14393_v8 = vpop.eup %7517 }
 0x5cb   :  { %v5507_v57 = vadd.f32 %v5506_v11, %v5217_v17  ;;  %v5364_v54 = vunpack.c.l.bf16 %v14373_v23  ;;  %v5474_v49 = vadd.f32 %v5473_v10, %v5360_v47  ;;  %v5219_v51 = vunpack.c.h.bf16 %v14346_v43  ;;  %17646 = vst [vmem:[#allocation190_spill] sm:$0xff] %v14393_v8  ;;  %v14400_v17 = vpop.eup %7519 }
 0x5cc   :  { %v5618_v55 = vadd.f32 %v5617_v19, %v17644_v6  ;;  %7533 = vpow.bf16 %v17645_v52  ;;  %v5643_v20 = vadd.f32 %v5642_v5, %v5211_v28  ;;  %v17647_v31 = vunpack.c.l.bf16 %v14219_v9 }
 0x5cd   :  { %v17648_v19 = vmul.bf16 1069105081, %v17520_v39  ;;  %v5225_v18 = vunpack.c.h.bf16 %v14357_v4  ;;  %v5508_v6 = vadd.f32 %v5507_v57, %v5221_v53  ;;  %v17649_v11 = vmul.bf16 1069105081, %v17521_v21 }
 0x5ce   :  { %v5619_v14 = vadd.f32 %v5618_v55, %v17647_v31  ;;  %v5368_v47 = vunpack.c.h.bf16 %v14373_v23  ;;  %v5475_v10 = vadd.f32 %v5474_v49, %v5364_v54  ;;  %v5644_v28 = vadd.f32 %v5643_v20, %v5215_v48 }
 0x5cf   :  { %7535 = vpow.bf16 %v17648_v19  ;;  %v17650_v5 = vunpack.c.h.bf16 %v14219_v9  ;;  %v17651_v55 = vmul.bf16 1069105081, %v13908_v42  ;;  %v5229_v39 = vunpack.c.l.bf16 %v14368_v27  ;;  %v14410_v19 = vpop.eup %7521 }
 0x5d0   :  { %7537 = vpow.bf16 %v17649_v11  ;;  %v5509_v31 = vadd.f32 %v5508_v6, %v5225_v18  ;;  %v5372_v53 = vunpack.c.l.bf16 %v14393_v8  ;;  %v5476_v57 = vadd.f32 %v5475_v10, %v5368_v47  ;;  %v14414_v7 = vpop.eup %7523 }
 0x5d1   :  { %v5620_v52 = vadd.f32 %v5619_v14, %v17650_v5  ;;  %7539 = vpow.bf16 %v17651_v55  ;;  %v5223_v21 = vunpack.c.l.bf16 %v14361_v33  ;;  %v5645_v11 = vadd.f32 %v5644_v28, %v5219_v51  ;;  %17652 = vst [vmem:[#allocation198_spill] sm:$0xff] %v14414_v7 }
 0x5d2   :  { %v17653_v48 = vunpack.c.l.bf16 %v14224_v37  ;;  %v5227_v49 = vunpack.c.h.bf16 %v14361_v33  ;;  %v5233_v42 = vunpack.c.h.bf16 %v14368_v27  ;;  %v5510_v20 = vadd.f32 %v5509_v31, %v5229_v39  ;;  %v14423_v10 = vpop.eup %7525 }
 0x5d3   :  { %v17654_v14 = vmul.bf16 1069105081, %v13467_v50  ;;  %v5376_v18 = vunpack.c.h.bf16 %v14393_v8  ;;  %v5477_v6 = vadd.f32 %v5476_v57, %v5372_v53  ;;  %v5646_v47 = vadd.f32 %v5645_v11, %v5223_v21 }
 0x5d4   :  { %v5621_v54 = vadd.f32 %v5620_v52, %v17653_v48  ;;  %v17655_v51 = vunpack.c.h.bf16 %v14224_v37  ;;  %v17656_v5 = vmul.bf16 1069105081, %v13935_v63  ;;  %v5237_v52 = vunpack.c.l.bf16 %v14389_v34 }
 0x5d5   :  { %7541 = vpow.bf16 %v17654_v14  ;;  %v5511_v55 = vadd.f32 %v5510_v20, %v5233_v42  ;;  %v5380_v39 = vunpack.c.l.bf16 %v14414_v7  ;;  %v5478_v31 = vadd.f32 %v5477_v6, %v5376_v18  ;;  %v14432_v14 = vpop.eup %7527 }
 0x5d6   :  { %v5622_v28 = vadd.f32 %v5621_v54, %v17655_v51  ;;  %7543 = vpow.bf16 %v17656_v5  ;;  %v5231_v50 = vunpack.c.l.bf16 %v14380_v22  ;;  %v5647_v48 = vadd.f32 %v5646_v47, %v5227_v49  ;;  %17657 = vst [vmem:[#allocation211_spill] sm:$0xff] %v14432_v14  ;;  %v14438_v54 = vpop.eup %7529 }
 0x5d7   :  { %v17658_v53 = vunpack.c.l.bf16 %v14230_v41  ;;  %v5235_v21 = vunpack.c.h.bf16 %v14380_v22  ;;  %v5241_v11 = vunpack.c.h.bf16 %v14389_v34  ;;  %v5512_v63 = vadd.f32 %v5511_v55, %v5237_v52 }
 0x5d8   :  { %v17659_v42 = vmul.bf16 1069105081, %v17524_v60  ;;  %v5384_v20 = vunpack.c.h.bf16 %v14414_v7  ;;  %v5479_v18 = vadd.f32 %v5478_v31, %v5380_v39  ;;  %v5648_v6 = vadd.f32 %v5647_v48, %v5231_v50  ;;  %v14443_v49 = vpop.eup %7531 }
 0x5d9   :  { %v5623_v57 = vadd.f32 %v5622_v28, %v17658_v53  ;;  %v17660_v47 = vunpack.c.h.bf16 %v14230_v41  ;;  %v17661_v28 = vmul.bf16 1069105081, %v13483_v46  ;;  %v5245_v5 = vunpack.c.l.bf16 %v14410_v19 }
 0x5da   :  { %7545 = vpow.bf16 %v17659_v42  ;;  %v5513_v52 = vadd.f32 %v5512_v63, %v5241_v11  ;;  %v5388_v55 = vunpack.c.l.bf16 %v14432_v14  ;;  %v5480_v53 = vadd.f32 %v5479_v18, %v5384_v20  ;;  %v14452_v37 = vpop.eup %7533 }
 0x5db   :  { %v5624_v51 = vadd.f32 %v5623_v57, %v17660_v47  ;;  %7547 = vpow.bf16 %v17661_v28  ;;  %v5239_v60 = vunpack.c.l.bf16 %v14400_v17  ;;  %v5649_v42 = vadd.f32 %v5648_v6, %v5235_v21  ;;  %17662 = vst [vmem:[#allocation205_spill] sm:$0xff] %v14452_v37  ;;  %v17664_v57 = vld [vmem:[#allocation154_spill] sm:$0xff]  ;;  %v17667_v28 = vld [vmem:[#allocation144_spill] sm:$0xff] }
 0x5dc   :  { %v17663_v39 = vunpack.c.l.bf16 %v14247_v30  ;;  %v5243_v50 = vunpack.c.h.bf16 %v14400_v17  ;;  %v5249_v48 = vunpack.c.h.bf16 %v14410_v19  ;;  %v5514_v46 = vadd.f32 %v5513_v52, %v5245_v5 }
 0x5dd   :  { %v17665_v47 = vmul.bf16 1069105081, %v17664_v57  ;;  %v5392_v11 = vunpack.c.h.bf16 %v14432_v14  ;;  %v5481_v63 = vadd.f32 %v5480_v53, %v5388_v55  ;;  %v5650_v20 = vadd.f32 %v5649_v42, %v5239_v60  ;;  %v14461_v18 = vpop.eup %7535  ;;  %v17670_v60 = vld [vmem:[#allocation139_spill] sm:$0xff] }
 0x5de   :  { %v5625_v31 = vadd.f32 %v5624_v51, %v17663_v39  ;;  %v17666_v21 = vunpack.c.h.bf16 %v14247_v30  ;;  %v17668_v41 = vmul.bf16 1069105081, %v17667_v28  ;;  %v5253_v51 = vunpack.c.l.bf16 %v14438_v54  ;;  %v14468_v9 = vpop.eup %7537  ;;  %v17672_v28 = vld [vmem:[#allocation152_spill] sm:$0xff] }
 0x5df   :  { %7549 = vpow.bf16 %v17665_v47  ;;  %v5515_v39 = vadd.f32 %v5514_v46, %v5249_v48  ;;  %v5396_v5 = vunpack.c.l.bf16 %v14452_v37  ;;  %v5482_v52 = vadd.f32 %v5481_v63, %v5392_v11  ;;  %v14472_v53 = vpop.eup %7539 }
 0x5e0   :  { %v5626_v6 = vadd.f32 %v5625_v31, %v17666_v21  ;;  %7551 = vpow.bf16 %v17668_v41  ;;  %v5247_v57 = vunpack.c.l.bf16 %v14423_v10  ;;  %v5651_v55 = vadd.f32 %v5650_v20, %v5243_v50  ;;  %17669 = vst [vmem:[#allocation212_spill] sm:$0xff] %v14472_v53  ;;  %v17675_v20 = vld [vmem:[#allocation108_spill] sm:$0xff] }
 0x5e1   :  { %v17671_v42 = vunpack.c.l.bf16 %v17670_v60  ;;  %v5251_v31 = vunpack.c.h.bf16 %v14423_v10  ;;  %v5257_v41 = vunpack.c.h.bf16 %v14438_v54  ;;  %v5516_v21 = vadd.f32 %v5515_v39, %v5253_v51 }
 0x5e2   :  { %v17673_v48 = vmul.bf16 1069105081, %v17672_v28  ;;  %v5400_v46 = vunpack.c.h.bf16 %v14452_v37  ;;  %v5483_v30 = vadd.f32 %v5482_v52, %v5396_v5  ;;  %v5652_v11 = vadd.f32 %v5651_v55, %v5247_v57 }
 0x5e3   :  { %v5627_v47 = vadd.f32 %v5626_v6, %v17671_v42  ;;  %v17674_v63 = vunpack.c.h.bf16 %v17670_v60  ;;  %v17676_v14 = vmul.bf16 1069105081, %v17675_v20  ;;  %v5261_v6 = vunpack.c.l.bf16 %v14461_v18  ;;  %v14486_v7 = vpop.eup %7541 }
 0x5e4   :  { %7553 = vpow.bf16 %v17673_v48  ;;  %v5517_v42 = vadd.f32 %v5516_v21, %v5257_v41  ;;  %v5404_v51 = vunpack.c.l.bf16 %v14472_v53  ;;  %v5484_v39 = vadd.f32 %v5483_v30, %v5400_v46  ;;  %v14490_v37 = vpop.eup %7543  ;;  %v17680_v30 = vld [vmem:[#allocation71_spill] sm:$0xff] }
 0x5e5   :  { %v5628_v50 = vadd.f32 %v5627_v47, %v17674_v63  ;;  %7555 = vpow.bf16 %v17676_v14  ;;  %v5255_v28 = vunpack.c.l.bf16 %v14443_v49  ;;  %v5653_v48 = vadd.f32 %v5652_v11, %v5251_v31  ;;  %17677 = vst [vmem:[#allocation204_spill] sm:$0xff] %v14490_v37  ;;  %v17678_v14 = vld [vmem:[#allocation121_spill] sm:$0xff] }
 0x5e6   :  { %v5259_v52 = vunpack.c.h.bf16 %v14443_v49  ;;  %v5265_v57 = vunpack.c.h.bf16 %v14461_v18  ;;  %v5518_v55 = vadd.f32 %v5517_v42, %v5261_v6  ;;  %v17679_v47 = vmul.bf16 1069105081, %v17678_v14 }
 0x5e7   :  { %v5629_v5 = vrot.slane %v5628_v50, 4  ;;  %v5408_v41 = vunpack.c.h.bf16 %v14472_v53  ;;  %v5485_v21 = vadd.f32 %v5484_v39, %v5404_v51  ;;  %v5654_v63 = vadd.f32 %v5653_v48, %v5255_v28  ;;  %v17683_v28 = vld [vmem:[#allocation196_spill] sm:$0xff]  ;;  %v17688_v53 = vld [vmem:[#allocation75_spill] sm:$0xff] }
 0x5e8   :  { %7557 = vpow.bf16 %v17679_v47  ;;  %v17681_v46 = vmul.bf16 1069105081, %v17680_v30  ;;  %v5269_v31 = vunpack.c.l.bf16 %v14486_v7  ;;  %v5519_v11 = vadd.f32 %v5518_v55, %v5265_v57  ;;  %v14500_v60 = vpop.eup %7545 }
 0x5e9   :  { %v5630_v20 = vadd.f32 %v5629_v5, %v5628_v50  ;;  %17682 = vst [vmem:[#allocation213_spill] sm:$0xff] %v14500_v60  ;;  %v5412_v8 = vunpack.c.l.bf16 %v14490_v37  ;;  %v5486_v23 = vadd.f32 %v5485_v21, %v5408_v41  ;;  %v5263_v6 = vunpack.c.l.bf16 %v14468_v9  ;;  %v14504_v14 = vpop.eup %7547  ;;  %v17685_v41 = vld [vmem:[#allocation195_spill] sm:$0xff] }
 0x5ea   :  { %7559 = vpow.bf16 %v17681_v46  ;;  %v5655_v42 = vadd.f32 %v5654_v63, %v5259_v52  ;;  %v5267_v51 = vunpack.c.h.bf16 %v14468_v9  ;;  %v5273_v50 = vunpack.c.h.bf16 %v14486_v7 }
 0x5eb   :  { %v5631_v47 = vrot.slane %v5630_v20, 2  ;;  %v5520_v39 = vadd.f32 %v5519_v11, %v5269_v31  ;;  %v17684_v48 = vmul.bf16 1069105081, %v17683_v28  ;;  %v5416_v5 = vunpack.c.h.bf16 %v14490_v37  ;;  %v17696_v37 = vld [vmem:[#allocation312_spill] sm:$0xff] }
 0x5ec   :  { %v5487_v57 = vadd.f32 %v5486_v23, %v5412_v8  ;;  %v5656_v55 = vadd.f32 %v5655_v42, %v5263_v6  ;;  %v17686_v21 = vmul.bf16 1069105081, %v17685_v41  ;;  %v5277_v52 = vunpack.c.l.bf16 %v14500_v60  ;;  %v17690_v6 = vld [vmem:[#allocation277_spill] sm:$0xff] }
 0x5ed   :  { %7561 = vpow.bf16 %v17684_v48  ;;  %v5632_v30 = vadd.f32 %v5631_v47, %v5630_v20  ;;  %v5521_v63 = vadd.f32 %v5520_v39, %v5273_v50  ;;  %v14514_v46 = vpop.eup %7549  ;;  %v5420_v35 = vunpack.c.l.bf16 %v17688_v53 }
 0x5ee   :  { %7563 = vpow.bf16 %v17686_v21  ;;  %17687 = vst [vmem:[#allocation206_spill] sm:$0xff] %v14514_v46  ;;  %v5488_v38 = vadd.f32 %v5487_v57, %v5416_v5  ;;  %v5271_v31 = vunpack.c.l.bf16 %v14504_v14  ;;  %v5657_v11 = vadd.f32 %v5656_v55, %v5267_v51  ;;  %v14518_v28 = vpop.eup %7551  ;;  %v17692_v5 = vld [vmem:[#allocation223_spill] sm:$0xff] }
 0x5ef   :  { %17689 = vst [vmem:[#allocation214_spill] sm:$0xff] %v14518_v28  ;;  %v5633_v48 = vrot.slane %v5632_v30, 1  ;;  %v5424_v23 = vunpack.c.h.bf16 %v17688_v53  ;;  %v5281_v8 = vunpack.c.h.bf16 %v14500_v60  ;;  %v5522_v20 = vadd.f32 %v5521_v63, %v5277_v52  ;;  %v17695_v53 = vld [vmem:[#allocation242_spill] sm:$0xff] }
 0x5f0   :  { %v17691_v42 = vmul.bf16 1069105081, %v17690_v6  ;;  %v5489_v47 = vadd.f32 %v5488_v38, %v5420_v35  ;;  %v5275_v50 = vunpack.c.h.bf16 %v14504_v14  ;;  %v5658_v39 = vadd.f32 %v5657_v11, %v5271_v31  ;;  %v17698_v52 = vld [vmem:[#allocation246_spill] sm:$0xff] }
 0x5f1   :  { %v5634_v41 = vadd.f32 %v5633_v48, %v5632_v30  ;;  %v17693_v57 = vmul.bf16 1069105081, %v17692_v5  ;;  %v5285_v51 = vunpack.c.l.bf16 %v14514_v46  ;;  %v5523_v55 = vadd.f32 %v5522_v20, %v5281_v8  ;;  %v17701_v11 = vld [vmem:[#allocation130_spill] sm:$0xff] }
 0x5f2   :  { %7565 = vpow.bf16 %v17691_v42  ;;  %v14528_v21 = vpop.eup %7553  ;;  %v17697_v58 = vsub.f32 %v17695_v53, %v17696_v37  ;;  %v17699_v63 = vsub.f32 %v17698_v52, %v17696_v37  ;;  %v5490_v38 = vadd.f32 %v5489_v47, %v5424_v23  ;;  %v17704_v47 = vld [vmem:[#allocation299_spill] sm:$0xff] }
 0x5f3   :  { %7567 = vpow.bf16 %v17693_v57  ;;  %17694 = vst [vmem:[#allocation170_spill] sm:$0xff] %v14528_v21  ;;  %v5279_v35 = vunpack.c.l.bf16 %v14518_v28  ;;  %v5659_v31 = vadd.f32 %v5658_v39, %v5275_v50  ;;  %v14537_v30 = vpop.eup %7555  ;;  %v5032_v48 = vmul.bf16 1069105081, %v17701_v11  ;;  %v17708_v11 = vld [vmem:[#allocation314_spill] sm:$0xff] }
 0x5f4   :  { %v4749_v6 = vpack.c.bf16 %v17699_v63, %v17697_v58  ;;  %17700 = vst [vmem:[#allocation219_spill] sm:$0xff] %v14537_v30  ;;  %7569 = vrcp.f32 %v5634_v41  ;;  %v5289_v8 = vunpack.c.h.bf16 %v14514_v46  ;;  %v5524_v20 = vadd.f32 %v5523_v55, %v5285_v51  ;;  %v17703_v58 = vld [vmem:[#allocation109_spill] sm:$0xff]  ;;  %v17707_v41 = vld [vmem:[#allocation244_spill] sm:$0xff] }
 0x5f5   :  { %v17702_v42 = vmul.bf16 1069105081, %v17552_v12  ;;  %v5491_v53 = vrot.slane %v5490_v38, 4  ;;  %v5283_v5 = vunpack.c.h.bf16 %v14518_v28  ;;  %v5660_v57 = vadd.f32 %v5659_v31, %v5279_v35  ;;  %v17710_v55 = vld [vmem:[#allocation248_spill] sm:$0xff] }
 0x5f6   :  { %v5026_v23 = vmul.bf16 1069105081, %v17703_v58  ;;  %v17705_v52 = vmul.bf16 1069105081, %v17704_v47  ;;  %v5293_v50 = vunpack.c.l.bf16 %v14528_v21  ;;  %v5525_v39 = vadd.f32 %v5524_v20, %v5289_v8  ;;  %v14548_v63 = vpop.eup %7557  ;;  %v17713_v47 = vld [vmem:[#allocation250_spill] sm:$0xff] }
 0x5f7   :  { %7571 = vpow.bf16 %v17702_v42  ;;  %17706 = vst [vmem:[#allocation171_spill] sm:$0xff] %v14548_v63  ;;  %v17709_v51 = vsub.f32 %v17707_v41, %v17708_v11  ;;  %v17711_v12 = vsub.f32 %v17710_v55, %v17708_v11  ;;  %v5492_v32 = vadd.f32 %v5491_v53, %v5490_v38  ;;  %v17715_v8 = vld [vmem:[#allocation254_spill] sm:$0xff] }
 0x5f8   :  { %7573 = vpow.bf16 %v17705_v52  ;;  %v5287_v35 = vunpack.c.l.bf16 %v14537_v30  ;;  %v5661_v31 = vadd.f32 %v5660_v57, %v5283_v5  ;;  %v14559_v58 = vpop.eup %7559  ;;  %v17714_v52 = vsub.f32 %v17713_v47, %v17696_v37  ;;  %v17718_v5 = vld [vmem:[#allocation101_spill] sm:$0xff] }
 0x5f9   :  { %v14556_v42 = vpack.c.bf16 %v17711_v12, %v17709_v51  ;;  %17712 = vst [vmem:[#allocation220_spill] sm:$0xff] %v14559_v58  ;;  %v17716_v20 = vsub.f32 %v17715_v8, %v17696_v37  ;;  %v5044_v41 = vmul.bf16 1069105081, %v17717_v2  ;;  %v5297_v1 = vunpack.c.h.bf16 %v14528_v21  ;;  %v17720_v8 = vld [vmem:[#allocation252_spill] sm:$0xff] }
 0x5fa   :  { %v5526_v55 = vadd.f32 %v5525_v39, %v5293_v50  ;;  %7575 = vpow.bf16 %v5032_v48  ;;  %v5493_v51 = vrot.slane %v5492_v32, 2  ;;  %v5291_v38 = vunpack.c.h.bf16 %v14537_v30  ;;  %v17722_v2 = vld [vmem:[#allocation256_spill] sm:$0xff] }
 0x5fb   :  { %v4753_v40 = vpack.c.bf16 %v17716_v20, %v17714_v52  ;;  %v5662_v53 = vadd.f32 %v5661_v31, %v5287_v35  ;;  %v5038_v57 = vmul.bf16 1069105081, %v17718_v5  ;;  %7577 = vpow.bf16 %v5026_v23  ;;  %v14572_v0 = vpop.eup %7561  ;;  %v17725_v23 = vld [vmem:[#allocation258_spill] sm:$0xff] }
 0x5fc   :  { %v5301_v12 = vunpack.c.l.bf16 %v14548_v63  ;;  %v5527_v47 = vadd.f32 %v5526_v55, %v5297_v1  ;;  %17719 = vst [vmem:[#allocation172_spill] sm:$0xff] %v14572_v0  ;;  %v17721_v52 = vsub.f32 %v17720_v8, %v17708_v11  ;;  %v17723_v20 = vsub.f32 %v17722_v2, %v17708_v11  ;;  %v14583_v31 = vpop.eup %7563  ;;  %v17727_v1 = vld [vmem:[#allocation262_spill] sm:$0xff]  ;;  %v17729_v2 = vld [vmem:[#allocation73_spill] sm:$0xff] }
 0x5fd   :  { %v5494_v48 = vadd.f32 %v5493_v51, %v5492_v32  ;;  %v5295_v39 = vunpack.c.l.bf16 %v14559_v58  ;;  %v5663_v35 = vadd.f32 %v5662_v53, %v5291_v38  ;;  %17724 = vst [vmem:[#allocation221_spill] sm:$0xff] %v14583_v31  ;;  %v17726_v5 = vsub.f32 %v17725_v23, %v17696_v37 }
 0x5fe   :  { %v14580_v50 = vpack.c.bf16 %v17723_v20, %v17721_v52  ;;  %v17728_v55 = vsub.f32 %v17727_v1, %v17696_v37  ;;  %v5056_v30 = vmul.bf16 1069105081, %v4749_v6  ;;  %v5305_v8 = vunpack.c.h.bf16 %v14548_v63 }
 0x5ff   :  { %v5528_v29 = vadd.f32 %v5527_v47, %v5301_v12  ;;  %7579 = vpow.bf16 %v5044_v41  ;;  %v5495_v52 = vrot.slane %v5494_v48, 1  ;;  %v5299_v32 = vunpack.c.h.bf16 %v14559_v58 }
 0x600   :  { %v4757_v21 = vpack.c.bf16 %v17728_v55, %v17726_v5  ;;  %v5664_v51 = vadd.f32 %v5663_v35, %v5295_v39  ;;  %v5050_v38 = vmul.bf16 1069105081, %v17729_v2  ;;  %7581 = vpow.bf16 %v5038_v57  ;;  %v14595_v23 = vpop.eup %7565  ;;  %v17732_v57 = vld [vmem:[#allocation313_spill] sm:$0xff] }
 0x601   :  { %v5309_v53 = vunpack.c.l.bf16 %v14572_v0  ;;  %v5529_v20 = vadd.f32 %v5528_v29, %v5305_v8  ;;  %17730 = vst [vmem:[#allocation173_spill] sm:$0xff] %v14595_v23  ;;  %v5062_v1 = vmul.bf16 1069105081, %v14556_v42  ;;  %v5496_v5 = vadd.f32 %v5495_v52, %v5494_v48  ;;  %v14599_v12 = vpop.eup %7567 }
 0x602   :  { %v5303_v6 = vunpack.c.l.bf16 %v14583_v31  ;;  %v5665_v55 = vadd.f32 %v5664_v51, %v5299_v32  ;;  %17731 = vst [vmem:[#allocation95_spill] sm:$0xff] %v14599_v12  ;;  %v5068_v41 = vmul.bf16 1069105081, %v4753_v40  ;;  %7583 = vpow.bf16 %v5056_v30  ;;  %v7570_v35 = vpop.eup %7569  ;;  %v17734_v40 = vld [vmem:[#allocation298_spill] sm:$0xff]  ;;  %v17735_v32 = vld [vmem:[#allocation300_spill] sm:$0xff] }
 0x603   :  { %v5313_v47 = vunpack.c.h.bf16 %v14572_v0  ;;  %v5530_v39 = vadd.f32 %v5529_v20, %v5309_v53  ;;  %vm5706_vm9 = vcmp.gt.f32.partialorder %v17732_v57, -1e+29  ;;  %7585 = vrcp.f32 %v5496_v5 }
 0x604   :  { %v5307_v29 = vunpack.c.h.bf16 %v14583_v31  ;;  %v5666_v8 = vadd.f32 %v5665_v55, %v5303_v6  ;;  %v5714_v2 = vsel %vm5706_vm9, %v7570_v35, 0.0  ;;  %7587 = vpow.bf16 %v5050_v38  ;;  %v17737_v6 = vld [vmem:[#allocation260_spill] sm:$0xff]  ;;  %v17741_v35 = vld [vmem:[#allocation266_spill] sm:$0xff] }
 0x605   :  { %v5317_v42 = vunpack.c.l.bf16 %v14595_v23  ;;  %v5531_v48 = vadd.f32 %v5530_v39, %v5313_v47  ;;  %v14605_v52 = vpop.eup %7571  ;;  %v4633_v30 = vsub.f32 %v17734_v40, %v17696_v37  ;;  %5780 = vxpose.xlu0.b32.start.end [1/1] (short) %v5714_v2, 128  ;;  %v5311_v53 = vunpack.c.l.bf16 %v14599_v12  ;;  %v17739_v55 = vld [vmem:[#allocation264_spill] sm:$0xff]  ;;  %v17743_v40 = vld [vmem:[#allocation270_spill] sm:$0xff] }
 0x606   :  { %17733 = vst [vmem:[#allocation176_spill] sm:$0xff] %v14605_v52  ;;  %v5667_v20 = vadd.f32 %v5666_v8, %v5307_v29  ;;  %v14612_v5 = vpop.eup %7573  ;;  %v17738_v38 = vsub.f32 %v17737_v6, %v17708_v11  ;;  %v17740_v47 = vsub.f32 %v17739_v55, %v17708_v11  ;;  %v17742_v57 = vsub.f32 %v17741_v35, %v17696_v37  ;;  %v17746_v35 = vld [vmem:[#allocation294_spill] sm:$0xff] }
 0x607   :  { %17736 = vst [vmem:[#allocation222_spill] sm:$0xff] %v14612_v5  ;;  %v17744_v0 = vsub.f32 %v17743_v40, %v17696_v37  ;;  %v5321_v2 = vunpack.c.h.bf16 %v14595_v23  ;;  %v5532_v31 = vadd.f32 %v5531_v48, %v5317_v42  ;;  %v5080_v29 = vmul.bf16 1069105081, %v4757_v21  ;;  %v17749_v48 = vld [vmem:[#allocation268_spill] sm:$0xff]  ;;  %v17755_v23 = vld [vmem:[#allocation278_spill] sm:$0xff] }
 0x608   :  { %v4759_v39 = vpack.c.bf16 %v17740_v47, %v17738_v38  ;;  %7589 = vpow.bf16 %v5068_v41  ;;  %v5315_v8 = vunpack.c.h.bf16 %v14599_v12  ;;  %v5668_v63 = vadd.f32 %v5667_v20, %v5311_v53  ;;  %v14630_v47 = vpop.eup %7575  ;;  %v17753_v20 = vld [vmem:[#allocation274_spill] sm:$0xff] }
 0x609   :  { %v4761_v51 = vpack.c.bf16 %v17744_v0, %v17742_v57  ;;  %v5074_v6 = vmul.bf16 1069105081, %v14580_v50  ;;  %7591 = vpow.bf16 %v5062_v1  ;;  %v5325_v38 = vunpack.c.l.bf16 %v14605_v52  ;;  %17745 = vst [vmem:[#allocation177_spill] sm:$0xff] %v14630_v47  ;;  %v17747_v0 = vld [vmem:[#allocation296_spill] sm:$0xff]  ;;  %v14637_v42 = vpop.eup %7577 }
 0x60a   :  { %v5533_v55 = vadd.f32 %v5532_v31, %v5321_v2  ;;  %v4637_v40 = vsub.f32 %v17746_v35, %v17696_v37  ;;  %v5319_v21 = vunpack.c.l.bf16 %v14612_v5  ;;  %v5669_v41 = vadd.f32 %v5668_v63, %v5315_v8  ;;  %17748 = vst [vmem:[#allocation178_spill] sm:$0xff] %v14637_v42  ;;  %v17751_v1 = vld [vmem:[#allocation272_spill] sm:$0xff] }
 0x60b   :  { %v17750_v50 = vsub.f32 %v17749_v48, %v17708_v11  ;;  %v17752_v53 = vsub.f32 %v17751_v1, %v17708_v11  ;;  %v17754_v2 = vsub.f32 %v17753_v20, %v17696_v37  ;;  %v17756_v35 = vsub.f32 %v17755_v23, %v17696_v37  ;;  %v17758_v20 = vld [vmem:[#allocation306_spill] sm:$0xff]  ;;  %v17759_v23 = vld [vmem:[#allocation276_spill] sm:$0xff] }
 0x60c   :  { %v5329_v57 = vunpack.c.h.bf16 %v14605_v52  ;;  %v5534_v58 = vadd.f32 %v5533_v55, %v5325_v38  ;;  %v5092_v63 = vmul.bf16 1069105081, %v4761_v51  ;;  %7593 = vpow.bf16 %v5080_v29 }
 0x60d   :  { %v4763_v31 = vpack.c.bf16 %v17752_v53, %v17750_v50  ;;  %v4765_v12 = vpack.c.bf16 %v17756_v35, %v17754_v2  ;;  %v5323_v8 = vunpack.c.h.bf16 %v14612_v5  ;;  %v5670_v46 = vadd.f32 %v5669_v41, %v5319_v21  ;;  %v14654_v53 = vpop.eup %7579  ;;  %v17761_v35 = vld [vmem:[#allocation280_spill] sm:$0xff] }
 0x60e   :  { %v5086_v48 = vmul.bf16 1069105081, %v4759_v39  ;;  %7595 = vpow.bf16 %v5074_v6  ;;  %v5333_v1 = vunpack.c.l.bf16 %v14630_v47  ;;  %v5535_v50 = vadd.f32 %v5534_v58, %v5329_v57  ;;  %17757 = vst [vmem:[#allocation224_spill] sm:$0xff] %v14654_v53  ;;  %v14665_v39 = vpop.eup %7581  ;;  %v17764_v6 = vld [vmem:[#allocation282_spill] sm:$0xff] }
 0x60f   :  { %v4641_v62 = vsub.f32 %v17758_v20, %v17696_v37  ;;  %v17760_v2 = vsub.f32 %v17759_v23, %v17708_v11  ;;  %v17762_v51 = vsub.f32 %v17761_v35, %v17708_v11  ;;  %v5327_v38 = vunpack.c.l.bf16 %v14637_v42  ;;  %17763 = vst [vmem:[#allocation179_spill] sm:$0xff] %v14665_v39  ;;  %v17766_v57 = vld [vmem:[#allocation290_spill] sm:$0xff] }
 0x610   :  { %v5671_v55 = vadd.f32 %v5670_v46, %v5323_v8  ;;  %v17765_v58 = vsub.f32 %v17764_v6, %v17696_v37  ;;  %v17767_v21 = vsub.f32 %v17766_v57, %v17696_v37  ;;  %v5098_v20 = vmul.bf16 1069105081, %v4763_v31  ;;  %v17769_v8 = vld [vmem:[#allocation311_spill] sm:$0xff] }
 0x611   :  { %v4767_v29 = vpack.c.bf16 %v17762_v51, %v17760_v2  ;;  %v5337_v52 = vunpack.c.h.bf16 %v14630_v47  ;;  %v5536_v23 = vadd.f32 %v5535_v50, %v5333_v1  ;;  %v5104_v5 = vmul.bf16 1069105081, %v4765_v12  ;;  %v14675_v51 = vpop.eup %7583  ;;  %v17772_v50 = vld [vmem:[#allocation284_spill] sm:$0xff] }
 0x612   :  { %v4769_v41 = vpack.c.bf16 %v17767_v21, %v17765_v58  ;;  %7597 = vpow.bf16 %v5092_v63  ;;  %v5331_v2 = vunpack.c.h.bf16 %v14637_v42  ;;  %v5672_v35 = vadd.f32 %v5671_v55, %v5327_v38  ;;  %17768 = vst [vmem:[#allocation225_spill] sm:$0xff] %v14675_v51  ;;  %v7586_v46 = vpop.eup %7585  ;;  %v17770_v58 = vld [vmem:[#allocation307_spill] sm:$0xff]  ;;  %v17774_v55 = vld [vmem:[#allocation292_spill] sm:$0xff] }
 0x613   :  { %7599 = vpow.bf16 %v5086_v48  ;;  %vm5704_vm10 = vcmp.gt.f32.partialorder %v17769_v8, -1e+29  ;;  %v5341_v6 = vunpack.c.l.bf16 %v14654_v53  ;;  %v5537_v28 = vadd.f32 %v5536_v23, %v5337_v52  ;;  %v14682_v63 = vpop.eup %7587  ;;  %v17776_v8 = vld [vmem:[#allocation286_spill] sm:$0xff] }
 0x614   :  { %v4643_v31 = vsub.f32 %v17770_v58, %v17708_v11  ;;  %v5712_v57 = vsel %vm5704_vm10, %v7586_v46, 0.0  ;;  %v5335_v1 = vunpack.c.l.bf16 %v14665_v39  ;;  %v5673_v12 = vadd.f32 %v5672_v35, %v5331_v2  ;;  %17771 = vst [vmem:[#allocation183_spill] sm:$0xff] %v14682_v63 }
 0x615   :  { %v17773_v38 = vsub.f32 %v17772_v50, %v17708_v11  ;;  %v17775_v48 = vsub.f32 %v17774_v55, %v17708_v11  ;;  %v17777_v47 = vsub.f32 %v17776_v8, %v17696_v37  ;;  %5716 = vxpose.xlu1.b32.start.end [1/1] (short) %v5712_v57, 128  ;;  %v5345_v23 = vunpack.c.h.bf16 %v14654_v53 }
 0x616   :  { %v5538_v46 = vadd.f32 %v5537_v28, %v5341_v6  ;;  %v5116_v58 = vmul.bf16 1069105081, %v4769_v41  ;;  %7601 = vpow.bf16 %v5104_v5  ;;  %v5339_v2 = vunpack.c.h.bf16 %v14665_v39  ;;  %v14696_v55 = vpop.eup %7589  ;;  %v17782_v6 = vld [vmem:[#allocation288_spill] sm:$0xff] }
 0x617   :  { %v4771_v21 = vpack.c.bf16 %v17775_v48, %v17773_v38  ;;  %v4773_v52 = vpack.c.bf16 %v4633_v30, %v17777_v47  ;;  %v5674_v35 = vadd.f32 %v5673_v12, %v5335_v1  ;;  %v5110_v42 = vmul.bf16 1069105081, %v4767_v29  ;;  %17778 = vst [vmem:[#allocation184_spill] sm:$0xff] %v14696_v55  ;;  %v17779_v38 = vld [vmem:[#allocation302_spill] sm:$0xff]  ;;  %v17780_v30 = vld [vmem:[#allocation308_spill] sm:$0xff]  ;;  %v14703_v5 = vpop.eup %7591 }
 0x618   :  { %7603 = vpow.bf16 %v5098_v20  ;;  %v5349_v50 = vunpack.c.l.bf16 %v14675_v51  ;;  %v5539_v60 = vadd.f32 %v5538_v46, %v5345_v23  ;;  %v4645_v48 = vsub.f32 %v17779_v38, %v17696_v37  ;;  %17781 = vst [vmem:[#allocation92_spill] sm:$0xff] %v14703_v5 }
 0x619   :  { %v4649_v47 = vsub.f32 %v17780_v30, %v17696_v37  ;;  %v5343_v28 = vunpack.c.l.bf16 %v14682_v63  ;;  %v5675_v41 = vadd.f32 %v5674_v35, %v5339_v2  ;;  %v17783_v29 = vsub.f32 %v17782_v6, %v17708_v11  ;;  %v17786_v6 = vld [vmem:[#allocation304_spill] sm:$0xff] }
 0x61a   :  { %v17784_v20 = vsub.f32 %v17735_v32, %v17708_v11  ;;  %v4777_v1 = vpack.c.bf16 %v4641_v62, %v4637_v40  ;;  %v5353_v12 = vunpack.c.h.bf16 %v14675_v51  ;;  %v5540_v8 = vadd.f32 %v5539_v60, %v5349_v50  ;;  %v14714_v53 = vpop.eup %7593  ;;  %v17787_v62 = vld [vmem:[#allocation310_spill] sm:$0xff] }
 0x61b   :  { %v5128_v23 = vmul.bf16 1069105081, %v4773_v52  ;;  %7605 = vpow.bf16 %v5116_v58  ;;  %v5347_v46 = vunpack.c.h.bf16 %v14682_v63  ;;  %v5676_v38 = vadd.f32 %v5675_v41, %v5343_v28  ;;  %17785 = vst [vmem:[#allocation185_spill] sm:$0xff] %v14714_v53 }
 0x61c   :  { %v4775_v57 = vpack.c.bf16 %v17784_v20, %v17783_v29  ;;  %v5122_v30 = vmul.bf16 1069105081, %v4771_v21  ;;  %7607 = vpow.bf16 %v5110_v42  ;;  %v5357_v2 = vunpack.c.l.bf16 %v14696_v55  ;;  %v14721_v58 = vpop.eup %7595 }
 0x61d   :  { %v5541_v35 = vadd.f32 %v5540_v8, %v5353_v12  ;;  %v4647_v32 = vsub.f32 %v17786_v6, %v17708_v11  ;;  %v4651_v40 = vsub.f32 %v17787_v62, %v17708_v11  ;;  %v5351_v60 = vunpack.c.l.bf16 %v14703_v5  ;;  %17788 = vst [vmem:[#allocation98_spill] sm:$0xff] %v14721_v58 }
 0x61e   :  { %v5677_v52 = vadd.f32 %v5676_v38, %v5347_v46  ;;  %v17789_v21 = vsub.f32 %v17747_v0, %v17708_v11  ;;  %v4781_v50 = vpack.c.bf16 %v4649_v47, %v4645_v48  ;;  %v5361_v28 = vunpack.c.h.bf16 %v14696_v55 }
 0x61f   :  { %v5542_v41 = vadd.f32 %v5541_v35, %v5357_v2  ;;  %v5140_v29 = vmul.bf16 1069105081, %v4777_v1  ;;  %7609 = vpow.bf16 %v5128_v23  ;;  %v5355_v20 = vunpack.c.h.bf16 %v14703_v5 }
 0x620   :  { %v4779_v42 = vpack.c.bf16 %v4643_v31, %v17789_v21  ;;  %v5678_v12 = vadd.f32 %v5677_v52, %v5351_v60  ;;  %v5134_v8 = vmul.bf16 1069105081, %v4775_v57  ;;  %7611 = vpow.bf16 %v5122_v30  ;;  %v14729_v38 = vpop.eup %7597 }
 0x621   :  { %v5365_v6 = vunpack.c.l.bf16 %v14714_v53  ;;  %v5543_v46 = vadd.f32 %v5542_v41, %v5361_v28  ;;  %17790 = vst [vmem:[#allocation186_spill] sm:$0xff] %v14729_v38  ;;  %v5359_v62 = vunpack.c.l.bf16 %v14721_v58  ;;  %v14732_v31 = vpop.eup %7599  ;;  %v4783_v48 = vpack.c.bf16 %v4651_v40, %v4647_v32 }
 0x622   :  { %v5679_v0 = vadd.f32 %v5678_v12, %v5355_v20  ;;  %17791 = vst [vmem:[#allocation74_spill] sm:$0xff] %v14732_v31  ;;  %v5369_v47 = vunpack.c.h.bf16 %v14714_v53  ;;  %v5152_v23 = vmul.bf16 1069105081, %v4781_v50  ;;  %7613 = vpow.bf16 %v5140_v29  ;;  %v17794_v50 = vld [vmem:[#allocation315_spill] sm:$0xff] }
 0x623   :  { %v5544_v1 = vadd.f32 %v5543_v46, %v5365_v6  ;;  %v5363_v2 = vunpack.c.h.bf16 %v14721_v58  ;;  %v5146_v30 = vmul.bf16 1069105081, %v4779_v42  ;;  %7615 = vpow.bf16 %v5134_v8 }
 0x624   :  { %v5680_v57 = vadd.f32 %v5679_v0, %v5359_v62  ;;  %v5373_v35 = vunpack.c.l.bf16 %v14729_v38  ;;  %v14737_v52 = vpop.eup %7601  ;;  %v5367_v21 = vunpack.c.l.bf16 %v14732_v31  ;;  %v5377_v32 = vunpack.c.h.bf16 %v14729_v38 }
 0x625   :  { %v5545_v60 = vadd.f32 %v5544_v1, %v5369_v47  ;;  %17792 = vst [vmem:[#allocation191_spill] sm:$0xff] %v14737_v52  ;;  %v5164_v29 = vmul.bf16 1069105081, %v17794_v50  ;;  %7617 = vpow.bf16 %v5152_v23  ;;  %v5371_v20 = vunpack.c.h.bf16 %v14732_v31 }
 0x626   :  { %v5681_v28 = vadd.f32 %v5680_v57, %v5363_v2  ;;  %v14740_v41 = vpop.eup %7603  ;;  %v5158_v12 = vmul.bf16 1069105081, %v4783_v48  ;;  %7619 = vpow.bf16 %v5146_v30  ;;  %v5381_v8 = vunpack.c.l.bf16 %v14737_v52 }
 0x627   :  { %17793 = vst [vmem:[#allocation82_spill] sm:$0xff] %v14740_v41  ;;  %v5546_v40 = vadd.f32 %v5545_v60, %v5373_v35  ;;  %v5375_v62 = vunpack.c.l.bf16 %v14740_v41  ;;  %v5385_v1 = vunpack.c.h.bf16 %v14737_v52  ;;  %7621 = vpow.bf16 %v5164_v29  ;;  %v17797_v35 = vld [vmem:[#allocation316_spill] sm:$0xff] }
 0x628   :  { %v5682_v42 = vadd.f32 %v5681_v28, %v5367_v21  ;;  %v5379_v23 = vunpack.c.h.bf16 %v14740_v41  ;;  %v5170_v48 = vmul.bf16 1069105081, %v17797_v35  ;;  %7623 = vpow.bf16 %v5158_v12 }
 0x629   :  { %v5547_v6 = vadd.f32 %v5546_v40, %v5377_v32  ;;  %v14746_v46 = vpop.eup %7605  ;;  %vm5705_vm11 = vcmp.gt.f32.partialorder %v17696_v37, -1e+29  ;;  %vm5707_vm12 = vcmp.gt.f32.partialorder %v17708_v11, -1e+29 }
 0x62a   :  { %17795 = vst [vmem:[#allocation192_spill] sm:$0xff] %v14746_v46  ;;  %v5683_v0 = vadd.f32 %v5682_v42, %v5371_v20  ;;  %v14749_v47 = vpop.eup %7607  ;;  %v5389_v30 = vunpack.c.l.bf16 %v14746_v46  ;;  %v5393_v50 = vunpack.c.h.bf16 %v14746_v46  ;;  %7625 = vpow.bf16 %v5170_v48 }
 0x62b   :  { %17796 = vst [vmem:[#allocation226_spill] sm:$0xff] %v14749_v47  ;;  %v5548_v2 = vadd.f32 %v5547_v6, %v5381_v8  ;;  %v5383_v28 = vunpack.c.l.bf16 %v14749_v47  ;;  %v5387_v29 = vunpack.c.h.bf16 %v14749_v47 }
 0x62c   :  { %v5684_v57 = vadd.f32 %v5683_v0, %v5375_v62 }
 0x62d   :  { %v5549_v60 = vadd.f32 %v5548_v2, %v5385_v1  ;;  %v14755_v21 = vpop.eup %7609 }
 0x62e   :  { %17798 = vst [vmem:[#allocation193_spill] sm:$0xff] %v14755_v21  ;;  %v5685_v32 = vadd.f32 %v5684_v57, %v5379_v23  ;;  %v14758_v40 = vpop.eup %7611  ;;  %v5397_v8 = vunpack.c.l.bf16 %v14755_v21  ;;  %v5401_v2 = vunpack.c.h.bf16 %v14755_v21 }
 0x62f   :  { %17799 = vst [vmem:[#allocation227_spill] sm:$0xff] %v14758_v40  ;;  %v5550_v20 = vadd.f32 %v5549_v60, %v5389_v30  ;;  %v5391_v62 = vunpack.c.l.bf16 %v14758_v40  ;;  %v5395_v57 = vunpack.c.h.bf16 %v14758_v40 }
 0x630   :  { %v5686_v42 = vadd.f32 %v5685_v32, %v5383_v28  ;;  %v14763_v6 = vpop.eup %7613 }
 0x631   :  { %v5551_v12 = vadd.f32 %v5550_v20, %v5393_v50  ;;  %17800 = vst [vmem:[#allocation194_spill] sm:$0xff] %v14763_v6  ;;  %v14766_v1 = vpop.eup %7615  ;;  %v5405_v30 = vunpack.c.l.bf16 %v14763_v6  ;;  %v5409_v20 = vunpack.c.h.bf16 %v14763_v6 }
 0x632   :  { %v5687_v0 = vadd.f32 %v5686_v42, %v5387_v29  ;;  %17801 = vst [vmem:[#allocation228_spill] sm:$0xff] %v14766_v1  ;;  %v5399_v28 = vunpack.c.l.bf16 %v14766_v1  ;;  %v5403_v42 = vunpack.c.h.bf16 %v14766_v1 }
 0x633   :  { %v5552_v23 = vadd.f32 %v5551_v12, %v5397_v8  ;;  %v14771_v48 = vpop.eup %7617 }
 0x634   :  { %v5688_v35 = vadd.f32 %v5687_v0, %v5391_v62  ;;  %17802 = vst [vmem:[#allocation199_spill] sm:$0xff] %v14771_v48  ;;  %v14774_v50 = vpop.eup %7619  ;;  %v5413_v8 = vunpack.c.l.bf16 %v14771_v48 }
 0x635   :  { %v5553_v60 = vadd.f32 %v5552_v23, %v5401_v2  ;;  %17803 = vst [vmem:[#allocation229_spill] sm:$0xff] %v14774_v50  ;;  %v14779_v62 = vpop.eup %7621  ;;  %v5407_v0 = vunpack.c.l.bf16 %v14774_v50  ;;  %v5411_v40 = vunpack.c.h.bf16 %v14774_v50 }
 0x636   :  { %v5689_v32 = vadd.f32 %v5688_v35, %v5395_v57  ;;  %17804 = vst [vmem:[#allocation200_spill] sm:$0xff] %v14779_v62  ;;  %v14782_v23 = vpop.eup %7623  ;;  %v5417_v57 = vunpack.c.h.bf16 %v14771_v48 }
 0x637   :  { %v5554_v29 = vadd.f32 %v5553_v60, %v5405_v30  ;;  %17805 = vst [vmem:[#allocation230_spill] sm:$0xff] %v14782_v23  ;;  %v5421_v30 = vunpack.c.l.bf16 %v14779_v62 }
 0x638   :  { %v5690_v21 = vadd.f32 %v5689_v32, %v5399_v28  ;;  %v5415_v28 = vunpack.c.l.bf16 %v14782_v23 }
 0x639   :  { %v5555_v12 = vadd.f32 %v5554_v29, %v5409_v20  ;;  %v14788_v20 = vpop.eup %7625  ;;  %v5425_v29 = vunpack.c.h.bf16 %v14779_v62 }
 0x63a   :  { %v5691_v2 = vadd.f32 %v5690_v21, %v5403_v42  ;;  %17806 = vst [vmem:[#allocation201_spill] sm:$0xff] %v14788_v20  ;;  %v5419_v21 = vunpack.c.h.bf16 %v14782_v23 }
 0x63b   :  { %v5556_v35 = vadd.f32 %v5555_v12, %v5413_v8  ;;  %v5423_v8 = vunpack.c.l.bf16 %v14788_v20 }
 0x63c   :  { %v5692_v6 = vadd.f32 %v5691_v2, %v5407_v0  ;;  %v5427_v0 = vunpack.c.h.bf16 %v14788_v20 }
 0x63d   :  { %v5557_v60 = vadd.f32 %v5556_v35, %v5417_v57 }
 0x63e   :  { %v5693_v32 = vadd.f32 %v5692_v6, %v5411_v40 }
 0x63f   :  { %v5558_v1 = vadd.f32 %v5557_v60, %v5421_v30 }
 0x640   :  { %v5694_v42 = vadd.f32 %v5693_v32, %v5415_v28 }
 0x641   :  { %v5559_v46 = vadd.f32 %v5558_v1, %v5425_v29 }
 0x642   :  { %v5695_v12 = vadd.f32 %v5694_v42, %v5419_v21 }
 0x643   :  { %v5560_v48 = vrot.slane %v5559_v46, 4 }
 0x644   :  { %v5696_v2 = vadd.f32 %v5695_v12, %v5423_v8 }
 0x645   :  { %v5561_v57 = vadd.f32 %v5560_v48, %v5559_v46 }
 0x646   :  { %v5697_v35 = vadd.f32 %v5696_v2, %v5427_v0 }
 0x647   :  { %v5562_v50 = vrot.slane %v5561_v57, 2 }
 0x648   :  { %v5698_v40 = vrot.slane %v5697_v35, 4 }
 0x649   :  { %v5563_v6 = vadd.f32 %v5562_v50, %v5561_v57 }
 0x64a   :  { %v5699_v47 = vadd.f32 %v5698_v40, %v5697_v35 }
 0x64b   :  { %v5564_v52 = vrot.slane %v5563_v6, 1 }
 0x64c   :  { %v5700_v62 = vrot.slane %v5699_v47, 2 }
 0x64d   :  { %v5565_v30 = vadd.f32 %v5564_v52, %v5563_v6 }
 0x64e   :  { %v5701_v60 = vadd.f32 %v5700_v62, %v5699_v47 }
 0x64f   :  { %7627 = vrcp.f32 %v5565_v30 }
 0x650   :  { %v5702_v28 = vrot.slane %v5701_v60, 1 }
 0x652   :  { %v5703_v1 = vadd.f32 %v5702_v28, %v5701_v60 }
 0x654   :  { %7629 = vrcp.f32 %v5703_v1 }
 0x65c   :  { %v7628_v32 = vpop.eup %7627 }
 0x65d   :  { %v5713_v29 = vsel %vm5705_vm11, %v7628_v32, 0.0 }
 0x65e   :  { %5748 = vxpose.xlu0.b32.start.end [1/1] (short) %v5713_v29, 128 }
 0x661   :  { %v7630_v21 = vpop.eup %7629 }
 0x662   :  { %v5715_v46 = vsel %vm5707_vm12, %v7630_v21, 0.0 }
 0x663   :  { %5812 = vxpose.xlu1.b32.start.end [1/1] (short) %v5715_v46, 128 }
 0x681   :  { %v14796_v48 = vpop.trf.xlu0 }
 0x685   :  { %v14798_v50 = vpop.trf.xlu0 }
 0x689   :  { %v14800_v52 = vpop.trf.xlu0 }
 0x68d   :  { %v14802_v47 = vpop.trf.xlu0 }
 0x691   :  { %v14804_v62 = vpop.trf.xlu1  ;;  %v14806_v42 = vpop.trf.xlu0 }
 0x695   :  { %v14808_v37 = vpop.trf.xlu1  ;;  %v5801_v8 = vpop.trf.xlu0 }
 0x699   :  { %v14810_v12 = vpop.trf.xlu1  ;;  %v5802_v11 = vpop.trf.xlu0 }
 0x69d   :  { %v5735_v0 = vpop.trf.xlu1  ;;  %v5803_v2 = vpop.trf.xlu0 }
 0x6a1   :  { %v5736_v57 = vpop.trf.xlu1  ;;  %v5804_v35 = vpop.trf.xlu0 }
 0x6a5   :  { %v5737_v40 = vpop.trf.xlu1  ;;  %v5805_v6 = vpop.trf.xlu0 }
 0x6a9   :  { %v5738_v30 = vpop.trf.xlu1  ;;  %v5806_v28 = vpop.trf.xlu0 }
 0x6ad   :  { %v5739_v60 = vpop.trf.xlu1  ;;  %v5807_v32 = vpop.trf.xlu0 }
 0x6b1   :  { %v5740_v1 = vpop.trf.xlu1  ;;  %v5808_v46 = vpop.trf.xlu0 }
 0x6b5   :  { %v5741_v29 = vpop.trf.xlu1  ;;  %v5809_v23 = vpop.trf.xlu0 }
 0x6b9   :  { %v5742_v21 = vpop.trf.xlu1  ;;  %v5810_v31 = vpop.trf.xlu0 }
 0x6bd   :  { %v5743_v20 = vpop.trf.xlu1  ;;  %v5811_v58 = vpop.trf.xlu0 }
 0x6c1   :  { %v5744_v41 = vpop.trf.xlu1 }
 0x6c5   :  { %v5745_v38 = vpop.trf.xlu1 }
 0x6c9   :  { %v5746_v53 = vpop.trf.xlu1 }
 0x6ca   :  { %5916 = vperm.xlu0 %7366, %v5746_v53  }
 0x6cd   :  { %v5747_v55 = vpop.trf.xlu1 }
 0x6ce   :  { %6081 = vperm.xlu0 %7366, %v5811_v58   ;;  %5921 = vperm.xlu1 %7365, %v5747_v55  }
 0x6d2   :  { %5911 = vperm.xlu0 %7366, %v5745_v38   ;;  %6076 = vperm.xlu1 %7365, %v5810_v31  }
 0x6d6   :  { %6071 = vperm.xlu0 %7366, %v5809_v23   ;;  %5906 = vperm.xlu1 %7365, %v5744_v41  }
 0x6da   :  { %v14812_v5 = vpop.trf.xlu0  ;;  %5901 = vperm.xlu0 %7366, %v5743_v20   ;;  %6066 = vperm.xlu1 %7365, %v5808_v46  }
 0x6de   :  { %v14814_v51 = vpop.trf.xlu0  ;;  %6061 = vperm.xlu0 %7366, %v5807_v32   ;;  %5896 = vperm.xlu1 %7365, %v5742_v21  }
 0x6df   :  { %v14816_v63 = vpop.trf.xlu1 }
 0x6e2   :  { %v14818_v39 = vpop.trf.xlu0  ;;  %5891 = vperm.xlu0 %7366, %v5741_v29   ;;  %6056 = vperm.xlu1 %7365, %v5806_v28  }
 0x6e3   :  { %v14820_v53 = vpop.trf.xlu1 }
 0x6e6   :  { %v14822_v55 = vpop.trf.xlu0  ;;  %6051 = vperm.xlu0 %7366, %v5805_v6   ;;  %5886 = vperm.xlu1 %7365, %v5740_v1  }
 0x6e7   :  { %v14824_v58 = vpop.trf.xlu1 }
 0x6ea   :  { %v5768_v38 = vpop.trf.xlu0  ;;  %5881 = vperm.xlu0 %7366, %v5739_v60   ;;  %6046 = vperm.xlu1 %7365, %v5804_v35  }
 0x6eb   :  { %v14826_v31 = vpop.trf.xlu1 }
 0x6ee   :  { %v5769_v41 = vpop.trf.xlu0  ;;  %6041 = vperm.xlu0 %7366, %v5803_v2   ;;  %5876 = vperm.xlu1 %7365, %v5738_v30  }
 0x6ef   :  { %v5832_v23 = vpop.trf.xlu1 }
 0x6f2   :  { %v5770_v20 = vpop.trf.xlu0  ;;  %5871 = vperm.xlu0 %7366, %v5737_v40   ;;  %6036 = vperm.xlu1 %7365, %v5802_v11  }
 0x6f3   :  { %v5833_v32 = vpop.trf.xlu1 }
 0x6f6   :  { %v5771_v28 = vpop.trf.xlu0  ;;  %6031 = vperm.xlu0 %7366, %v5801_v8   ;;  %5866 = vperm.xlu1 %7365, %v5736_v57  }
 0x6f7   :  { %v5834_v29 = vpop.trf.xlu1 }
 0x6fa   :  { %v5772_v21 = vpop.trf.xlu0  ;;  %5861 = vperm.xlu0 %7366, %v5735_v0   ;;  %6026 = vperm.xlu1 %7365, %v14806_v42  }
 0x6fb   :  { %v5835_v6 = vpop.trf.xlu1 }
 0x6fe   :  { %v5773_v1 = vpop.trf.xlu0  ;;  %6021 = vperm.xlu0 %7366, %v14802_v47   ;;  %5856 = vperm.xlu1 %7365, %v14810_v12  }
 0x6ff   :  { %v5836_v60 = vpop.trf.xlu1 }
 0x702   :  { %v5774_v2 = vpop.trf.xlu0  ;;  %5851 = vperm.xlu0 %7366, %v14808_v37   ;;  %6016 = vperm.xlu1 %7365, %v14800_v52   ;;  %v17807_v37 = vld [vmem:[#allocation37_spill] sm:$0xff] }
 0x703   :  { %v5837_v35 = vpop.trf.xlu1 }
 0x706   :  { %v5775_v11 = vpop.trf.xlu0  ;;  %6011 = vperm.xlu0 %7366, %v14798_v50   ;;  %5846 = vperm.xlu1 %7365, %v14804_v62  }
 0x707   :  { %v5838_v8 = vpop.trf.xlu1 }
 0x70a   :  { %v5776_v0 = vpop.trf.xlu0  ;;  %6006 = vperm.xlu1 %7365, %v14796_v48  }
 0x70b   :  { %v5839_v42 = vpop.trf.xlu1 }
 0x70e   :  { %v5777_v57 = vpop.trf.xlu0 }
 0x70f   :  { %v5840_v47 = vpop.trf.xlu1 }
 0x712   :  { %v5778_v40 = vpop.trf.xlu0 }
 0x713   :  { %v5841_v12 = vpop.trf.xlu1  ;;  %5996 = vperm.xlu1 %7365, %v5778_v40  }
 0x716   :  { %v5779_v30 = vpop.trf.xlu0 }
 0x717   :  { %v5842_v46 = vpop.trf.xlu1  ;;  %6001 = vperm.xlu0 %7366, %v5779_v30  }
 0x718   :  { %6156 = vperm.xlu1 %7365, %v5842_v46   ;;  %v17817_v46 = vld [vmem:[#allocation29_spill] sm:$0xff] }
 0x71b   :  { %v5843_v52 = vpop.trf.xlu1 }
 0x71c   :  { %6161 = vperm.xlu0 %7366, %v5843_v52   ;;  %5986 = vperm.xlu1 %7365, %v5776_v0  }
 0x720   :  { %5991 = vperm.xlu0 %7366, %v5777_v57   ;;  %6146 = vperm.xlu1 %7365, %v5840_v47  }
 0x724   :  { %6151 = vperm.xlu0 %7366, %v5841_v12   ;;  %5976 = vperm.xlu1 %7365, %v5774_v2   ;;  %v17813_v2 = vld [vmem:[#allocation33_spill] sm:$0xff]  ;;  %v17816_v12 = vld [vmem:[#allocation27_spill] sm:$0xff] }
 0x728   :  { %5981 = vperm.xlu0 %7366, %v5775_v11   ;;  %6136 = vperm.xlu1 %7365, %v5838_v8   ;;  %v17814_v8 = vld [vmem:[#allocation32_spill] sm:$0xff] }
 0x72c   :  { %6141 = vperm.xlu0 %7366, %v5839_v42   ;;  %5966 = vperm.xlu1 %7365, %v5772_v21   ;;  %v17815_v42 = vld [vmem:[#allocation35_spill] sm:$0xff] }
 0x730   :  { %5971 = vperm.xlu0 %7366, %v5773_v1   ;;  %6126 = vperm.xlu1 %7365, %v5836_v60  }
 0x734   :  { %6131 = vperm.xlu0 %7366, %v5837_v35   ;;  %5956 = vperm.xlu1 %7365, %v5770_v20  }
 0x738   :  { %5961 = vperm.xlu0 %7366, %v5771_v28   ;;  %6116 = vperm.xlu1 %7365, %v5834_v29   ;;  %v17808_v28 = vld [vmem:[#allocation34_spill] sm:$0xff] }
 0x73c   :  { %6121 = vperm.xlu0 %7366, %v5835_v6   ;;  %5946 = vperm.xlu1 %7365, %v5768_v38  }
 0x740   :  { %5951 = vperm.xlu0 %7366, %v5769_v41   ;;  %6106 = vperm.xlu1 %7365, %v5832_v23  }
 0x744   :  { %6111 = vperm.xlu0 %7366, %v5833_v32   ;;  %5936 = vperm.xlu1 %7365, %v14818_v39   ;;  %v17809_v39 = vld [vmem:[#allocation36_spill] sm:$0xff] }
 0x745   :  { %v5917_v48 = vpop.permute.xlu0 %5916 }
 0x746   :  { %v6178_v20 = vmul.f32 %v5917_v48, %v17807_v37  ;;  %v17818_v37 = vld [vmem:[#allocation28_spill] sm:$0xff] }
 0x748   :  { %5941 = vperm.xlu0 %7366, %v14822_v55   ;;  %6096 = vperm.xlu1 %7365, %v14824_v58   ;;  %v17810_v55 = vld [vmem:[#allocation39_spill] sm:$0xff] }
 0x749   :  { %v6082_v50 = vpop.permute.xlu0 %6081  ;;  %v5922_v62 = vpop.permute.xlu1 %5921 }
 0x74a   :  { %v6179_v38 = vmul.f32 %v5922_v62, %v17808_v28  ;;  %v6211_v29 = vmul.f32 %v6082_v50, %v17809_v39  ;;  %v17819_v28 = vld [vmem:[#allocation30_spill] sm:$0xff]  ;;  %v17820_v39 = vld [vmem:[#allocation23_spill] sm:$0xff] }
 0x74c   :  { %6101 = vperm.xlu0 %7366, %v14826_v31   ;;  %5926 = vperm.xlu1 %7365, %v14812_v5   ;;  %v6235_v41 = vpack.c.bf16 %v6179_v38, %v6178_v20  ;;  %v17811_v31 = vmov 0   ;;  %v17812_v5 = vld [vmem:[#allocation31_spill] sm:$0xff] }
 0x74d   :  { %v5912_v23 = vpop.permute.xlu0 %5911  ;;  %v6077_v32 = vpop.permute.xlu1 %6076 }
 0x74e   :  { %v6210_v58 = vmul.f32 %v6077_v32, %v17810_v55  ;;  %6261 = vmatpush1.bf16.msra.mxu1 %v6235_v41  ;;  %v6177_v60 = vmul.f32 %v5912_v23, %v17812_v5  ;;  %v17821_v55 = vld [vmem:[#allocation25_spill] sm:$0xff]  ;;  %v17822_v5 = vld [vmem:[#allocation24_spill] sm:$0xff] }
 0x74f   :  { %6262 = vmatprep.subr.bf16.mxu1 %v17811_v31 }
 0x750   :  { %5931 = vperm.xlu0 %7366, %v14814_v51   ;;  %6086 = vperm.xlu1 %7365, %v14816_v63   ;;  %v6251_v21 = vpack.c.bf16 %v6211_v29, %v6210_v58 }
 0x751   :  { %v6072_v6 = vpop.permute.xlu0 %6071  ;;  %v5907_v1 = vpop.permute.xlu1 %5906 }
 0x752   :  { %v6176_v35 = vmul.f32 %v5907_v1, %v17813_v2  ;;  %6550 = vmatpush1.bf16.msra.mxu0 %v6251_v21  ;;  %v6209_v0 = vmul.f32 %v6072_v6, %v17814_v8  ;;  %v17823_v2 = vld [vmem:[#allocation26_spill] sm:$0xff]  ;;  %v17824_v8 = vld [vmem:[#allocation19_spill] sm:$0xff] }
 0x753   :  { %6551 = vmatprep.subr.bf16.mxu0 %v17811_v31 }
 0x754   :  { %6091 = vperm.xlu0 %7366, %v14820_v53   ;;  %v6234_v51 = vpack.c.bf16 %v6177_v60, %v6176_v35 }
 0x755   :  { %v5902_v11 = vpop.permute.xlu0 %5901  ;;  %v6067_v63 = vpop.permute.xlu1 %6066 }
 0x756   :  { %v6208_v57 = vmul.f32 %v6067_v63, %v17815_v42  ;;  %6263 = vmatpush1.bf16.msra.mxu1 %v6234_v51  ;;  %v6175_v30 = vmul.f32 %v5902_v11, %v17816_v12  ;;  %v17825_v42 = vld [vmem:[#allocation21_spill] sm:$0xff]  ;;  %v17826_v12 = vld [vmem:[#allocation20_spill] sm:$0xff] }
 0x757   :  { %6264 = vmatprep.subr.bf16.mxu1 %v17811_v31 }
 0x758   :  { %v6250_v47 = vpack.c.bf16 %v6209_v0, %v6208_v57 }
 0x759   :  { %v6062_v40 = vpop.permute.xlu0 %6061  ;;  %v5897_v53 = vpop.permute.xlu1 %5896 }
 0x75a   :  { %v6174_v52 = vmul.f32 %v5897_v53, %v17817_v46  ;;  %6552 = vmatpush1.bf16.msra.mxu0 %v6250_v47  ;;  %v6207_v20 = vmul.f32 %v6062_v40, %v17818_v37  ;;  %v17827_v46 = vld [vmem:[#allocation22_spill] sm:$0xff]  ;;  %v17828_v37 = vld [vmem:[#allocation15_spill] sm:$0xff] }
 0x75b   :  { %6553 = vmatprep.subr.bf16.mxu0 %v17811_v31 }
 0x75c   :  { %v6233_v48 = vpack.c.bf16 %v6175_v30, %v6174_v52 }
 0x75d   :  { %v5892_v50 = vpop.permute.xlu0 %5891  ;;  %v6057_v62 = vpop.permute.xlu1 %6056 }
 0x75e   :  { %v6206_v38 = vmul.f32 %v6057_v62, %v17819_v28  ;;  %6265 = vmatpush1.bf16.msra.mxu1 %v6233_v48  ;;  %v6173_v29 = vmul.f32 %v5892_v50, %v17820_v39  ;;  %v17829_v28 = vld [vmem:[#allocation17_spill] sm:$0xff]  ;;  %v17830_v39 = vld [vmem:[#allocation16_spill] sm:$0xff] }
 0x75f   :  { %6266 = vmatprep.subr.bf16.mxu1 %v17811_v31 }
 0x760   :  { %v6249_v41 = vpack.c.bf16 %v6207_v20, %v6206_v38 }
 0x761   :  { %v6052_v23 = vpop.permute.xlu0 %6051  ;;  %v5887_v32 = vpop.permute.xlu1 %5886 }
 0x762   :  { %v6172_v58 = vmul.f32 %v5887_v32, %v17821_v55  ;;  %6554 = vmatpush1.bf16.msra.mxu0 %v6249_v41  ;;  %v6205_v60 = vmul.f32 %v6052_v23, %v17822_v5  ;;  %v17831_v55 = vld [vmem:[#allocation18_spill] sm:$0xff] }
 0x763   :  { %6555 = vmatprep.subr.bf16.mxu0 %v17811_v31  ;;  %v17832_v5 = vld [vmem:[#allocation10_spill] sm:$0xff] }
 0x764   :  { %v6232_v21 = vpack.c.bf16 %v6173_v29, %v6172_v58 }
 0x765   :  { %v5882_v6 = vpop.permute.xlu0 %5881  ;;  %v6047_v1 = vpop.permute.xlu1 %6046 }
 0x766   :  { %v6204_v35 = vmul.f32 %v6047_v1, %v17823_v2  ;;  %6267 = vmatpush1.bf16.msra.mxu1 %v6232_v21  ;;  %v6171_v0 = vmul.f32 %v5882_v6, %v17824_v8  ;;  %v17833_v2 = vld [vmem:[#allocation13_spill] sm:$0xff]  ;;  %v17834_v8 = vld [vmem:[#allocation12_spill] sm:$0xff] }
 0x767   :  { %6268 = vmatprep.subr.bf16.mxu1 %v17811_v31 }
 0x768   :  { %v6248_v51 = vpack.c.bf16 %v6205_v60, %v6204_v35 }
 0x769   :  { %v6042_v11 = vpop.permute.xlu0 %6041  ;;  %v5877_v63 = vpop.permute.xlu1 %5876 }
 0x76a   :  { %v6170_v57 = vmul.f32 %v5877_v63, %v17825_v42  ;;  %6556 = vmatpush1.bf16.msra.mxu0 %v6248_v51  ;;  %v6203_v30 = vmul.f32 %v6042_v11, %v17826_v12  ;;  %v17835_v42 = vld [vmem:[#allocation14_spill] sm:$0xff] }
 0x76b   :  { %6557 = vmatprep.subr.bf16.mxu0 %v17811_v31 }
 0x76c   :  { %v6231_v47 = vpack.c.bf16 %v6171_v0, %v6170_v57 }
 0x76d   :  { %v5872_v40 = vpop.permute.xlu0 %5871  ;;  %v6037_v53 = vpop.permute.xlu1 %6036 }
 0x76e   :  { %v6202_v52 = vmul.f32 %v6037_v53, %v17827_v46  ;;  %6269 = vmatpush1.bf16.msra.mxu1 %v6231_v47  ;;  %v6169_v20 = vmul.f32 %v5872_v40, %v17828_v37  ;;  %v17836_v53 = vld [vmem:[#allocation7_spill] sm:$0xff] }
 0x76f   :  { %6270 = vmatprep.subr.bf16.mxu1 %v17811_v31 }
 0x770   :  { %v6247_v48 = vpack.c.bf16 %v6203_v30, %v6202_v52  ;;  %v17837_v30 = vld [vmem:[#allocation9_spill] sm:$0xff] }
 0x771   :  { %v6032_v50 = vpop.permute.xlu0 %6031  ;;  %v5867_v62 = vpop.permute.xlu1 %5866 }
 0x772   :  { %v6168_v38 = vmul.f32 %v5867_v62, %v17829_v28  ;;  %6558 = vmatpush1.bf16.msra.mxu0 %v6247_v48  ;;  %v6201_v29 = vmul.f32 %v6032_v50, %v17830_v39  ;;  %v17838_v62 = vld [vmem:[#allocation8_spill] sm:$0xff] }
 0x773   :  { %6559 = vmatprep.subr.bf16.mxu0 %v17811_v31 }
 0x774   :  { %v6230_v41 = vpack.c.bf16 %v6169_v20, %v6168_v38  ;;  %v17839_v20 = vld [vmem:[#allocation11_spill] sm:$0xff] }
 0x775   :  { %v5862_v23 = vpop.permute.xlu0 %5861  ;;  %v6027_v32 = vpop.permute.xlu1 %6026 }
 0x776   :  { %v6200_v58 = vmul.f32 %v6027_v32, %v17831_v55  ;;  %6271 = vmatpush1.bf16.msra.mxu1 %v6230_v41  ;;  %v6167_v60 = vmul.f32 %v5862_v23, %v17832_v5  ;;  %v17840_v23 = vld [vmem:[#allocation69_spill] sm:$0xff] }
 0x777   :  { %6272 = vmatprep.subr.bf16.mxu1 %v17811_v31 }
 0x778   :  { %v6246_v21 = vpack.c.bf16 %v6201_v29, %v6200_v58  ;;  %v17841_v29 = vld [vmem:[#allocation66_spill] sm:$0xff] }
 0x779   :  { %v6022_v6 = vpop.permute.xlu0 %6021  ;;  %v5857_v1 = vpop.permute.xlu1 %5856 }
 0x77a   :  { %v6166_v35 = vmul.f32 %v5857_v1, %v17833_v2  ;;  %6560 = vmatpush1.bf16.msra.mxu0 %v6246_v21  ;;  %v6199_v0 = vmul.f32 %v6022_v6, %v17834_v8  ;;  %v17842_v6 = vld [vmem:[#allocation70_spill] sm:$0xff]  ;;  %v17843_v2 = vld [vmem:[#allocation68_spill] sm:$0xff] }
 0x77b   :  { %6561 = vmatprep.subr.bf16.mxu0 %v17811_v31 }
 0x77c   :  { %v6229_v51 = vpack.c.bf16 %v6167_v60, %v6166_v35 }
 0x77d   :  { %v5852_v11 = vpop.permute.xlu0 %5851  ;;  %v6017_v63 = vpop.permute.xlu1 %6016 }
 0x77e   :  { %v6198_v57 = vmul.f32 %v6017_v63, %v17835_v42  ;;  %6273 = vmatpush1.bf16.msra.mxu1 %v6229_v51  ;;  %v6165_v12 = vmul.f32 %v5852_v11, %v17836_v53  ;;  %v17844_v11 = vld [vmem:[#allocation65_spill] sm:$0xff]  ;;  %v17845_v42 = vld [vmem:[#allocation62_spill] sm:$0xff] }
 0x77f   :  { %6274 = vmatprep.subr.bf16.mxu1 %v17811_v31 }
 0x780   :  { %v6245_v47 = vpack.c.bf16 %v6199_v0, %v6198_v57 }
 0x781   :  { %v5847_v40 = vpop.permute.xlu1 %5846  ;;  %v6012_v52 = vpop.permute.xlu0 %6011 }
 0x782   :  { %v6164_v46 = vmul.f32 %v5847_v40, %v17837_v30  ;;  %6562 = vmatpush1.bf16.msra.mxu0 %v6245_v47  ;;  %v6197_v37 = vmul.f32 %v6012_v52, %v17838_v62  ;;  %v17846_v40 = vld [vmem:[#allocation67_spill] sm:$0xff] }
 0x783   :  { %6563 = vmatprep.subr.bf16.mxu0 %v17811_v31 }
 0x784   :  { %v6228_v48 = vpack.c.bf16 %v6165_v12, %v6164_v46  ;;  %v17847_v46 = vld [vmem:[#allocation64_spill] sm:$0xff] }
 0x785   :  { %v6007_v50 = vpop.permute.xlu1 %6006 }
 0x786   :  { %v6196_v28 = vmul.f32 %v6007_v50, %v17839_v20  ;;  %6275 = vmatpush1.bf16.msra.mxu1 %v6228_v48  ;;  %v17848_v50 = vld [vmem:[#allocation61_spill] sm:$0xff] }
 0x787   :  { %6276 = vmatprep.subr.bf16.mxu1 %v17811_v31 }
 0x788   :  { %v6244_v38 = vpack.c.bf16 %v6197_v37, %v6196_v28  ;;  %v17849_v28 = vld [vmem:[#allocation58_spill] sm:$0xff] }
 0x78a   :  { %6564 = vmatpush1.bf16.msra.mxu0 %v6244_v38 }
 0x78b   :  { %6565 = vmatprep.subr.bf16.mxu0 %v17811_v31 }
 0x78e   :  { %v5997_v41 = vpop.permute.xlu1 %5996 }
 0x78f   :  { %v6194_v32 = vmul.f32 %v5997_v41, %v17840_v23  ;;  %v17850_v23 = vld [vmem:[#allocation63_spill] sm:$0xff] }
 0x792   :  { %v6002_v39 = vpop.permute.xlu0 %6001 }
 0x793   :  { %v6195_v55 = vmul.f32 %v6002_v39, %v17841_v29  ;;  %v6157_v58 = vpop.permute.xlu1 %6156 }
 0x794   :  { %v6226_v1 = vmul.f32 %v6157_v58, %v17842_v6  ;;  %v17852_v6 = vld [vmem:[#allocation57_spill] sm:$0xff] }
 0x795   :  { %v6243_v21 = vpack.c.bf16 %v6195_v55, %v6194_v32  ;;  %v17851_v55 = vld [vmem:[#allocation60_spill] sm:$0xff] }
 0x797   :  { %v6162_v5 = vpop.permute.xlu0 %6161  ;;  %6277 = vmatpush2.bf16.msra.mxu1 %v6243_v21  ;;  %v5987_v60 = vpop.permute.xlu1 %5986 }
 0x798   :  { %v6227_v35 = vmul.f32 %v6162_v5, %v17843_v2  ;;  %6278 = vmatprep.subr.bf16.mxu1 %v17811_v31  ;;  %v6192_v63 = vmul.f32 %v5987_v60, %v17844_v11  ;;  %v17853_v2 = vld [vmem:[#allocation54_spill] sm:$0xff]  ;;  %v17854_v11 = vld [vmem:[#allocation59_spill] sm:$0xff] }
 0x79a   :  { %v6259_v51 = vpack.c.bf16 %v6227_v35, %v6226_v1 }
 0x79b   :  { %v5992_v8 = vpop.permute.xlu0 %5991  ;;  %v6147_v0 = vpop.permute.xlu1 %6146 }
 0x79c   :  { %v6193_v57 = vmul.f32 %v5992_v8, %v17845_v42  ;;  %6566 = vmatpush2.bf16.msra.mxu0 %v6259_v51  ;;  %v6224_v53 = vmul.f32 %v6147_v0, %v17846_v40  ;;  %v17855_v42 = vld [vmem:[#allocation56_spill] sm:$0xff]  ;;  %v17856_v40 = vld [vmem:[#allocation53_spill] sm:$0xff] }
 0x79d   :  { %6567 = vmatprep.subr.bf16.mxu0 %v17811_v31 }
 0x79e   :  { %v6242_v47 = vpack.c.bf16 %v6193_v57, %v6192_v63 }
 0x79f   :  { %v6152_v12 = vpop.permute.xlu0 %6151  ;;  %v5977_v30 = vpop.permute.xlu1 %5976 }
 0x7a0   :  { %v6225_v52 = vmul.f32 %v6152_v12, %v17847_v46  ;;  %6279 = vmatpush2.bf16.msra.mxu1 %v6242_v47  ;;  %v6190_v62 = vmul.f32 %v5977_v30, %v17848_v50  ;;  %v17857_v46 = vld [vmem:[#allocation50_spill] sm:$0xff]  ;;  %v17858_v50 = vld [vmem:[#allocation55_spill] sm:$0xff] }
 0x7a1   :  { %6280 = vmatprep.subr.bf16.mxu1 %v17811_v31 }
 0x7a2   :  { %v6258_v48 = vpack.c.bf16 %v6225_v52, %v6224_v53 }
 0x7a3   :  { %v5982_v37 = vpop.permute.xlu0 %5981  ;;  %v6137_v20 = vpop.permute.xlu1 %6136 }
 0x7a4   :  { %v6191_v38 = vmul.f32 %v5982_v37, %v17849_v28  ;;  %6568 = vmatpush2.bf16.msra.mxu0 %v6258_v48  ;;  %v6222_v32 = vmul.f32 %v6137_v20, %v17850_v23  ;;  %v17859_v28 = vld [vmem:[#allocation52_spill] sm:$0xff]  ;;  %v17860_v23 = vld [vmem:[#allocation49_spill] sm:$0xff] }
 0x7a5   :  { %6569 = vmatprep.subr.bf16.mxu0 %v17811_v31 }
 0x7a6   :  { %v6241_v41 = vpack.c.bf16 %v6191_v38, %v6190_v62 }
 0x7a7   :  { %v6142_v39 = vpop.permute.xlu0 %6141  ;;  %v5967_v29 = vpop.permute.xlu1 %5966 }
 0x7a8   :  { %v6223_v58 = vmul.f32 %v6142_v39, %v17851_v55  ;;  %6281 = vmatpush2.bf16.msra.mxu1 %v6241_v41  ;;  %v6188_v1 = vmul.f32 %v5967_v29, %v17852_v6  ;;  %v17861_v55 = vld [vmem:[#allocation46_spill] sm:$0xff]  ;;  %v17862_v6 = vld [vmem:[#allocation51_spill] sm:$0xff] }
 0x7a9   :  { %6282 = vmatprep.subr.bf16.mxu1 %v17811_v31 }
 0x7aa   :  { %v6257_v21 = vpack.c.bf16 %v6223_v58, %v6222_v32 }
 0x7ab   :  { %v5972_v5 = vpop.permute.xlu0 %5971  ;;  %v6127_v60 = vpop.permute.xlu1 %6126 }
 0x7ac   :  { %v6189_v35 = vmul.f32 %v5972_v5, %v17853_v2  ;;  %6570 = vmatpush2.bf16.msra.mxu0 %v6257_v21  ;;  %v6220_v63 = vmul.f32 %v6127_v60, %v17854_v11  ;;  %v17863_v2 = vld [vmem:[#allocation48_spill] sm:$0xff]  ;;  %v17864_v11 = vld [vmem:[#allocation45_spill] sm:$0xff] }
 0x7ad   :  { %6571 = vmatprep.subr.bf16.mxu0 %v17811_v31 }
 0x7ae   :  { %v6240_v51 = vpack.c.bf16 %v6189_v35, %v6188_v1 }
 0x7af   :  { %v6132_v8 = vpop.permute.xlu0 %6131  ;;  %v5957_v0 = vpop.permute.xlu1 %5956 }
 0x7b0   :  { %v6221_v57 = vmul.f32 %v6132_v8, %v17855_v42  ;;  %6283 = vmatpush2.bf16.msra.mxu1 %v6240_v51  ;;  %v6186_v53 = vmul.f32 %v5957_v0, %v17856_v40  ;;  %v17865_v42 = vld [vmem:[#allocation42_spill] sm:$0xff]  ;;  %v17866_v40 = vld [vmem:[#allocation47_spill] sm:$0xff] }
 0x7b1   :  { %6284 = vmatprep.subr.bf16.mxu1 %v17811_v31 }
 0x7b2   :  { %v6256_v47 = vpack.c.bf16 %v6221_v57, %v6220_v63 }
 0x7b3   :  { %v5962_v12 = vpop.permute.xlu0 %5961  ;;  %v6117_v30 = vpop.permute.xlu1 %6116 }
 0x7b4   :  { %v6187_v52 = vmul.f32 %v5962_v12, %v17857_v46  ;;  %6572 = vmatpush2.bf16.msra.mxu0 %v6256_v47  ;;  %v6218_v62 = vmul.f32 %v6117_v30, %v17858_v50  ;;  %v17867_v46 = vld [vmem:[#allocation44_spill] sm:$0xff]  ;;  %v17868_v50 = vld [vmem:[#allocation41_spill] sm:$0xff] }
 0x7b5   :  { %6573 = vmatprep.subr.bf16.mxu0 %v17811_v31 }
 0x7b6   :  { %v6239_v48 = vpack.c.bf16 %v6187_v52, %v6186_v53 }
 0x7b7   :  { %v6122_v37 = vpop.permute.xlu0 %6121  ;;  %v5947_v20 = vpop.permute.xlu1 %5946 }
 0x7b8   :  { %v6219_v38 = vmul.f32 %v6122_v37, %v17859_v28  ;;  %6285 = vmatpush2.bf16.msra.mxu1 %v6239_v48  ;;  %v6184_v32 = vmul.f32 %v5947_v20, %v17860_v23  ;;  %v17869_v28 = vld [vmem:[#allocation38_spill] sm:$0xff]  ;;  %v17870_v23 = vld [vmem:[#allocation43_spill] sm:$0xff] }
 0x7b9   :  { %6286 = vmatprep.subr.bf16.mxu1 %v17811_v31 }
 0x7ba   :  { %v6255_v41 = vpack.c.bf16 %v6219_v38, %v6218_v62 }
 0x7bb   :  { %v5952_v39 = vpop.permute.xlu0 %5951  ;;  %v6107_v29 = vpop.permute.xlu1 %6106 }
 0x7bc   :  { %v6185_v58 = vmul.f32 %v5952_v39, %v17861_v55  ;;  %6574 = vmatpush2.bf16.msra.mxu0 %v6255_v41  ;;  %v6216_v1 = vmul.f32 %v6107_v29, %v17862_v6  ;;  %v17871_v29 = vld [vmem:[#allocation40_spill] sm:$0xff]  ;;  %v17873_v6 = vld [vmem:[#allocation301_spill] sm:$0xff] }
 0x7bd   :  { %6575 = vmatprep.subr.bf16.mxu0 %v17811_v31 }
 0x7be   :  { %v6238_v21 = vpack.c.bf16 %v6185_v58, %v6184_v32 }
 0x7bf   :  { %v6112_v5 = vpop.permute.xlu0 %6111  ;;  %v5937_v60 = vpop.permute.xlu1 %5936 }
 0x7c0   :  { %v6217_v35 = vmul.f32 %v6112_v5, %v17863_v2  ;;  %6287 = vmatpush2.bf16.msra.mxu1 %v6238_v21  ;;  %v6182_v63 = vmul.f32 %v5937_v60, %v17864_v11  ;;  %v17872_v21 = vld [vmem:[#allocation155_spill] sm:$0xff]  ;;  %v17876_v5 = vld [vmem:[#allocation158_spill] sm:$0xff]  ;;  %v17877_v60 = vld [vmem:[#allocation93_spill] sm:$0xff] }
 0x7c1   :  { %6288 = vmatprep.subr.bf16.mxu1 %v17811_v31  ;;  %v17906_v2 = vld [vmem:[#allocation120_spill] sm:$0xff] }
 0x7c2   :  { %v6254_v51 = vpack.c.bf16 %v6217_v35, %v6216_v1  ;;  %v17874_v1 = vld [vmem:[#allocation156_spill] sm:$0xff]  ;;  %v17907_v35 = vld [vmem:[#allocation221_spill] sm:$0xff] }
 0x7c3   :  { %v5942_v8 = vpop.permute.xlu0 %5941  ;;  %v6097_v0 = vpop.permute.xlu1 %6096  ;;  %v17909_v11 = vld [vmem:[#allocation172_spill] sm:$0xff] }
 0x7c4   :  { %v6183_v57 = vmul.f32 %v5942_v8, %v17865_v42  ;;  %6576 = vmatpush2.bf16.msra.mxu0 %v6254_v51  ;;  %v6214_v53 = vmul.f32 %v6097_v0, %v17866_v40  ;;  %v17908_v51 = vld [vmem:[#allocation168_spill] sm:$0xff]  ;;  %v17911_v8 = vld [vmem:[#allocation95_spill] sm:$0xff]  ;;  %v17913_v42 = vld [vmem:[#allocation173_spill] sm:$0xff] }
 0x7c5   :  { %6577 = vmatprep.subr.bf16.mxu0 %v17811_v31  ;;  %v17912_v0 = vld [vmem:[#allocation143_spill] sm:$0xff]  ;;  %v17916_v40 = vld [vmem:[#allocation137_spill] sm:$0xff] }
 0x7c6   :  { %v6237_v47 = vpack.c.bf16 %v6183_v57, %v6182_v63  ;;  %v17910_v63 = vld [vmem:[#allocation165_spill] sm:$0xff]  ;;  %v17914_v57 = vld [vmem:[#allocation116_spill] sm:$0xff] }
 0x7c7   :  { %v6102_v12 = vpop.permute.xlu0 %6101  ;;  %v5927_v30 = vpop.permute.xlu1 %5926 }
 0x7c8   :  { %v6215_v52 = vmul.f32 %v6102_v12, %v17867_v46  ;;  %6289 = vmatpush2.bf16.msra.mxu1 %v6237_v47  ;;  %v6180_v62 = vmul.f32 %v5927_v30, %v17868_v50  ;;  %v17915_v47 = vld [vmem:[#allocation222_spill] sm:$0xff]  ;;  %v17918_v12 = vld [vmem:[#allocation151_spill] sm:$0xff] }
 0x7c9   :  { %6290 = vmatprep.subr.bf16.mxu1 %v17811_v31  ;;  %v17919_v30 = vld [vmem:[#allocation178_spill] sm:$0xff]  ;;  %v17923_v50 = vld [vmem:[#allocation179_spill] sm:$0xff] }
 0x7ca   :  { %v6253_v48 = vpack.c.bf16 %v6215_v52, %v6214_v53  ;;  %v17917_v53 = vld [vmem:[#allocation176_spill] sm:$0xff]  ;;  %v17920_v46 = vld [vmem:[#allocation146_spill] sm:$0xff]  ;;  %v17921_v52 = vld [vmem:[#allocation177_spill] sm:$0xff] }
 0x7cb   :  { %v5932_v37 = vpop.permute.xlu0 %5931  ;;  %v6087_v20 = vpop.permute.xlu1 %6086 }
 0x7cc   :  { %v6181_v38 = vmul.f32 %v5932_v37, %v17869_v28  ;;  %6578 = vmatpush2.bf16.msra.mxu0 %v6253_v48  ;;  %v6212_v32 = vmul.f32 %v6087_v20, %v17870_v23  ;;  %v17922_v48 = vld [vmem:[#allocation72_spill] sm:$0xff]  ;;  %v17927_v28 = vld [vmem:[#allocation183_spill] sm:$0xff] }
 0x7cd   :  { %6579 = vmatprep.subr.bf16.mxu0 %v17811_v31  ;;  %v17875_v31 = vld [vmem:[#allocation131_spill] sm:$0xff]  ;;  %v17925_v37 = vld [vmem:[#allocation224_spill] sm:$0xff] }
 0x7ce   :  { %v6236_v41 = vpack.c.bf16 %v6181_v38, %v6180_v62  ;;  %v17924_v62 = vld [vmem:[#allocation181_spill] sm:$0xff]  ;;  %v17926_v20 = vld [vmem:[#allocation140_spill] sm:$0xff]  ;;  %v17930_v23 = vld [vmem:[#allocation79_spill] sm:$0xff] }
 0x7cf   :  { %v6092_v39 = vpop.permute.xlu0 %6091  ;;  %v17928_v38 = vld [vmem:[#allocation104_spill] sm:$0xff] }
 0x7d0   :  { %v6213_v55 = vmul.f32 %v6092_v39, %v17871_v29  ;;  %6291 = vmatpush2.bf16.msra.mxu1 %v6236_v41  ;;  %v17929_v41 = vld [vmem:[#allocation225_spill] sm:$0xff]  ;;  %v17932_v39 = vld [vmem:[#allocation182_spill] sm:$0xff]  ;;  %v17933_v29 = vld [vmem:[#allocation184_spill] sm:$0xff] }
 0x7d2   :  { %v6252_v58 = vpack.c.bf16 %v6213_v55, %v6212_v32  ;;  %v17931_v32 = vld [vmem:[#allocation92_spill] sm:$0xff]  ;;  %v17934_v55 = vld [vmem:[#allocation166_spill] sm:$0xff] }
 0x7d3   :  { %6293 = vmatmul.mubr.bf16.vlgmr.msra.gmra.mxu1 %v17872_v21  ;;  %v17936_v21 = vld [vmem:[#allocation187_spill] sm:$0xff] }
 0x7d4   :  { %6300 = vmatprep.mubr.bf16.mxu1 %v14241_v59  ;;  %6580 = vmatpush2.bf16.msra.mxu0 %v6252_v58  ;;  %v17878_v59 = vld [vmem:[#allocation94_spill] sm:$0xff] }
 0x7d5   :  { %v17935_v58 = vld [vmem:[#allocation98_spill] sm:$0xff] }
 0x7d7   :  { %6582 = vmatmul.mubr.bf16.vlgmr.msra.gmra.mxu0 %v17873_v6  ;;  %v17937_v6 = vld [vmem:[#allocation185_spill] sm:$0xff] }
 0x7d8   :  { %6589 = vmatprep.mubr.bf16.mxu0 %v14266_v44  ;;  %v17879_v44 = vld [vmem:[#allocation81_spill] sm:$0xff] }
 0x7db   :  { %6301 = vmatmul.mubr.bf16.gmra.mxu1 %v17874_v1  ;;  %v17938_v1 = vld [vmem:[#allocation167_spill] sm:$0xff] }
 0x7dc   :  { %6308 = vmatprep.mubr.bf16.mxu1 %v14272_v15  ;;  %v17880_v15 = vld [vmem:[#allocation159_spill] sm:$0xff] }
 0x7df   :  { %6590 = vmatmul.mubr.bf16.gmra.mxu0 %v17875_v31  ;;  %v17939_v31 = vld [vmem:[#allocation74_spill] sm:$0xff] }
 0x7e0   :  { %6597 = vmatprep.mubr.bf16.mxu0 %v14290_v24  ;;  %v17881_v24 = vld [vmem:[#allocation157_spill] sm:$0xff] }
 0x7e3   :  { %6309 = vmatmul.mubr.bf16.gmra.mxu1 %v17876_v5 }
 0x7e4   :  { %6316 = vmatprep.mubr.bf16.mxu1 %v14296_v36  ;;  %v17882_v36 = vld [vmem:[#allocation160_spill] sm:$0xff] }
 0x7e7   :  { %6598 = vmatmul.mubr.bf16.gmra.mxu0 %v17877_v60  ;;  %v17940_v60 = vld [vmem:[#allocation189_spill] sm:$0xff] }
 0x7e8   :  { %6605 = vmatprep.mubr.bf16.mxu0 %v14312_v16  ;;  %v17883_v16 = vld [vmem:[#allocation134_spill] sm:$0xff] }
 0x7eb   :  { %6317 = vmatmul.mubr.bf16.gmra.mxu1 %v17878_v59  ;;  %v17941_v59 = vld [vmem:[#allocation186_spill] sm:$0xff] }
 0x7ec   :  { %6324 = vmatprep.mubr.bf16.mxu1 %v14323_v45  ;;  %v17884_v45 = vld [vmem:[#allocation161_spill] sm:$0xff] }
 0x7ef   :  { %6606 = vmatmul.mubr.bf16.gmra.mxu0 %v17879_v44 }
 0x7f0   :  { %6613 = vmatprep.mubr.bf16.mxu0 %v14334_v25  ;;  %v17885_v25 = vld [vmem:[#allocation118_spill] sm:$0xff] }
 0x7f3   :  { %6325 = vmatmul.mubr.bf16.gmra.mxu1 %v17880_v15 }
 0x7f4   :  { %6332 = vmatprep.mubr.bf16.mxu1 %v14339_v13  ;;  %v17886_v13 = vld [vmem:[#allocation84_spill] sm:$0xff] }
 0x7f7   :  { %6614 = vmatmul.mubr.bf16.gmra.mxu0 %v17881_v24 }
 0x7f8   :  { %6621 = vmatprep.mubr.bf16.mxu0 %v14346_v43  ;;  %v17887_v43 = vld [vmem:[#allocation83_spill] sm:$0xff] }
 0x7fb   :  { %6333 = vmatmul.mubr.bf16.gmra.mxu1 %v17882_v36  ;;  %v17942_v36 = vld [vmem:[#allocation169_spill] sm:$0xff] }
 0x7fc   :  { %6340 = vmatprep.mubr.bf16.mxu1 %v14357_v4  ;;  %v17888_v4 = vld [vmem:[#allocation149_spill] sm:$0xff] }
 0x7ff   :  { %6622 = vmatmul.mubr.bf16.gmra.mxu0 %v17883_v16 }
 0x800   :  { %6629 = vmatprep.mubr.bf16.mxu0 %v14361_v33  ;;  %v17889_v33 = vld [vmem:[#allocation147_spill] sm:$0xff] }
 0x803   :  { %6341 = vmatmul.mubr.bf16.gmra.mxu1 %v17884_v45  ;;  %v17943_v45 = vld [vmem:[#allocation82_spill] sm:$0xff] }
 0x804   :  { %6348 = vmatprep.mubr.bf16.mxu1 %v14368_v27  ;;  %v17890_v27 = vld [vmem:[#allocation136_spill] sm:$0xff] }
 0x807   :  { %6630 = vmatmul.mubr.bf16.gmra.mxu0 %v17885_v25 }
 0x808   :  { %6637 = vmatprep.mubr.bf16.mxu0 %v14380_v22  ;;  %v17891_v22 = vld [vmem:[#allocation119_spill] sm:$0xff] }
 0x80b   :  { %6349 = vmatmul.mubr.bf16.gmra.mxu1 %v17886_v13 }
 0x80c   :  { %6356 = vmatprep.mubr.bf16.mxu1 %v14389_v34  ;;  %v17892_v34 = vld [vmem:[#allocation162_spill] sm:$0xff] }
 0x80f   :  { %6638 = vmatmul.mubr.bf16.gmra.mxu0 %v17887_v43 }
 0x810   :  { %6645 = vmatprep.mubr.bf16.mxu0 %v14400_v17  ;;  %v17894_v17 = vld [vmem:[#allocation163_spill] sm:$0xff] }
 0x813   :  { %6357 = vmatmul.mubr.bf16.gmra.mxu1 %v17888_v4  ;;  %v17944_v4 = vld [vmem:[#allocation190_spill] sm:$0xff] }
 0x814   :  { %6364 = vmatprep.mubr.bf16.mxu1 %v14410_v19  ;;  %v17896_v19 = vld [vmem:[#allocation85_spill] sm:$0xff] }
 0x817   :  { %6646 = vmatmul.mubr.bf16.gmra.mxu0 %v17889_v33 }
 0x818   :  { %6653 = vmatprep.mubr.bf16.mxu0 %v14423_v10  ;;  %v17897_v10 = vld [vmem:[#allocation206_spill] sm:$0xff] }
 0x81b   :  { %6365 = vmatmul.mubr.bf16.gmra.mxu1 %v14076_v61  ;;  %v17893_v61 = vld [vmem:[#allocation213_spill] sm:$0xff] }
 0x81c   :  { %6372 = vmatprep.mubr.bf16.mxu1 %v14438_v54  ;;  %v17901_v54 = vld [vmem:[#allocation170_spill] sm:$0xff] }
 0x81f   :  { %6654 = vmatmul.mubr.bf16.gmra.mxu0 %v17890_v27 }
 0x820   :  { %6661 = vmatprep.mubr.bf16.mxu0 %v14443_v49  ;;  %v17902_v49 = vld [vmem:[#allocation164_spill] sm:$0xff] }
 0x823   :  { %6373 = vmatmul.mubr.bf16.gmra.mxu1 %v14092_v26  ;;  %v17895_v26 = vld [vmem:[#allocation214_spill] sm:$0xff] }
 0x824   :  { %6380 = vmatprep.mubr.bf16.mxu1 %v14461_v18  ;;  %v17904_v18 = vld [vmem:[#allocation97_spill] sm:$0xff] }
 0x827   :  { %6662 = vmatmul.mubr.bf16.gmra.mxu0 %v17891_v22  ;;  %v17945_v22 = vld [vmem:[#allocation191_spill] sm:$0xff] }
 0x828   :  { %6669 = vmatprep.mubr.bf16.mxu0 %v14468_v9  ;;  %v17898_v9 = vld [vmem:[#allocation138_spill] sm:$0xff] }
 0x82b   :  { %6381 = vmatmul.mubr.bf16.gmra.mxu1 %v14107_v56  ;;  %v17899_v56 = vld [vmem:[#allocation219_spill] sm:$0xff] }
 0x82c   :  { %6388 = vmatprep.mubr.bf16.mxu1 %v14486_v7  ;;  %v17900_v7 = vld [vmem:[#allocation150_spill] sm:$0xff] }
 0x82f   :  { %6670 = vmatmul.mubr.bf16.gmra.mxu0 %v17892_v34 }
 0x830   :  { %6677 = vmatprep.mubr.bf16.mxu0 %v14504_v14  ;;  %v17905_v14 = vld [vmem:[#allocation171_spill] sm:$0xff] }
 0x833   :  { %6389 = vmatmul.mubr.bf16.gmra.mxu1 %v14121_v3  ;;  %v17903_v3 = vld [vmem:[#allocation220_spill] sm:$0xff] }
 0x834   :  { %6396 = vmatprep.mubr.bf16.mxu1 %v17893_v61 }
 0x837   :  { %6678 = vmatmul.mubr.bf16.gmra.mxu0 %v17894_v17 }
 0x838   :  { %6685 = vmatprep.mubr.bf16.mxu0 %v17895_v26 }
 0x83b   :  { %6397 = vmatmul.mubr.bf16.gmra.mxu1 %v17896_v19  ;;  %v17946_v19 = vld [vmem:[#allocation174_spill] sm:$0xff] }
 0x83c   :  { %6404 = vmatprep.mubr.bf16.mxu1 %v17897_v10 }
 0x83f   :  { %6686 = vmatmul.mubr.bf16.gmra.mxu0 %v17898_v9  ;;  %v17947_v9 = vld [vmem:[#allocation226_spill] sm:$0xff] }
 0x840   :  { %6693 = vmatprep.mubr.bf16.mxu0 %v17899_v56 }
 0x843   :  { %6405 = vmatmul.mubr.bf16.gmra.mxu1 %v17900_v7 }
 0x844   :  { %6412 = vmatprep.mubr.bf16.mxu1 %v17901_v54 }
 0x847   :  { %6694 = vmatmul.mubr.bf16.gmra.mxu0 %v17902_v49  ;;  %v17948_v49 = vld [vmem:[#allocation198_spill] sm:$0xff] }
 0x848   :  { %6701 = vmatprep.mubr.bf16.mxu0 %v17903_v3 }
 0x84b   :  { %6413 = vmatmul.mubr.bf16.gmra.mxu1 %v17904_v18 }
 0x84c   :  { %6420 = vmatprep.mubr.bf16.mxu1 %v17905_v14  ;;  %v17949_v14 = vld [vmem:[#allocation192_spill] sm:$0xff] }
 0x84f   :  { %6702 = vmatmul.mubr.bf16.gmra.mxu0 %v17906_v2 }
 0x850   :  { %6709 = vmatprep.mubr.bf16.mxu0 %v17907_v35 }
 0x853   :  { %6421 = vmatmul.mubr.bf16.gmra.mxu1 %v17908_v51 }
 0x854   :  { %6428 = vmatprep.mubr.bf16.mxu1 %v17909_v11 }
 0x857   :  { %6710 = vmatmul.mubr.bf16.gmra.mxu0 %v17910_v63  ;;  %v17950_v63 = vld [vmem:[#allocation153_spill] sm:$0xff] }
 0x858   :  { %6717 = vmatprep.mubr.bf16.mxu0 %v17911_v8 }
 0x85b   :  { %6429 = vmatmul.mubr.bf16.gmra.mxu1 %v17912_v0  ;;  %v17951_v0 = vld [vmem:[#allocation227_spill] sm:$0xff] }
 0x85c   :  { %6436 = vmatprep.mubr.bf16.mxu1 %v17913_v42 }
 0x85f   :  { %6718 = vmatmul.mubr.bf16.gmra.mxu0 %v17914_v57 }
 0x860   :  { %6725 = vmatprep.mubr.bf16.mxu0 %v17915_v47 }
 0x863   :  { %6437 = vmatmul.mubr.bf16.gmra.mxu1 %v17916_v40  ;;  %v17952_v40 = vld [vmem:[#allocation211_spill] sm:$0xff] }
 0x864   :  { %6444 = vmatprep.mubr.bf16.mxu1 %v17917_v53 }
 0x867   :  { %6726 = vmatmul.mubr.bf16.gmra.mxu0 %v17918_v12 }
 0x868   :  { %6733 = vmatprep.mubr.bf16.mxu0 %v17919_v30  ;;  %v17953_v30 = vld [vmem:[#allocation193_spill] sm:$0xff] }
 0x86b   :  { %6445 = vmatmul.mubr.bf16.gmra.mxu1 %v17920_v46 }
 0x86c   :  { %6452 = vmatprep.mubr.bf16.mxu1 %v17921_v52 }
 0x86f   :  { %6734 = vmatmul.mubr.bf16.gmra.mxu0 %v17922_v48 }
 0x870   :  { %6741 = vmatprep.mubr.bf16.mxu0 %v17923_v50 }
 0x873   :  { %6453 = vmatmul.mubr.bf16.gmra.mxu1 %v17924_v62  ;;  %v17954_v62 = vld [vmem:[#allocation103_spill] sm:$0xff] }
 0x874   :  { %6460 = vmatprep.mubr.bf16.mxu1 %v17925_v37 }
 0x877   :  { %6742 = vmatmul.mubr.bf16.gmra.mxu0 %v17926_v20  ;;  %v17955_v20 = vld [vmem:[#allocation228_spill] sm:$0xff] }
 0x878   :  { %6749 = vmatprep.mubr.bf16.mxu0 %v17927_v28 }
 0x87b   :  { %6461 = vmatmul.mubr.bf16.gmra.mxu1 %v17928_v38 }
 0x87c   :  { %6468 = vmatprep.mubr.bf16.mxu1 %v17929_v41 }
 0x87f   :  { %6750 = vmatmul.mubr.bf16.gmra.mxu0 %v17930_v23  ;;  %v17956_v23 = vld [vmem:[#allocation205_spill] sm:$0xff] }
 0x880   :  { %6757 = vmatprep.mubr.bf16.mxu0 %v17931_v32 }
 0x883   :  { %6469 = vmatmul.mubr.bf16.gmra.mxu1 %v17932_v39 }
 0x884   :  { %6476 = vmatprep.mubr.bf16.mxu1 %v17933_v29  ;;  %v17957_v29 = vld [vmem:[#allocation194_spill] sm:$0xff] }
 0x887   :  { %6758 = vmatmul.mubr.bf16.gmra.mxu0 %v17934_v55 }
 0x888   :  { %6765 = vmatprep.mubr.bf16.mxu0 %v17935_v58 }
 0x88b   :  { %6477 = vmatmul.mubr.bf16.gmra.mxu1 %v17936_v21 }
 0x88c   :  { %6484 = vmatprep.mubr.bf16.mxu1 %v17937_v6 }
 0x88f   :  { %6766 = vmatmul.mubr.bf16.gmra.mxu0 %v17938_v1  ;;  %v17958_v1 = vld [vmem:[#allocation175_spill] sm:$0xff] }
 0x890   :  { %6773 = vmatprep.mubr.bf16.mxu0 %v17939_v31 }
 0x893   :  { %v6294_v5 = vpop.f32.mrf.mxu1  ;;  %6485 = vmatmul.mubr.bf16.gmra.mxu1 %v17940_v60 }
 0x894   :  { %6492 = vmatprep.mubr.bf16.mxu1 %v17941_v59 }
 0x895   :  { %v6296_v44 = vpop.f32.mrf.mxu1 }
 0x897   :  { %v6297_v15 = vpop.f32.mrf.mxu1  ;;  %v6583_v24 = vpop.f32.mrf.mxu0  ;;  %6774 = vmatmul.mubr.bf16.gmra.mxu0 %v17942_v36 }
 0x898   :  { %v6584_v16 = vadd.f32 %v6583_v24, %v6294_v5  ;;  %6781 = vmatprep.mubr.bf16.mxu0 %v17943_v45  ;;  %v17959_v5 = vld [vmem:[#allocation229_spill] sm:$0xff] }
 0x899   :  { %v6299_v25 = vpop.f32.mrf.mxu1  ;;  %v6585_v13 = vpop.f32.mrf.mxu0 }
 0x89a   :  { %6841 = vst [vmem:[#allocation4] sm:$0xff] %v6584_v16  ;;  %v17961_v16 = vld [vmem:[#allocation199_spill] sm:$0xff] }
 0x89b   :  { %v6302_v43 = vpop.f32.mrf.mxu1  ;;  %6493 = vmatmul.mubr.bf16.gmra.mxu1 %v17944_v4  ;;  %v6586_v33 = vpop.f32.mrf.mxu0  ;;  %v17962_v4 = vld [vmem:[#allocation123_spill] sm:$0xff] }
 0x89c   :  { %v6587_v27 = vadd.f32 %v6586_v33, %v6297_v15  ;;  %6500 = vmatprep.mubr.bf16.mxu1 %v17945_v22  ;;  %v17960_v15 = vld [vmem:[#allocation212_spill] sm:$0xff] }
 0x89d   :  { %v6304_v34 = vpop.f32.mrf.mxu1  ;;  %v6588_v61 = vpop.f32.mrf.mxu0 }
 0x89e   :  { %6842 = vst [vmem:[#allocation4 + $0x8] sm:$0xff] %v6587_v27  ;;  %v17963_v27 = vld [vmem:[#allocation230_spill] sm:$0xff] }
 0x89f   :  { %v6305_v17 = vpop.f32.mrf.mxu1  ;;  %v6591_v26 = vpop.f32.mrf.mxu0  ;;  %6782 = vmatmul.mubr.bf16.gmra.mxu0 %v17946_v19 }
 0x8a0   :  { %v6592_v10 = vadd.f32 %v6591_v26, %v6302_v43  ;;  %6789 = vmatprep.mubr.bf16.mxu0 %v17947_v9 }
 0x8a1   :  { %v6307_v56 = vpop.f32.mrf.mxu1  ;;  %v6593_v7 = vpop.f32.mrf.mxu0 }
 0x8a2   :  { %6843 = vst [vmem:[#allocation4 + $0x10] sm:$0xff] %v6592_v10  ;;  %v17965_v10 = vld [vmem:[#allocation200_spill] sm:$0xff] }
 0x8a3   :  { %v6310_v54 = vpop.f32.mrf.mxu1  ;;  %6501 = vmatmul.mubr.bf16.gmra.mxu1 %v17948_v49  ;;  %v6594_v3 = vpop.f32.mrf.mxu0  ;;  %v17966_v49 = vld [vmem:[#allocation180_spill] sm:$0xff] }
 0x8a4   :  { %v6595_v18 = vadd.f32 %v6594_v3, %v6305_v17  ;;  %6508 = vmatprep.mubr.bf16.mxu1 %v17949_v14  ;;  %v17964_v17 = vld [vmem:[#allocation204_spill] sm:$0xff] }
 0x8a5   :  { %v6312_v2 = vpop.f32.mrf.mxu1  ;;  %v6596_v35 = vpop.f32.mrf.mxu0 }
 0x8a6   :  { %6844 = vst [vmem:[#allocation4 + $0x18] sm:$0xff] %v6595_v18  ;;  %v17967_v18 = vld [vmem:[#allocation201_spill] sm:$0xff] }
 0x8a7   :  { %v6313_v51 = vpop.f32.mrf.mxu1  ;;  %v6599_v11 = vpop.f32.mrf.mxu0  ;;  %6790 = vmatmul.mubr.bf16.gmra.mxu0 %v17950_v63 }
 0x8a8   :  { %v6600_v8 = vadd.f32 %v6599_v11, %v6310_v54  ;;  %6797 = vmatprep.mubr.bf16.mxu0 %v17951_v0 }
 0x8a9   :  { %v6315_v42 = vpop.f32.mrf.mxu1  ;;  %v6601_v57 = vpop.f32.mrf.mxu0 }
 0x8aa   :  { %6845 = vst [vmem:[#allocation4 + $0x20] sm:$0xff] %v6600_v8 }
 0x8ab   :  { %v6318_v47 = vpop.f32.mrf.mxu1  ;;  %6509 = vmatmul.mubr.bf16.gmra.mxu1 %v17952_v40  ;;  %v6602_v53 = vpop.f32.mrf.mxu0 }
 0x8ac   :  { %v6603_v12 = vadd.f32 %v6602_v53, %v6313_v51  ;;  %6516 = vmatprep.mubr.bf16.mxu1 %v17953_v30  ;;  %v17968_v51 = vld [vmem:[#allocation75_spill] sm:$0xff] }
 0x8ad   :  { %v6320_v46 = vpop.f32.mrf.mxu1  ;;  %v6604_v52 = vpop.f32.mrf.mxu0 }
 0x8ae   :  { %6846 = vst [vmem:[#allocation4 + $0x28] sm:$0xff] %v6603_v12 }
 0x8af   :  { %v6321_v48 = vpop.f32.mrf.mxu1  ;;  %v6607_v50 = vpop.f32.mrf.mxu0  ;;  %6798 = vmatmul.mubr.bf16.gmra.mxu0 %v17954_v62 }
 0x8b0   :  { %v6608_v37 = vadd.f32 %v6607_v50, %v6318_v47  ;;  %6805 = vmatprep.mubr.bf16.mxu0 %v17955_v20  ;;  %v17969_v47 = vld [vmem:[#allocation139_spill] sm:$0xff] }
 0x8b1   :  { %v6323_v28 = vpop.f32.mrf.mxu1  ;;  %v6609_v38 = vpop.f32.mrf.mxu0 }
 0x8b2   :  { %6847 = vst [vmem:[#allocation4 + $0x30] sm:$0xff] %v6608_v37 }
 0x8b3   :  { %v6326_v41 = vpop.f32.mrf.mxu1  ;;  %6517 = vmatmul.mubr.bf16.gmra.mxu1 %v17956_v23  ;;  %v6610_v32 = vpop.f32.mrf.mxu0 }
 0x8b4   :  { %v6611_v39 = vadd.f32 %v6610_v32, %v6321_v48  ;;  %6524 = vmatprep.mubr.bf16.mxu1 %v17957_v29 }
 0x8b5   :  { %v6328_v55 = vpop.f32.mrf.mxu1  ;;  %v6612_v58 = vpop.f32.mrf.mxu0 }
 0x8b6   :  { %6848 = vst [vmem:[#allocation4 + $0x38] sm:$0xff] %v6611_v39 }
 0x8b7   :  { %v6329_v21 = vpop.f32.mrf.mxu1  ;;  %v6615_v6 = vpop.f32.mrf.mxu0  ;;  %6806 = vmatmul.mubr.bf16.gmra.mxu0 %v17958_v1 }
 0x8b8   :  { %v6616_v31 = vadd.f32 %v6615_v6, %v6326_v41  ;;  %6813 = vmatprep.mubr.bf16.mxu0 %v17959_v5 }
 0x8b9   :  { %v6331_v60 = vpop.f32.mrf.mxu1  ;;  %v6617_v59 = vpop.f32.mrf.mxu0 }
 0x8ba   :  { %6849 = vst [vmem:[#allocation4 + $0x40] sm:$0xff] %v6616_v31 }
 0x8bb   :  { %v6334_v44 = vpop.f32.mrf.mxu1  ;;  %6525 = vmatmul.mubr.bf16.gmra.mxu1 %v17960_v15  ;;  %v6618_v24 = vpop.f32.mrf.mxu0 }
 0x8bc   :  { %v6619_v36 = vadd.f32 %v6618_v24, %v6329_v21  ;;  %6532 = vmatprep.mubr.bf16.mxu1 %v17961_v16 }
 0x8bd   :  { %v6336_v45 = vpop.f32.mrf.mxu1  ;;  %v6620_v25 = vpop.f32.mrf.mxu0 }
 0x8be   :  { %6850 = vst [vmem:[#allocation4 + $0x48] sm:$0xff] %v6619_v36 }
 0x8bf   :  { %v6337_v13 = vpop.f32.mrf.mxu1  ;;  %v6623_v43 = vpop.f32.mrf.mxu0  ;;  %6814 = vmatmul.mubr.bf16.gmra.mxu0 %v17962_v4 }
 0x8c0   :  { %v6624_v33 = vadd.f32 %v6623_v43, %v6334_v44  ;;  %6821 = vmatprep.mubr.bf16.mxu0 %v17963_v27 }
 0x8c1   :  { %v6339_v22 = vpop.f32.mrf.mxu1  ;;  %v6625_v34 = vpop.f32.mrf.mxu0 }
 0x8c2   :  { %6851 = vst [vmem:[#allocation4 + $0x50] sm:$0xff] %v6624_v33 }
 0x8c3   :  { %v6342_v61 = vpop.f32.mrf.mxu1  ;;  %6533 = vmatmul.mubr.bf16.gmra.mxu1 %v17964_v17  ;;  %v6626_v26 = vpop.f32.mrf.mxu0 }
 0x8c4   :  { %v6627_v19 = vadd.f32 %v6626_v26, %v6337_v13  ;;  %6540 = vmatprep.mubr.bf16.mxu1 %v17965_v10 }
 0x8c5   :  { %v6344_v9 = vpop.f32.mrf.mxu1  ;;  %v6628_v56 = vpop.f32.mrf.mxu0 }
 0x8c6   :  { %6852 = vst [vmem:[#allocation4 + $0x58] sm:$0xff] %v6627_v19 }
 0x8c7   :  { %v6345_v7 = vpop.f32.mrf.mxu1  ;;  %v6631_v54 = vpop.f32.mrf.mxu0  ;;  %6822 = vmatmul.mubr.bf16.gmra.mxu0 %v17966_v49 }
 0x8c8   :  { %v6632_v3 = vadd.f32 %v6631_v54, %v6342_v61  ;;  %6829 = vmatprep.mubr.bf16.mxu0 %v17967_v18 }
 0x8c9   :  { %v6347_v14 = vpop.f32.mrf.mxu1  ;;  %v6633_v2 = vpop.f32.mrf.mxu0 }
 0x8ca   :  { %6853 = vst [vmem:[#allocation4 + $0x60] sm:$0xff] %v6632_v3 }
 0x8cb   :  { %v6350_v35 = vpop.f32.mrf.mxu1  ;;  %6541 = vmatmul.mubr.bf16.gmra.mxu1 %v17968_v51  ;;  %v6634_v11 = vpop.f32.mrf.mxu0 }
 0x8cc   :  { %v6635_v63 = vadd.f32 %v6634_v11, %v6345_v7 }
 0x8cd   :  { %v6352_v8 = vpop.f32.mrf.mxu1  ;;  %v6636_v0 = vpop.f32.mrf.mxu0 }
 0x8ce   :  { %6854 = vst [vmem:[#allocation4 + $0x68] sm:$0xff] %v6635_v63 }
 0x8cf   :  { %v6353_v42 = vpop.f32.mrf.mxu1  ;;  %v6639_v57 = vpop.f32.mrf.mxu0  ;;  %6830 = vmatmul.mubr.bf16.gmra.mxu0 %v17969_v47 }
 0x8d0   :  { %v6640_v40 = vadd.f32 %v6639_v57, %v6350_v35 }
 0x8d1   :  { %v6355_v53 = vpop.f32.mrf.mxu1  ;;  %v6641_v12 = vpop.f32.mrf.mxu0 }
 0x8d2   :  { %6855 = vst [vmem:[#allocation4 + $0x70] sm:$0xff] %v6640_v40 }
 0x8d3   :  { %v6358_v30 = vpop.f32.mrf.mxu1  ;;  %v6642_v46 = vpop.f32.mrf.mxu0 }
 0x8d4   :  { %v6643_v52 = vadd.f32 %v6642_v46, %v6353_v42 }
 0x8d5   :  { %v6360_v48 = vpop.f32.mrf.mxu1  ;;  %v6644_v50 = vpop.f32.mrf.mxu0 }
 0x8d6   :  { %6856 = vst [vmem:[#allocation4 + $0x78] sm:$0xff] %v6643_v52 }
 0x8d7   :  { %v6361_v62 = vpop.f32.mrf.mxu1  ;;  %v6647_v37 = vpop.f32.mrf.mxu0 }
 0x8d8   :  { %v6648_v20 = vadd.f32 %v6647_v37, %v6358_v30 }
 0x8d9   :  { %v6363_v28 = vpop.f32.mrf.mxu1  ;;  %v6649_v38 = vpop.f32.mrf.mxu0 }
 0x8da   :  { %6857 = vst [vmem:[#allocation4 + $0x80] sm:$0xff] %v6648_v20 }
 0x8db   :  { %v6366_v41 = vpop.f32.mrf.mxu1  ;;  %v6650_v23 = vpop.f32.mrf.mxu0 }
 0x8dc   :  { %v6651_v32 = vadd.f32 %v6650_v23, %v6361_v62 }
 0x8dd   :  { %v6368_v39 = vpop.f32.mrf.mxu1  ;;  %v6652_v29 = vpop.f32.mrf.mxu0 }
 0x8de   :  { %6858 = vst [vmem:[#allocation4 + $0x88] sm:$0xff] %v6651_v32 }
 0x8df   :  { %v6369_v55 = vpop.f32.mrf.mxu1  ;;  %v6655_v58 = vpop.f32.mrf.mxu0 }
 0x8e0   :  { %v6656_v21 = vadd.f32 %v6655_v58, %v6366_v41 }
 0x8e1   :  { %v6371_v6 = vpop.f32.mrf.mxu1  ;;  %v6657_v1 = vpop.f32.mrf.mxu0 }
 0x8e2   :  { %6859 = vst [vmem:[#allocation4 + $0x90] sm:$0xff] %v6656_v21 }
 0x8e3   :  { %v6374_v31 = vpop.f32.mrf.mxu1  ;;  %v6658_v5 = vpop.f32.mrf.mxu0 }
 0x8e4   :  { %v6659_v60 = vadd.f32 %v6658_v5, %v6369_v55 }
 0x8e5   :  { %v6376_v59 = vpop.f32.mrf.mxu1  ;;  %v6660_v44 = vpop.f32.mrf.mxu0 }
 0x8e6   :  { %6860 = vst [vmem:[#allocation4 + $0x98] sm:$0xff] %v6659_v60 }
 0x8e7   :  { %v6377_v15 = vpop.f32.mrf.mxu1  ;;  %v6663_v24 = vpop.f32.mrf.mxu0 }
 0x8e8   :  { %v6664_v36 = vadd.f32 %v6663_v24, %v6374_v31 }
 0x8e9   :  { %v6379_v16 = vpop.f32.mrf.mxu1  ;;  %v6665_v45 = vpop.f32.mrf.mxu0 }
 0x8ea   :  { %6861 = vst [vmem:[#allocation4 + $0xa0] sm:$0xff] %v6664_v36 }
 0x8eb   :  { %v6382_v25 = vpop.f32.mrf.mxu1  ;;  %v6666_v13 = vpop.f32.mrf.mxu0 }
 0x8ec   :  { %v6667_v43 = vadd.f32 %v6666_v13, %v6377_v15 }
 0x8ed   :  { %v6384_v4 = vpop.f32.mrf.mxu1  ;;  %v6668_v33 = vpop.f32.mrf.mxu0 }
 0x8ee   :  { %6862 = vst [vmem:[#allocation4 + $0xa8] sm:$0xff] %v6667_v43 }
 0x8ef   :  { %v6385_v27 = vpop.f32.mrf.mxu1  ;;  %v6671_v22 = vpop.f32.mrf.mxu0 }
 0x8f0   :  { %v6672_v34 = vadd.f32 %v6671_v22, %v6382_v25 }
 0x8f1   :  { %v6387_v61 = vpop.f32.mrf.mxu1  ;;  %v6673_v17 = vpop.f32.mrf.mxu0 }
 0x8f2   :  { %6863 = vst [vmem:[#allocation4 + $0xb0] sm:$0xff] %v6672_v34 }
 0x8f3   :  { %v6390_v26 = vpop.f32.mrf.mxu1  ;;  %v6674_v19 = vpop.f32.mrf.mxu0 }
 0x8f4   :  { %v6675_v10 = vadd.f32 %v6674_v19, %v6385_v27 }
 0x8f5   :  { %v6392_v9 = vpop.f32.mrf.mxu1  ;;  %v6676_v56 = vpop.f32.mrf.mxu0 }
 0x8f6   :  { %6864 = vst [vmem:[#allocation4 + $0xb8] sm:$0xff] %v6675_v10 }
 0x8f7   :  { %v6393_v7 = vpop.f32.mrf.mxu1  ;;  %v6679_v54 = vpop.f32.mrf.mxu0 }
 0x8f8   :  { %v6680_v49 = vadd.f32 %v6679_v54, %v6390_v26 }
 0x8f9   :  { %v6395_v3 = vpop.f32.mrf.mxu1  ;;  %v6681_v18 = vpop.f32.mrf.mxu0 }
 0x8fa   :  { %6865 = vst [vmem:[#allocation4 + $0xc0] sm:$0xff] %v6680_v49 }
 0x8fb   :  { %v6398_v14 = vpop.f32.mrf.mxu1  ;;  %v6682_v2 = vpop.f32.mrf.mxu0 }
 0x8fc   :  { %v6683_v35 = vadd.f32 %v6682_v2, %v6393_v7 }
 0x8fd   :  { %v6400_v51 = vpop.f32.mrf.mxu1  ;;  %v6684_v11 = vpop.f32.mrf.mxu0 }
 0x8fe   :  { %6866 = vst [vmem:[#allocation4 + $0xc8] sm:$0xff] %v6683_v35 }
 0x8ff   :  { %v6401_v63 = vpop.f32.mrf.mxu1  ;;  %v6687_v8 = vpop.f32.mrf.mxu0 }
 0x900   :  { %v6688_v0 = vadd.f32 %v6687_v8, %v6398_v14 }
 0x901   :  { %v6403_v42 = vpop.f32.mrf.mxu1  ;;  %v6689_v57 = vpop.f32.mrf.mxu0 }
 0x902   :  { %6867 = vst [vmem:[#allocation4 + $0xd0] sm:$0xff] %v6688_v0 }
 0x903   :  { %v6406_v47 = vpop.f32.mrf.mxu1  ;;  %v6690_v40 = vpop.f32.mrf.mxu0 }
 0x904   :  { %v6691_v53 = vadd.f32 %v6690_v40, %v6401_v63 }
 0x905   :  { %v6408_v12 = vpop.f32.mrf.mxu1  ;;  %v6692_v30 = vpop.f32.mrf.mxu0 }
 0x906   :  { %6868 = vst [vmem:[#allocation4 + $0xd8] sm:$0xff] %v6691_v53 }
 0x907   :  { %v6409_v46 = vpop.f32.mrf.mxu1  ;;  %v6695_v52 = vpop.f32.mrf.mxu0 }
 0x908   :  { %v6696_v48 = vadd.f32 %v6695_v52, %v6406_v47 }
 0x909   :  { %v6411_v50 = vpop.f32.mrf.mxu1  ;;  %v6697_v62 = vpop.f32.mrf.mxu0 }
 0x90a   :  { %6869 = vst [vmem:[#allocation4 + $0xe0] sm:$0xff] %v6696_v48 }
 0x90b   :  { %v6414_v37 = vpop.f32.mrf.mxu1  ;;  %v6698_v20 = vpop.f32.mrf.mxu0 }
 0x90c   :  { %v6699_v28 = vadd.f32 %v6698_v20, %v6409_v46 }
 0x90d   :  { %v6416_v38 = vpop.f32.mrf.mxu1  ;;  %v6700_v41 = vpop.f32.mrf.mxu0 }
 0x90e   :  { %6870 = vst [vmem:[#allocation4 + $0xe8] sm:$0xff] %v6699_v28 }
 0x90f   :  { %v6417_v23 = vpop.f32.mrf.mxu1  ;;  %v6703_v32 = vpop.f32.mrf.mxu0 }
 0x910   :  { %v6704_v39 = vadd.f32 %v6703_v32, %v6414_v37 }
 0x911   :  { %v6419_v29 = vpop.f32.mrf.mxu1  ;;  %v6705_v55 = vpop.f32.mrf.mxu0 }
 0x912   :  { %6871 = vst [vmem:[#allocation4 + $0xf0] sm:$0xff] %v6704_v39 }
 0x913   :  { %v6422_v58 = vpop.f32.mrf.mxu1  ;;  %v6706_v21 = vpop.f32.mrf.mxu0 }
 0x914   :  { %v6707_v6 = vadd.f32 %v6706_v21, %v6417_v23 }
 0x915   :  { %v6424_v1 = vpop.f32.mrf.mxu1  ;;  %v6708_v31 = vpop.f32.mrf.mxu0 }
 0x916   :  { %6872 = vst [vmem:[#allocation4 + $0xf8] sm:$0xff] %v6707_v6 }
 0x917   :  { %v6425_v5 = vpop.f32.mrf.mxu1  ;;  %v6711_v60 = vpop.f32.mrf.mxu0 }
 0x918   :  { %v6712_v59 = vadd.f32 %v6711_v60, %v6422_v58 }
 0x919   :  { %v6427_v44 = vpop.f32.mrf.mxu1  ;;  %v6713_v15 = vpop.f32.mrf.mxu0 }
 0x91a   :  { %6873 = vst [vmem:[#allocation4 + $0x100] sm:$0xff] %v6712_v59 }
 0x91b   :  { %v6430_v24 = vpop.f32.mrf.mxu1  ;;  %v6714_v36 = vpop.f32.mrf.mxu0 }
 0x91c   :  { %v6715_v16 = vadd.f32 %v6714_v36, %v6425_v5 }
 0x91d   :  { %v6432_v45 = vpop.f32.mrf.mxu1  ;;  %v6716_v25 = vpop.f32.mrf.mxu0 }
 0x91e   :  { %6874 = vst [vmem:[#allocation4 + $0x108] sm:$0xff] %v6715_v16 }
 0x91f   :  { %v6433_v13 = vpop.f32.mrf.mxu1  ;;  %v6719_v43 = vpop.f32.mrf.mxu0 }
 0x920   :  { %v6720_v4 = vadd.f32 %v6719_v43, %v6430_v24 }
 0x921   :  { %v6435_v33 = vpop.f32.mrf.mxu1  ;;  %v6721_v27 = vpop.f32.mrf.mxu0 }
 0x922   :  { %6875 = vst [vmem:[#allocation4 + $0x110] sm:$0xff] %v6720_v4 }
 0x923   :  { %v6438_v22 = vpop.f32.mrf.mxu1  ;;  %v6722_v34 = vpop.f32.mrf.mxu0 }
 0x924   :  { %v6723_v61 = vadd.f32 %v6722_v34, %v6433_v13 }
 0x925   :  { %v6440_v17 = vpop.f32.mrf.mxu1  ;;  %v6724_v26 = vpop.f32.mrf.mxu0 }
 0x926   :  { %6876 = vst [vmem:[#allocation4 + $0x118] sm:$0xff] %v6723_v61 }
 0x927   :  { %v6441_v19 = vpop.f32.mrf.mxu1  ;;  %v6727_v10 = vpop.f32.mrf.mxu0 }
 0x928   :  { %v6728_v9 = vadd.f32 %v6727_v10, %v6438_v22 }
 0x929   :  { %v6443_v56 = vpop.f32.mrf.mxu1  ;;  %v6729_v7 = vpop.f32.mrf.mxu0 }
 0x92a   :  { %6877 = vst [vmem:[#allocation4 + $0x120] sm:$0xff] %v6728_v9 }
 0x92b   :  { %v6446_v54 = vpop.f32.mrf.mxu1  ;;  %v6730_v49 = vpop.f32.mrf.mxu0 }
 0x92c   :  { %v6731_v3 = vadd.f32 %v6730_v49, %v6441_v19 }
 0x92d   :  { %v6448_v18 = vpop.f32.mrf.mxu1  ;;  %v6732_v14 = vpop.f32.mrf.mxu0 }
 0x92e   :  { %6878 = vst [vmem:[#allocation4 + $0x128] sm:$0xff] %v6731_v3 }
 0x92f   :  { %v6449_v2 = vpop.f32.mrf.mxu1  ;;  %v6735_v35 = vpop.f32.mrf.mxu0 }
 0x930   :  { %v6736_v51 = vadd.f32 %v6735_v35, %v6446_v54 }
 0x931   :  { %v6451_v11 = vpop.f32.mrf.mxu1  ;;  %v6737_v63 = vpop.f32.mrf.mxu0 }
 0x932   :  { %6879 = vst [vmem:[#allocation4 + $0x130] sm:$0xff] %v6736_v51 }
 0x933   :  { %v6454_v8 = vpop.f32.mrf.mxu1  ;;  %v6738_v0 = vpop.f32.mrf.mxu0 }
 0x934   :  { %v6739_v42 = vadd.f32 %v6738_v0, %v6449_v2 }
 0x935   :  { %v6456_v57 = vpop.f32.mrf.mxu1  ;;  %v6740_v47 = vpop.f32.mrf.mxu0 }
 0x936   :  { %6880 = vst [vmem:[#allocation4 + $0x138] sm:$0xff] %v6739_v42 }
 0x937   :  { %v6457_v40 = vpop.f32.mrf.mxu1  ;;  %v6743_v53 = vpop.f32.mrf.mxu0 }
 0x938   :  { %v6744_v12 = vadd.f32 %v6743_v53, %v6454_v8 }
 0x939   :  { %v6459_v30 = vpop.f32.mrf.mxu1  ;;  %v6745_v46 = vpop.f32.mrf.mxu0 }
 0x93a   :  { %6881 = vst [vmem:[#allocation4 + $0x140] sm:$0xff] %v6744_v12 }
 0x93b   :  { %v6462_v52 = vpop.f32.mrf.mxu1  ;;  %v6746_v48 = vpop.f32.mrf.mxu0 }
 0x93c   :  { %v6747_v50 = vadd.f32 %v6746_v48, %v6457_v40 }
 0x93d   :  { %v6464_v62 = vpop.f32.mrf.mxu1  ;;  %v6748_v37 = vpop.f32.mrf.mxu0 }
 0x93e   :  { %6882 = vst [vmem:[#allocation4 + $0x148] sm:$0xff] %v6747_v50 }
 0x93f   :  { %v6465_v20 = vpop.f32.mrf.mxu1  ;;  %v6751_v28 = vpop.f32.mrf.mxu0 }
 0x940   :  { %v6752_v38 = vadd.f32 %v6751_v28, %v6462_v52 }
 0x941   :  { %v6467_v41 = vpop.f32.mrf.mxu1  ;;  %v6753_v23 = vpop.f32.mrf.mxu0 }
 0x942   :  { %6883 = vst [vmem:[#allocation4 + $0x150] sm:$0xff] %v6752_v38 }
 0x943   :  { %v6470_v32 = vpop.f32.mrf.mxu1  ;;  %v6754_v39 = vpop.f32.mrf.mxu0 }
 0x944   :  { %v6755_v29 = vadd.f32 %v6754_v39, %v6465_v20 }
 0x945   :  { %v6472_v55 = vpop.f32.mrf.mxu1  ;;  %v6756_v58 = vpop.f32.mrf.mxu0 }
 0x946   :  { %6884 = vst [vmem:[#allocation4 + $0x158] sm:$0xff] %v6755_v29 }
 0x947   :  { %v6473_v21 = vpop.f32.mrf.mxu1  ;;  %v6759_v6 = vpop.f32.mrf.mxu0 }
 0x948   :  { %v6760_v1 = vadd.f32 %v6759_v6, %v6470_v32 }
 0x949   :  { %v6475_v31 = vpop.f32.mrf.mxu1  ;;  %v6761_v5 = vpop.f32.mrf.mxu0 }
 0x94a   :  { %6885 = vst [vmem:[#allocation4 + $0x160] sm:$0xff] %v6760_v1 }
 0x94b   :  { %v6478_v60 = vpop.f32.mrf.mxu1  ;;  %v6762_v59 = vpop.f32.mrf.mxu0 }
 0x94c   :  { %v6763_v44 = vadd.f32 %v6762_v59, %v6473_v21 }
 0x94d   :  { %v6480_v15 = vpop.f32.mrf.mxu1  ;;  %v6764_v24 = vpop.f32.mrf.mxu0 }
 0x94e   :  { %6886 = vst [vmem:[#allocation4 + $0x168] sm:$0xff] %v6763_v44 }
 0x94f   :  { %v6481_v36 = vpop.f32.mrf.mxu1  ;;  %v6767_v16 = vpop.f32.mrf.mxu0 }
 0x950   :  { %v6768_v45 = vadd.f32 %v6767_v16, %v6478_v60 }
 0x951   :  { %v6483_v25 = vpop.f32.mrf.mxu1  ;;  %v6769_v13 = vpop.f32.mrf.mxu0 }
 0x952   :  { %6887 = vst [vmem:[#allocation4 + $0x170] sm:$0xff] %v6768_v45 }
 0x953   :  { %v6486_v43 = vpop.f32.mrf.mxu1  ;;  %v6770_v4 = vpop.f32.mrf.mxu0 }
 0x954   :  { %v6771_v33 = vadd.f32 %v6770_v4, %v6481_v36 }
 0x955   :  { %v6488_v27 = vpop.f32.mrf.mxu1  ;;  %v6772_v22 = vpop.f32.mrf.mxu0 }
 0x956   :  { %6888 = vst [vmem:[#allocation4 + $0x178] sm:$0xff] %v6771_v33 }
 0x957   :  { %v6489_v34 = vpop.f32.mrf.mxu1  ;;  %v6775_v61 = vpop.f32.mrf.mxu0 }
 0x958   :  { %v6776_v17 = vadd.f32 %v6775_v61, %v6486_v43 }
 0x959   :  { %v6491_v26 = vpop.f32.mrf.mxu1  ;;  %v6777_v19 = vpop.f32.mrf.mxu0 }
 0x95a   :  { %6889 = vst [vmem:[#allocation4 + $0x180] sm:$0xff] %v6776_v17 }
 0x95b   :  { %v6494_v10 = vpop.f32.mrf.mxu1  ;;  %v6778_v9 = vpop.f32.mrf.mxu0 }
 0x95c   :  { %v6779_v56 = vadd.f32 %v6778_v9, %v6489_v34 }
 0x95d   :  { %v6496_v7 = vpop.f32.mrf.mxu1  ;;  %v6780_v54 = vpop.f32.mrf.mxu0 }
 0x95e   :  { %6890 = vst [vmem:[#allocation4 + $0x188] sm:$0xff] %v6779_v56 }
 0x95f   :  { %v6497_v49 = vpop.f32.mrf.mxu1  ;;  %v6783_v3 = vpop.f32.mrf.mxu0 }
 0x960   :  { %v6784_v18 = vadd.f32 %v6783_v3, %v6494_v10 }
 0x961   :  { %v6499_v14 = vpop.f32.mrf.mxu1  ;;  %v6785_v2 = vpop.f32.mrf.mxu0 }
 0x962   :  { %6891 = vst [vmem:[#allocation4 + $0x190] sm:$0xff] %v6784_v18 }
 0x963   :  { %v6502_v35 = vpop.f32.mrf.mxu1  ;;  %v6786_v51 = vpop.f32.mrf.mxu0 }
 0x964   :  { %v6787_v11 = vadd.f32 %v6786_v51, %v6497_v49 }
 0x965   :  { %v6504_v63 = vpop.f32.mrf.mxu1  ;;  %v6788_v8 = vpop.f32.mrf.mxu0 }
 0x966   :  { %6892 = vst [vmem:[#allocation4 + $0x198] sm:$0xff] %v6787_v11 }
 0x967   :  { %v6505_v0 = vpop.f32.mrf.mxu1  ;;  %v6791_v42 = vpop.f32.mrf.mxu0 }
 0x968   :  { %v6792_v57 = vadd.f32 %v6791_v42, %v6502_v35 }
 0x969   :  { %v6507_v47 = vpop.f32.mrf.mxu1  ;;  %v6793_v40 = vpop.f32.mrf.mxu0 }
 0x96a   :  { %6893 = vst [vmem:[#allocation4 + $0x1a0] sm:$0xff] %v6792_v57 }
 0x96b   :  { %v6510_v53 = vpop.f32.mrf.mxu1  ;;  %v6794_v12 = vpop.f32.mrf.mxu0 }
 0x96c   :  { %v6795_v30 = vadd.f32 %v6794_v12, %v6505_v0 }
 0x96d   :  { %v6512_v46 = vpop.f32.mrf.mxu1  ;;  %v6796_v52 = vpop.f32.mrf.mxu0 }
 0x96e   :  { %6894 = vst [vmem:[#allocation4 + $0x1a8] sm:$0xff] %v6795_v30 }
 0x96f   :  { %v6513_v48 = vpop.f32.mrf.mxu1  ;;  %v6799_v50 = vpop.f32.mrf.mxu0 }
 0x970   :  { %v6800_v62 = vadd.f32 %v6799_v50, %v6510_v53 }
 0x971   :  { %v6515_v37 = vpop.f32.mrf.mxu1  ;;  %v6801_v20 = vpop.f32.mrf.mxu0 }
 0x972   :  { %6895 = vst [vmem:[#allocation4 + $0x1b0] sm:$0xff] %v6800_v62 }
 0x973   :  { %v6518_v28 = vpop.f32.mrf.mxu1  ;;  %v6802_v38 = vpop.f32.mrf.mxu0 }
 0x974   :  { %v6803_v41 = vadd.f32 %v6802_v38, %v6513_v48 }
 0x975   :  { %v6520_v23 = vpop.f32.mrf.mxu1  ;;  %v6804_v32 = vpop.f32.mrf.mxu0 }
 0x976   :  { %6896 = vst [vmem:[#allocation4 + $0x1b8] sm:$0xff] %v6803_v41 }
 0x977   :  { %v6521_v39 = vpop.f32.mrf.mxu1  ;;  %v6807_v29 = vpop.f32.mrf.mxu0 }
 0x978   :  { %v6808_v55 = vadd.f32 %v6807_v29, %v6518_v28 }
 0x979   :  { %v6523_v58 = vpop.f32.mrf.mxu1  ;;  %v6809_v21 = vpop.f32.mrf.mxu0 }
 0x97a   :  { %6897 = vst [vmem:[#allocation4 + $0x1c0] sm:$0xff] %v6808_v55 }
 0x97b   :  { %v6526_v6 = vpop.f32.mrf.mxu1  ;;  %v6810_v1 = vpop.f32.mrf.mxu0 }
 0x97c   :  { %v6811_v31 = vadd.f32 %v6810_v1, %v6521_v39 }
 0x97d   :  { %v6528_v5 = vpop.f32.mrf.mxu1  ;;  %v6812_v60 = vpop.f32.mrf.mxu0 }
 0x97e   :  { %6898 = vst [vmem:[#allocation4 + $0x1c8] sm:$0xff] %v6811_v31 }
 0x97f   :  { %v6529_v59 = vpop.f32.mrf.mxu1  ;;  %v6815_v44 = vpop.f32.mrf.mxu0 }
 0x980   :  { %v6816_v15 = vadd.f32 %v6815_v44, %v6526_v6 }
 0x981   :  { %v6531_v24 = vpop.f32.mrf.mxu1  ;;  %v6817_v36 = vpop.f32.mrf.mxu0 }
 0x982   :  { %6899 = vst [vmem:[#allocation4 + $0x1d0] sm:$0xff] %v6816_v15 }
 0x983   :  { %v6534_v16 = vpop.f32.mrf.mxu1  ;;  %v6818_v45 = vpop.f32.mrf.mxu0 }
 0x984   :  { %v6819_v25 = vadd.f32 %v6818_v45, %v6529_v59 }
 0x985   :  { %v6536_v13 = vpop.f32.mrf.mxu1  ;;  %v6820_v43 = vpop.f32.mrf.mxu0 }
 0x986   :  { %6900 = vst [vmem:[#allocation4 + $0x1d8] sm:$0xff] %v6819_v25 }
 0x987   :  { %v6537_v4 = vpop.f32.mrf.mxu1  ;;  %v6823_v33 = vpop.f32.mrf.mxu0 }
 0x988   :  { %v6824_v27 = vadd.f32 %v6823_v33, %v6534_v16 }
 0x989   :  { %v6539_v22 = vpop.f32.mrf.mxu1  ;;  %v6825_v34 = vpop.f32.mrf.mxu0 }
 0x98a   :  { %6901 = vst [vmem:[#allocation4 + $0x1e0] sm:$0xff] %v6824_v27 }
 0x98b   :  { %v6542_v61 = vpop.f32.mrf.mxu1  ;;  %v6826_v17 = vpop.f32.mrf.mxu0 }
 0x98c   :  { %v6827_v26 = vadd.f32 %v6826_v17, %v6537_v4 }
 0x98d   :  { %v6544_v19 = vpop.f32.mrf.mxu1  ;;  %v6828_v10 = vpop.f32.mrf.mxu0 }
 0x98e   :  { %6902 = vst [vmem:[#allocation4 + $0x1e8] sm:$0xff] %v6827_v26 }
 0x98f   :  { %v6545_v9 = vpop.f32.mrf.mxu1  ;;  %v6831_v56 = vpop.f32.mrf.mxu0 }
 0x990   :  { %v6832_v7 = vadd.f32 %v6831_v56, %v6542_v61 }
 0x991   :  { %v6547_v54 = vpop.f32.mrf.mxu1  ;;  %v6833_v49 = vpop.f32.mrf.mxu0 }
 0x992   :  { %6903 = vst [vmem:[#allocation4 + $0x1f0] sm:$0xff] %v6832_v7 }
 0x993   :  { %v6834_v3 = vpop.f32.mrf.mxu0 }
 0x994   :  { %v6835_v18 = vadd.f32 %v6834_v3, %v6545_v9 }
 0x995   :  { %v6836_v14 = vpop.f32.mrf.mxu0 }
 0x996   :  { %6904 = vst [vmem:[#allocation4 + $0x1f8] sm:$0xff] %v6835_v18 }
 0x997   :  { %7643 = shalt.err (!%p7640_p4)
}
 0x998   :  { %s7656_s22 = smov 128   ;;  %s7657_s23 = smov 8  }
 0x999   :  { %7112 = dma.vmem_to_hbm [thread:$0]  %s7107_s20, 8192, %s15073_s6, [#allocation5], %s7656_s22, %s7656_s22, %s7657_s23  }
 0x99a   :  { %7652 = dma.done.wait [#allocation5], 8192  }
 0x99b   :  { %7653 = vsyncadd [#allocation5], 4294959104 }
 0x99c   :  { %7116 = vsyncpa [#allocation5], 1 }

</bundles_post_ra>
